<compile_context>
chip_gen: v6e
topology: v6e:2x2x1
jax: 0.10.0
libtpu: 0.0.40
codegen_flags: <defaults>
</compile_context>

<pallas_src>
from collections import namedtuple

import jax
import jax.numpy as jnp
from jax.experimental import pallas as pl
from jax.experimental.pallas import tpu as pltpu

NetworkEval = namedtuple("NetworkEval", ["reconstructions", "quant_loss", "quant_info"])

_FSQ_TILE_L = 2048                # positions (lanes) per FSQ grid step

_vmem_limit_cache = None


def _vmem_limit_bytes():
    """Per-generation VMEM scoped limit (v7x: ~48MiB, v5e/v6e: ~96MiB)."""
    global _vmem_limit_cache
    if _vmem_limit_cache is None:
        try:
            cap = int(pltpu.get_tpu_info().vmem_capacity_bytes)
        except Exception:
            cap = 64 * 1024 * 1024
        _vmem_limit_cache = max(32 * 1024 * 1024,
                                min(cap - 16 * 1024 * 1024, 96 * 1024 * 1024))
    return _vmem_limit_cache


# --------------------------------------------------------------------------
# Banded causal 3-D convolution (Pallas kernel + host glue)
# --------------------------------------------------------------------------
def _make_conv_kernel(kt, kh, H, TB, act):
    """One grid step: TB output frames, kt*kh taps, f32 accumulate, bias+act epilogue."""
    nfr = TB + kt - 1

    def kernel(*refs):
        frames = refs[:nfr]                                   # nfr x (1,1,Hp,Wp*Cin) bf16
        band_ref, bias_ref, o_ref = refs[nfr], refs[nfr + 1], refs[nfr + 2]
        fvals = [frames[j][0, 0] for j in range(nfr)]         # [Hp, Wp*Cin] each
        acc = None
        tap = 0
        for dt in range(kt):
            for dh in range(kh):
                # lhs: [TB*H, Wp*Cin] built by sublane-concat of the TB frame windows
                pieces = [fvals[tt + dt][dh:dh + H, :] for tt in range(TB)]
                lhs = pieces[0] if TB == 1 else jnp.concatenate(pieces, axis=0)
                part = jnp.dot(lhs, band_ref[tap],
                               preferred_element_type=jnp.float32)   # MXU, f32 acc
                acc = part if acc is None else acc + part
                tap += 1
        y = acc + bias_ref[...]                               # f32 epilogue
        if act == "silu":
            y = y * jax.nn.sigmoid(y)
        o_ref[0, :, :] = y.astype(o_ref.dtype)                # lane-dense store (Ncols % 128 == 0)

    return kernel


def _build_banded_weight(w, W_out):
    """w: [Cout, Cin, kt, kh, kw] (torch layout) -> band [kt, kh, Wp*Cin, W_out*Cout].

    band[dt, dh, w'*Cin + c, w*Cout + o] = w[o, c, dt, dh, w' - w]  (0 elsewhere), so
    out[h, w, o] = sum_{dt,dh} xp[t+dt, h+dh, :] @ band[dt, dh] realizes the kw taps
    as a (mostly-zero) banded matmul with a lane-dense output.  Weight is tiny.
    """
    Cout, Cin, kt, kh, kw = w.shape
    Wp = W_out + kw - 1
    wt = jnp.transpose(w.astype(jnp.float32), (2, 3, 4, 1, 0))       # [kt,kh,kw,Cin,Cout]
    sel = (jnp.arange(Wp)[None, :, None]
           == jnp.arange(W_out)[None, None, :] + jnp.arange(kw)[:, None, None])
    sel = sel.astype(jnp.float32)                                    # [kw, Wp, W]
    band = jnp.einsum("abdco,dpw->abpcwo", wt, sel)                  # [kt,kh,Wp,Cin,W,Cout]
    return band.reshape(kt, kh, Wp * Cin, W_out * Cout)


def causal_conv3d(x, w, b, *, act=None, out_dtype=jnp.bfloat16):
    """Causal 'same' 3-D conv.  x: [B,T,H,W,Cin] channels-last, w: [Cout,Cin,kt,kh,kw]."""
    Cout, Cin, kt, kh, kw = w.shape
    B, T, H, W, _ = x.shape
    assert kh == kw and kh % 2 == 1, "square odd spatial kernels only"
    p = (kh - 1) // 2

    # Only the small symmetric spatial zero pad is done host-side; the causal temporal
    # pad (replicate frame 0) is folded into the index_map below (no HBM pad copy).
    xq = jnp.pad(x, ((0, 0), (0, 0), (p, p), (p, p), (0, 0))) if p > 0 else x
    Hp, Wp = H + 2 * p, W + 2 * p
    xq = xq.reshape(B, T, Hp, Wp * Cin).astype(jnp.bfloat16)         # bf16 MXU inputs

    Nraw = W * Cout
    Ncols = ((Nraw + 127) // 128) * 128                              # lane-dense output width
    band = _build_banded_weight(w, W).reshape(kt * kh, Wp * Cin, Nraw)
    bias_row = jnp.tile(b.astype(jnp.float32).reshape(1, Cout), (1, W))   # [1, Nraw]
    if Ncols != Nraw:
        band = jnp.pad(band, ((0, 0), (0, 0), (0, Ncols - Nraw)))
        bias_row = jnp.pad(bias_row, ((0, 0), (0, Ncols - Nraw)))
    band = band.astype(jnp.bfloat16)

    # frames-per-step block: target M = TB*H >= 128, keep TB*H a sublane multiple
    TB = max(1, min(T, (128 // H) if H <= 128 else 1))
    while (TB * H) % 8:
        TB += 1
    nb = pl.cdiv(T, TB)
    nfr = TB + kt - 1

    def frame_map(j):
        def imap(bi, ti):
            t = ti * TB + j - (kt - 1)                        # causal: needs frames t-2..t
            t = jnp.minimum(jnp.maximum(t, 0), T - 1)         # clamp == replicate frame 0 / T-1
            return (bi, t, 0, 0)
        return imap

    in_specs = [pl.BlockSpec((1, 1, Hp, Wp * Cin), frame_map(j)) for j in range(nfr)]
    in_specs += [
        pl.BlockSpec((kt * kh, Wp * Cin, Ncols), lambda bi, ti: (0, 0, 0)),
        pl.BlockSpec((1, Ncols), lambda bi, ti: (0, 0)),
    ]

    flops = 2 * B * nb * (kt * kh) * (TB * H) * (Wp * Cin) * Ncols
    bytes_accessed = (B * nb * nfr * Hp * Wp * Cin * 2 + kt * kh * Wp * Cin * Ncols * 2
                      + B * nb * TB * H * Ncols * jnp.dtype(out_dtype).itemsize)

    out = pl.pallas_call(
        _make_conv_kernel(kt, kh, H, TB, act),
        out_shape=jax.ShapeDtypeStruct((B, nb * TB * H, Ncols), out_dtype),
        grid=(B, nb),
        in_specs=in_specs,
        out_specs=pl.BlockSpec((1, TB * H, Ncols), lambda bi, ti: (bi, ti, 0)),
        compiler_params=pltpu.CompilerParams(
            dimension_semantics=("parallel", "parallel"),
            vmem_limit_bytes=_vmem_limit_bytes()),
        cost_estimate=pl.CostEstimate(flops=int(flops), transcendentals=0,
                                      bytes_accessed=int(bytes_accessed)),
    )(*([xq] * nfr), band, bias_row)

    out = out.reshape(B, nb * TB, H, Ncols)[:, :T, :, :Nraw]         # drop T / lane padding
    return out.reshape(B, T, H, W, Cout)


def _compose_conv_then_1x1(w3, b3, w1, b1):
    """conv1x1(conv3d(x)) composed into a single conv3d weight/bias (exact)."""
    w1m = w1.reshape(w1.shape[0], w1.shape[1]).astype(jnp.float32)   # [Cout, Cmid]
    w = jnp.einsum("pm,mcxyz->pcxyz", w1m, w3.astype(jnp.float32))
    b = b1.astype(jnp.float32) + w1m @ b3.astype(jnp.float32)
    return w, b


# --------------------------------------------------------------------------
# Fused ResidualFSQ + post_quant_conv (Pallas kernel, lane-dense layout)
# --------------------------------------------------------------------------
def _fsq_constants(levels):
    lv = jnp.array(levels, jnp.float32)
    eps = 1e-3
    half_l = (lv - 1.0) * (1.0 + eps) / 2.0
    offset = jnp.where(jnp.array(levels, jnp.int32) % 2 == 0, 0.5, 0.0).astype(jnp.float32)
    shift = jnp.arctanh(offset / half_l)
    half_width = jnp.floor(lv / 2.0)
    # columns: half_l, offset, shift, 1/half_width
    return jnp.stack([half_l, offset, shift, 1.0 / half_width], axis=1)


def _fsq_int_constants(levels):
    basis, acc = [], 1
    for lvl in levels:
        basis.append(acc)
        acc *= int(lvl)
    hw = [int(lvl) // 2 for lvl in levels]
    # columns: half_width (int), basis (int) -- exact int32 index arithmetic
    return jnp.stack([jnp.array(hw, jnp.int32), jnp.array(basis, jnp.int32)], axis=1)


def _make_resfsq_kernel(num_quantizers, C):
    def kernel(z_ref, c_ref, ic_ref, sc_ref, isc_ref, wpq_ref, bpq_ref, pq_ref, idx_ref):
        half_l = c_ref[:, 0:1]
        offset = c_ref[:, 1:2]
        shift = c_ref[:, 2:3]
        inv_hw = c_ref[:, 3:4]
        hw_i = ic_ref[:, 0:1]
        basis_i = ic_ref[:, 1:2]

        residual = z_ref[...]                                  # [C, TILE_L] f32
        quant = jnp.zeros_like(residual)
        for q in range(num_quantizers):                        # static unroll, all in vregs/VMEM
            scale = sc_ref[:, q:q + 1]                         # (levels-1)^-q   per channel
            inv_scale = isc_ref[:, q:q + 1]                    # (levels-1)^+q
            zs = residual * inv_scale                          # reference: FSQ(residual / scale)
            bounded = jnp.tanh(zs + shift) * half_l - offset
            qint = jnp.round(bounded)                          # integer code per level
            quantized = (qint * inv_hw) * scale                # normalized code, re-scaled
            residual = residual - quantized
            quant = quant + quantized
            # exact int32 codebook index: sum_c (qint + half_width) * basis
            terms = (qint.astype(jnp.int32) + hw_i) * basis_i  # [C, TILE_L] int32
            idx = terms[0:1, :]
            for c in range(1, C):
                idx = idx + terms[c:c + 1, :]
            idx_ref[q:q + 1, :] = idx                          # lane-dense index row
        # fused post_quant_conv (1x1x1) as VPU broadcast MACs (tiny 4x6 dot wastes the MXU)
        pq = bpq_ref[...] + wpq_ref[:, 0:1] * quant[0:1, :]
        for c in range(1, C):
            pq = pq + wpq_ref[:, c:c + 1] * quant[c:c + 1, :]
        pq_ref[...] = pq.astype(pq_ref.dtype)

    return kernel


def residual_fsq_post_quant(h, levels, num_quantizers, wpq, bpq, *, out_dtype=jnp.bfloat16):
    """h: [B,T,H,W,C] with C == len(levels).  Returns (indices, post_quant codes, loss)."""
    B, T, H, W, C = h.shape
    assert C == len(levels)
    z_ch = wpq.shape[0]
    M = B * T * H * W
    Mp = ((M + _FSQ_TILE_L - 1) // _FSQ_TILE_L) * _FSQ_TILE_L

    # TODO(synk): emit z as [C, M] directly from enc2 (and post_quant in dec1's layout)
    # to drop these two small XLA relayouts over the latent.
    z_t = h.reshape(M, C).astype(jnp.float32).T                # [C, M]  positions -> lanes
    if Mp != M:
        z_t = jnp.pad(z_t, ((0, 0), (0, Mp - M)))

    consts = _fsq_constants(levels)                            # [C, 4] f32
    iconsts = _fsq_int_constants(levels)                       # [C, 2] int32
    lv = jnp.array(levels, jnp.float32)
    qi = jnp.arange(num_quantizers, dtype=jnp.float32)
    scales = (lv[:, None] - 1.0) ** (-qi[None, :])             # [C, num_q]  ResidualFSQ scales
    inv_scales = (lv[:, None] - 1.0) ** (qi[None, :])          # [C, num_q]
    wpq2 = wpq.reshape(z_ch, C).astype(jnp.float32)            # [z, C]
    bpq2 = bpq.reshape(z_ch, 1).astype(jnp.float32)            # [z, 1]

    pq_t, idx = pl.pallas_call(
        _make_resfsq_kernel(num_quantizers, C),
        out_shape=(jax.ShapeDtypeStruct((z_ch, Mp), out_dtype),
                   jax.ShapeDtypeStruct((num_quantizers, Mp), jnp.int32)),
        grid=(Mp // _FSQ_TILE_L,),
        in_specs=[
            pl.BlockSpec((C, _FSQ_TILE_L), lambda i: (0, i)),
            pl.BlockSpec((C, 4), lambda i: (0, 0)),
            pl.BlockSpec((C, 2), lambda i: (0, 0)),
            pl.BlockSpec((C, num_quantizers), lambda i: (0, 0)),
            pl.BlockSpec((C, num_quantizers), lambda i: (0, 0)),
            pl.BlockSpec((z_ch, C), lambda i: (0, 0)),
            pl.BlockSpec((z_ch, 1), lambda i: (0, 0)),
        ],
        out_specs=(
            pl.BlockSpec((z_ch, _FSQ_TILE_L), lambda i: (0, i)),
            pl.BlockSpec((num_quantizers, _FSQ_TILE_L), lambda i: (0, i)),
        ),
        compiler_params=pltpu.CompilerParams(
            dimension_semantics=("parallel",),
            vmem_limit_bytes=_vmem_limit_bytes()),
        cost_estimate=pl.CostEstimate(
            flops=int((14 * num_quantizers * C + 2 * z_ch * C) * Mp),
            transcendentals=int(num_quantizers * C * Mp),
            bytes_accessed=int(C * Mp * 4 + z_ch * Mp * 2 + num_quantizers * Mp * 4)),
    )(z_t, consts, iconsts, scales, inv_scales, wpq2, bpq2)

    post_quant = pq_t[:, :M].T.reshape(B, T, H, W, z_ch)
    indices = jnp.transpose(idx[:, :M].reshape(num_quantizers, B, T, H, W), (1, 0, 2, 3, 4))
    loss = jnp.zeros((), jnp.float32)                          # FSQ has no commitment loss
    return indices, post_quant, loss


# --------------------------------------------------------------------------
# Full tokenizer forward
# --------------------------------------------------------------------------
def tokenizer_forward(x_ncthw, params, levels, num_quantizers):
    # NCTHW -> channels-last NTHWC
    x = jnp.transpose(x_ncthw, (0, 2, 3, 4, 1)).astype(jnp.float32)

    # ---- encoder (simplified EncoderBase) ----
    h = causal_conv3d(x, *params["enc1"], act="silu", out_dtype=jnp.bfloat16)

    # enc2 with the 1x1x1 quant_conv composed in (exact; saves a full HBM round trip)
    w_eq, b_eq = _compose_conv_then_1x1(*params["enc2"], *params["quant_conv"])
    z = causal_conv3d(h, w_eq, b_eq, act=None, out_dtype=jnp.float32)   # [B,T,H,W,embedding_dim]

    # ---- ResidualFSQ quantizer with fused post_quant_conv ----
    quant_info, d_in, quant_loss = residual_fsq_post_quant(
        z, levels, num_quantizers, *params["post_quant_conv"], out_dtype=jnp.bfloat16)

    # ---- decoder (simplified DecoderBase) ----
    d = causal_conv3d(d_in, *params["dec1"], act="silu", out_dtype=jnp.bfloat16)
    recon = causal_conv3d(d, *params["dec2"], act=None, out_dtype=jnp.float32)

    recon = jnp.transpose(recon, (0, 4, 1, 2, 3))                        # -> NCTHW
    return NetworkEval(reconstructions=recon, quant_loss=quant_loss, quant_info=quant_info)


# --------------------------------------------------------------------------
# Deterministic parameter init
# --------------------------------------------------------------------------
def conv_params(key, cin, cout, k):
    kw_, kb_ = jax.random.split(key)
    fan_in = cin * k * k * k
    w = jax.random.normal(kw_, (cout, cin, k, k, k), jnp.float32) / jnp.sqrt(float(fan_in))
    b = 0.01 * jax.random.normal(kb_, (cout,), jnp.float32)
    return w, b


if __name__ == "__main__":
    key = jax.random.PRNGKey(0)

    # small shapes consistent with a causal video tokenizer
    B, Cin, T, H, W = 2, 3, 5, 8, 8
    z_channels, z_factor = 4, 1
    levels = (8, 8, 8, 5, 5, 5)          # embedding_dim == len(levels)
    embedding_dim = len(levels)
    num_quantizers = 2
    hidden = 16

    keys = jax.random.split(key, 7)
    x = jax.random.normal(keys[0], (B, Cin, T, H, W), jnp.float32)

    params = {
        "enc1": conv_params(keys[1], Cin, hidden, 3),
        "enc2": conv_params(keys[2], hidden, z_factor * z_channels, 3),
        "quant_conv": conv_params(keys[3], z_factor * z_channels, embedding_dim, 1),
        "post_quant_conv": conv_params(keys[4], embedding_dim, z_channels, 1),
        "dec1": conv_params(keys[5], z_channels, hidden, 3),
        "dec2": conv_params(keys[6], hidden, Cin, 3),
    }

    fwd = jax.jit(tokenizer_forward, static_argnames=("levels", "num_quantizers"))
    out = fwd(x, params, levels=levels, num_quantizers=num_quantizers)
    out = jax.block_until_ready(out)

    assert out.reconstructions.shape == (B, Cin, T, H, W)
    assert out.quant_info.shape == (B, num_quantizers, T, H, W)
    assert out.quant_info.dtype == jnp.int32
    assert out.quant_loss.shape == ()

    print("KERNEL_OK")
</pallas_src>

<mosaic_0001>
module attributes {stable_mosaic.version = 11 : i64} {
  func.func @kernel(%arg0: i32, %arg1: i32, %arg2: memref<1x1x10x30xbf16, #tpu.memory_space<vmem>>, %arg3: memref<1x1x10x30xbf16, #tpu.memory_space<vmem>>, %arg4: memref<1x1x10x30xbf16, #tpu.memory_space<vmem>>, %arg5: memref<1x1x10x30xbf16, #tpu.memory_space<vmem>>, %arg6: memref<1x1x10x30xbf16, #tpu.memory_space<vmem>>, %arg7: memref<1x1x10x30xbf16, #tpu.memory_space<vmem>>, %arg8: memref<1x1x10x30xbf16, #tpu.memory_space<vmem>>, %arg9: memref<9x30x128xbf16, #tpu.memory_space<vmem>>, %arg10: memref<1x128xf32, #tpu.memory_space<vmem>>, %arg11: memref<1x40x128xbf16, #tpu.memory_space<vmem>>) attributes {dimension_semantics = [#tpu.dimension_semantics<parallel>, #tpu.dimension_semantics<parallel>], iteration_bounds = array<i64: 2, 1>, scalar_prefetch = 0 : i64, scratch_operands = 0 : i64, tpu.core_type = #tpu.core_type<tc>, window_params = [{transform_indices = @transform_0, window_bounds = array<i64: 1, 1, 10, 30>}, {transform_indices = @transform_1, window_bounds = array<i64: 1, 1, 10, 30>}, {transform_indices = @transform_2, window_bounds = array<i64: 1, 1, 10, 30>}, {transform_indices = @transform_3, window_bounds = array<i64: 1, 1, 10, 30>}, {transform_indices = @transform_4, window_bounds = array<i64: 1, 1, 10, 30>}, {transform_indices = @transform_5, window_bounds = array<i64: 1, 1, 10, 30>}, {transform_indices = @transform_6, window_bounds = array<i64: 1, 1, 10, 30>}, {pipeline_mode = #tpu.pipeline_mode<synchronous>, transform_indices = @transform_7, window_bounds = array<i64: 9, 30, 128>}, {pipeline_mode = #tpu.pipeline_mode<synchronous>, transform_indices = @transform_8, window_bounds = array<i64: 1, 128>}, {transform_indices = @transform_9, window_bounds = array<i64: 1, 40, 128>}]} {
    %c0 = arith.constant 0 : index
    %c0_0 = arith.constant 0 : index
    %c0_1 = arith.constant 0 : index
    %c0_2 = arith.constant 0 : index
    %0 = vector.load %arg2[%c0, %c0_0, %c0_1, %c0_2] : memref<1x1x10x30xbf16, #tpu.memory_space<vmem>>, vector<1x1x10x30xbf16>
    %1 = vector.shape_cast %0 : vector<1x1x10x30xbf16> to vector<10x30xbf16>
    %c0_3 = arith.constant 0 : index
    %c0_4 = arith.constant 0 : index
    %c0_5 = arith.constant 0 : index
    %c0_6 = arith.constant 0 : index
    %2 = vector.load %arg3[%c0_3, %c0_4, %c0_5, %c0_6] : memref<1x1x10x30xbf16, #tpu.memory_space<vmem>>, vector<1x1x10x30xbf16>
    %3 = vector.shape_cast %2 : vector<1x1x10x30xbf16> to vector<10x30xbf16>
    %c0_7 = arith.constant 0 : index
    %c0_8 = arith.constant 0 : index
    %c0_9 = arith.constant 0 : index
    %c0_10 = arith.constant 0 : index
    %4 = vector.load %arg4[%c0_7, %c0_8, %c0_9, %c0_10] : memref<1x1x10x30xbf16, #tpu.memory_space<vmem>>, vector<1x1x10x30xbf16>
    %5 = vector.shape_cast %4 : vector<1x1x10x30xbf16> to vector<10x30xbf16>
    %c0_11 = arith.constant 0 : index
    %c0_12 = arith.constant 0 : index
    %c0_13 = arith.constant 0 : index
    %c0_14 = arith.constant 0 : index
    %6 = vector.load %arg5[%c0_11, %c0_12, %c0_13, %c0_14] : memref<1x1x10x30xbf16, #tpu.memory_space<vmem>>, vector<1x1x10x30xbf16>
    %7 = vector.shape_cast %6 : vector<1x1x10x30xbf16> to vector<10x30xbf16>
    %c0_15 = arith.constant 0 : index
    %c0_16 = arith.constant 0 : index
    %c0_17 = arith.constant 0 : index
    %c0_18 = arith.constant 0 : index
    %8 = vector.load %arg6[%c0_15, %c0_16, %c0_17, %c0_18] : memref<1x1x10x30xbf16, #tpu.memory_space<vmem>>, vector<1x1x10x30xbf16>
    %9 = vector.shape_cast %8 : vector<1x1x10x30xbf16> to vector<10x30xbf16>
    %c0_19 = arith.constant 0 : index
    %c0_20 = arith.constant 0 : index
    %c0_21 = arith.constant 0 : index
    %c0_22 = arith.constant 0 : index
    %10 = vector.load %arg7[%c0_19, %c0_20, %c0_21, %c0_22] : memref<1x1x10x30xbf16, #tpu.memory_space<vmem>>, vector<1x1x10x30xbf16>
    %11 = vector.shape_cast %10 : vector<1x1x10x30xbf16> to vector<10x30xbf16>
    %c0_23 = arith.constant 0 : index
    %c0_24 = arith.constant 0 : index
    %c0_25 = arith.constant 0 : index
    %c0_26 = arith.constant 0 : index
    %12 = vector.load %arg8[%c0_23, %c0_24, %c0_25, %c0_26] : memref<1x1x10x30xbf16, #tpu.memory_space<vmem>>, vector<1x1x10x30xbf16>
    %13 = vector.shape_cast %12 : vector<1x1x10x30xbf16> to vector<10x30xbf16>
    %14 = vector.extract_strided_slice %1 {offsets = [0, 0], sizes = [8, 30], strides = [1, 1]} : vector<10x30xbf16> to vector<8x30xbf16>
    %15 = vector.extract_strided_slice %3 {offsets = [0, 0], sizes = [8, 30], strides = [1, 1]} : vector<10x30xbf16> to vector<8x30xbf16>
    %16 = vector.extract_strided_slice %5 {offsets = [0, 0], sizes = [8, 30], strides = [1, 1]} : vector<10x30xbf16> to vector<8x30xbf16>
    %17 = vector.extract_strided_slice %7 {offsets = [0, 0], sizes = [8, 30], strides = [1, 1]} : vector<10x30xbf16> to vector<8x30xbf16>
    %18 = vector.extract_strided_slice %9 {offsets = [0, 0], sizes = [8, 30], strides = [1, 1]} : vector<10x30xbf16> to vector<8x30xbf16>
    %19 = tpu.concatenate %14, %15, %16, %17, %18 in 0 : vector<8x30xbf16>, vector<8x30xbf16>, vector<8x30xbf16>, vector<8x30xbf16>, vector<8x30xbf16> -> vector<40x30xbf16>
    %c0_27 = arith.constant 0 : index
    %c0_28 = arith.constant 0 : index
    %c0_29 = arith.constant 0 : index
    %20 = vector.load %arg9[%c0_27, %c0_28, %c0_29] : memref<9x30x128xbf16, #tpu.memory_space<vmem>>, vector<1x30x128xbf16>
    %21 = vector.shape_cast %20 : vector<1x30x128xbf16> to vector<30x128xbf16>
    %cst = arith.constant dense<0.000000e+00> : vector<40x128xf32>
    %22 = tpu.matmul %19, %21, %cst {dimension_numbers = #tpu.dot_dimension_numbers<[1], [0], [0], [1], [0, 0, 1, 1], [], []>} : vector<40x30xbf16>, vector<30x128xbf16>, vector<40x128xf32> -> vector<40x128xf32>
    %23 = vector.extract_strided_slice %1 {offsets = [1, 0], sizes = [8, 30], strides = [1, 1]} : vector<10x30xbf16> to vector<8x30xbf16>
    %24 = vector.extract_strided_slice %3 {offsets = [1, 0], sizes = [8, 30], strides = [1, 1]} : vector<10x30xbf16> to vector<8x30xbf16>
    %25 = vector.extract_strided_slice %5 {offsets = [1, 0], sizes = [8, 30], strides = [1, 1]} : vector<10x30xbf16> to vector<8x30xbf16>
    %26 = vector.extract_strided_slice %7 {offsets = [1, 0], sizes = [8, 30], strides = [1, 1]} : vector<10x30xbf16> to vector<8x30xbf16>
    %27 = vector.extract_strided_slice %9 {offsets = [1, 0], sizes = [8, 30], strides = [1, 1]} : vector<10x30xbf16> to vector<8x30xbf16>
    %28 = tpu.concatenate %23, %24, %25, %26, %27 in 0 : vector<8x30xbf16>, vector<8x30xbf16>, vector<8x30xbf16>, vector<8x30xbf16>, vector<8x30xbf16> -> vector<40x30xbf16>
    %c1 = arith.constant 1 : index
    %c0_30 = arith.constant 0 : index
    %c0_31 = arith.constant 0 : index
    %29 = vector.load %arg9[%c1, %c0_30, %c0_31] : memref<9x30x128xbf16, #tpu.memory_space<vmem>>, vector<1x30x128xbf16>
    %30 = vector.shape_cast %29 : vector<1x30x128xbf16> to vector<30x128xbf16>
    %cst_32 = arith.constant dense<0.000000e+00> : vector<40x128xf32>
    %31 = tpu.matmul %28, %30, %cst_32 {dimension_numbers = #tpu.dot_dimension_numbers<[1], [0], [0], [1], [0, 0, 1, 1], [], []>} : vector<40x30xbf16>, vector<30x128xbf16>, vector<40x128xf32> -> vector<40x128xf32>
    %32 = arith.addf %22, %31 : vector<40x128xf32>
    %33 = vector.extract_strided_slice %1 {offsets = [2, 0], sizes = [8, 30], strides = [1, 1]} : vector<10x30xbf16> to vector<8x30xbf16>
    %34 = vector.extract_strided_slice %3 {offsets = [2, 0], sizes = [8, 30], strides = [1, 1]} : vector<10x30xbf16> to vector<8x30xbf16>
    %35 = vector.extract_strided_slice %5 {offsets = [2, 0], sizes = [8, 30], strides = [1, 1]} : vector<10x30xbf16> to vector<8x30xbf16>
    %36 = vector.extract_strided_slice %7 {offsets = [2, 0], sizes = [8, 30], strides = [1, 1]} : vector<10x30xbf16> to vector<8x30xbf16>
    %37 = vector.extract_strided_slice %9 {offsets = [2, 0], sizes = [8, 30], strides = [1, 1]} : vector<10x30xbf16> to vector<8x30xbf16>
    %38 = tpu.concatenate %33, %34, %35, %36, %37 in 0 : vector<8x30xbf16>, vector<8x30xbf16>, vector<8x30xbf16>, vector<8x30xbf16>, vector<8x30xbf16> -> vector<40x30xbf16>
    %c2 = arith.constant 2 : index
    %c0_33 = arith.constant 0 : index
    %c0_34 = arith.constant 0 : index
    %39 = vector.load %arg9[%c2, %c0_33, %c0_34] : memref<9x30x128xbf16, #tpu.memory_space<vmem>>, vector<1x30x128xbf16>
    %40 = vector.shape_cast %39 : vector<1x30x128xbf16> to vector<30x128xbf16>
    %cst_35 = arith.constant dense<0.000000e+00> : vector<40x128xf32>
    %41 = tpu.matmul %38, %40, %cst_35 {dimension_numbers = #tpu.dot_dimension_numbers<[1], [0], [0], [1], [0, 0, 1, 1], [], []>} : vector<40x30xbf16>, vector<30x128xbf16>, vector<40x128xf32> -> vector<40x128xf32>
    %42 = arith.addf %32, %41 : vector<40x128xf32>
    %43 = vector.extract_strided_slice %3 {offsets = [0, 0], sizes = [8, 30], strides = [1, 1]} : vector<10x30xbf16> to vector<8x30xbf16>
    %44 = vector.extract_strided_slice %5 {offsets = [0, 0], sizes = [8, 30], strides = [1, 1]} : vector<10x30xbf16> to vector<8x30xbf16>
    %45 = vector.extract_strided_slice %7 {offsets = [0, 0], sizes = [8, 30], strides = [1, 1]} : vector<10x30xbf16> to vector<8x30xbf16>
    %46 = vector.extract_strided_slice %9 {offsets = [0, 0], sizes = [8, 30], strides = [1, 1]} : vector<10x30xbf16> to vector<8x30xbf16>
    %47 = vector.extract_strided_slice %11 {offsets = [0, 0], sizes = [8, 30], strides = [1, 1]} : vector<10x30xbf16> to vector<8x30xbf16>
    %48 = tpu.concatenate %43, %44, %45, %46, %47 in 0 : vector<8x30xbf16>, vector<8x30xbf16>, vector<8x30xbf16>, vector<8x30xbf16>, vector<8x30xbf16> -> vector<40x30xbf16>
    %c3 = arith.constant 3 : index
    %c0_36 = arith.constant 0 : index
    %c0_37 = arith.constant 0 : index
    %49 = vector.load %arg9[%c3, %c0_36, %c0_37] : memref<9x30x128xbf16, #tpu.memory_space<vmem>>, vector<1x30x128xbf16>
    %50 = vector.shape_cast %49 : vector<1x30x128xbf16> to vector<30x128xbf16>
    %cst_38 = arith.constant dense<0.000000e+00> : vector<40x128xf32>
    %51 = tpu.matmul %48, %50, %cst_38 {dimension_numbers = #tpu.dot_dimension_numbers<[1], [0], [0], [1], [0, 0, 1, 1], [], []>} : vector<40x30xbf16>, vector<30x128xbf16>, vector<40x128xf32> -> vector<40x128xf32>
    %52 = arith.addf %42, %51 : vector<40x128xf32>
    %53 = vector.extract_strided_slice %3 {offsets = [1, 0], sizes = [8, 30], strides = [1, 1]} : vector<10x30xbf16> to vector<8x30xbf16>
    %54 = vector.extract_strided_slice %5 {offsets = [1, 0], sizes = [8, 30], strides = [1, 1]} : vector<10x30xbf16> to vector<8x30xbf16>
    %55 = vector.extract_strided_slice %7 {offsets = [1, 0], sizes = [8, 30], strides = [1, 1]} : vector<10x30xbf16> to vector<8x30xbf16>
    %56 = vector.extract_strided_slice %9 {offsets = [1, 0], sizes = [8, 30], strides = [1, 1]} : vector<10x30xbf16> to vector<8x30xbf16>
    %57 = vector.extract_strided_slice %11 {offsets = [1, 0], sizes = [8, 30], strides = [1, 1]} : vector<10x30xbf16> to vector<8x30xbf16>
    %58 = tpu.concatenate %53, %54, %55, %56, %57 in 0 : vector<8x30xbf16>, vector<8x30xbf16>, vector<8x30xbf16>, vector<8x30xbf16>, vector<8x30xbf16> -> vector<40x30xbf16>
    %c4 = arith.constant 4 : index
    %c0_39 = arith.constant 0 : index
    %c0_40 = arith.constant 0 : index
    %59 = vector.load %arg9[%c4, %c0_39, %c0_40] : memref<9x30x128xbf16, #tpu.memory_space<vmem>>, vector<1x30x128xbf16>
    %60 = vector.shape_cast %59 : vector<1x30x128xbf16> to vector<30x128xbf16>
    %cst_41 = arith.constant dense<0.000000e+00> : vector<40x128xf32>
    %61 = tpu.matmul %58, %60, %cst_41 {dimension_numbers = #tpu.dot_dimension_numbers<[1], [0], [0], [1], [0, 0, 1, 1], [], []>} : vector<40x30xbf16>, vector<30x128xbf16>, vector<40x128xf32> -> vector<40x128xf32>
    %62 = arith.addf %52, %61 : vector<40x128xf32>
    %63 = vector.extract_strided_slice %3 {offsets = [2, 0], sizes = [8, 30], strides = [1, 1]} : vector<10x30xbf16> to vector<8x30xbf16>
    %64 = vector.extract_strided_slice %5 {offsets = [2, 0], sizes = [8, 30], strides = [1, 1]} : vector<10x30xbf16> to vector<8x30xbf16>
    %65 = vector.extract_strided_slice %7 {offsets = [2, 0], sizes = [8, 30], strides = [1, 1]} : vector<10x30xbf16> to vector<8x30xbf16>
    %66 = vector.extract_strided_slice %9 {offsets = [2, 0], sizes = [8, 30], strides = [1, 1]} : vector<10x30xbf16> to vector<8x30xbf16>
    %67 = vector.extract_strided_slice %11 {offsets = [2, 0], sizes = [8, 30], strides = [1, 1]} : vector<10x30xbf16> to vector<8x30xbf16>
    %68 = tpu.concatenate %63, %64, %65, %66, %67 in 0 : vector<8x30xbf16>, vector<8x30xbf16>, vector<8x30xbf16>, vector<8x30xbf16>, vector<8x30xbf16> -> vector<40x30xbf16>
    %c5 = arith.constant 5 : index
    %c0_42 = arith.constant 0 : index
    %c0_43 = arith.constant 0 : index
    %69 = vector.load %arg9[%c5, %c0_42, %c0_43] : memref<9x30x128xbf16, #tpu.memory_space<vmem>>, vector<1x30x128xbf16>
    %70 = vector.shape_cast %69 : vector<1x30x128xbf16> to vector<30x128xbf16>
    %cst_44 = arith.constant dense<0.000000e+00> : vector<40x128xf32>
    %71 = tpu.matmul %68, %70, %cst_44 {dimension_numbers = #tpu.dot_dimension_numbers<[1], [0], [0], [1], [0, 0, 1, 1], [], []>} : vector<40x30xbf16>, vector<30x128xbf16>, vector<40x128xf32> -> vector<40x128xf32>
    %72 = arith.addf %62, %71 : vector<40x128xf32>
    %73 = vector.extract_strided_slice %5 {offsets = [0, 0], sizes = [8, 30], strides = [1, 1]} : vector<10x30xbf16> to vector<8x30xbf16>
    %74 = vector.extract_strided_slice %7 {offsets = [0, 0], sizes = [8, 30], strides = [1, 1]} : vector<10x30xbf16> to vector<8x30xbf16>
    %75 = vector.extract_strided_slice %9 {offsets = [0, 0], sizes = [8, 30], strides = [1, 1]} : vector<10x30xbf16> to vector<8x30xbf16>
    %76 = vector.extract_strided_slice %11 {offsets = [0, 0], sizes = [8, 30], strides = [1, 1]} : vector<10x30xbf16> to vector<8x30xbf16>
    %77 = vector.extract_strided_slice %13 {offsets = [0, 0], sizes = [8, 30], strides = [1, 1]} : vector<10x30xbf16> to vector<8x30xbf16>
    %78 = tpu.concatenate %73, %74, %75, %76, %77 in 0 : vector<8x30xbf16>, vector<8x30xbf16>, vector<8x30xbf16>, vector<8x30xbf16>, vector<8x30xbf16> -> vector<40x30xbf16>
    %c6 = arith.constant 6 : index
    %c0_45 = arith.constant 0 : index
    %c0_46 = arith.constant 0 : index
    %79 = vector.load %arg9[%c6, %c0_45, %c0_46] : memref<9x30x128xbf16, #tpu.memory_space<vmem>>, vector<1x30x128xbf16>
    %80 = vector.shape_cast %79 : vector<1x30x128xbf16> to vector<30x128xbf16>
    %cst_47 = arith.constant dense<0.000000e+00> : vector<40x128xf32>
    %81 = tpu.matmul %78, %80, %cst_47 {dimension_numbers = #tpu.dot_dimension_numbers<[1], [0], [0], [1], [0, 0, 1, 1], [], []>} : vector<40x30xbf16>, vector<30x128xbf16>, vector<40x128xf32> -> vector<40x128xf32>
    %82 = arith.addf %72, %81 : vector<40x128xf32>
    %83 = vector.extract_strided_slice %5 {offsets = [1, 0], sizes = [8, 30], strides = [1, 1]} : vector<10x30xbf16> to vector<8x30xbf16>
    %84 = vector.extract_strided_slice %7 {offsets = [1, 0], sizes = [8, 30], strides = [1, 1]} : vector<10x30xbf16> to vector<8x30xbf16>
    %85 = vector.extract_strided_slice %9 {offsets = [1, 0], sizes = [8, 30], strides = [1, 1]} : vector<10x30xbf16> to vector<8x30xbf16>
    %86 = vector.extract_strided_slice %11 {offsets = [1, 0], sizes = [8, 30], strides = [1, 1]} : vector<10x30xbf16> to vector<8x30xbf16>
    %87 = vector.extract_strided_slice %13 {offsets = [1, 0], sizes = [8, 30], strides = [1, 1]} : vector<10x30xbf16> to vector<8x30xbf16>
    %88 = tpu.concatenate %83, %84, %85, %86, %87 in 0 : vector<8x30xbf16>, vector<8x30xbf16>, vector<8x30xbf16>, vector<8x30xbf16>, vector<8x30xbf16> -> vector<40x30xbf16>
    %c7 = arith.constant 7 : index
    %c0_48 = arith.constant 0 : index
    %c0_49 = arith.constant 0 : index
    %89 = vector.load %arg9[%c7, %c0_48, %c0_49] : memref<9x30x128xbf16, #tpu.memory_space<vmem>>, vector<1x30x128xbf16>
    %90 = vector.shape_cast %89 : vector<1x30x128xbf16> to vector<30x128xbf16>
    %cst_50 = arith.constant dense<0.000000e+00> : vector<40x128xf32>
    %91 = tpu.matmul %88, %90, %cst_50 {dimension_numbers = #tpu.dot_dimension_numbers<[1], [0], [0], [1], [0, 0, 1, 1], [], []>} : vector<40x30xbf16>, vector<30x128xbf16>, vector<40x128xf32> -> vector<40x128xf32>
    %92 = arith.addf %82, %91 : vector<40x128xf32>
    %93 = vector.extract_strided_slice %5 {offsets = [2, 0], sizes = [8, 30], strides = [1, 1]} : vector<10x30xbf16> to vector<8x30xbf16>
    %94 = vector.extract_strided_slice %7 {offsets = [2, 0], sizes = [8, 30], strides = [1, 1]} : vector<10x30xbf16> to vector<8x30xbf16>
    %95 = vector.extract_strided_slice %9 {offsets = [2, 0], sizes = [8, 30], strides = [1, 1]} : vector<10x30xbf16> to vector<8x30xbf16>
    %96 = vector.extract_strided_slice %11 {offsets = [2, 0], sizes = [8, 30], strides = [1, 1]} : vector<10x30xbf16> to vector<8x30xbf16>
    %97 = vector.extract_strided_slice %13 {offsets = [2, 0], sizes = [8, 30], strides = [1, 1]} : vector<10x30xbf16> to vector<8x30xbf16>
    %98 = tpu.concatenate %93, %94, %95, %96, %97 in 0 : vector<8x30xbf16>, vector<8x30xbf16>, vector<8x30xbf16>, vector<8x30xbf16>, vector<8x30xbf16> -> vector<40x30xbf16>
    %c8 = arith.constant 8 : index
    %c0_51 = arith.constant 0 : index
    %c0_52 = arith.constant 0 : index
    %99 = vector.load %arg9[%c8, %c0_51, %c0_52] : memref<9x30x128xbf16, #tpu.memory_space<vmem>>, vector<1x30x128xbf16>
    %100 = vector.shape_cast %99 : vector<1x30x128xbf16> to vector<30x128xbf16>
    %cst_53 = arith.constant dense<0.000000e+00> : vector<40x128xf32>
    %101 = tpu.matmul %98, %100, %cst_53 {dimension_numbers = #tpu.dot_dimension_numbers<[1], [0], [0], [1], [0, 0, 1, 1], [], []>} : vector<40x30xbf16>, vector<30x128xbf16>, vector<40x128xf32> -> vector<40x128xf32>
    %102 = arith.addf %92, %101 : vector<40x128xf32>
    %c0_54 = arith.constant 0 : index
    %c0_55 = arith.constant 0 : index
    %103 = vector.load %arg10[%c0_54, %c0_55] : memref<1x128xf32, #tpu.memory_space<vmem>>, vector<1x128xf32>
    %104 = vector.broadcast %103 : vector<1x128xf32> to vector<40x128xf32>
    %105 = arith.addf %102, %104 : vector<40x128xf32>
    %106 = arith.negf %105 : vector<40x128xf32>
    %107 = math.exp %106 : vector<40x128xf32>
    %cst_56 = arith.constant 1.000000e+00 : f32
    %108 = vector.broadcast %cst_56 : f32 to vector<40x128xf32>
    %109 = arith.addf %108, %107 : vector<40x128xf32>
    %110 = arith.divf %108, %109 : vector<40x128xf32>
    %111 = arith.mulf %105, %110 : vector<40x128xf32>
    %112 = arith.truncf %111 : vector<40x128xf32> to vector<40x128xbf16>
    %c0_57 = arith.constant 0 : index
    %c0_58 = arith.constant 0 : index
    %c0_59 = arith.constant 0 : index
    %113 = vector.load %arg11[%c0_57, %c0_58, %c0_59] : memref<1x40x128xbf16, #tpu.memory_space<vmem>>, vector<1x40x128xbf16>
    %114 = vector.shape_cast %113 : vector<1x40x128xbf16> to vector<40x128xbf16>
    %115 = vector.shape_cast %112 : vector<40x128xbf16> to vector<1x40x128xbf16>
    tpu.vector_store %arg11[%c0_57, %c0_58, %c0_59], %115 {strides = array<i32>} : memref<1x40x128xbf16, #tpu.memory_space<vmem>>, vector<1x40x128xbf16>,
    return
  }
  func.func @transform_0(%arg0: i32, %arg1: i32) -> (i32, i32, i32, i32) {
    %c5_i32 = arith.constant 5 : i32
    %0 = arith.muli %arg1, %c5_i32 : i32
    %c0_i32 = arith.constant 0 : i32
    %1 = arith.addi %0, %c0_i32 : i32
    %c2_i32 = arith.constant 2 : i32
    %2 = arith.subi %1, %c2_i32 : i32
    %c0_i32_0 = arith.constant 0 : i32
    %3 = arith.maxsi %2, %c0_i32_0 : i32
    %c4_i32 = arith.constant 4 : i32
    %4 = arith.minsi %3, %c4_i32 : i32
    %c0_i32_1 = arith.constant 0 : i32
    %c0_i32_2 = arith.constant 0 : i32
    %c0_i32_3 = arith.constant 0 : i32
    return %arg0, %4, %c0_i32_1, %c0_i32_2 : i32, i32, i32, i32
  }
  func.func @transform_1(%arg0: i32, %arg1: i32) -> (i32, i32, i32, i32) {
    %c5_i32 = arith.constant 5 : i32
    %0 = arith.muli %arg1, %c5_i32 : i32
    %c1_i32 = arith.constant 1 : i32
    %1 = arith.addi %0, %c1_i32 : i32
    %c2_i32 = arith.constant 2 : i32
    %2 = arith.subi %1, %c2_i32 : i32
    %c0_i32 = arith.constant 0 : i32
    %3 = arith.maxsi %2, %c0_i32 : i32
    %c4_i32 = arith.constant 4 : i32
    %4 = arith.minsi %3, %c4_i32 : i32
    %c0_i32_0 = arith.constant 0 : i32
    %c0_i32_1 = arith.constant 0 : i32
    %c0_i32_2 = arith.constant 0 : i32
    return %arg0, %4, %c0_i32_0, %c0_i32_1 : i32, i32, i32, i32
  }
  func.func @transform_2(%arg0: i32, %arg1: i32) -> (i32, i32, i32, i32) {
    %c5_i32 = arith.constant 5 : i32
    %0 = arith.muli %arg1, %c5_i32 : i32
    %c2_i32 = arith.constant 2 : i32
    %1 = arith.addi %0, %c2_i32 : i32
    %c2_i32_0 = arith.constant 2 : i32
    %2 = arith.subi %1, %c2_i32_0 : i32
    %c0_i32 = arith.constant 0 : i32
    %3 = arith.maxsi %2, %c0_i32 : i32
    %c4_i32 = arith.constant 4 : i32
    %4 = arith.minsi %3, %c4_i32 : i32
    %c0_i32_1 = arith.constant 0 : i32
    %c0_i32_2 = arith.constant 0 : i32
    %c0_i32_3 = arith.constant 0 : i32
    return %arg0, %4, %c0_i32_1, %c0_i32_2 : i32, i32, i32, i32
  }
  func.func @transform_3(%arg0: i32, %arg1: i32) -> (i32, i32, i32, i32) {
    %c5_i32 = arith.constant 5 : i32
    %0 = arith.muli %arg1, %c5_i32 : i32
    %c3_i32 = arith.constant 3 : i32
    %1 = arith.addi %0, %c3_i32 : i32
    %c2_i32 = arith.constant 2 : i32
    %2 = arith.subi %1, %c2_i32 : i32
    %c0_i32 = arith.constant 0 : i32
    %3 = arith.maxsi %2, %c0_i32 : i32
    %c4_i32 = arith.constant 4 : i32
    %4 = arith.minsi %3, %c4_i32 : i32
    %c0_i32_0 = arith.constant 0 : i32
    %c0_i32_1 = arith.constant 0 : i32
    %c0_i32_2 = arith.constant 0 : i32
    return %arg0, %4, %c0_i32_0, %c0_i32_1 : i32, i32, i32, i32
  }
  func.func @transform_4(%arg0: i32, %arg1: i32) -> (i32, i32, i32, i32) {
    %c5_i32 = arith.constant 5 : i32
    %0 = arith.muli %arg1, %c5_i32 : i32
    %c4_i32 = arith.constant 4 : i32
    %1 = arith.addi %0, %c4_i32 : i32
    %c2_i32 = arith.constant 2 : i32
    %2 = arith.subi %1, %c2_i32 : i32
    %c0_i32 = arith.constant 0 : i32
    %3 = arith.maxsi %2, %c0_i32 : i32
    %c4_i32_0 = arith.constant 4 : i32
    %4 = arith.minsi %3, %c4_i32_0 : i32
    %c0_i32_1 = arith.constant 0 : i32
    %c0_i32_2 = arith.constant 0 : i32
    %c0_i32_3 = arith.constant 0 : i32
    return %arg0, %4, %c0_i32_1, %c0_i32_2 : i32, i32, i32, i32
  }
  func.func @transform_5(%arg0: i32, %arg1: i32) -> (i32, i32, i32, i32) {
    %c5_i32 = arith.constant 5 : i32
    %0 = arith.muli %arg1, %c5_i32 : i32
    %c5_i32_0 = arith.constant 5 : i32
    %1 = arith.addi %0, %c5_i32_0 : i32
    %c2_i32 = arith.constant 2 : i32
    %2 = arith.subi %1, %c2_i32 : i32
    %c0_i32 = arith.constant 0 : i32
    %3 = arith.maxsi %2, %c0_i32 : i32
    %c4_i32 = arith.constant 4 : i32
    %4 = arith.minsi %3, %c4_i32 : i32
    %c0_i32_1 = arith.constant 0 : i32
    %c0_i32_2 = arith.constant 0 : i32
    %c0_i32_3 = arith.constant 0 : i32
    return %arg0, %4, %c0_i32_1, %c0_i32_2 : i32, i32, i32, i32
  }
  func.func @transform_6(%arg0: i32, %arg1: i32) -> (i32, i32, i32, i32) {
    %c5_i32 = arith.constant 5 : i32
    %0 = arith.muli %arg1, %c5_i32 : i32
    %c6_i32 = arith.constant 6 : i32
    %1 = arith.addi %0, %c6_i32 : i32
    %c2_i32 = arith.constant 2 : i32
    %2 = arith.subi %1, %c2_i32 : i32
    %c0_i32 = arith.constant 0 : i32
    %3 = arith.maxsi %2, %c0_i32 : i32
    %c4_i32 = arith.constant 4 : i32
    %4 = arith.minsi %3, %c4_i32 : i32
    %c0_i32_0 = arith.constant 0 : i32
    %c0_i32_1 = arith.constant 0 : i32
    %c0_i32_2 = arith.constant 0 : i32
    return %arg0, %4, %c0_i32_0, %c0_i32_1 : i32, i32, i32, i32
  }
  func.func @transform_7(%arg0: i32, %arg1: i32) -> (i32, i32, i32) {
    %c0_i32 = arith.constant 0 : i32
    %c0_i32_0 = arith.constant 0 : i32
    %c0_i32_1 = arith.constant 0 : i32
    %c0_i32_2 = arith.constant 0 : i32
    return %c0_i32, %c0_i32_0, %c0_i32_1 : i32, i32, i32
  }
  func.func @transform_8(%arg0: i32, %arg1: i32) -> (i32, i32) {
    %c0_i32 = arith.constant 0 : i32
    %c0_i32_0 = arith.constant 0 : i32
    %c0_i32_1 = arith.constant 0 : i32
    return %c0_i32, %c0_i32_0 : i32, i32
  }
  func.func @transform_9(%arg0: i32, %arg1: i32) -> (i32, i32, i32) {
    %c0_i32 = arith.constant 0 : i32
    %c0_i32_0 = arith.constant 0 : i32
    return %arg0, %arg1, %c0_i32 : i32, i32, i32
  }
}

module attributes {stable_mosaic.version = 11 : i64} {
  func.func @kernel(%arg0: i32, %arg1: i32, %arg2: memref<1x1x10x160xbf16, #tpu.memory_space<vmem>>, %arg3: memref<1x1x10x160xbf16, #tpu.memory_space<vmem>>, %arg4: memref<1x1x10x160xbf16, #tpu.memory_space<vmem>>, %arg5: memref<1x1x10x160xbf16, #tpu.memory_space<vmem>>, %arg6: memref<1x1x10x160xbf16, #tpu.memory_space<vmem>>, %arg7: memref<1x1x10x160xbf16, #tpu.memory_space<vmem>>, %arg8: memref<1x1x10x160xbf16, #tpu.memory_space<vmem>>, %arg9: memref<9x160x128xbf16, #tpu.memory_space<vmem>>, %arg10: memref<1x128xf32, #tpu.memory_space<vmem>>, %arg11: memref<1x40x128xf32, #tpu.memory_space<vmem>>) attributes {dimension_semantics = [#tpu.dimension_semantics<parallel>, #tpu.dimension_semantics<parallel>], iteration_bounds = array<i64: 2, 1>, scalar_prefetch = 0 : i64, scratch_operands = 0 : i64, tpu.core_type = #tpu.core_type<tc>, window_params = [{transform_indices = @transform_0, window_bounds = array<i64: 1, 1, 10, 160>}, {transform_indices = @transform_1, window_bounds = array<i64: 1, 1, 10, 160>}, {transform_indices = @transform_2, window_bounds = array<i64: 1, 1, 10, 160>}, {transform_indices = @transform_3, window_bounds = array<i64: 1, 1, 10, 160>}, {transform_indices = @transform_4, window_bounds = array<i64: 1, 1, 10, 160>}, {transform_indices = @transform_5, window_bounds = array<i64: 1, 1, 10, 160>}, {transform_indices = @transform_6, window_bounds = array<i64: 1, 1, 10, 160>}, {pipeline_mode = #tpu.pipeline_mode<synchronous>, transform_indices = @transform_7, window_bounds = array<i64: 9, 160, 128>}, {pipeline_mode = #tpu.pipeline_mode<synchronous>, transform_indices = @transform_8, window_bounds = array<i64: 1, 128>}, {transform_indices = @transform_9, window_bounds = array<i64: 1, 40, 128>}]} {
    %c0 = arith.constant 0 : index
    %c0_0 = arith.constant 0 : index
    %c0_1 = arith.constant 0 : index
    %c0_2 = arith.constant 0 : index
    %0 = vector.load %arg2[%c0, %c0_0, %c0_1, %c0_2] : memref<1x1x10x160xbf16, #tpu.memory_space<vmem>>, vector<1x1x10x160xbf16>
    %1 = vector.shape_cast %0 : vector<1x1x10x160xbf16> to vector<10x160xbf16>
    %c0_3 = arith.constant 0 : index
    %c0_4 = arith.constant 0 : index
    %c0_5 = arith.constant 0 : index
    %c0_6 = arith.constant 0 : index
    %2 = vector.load %arg3[%c0_3, %c0_4, %c0_5, %c0_6] : memref<1x1x10x160xbf16, #tpu.memory_space<vmem>>, vector<1x1x10x160xbf16>
    %3 = vector.shape_cast %2 : vector<1x1x10x160xbf16> to vector<10x160xbf16>
    %c0_7 = arith.constant 0 : index
    %c0_8 = arith.constant 0 : index
    %c0_9 = arith.constant 0 : index
    %c0_10 = arith.constant 0 : index
    %4 = vector.load %arg4[%c0_7, %c0_8, %c0_9, %c0_10] : memref<1x1x10x160xbf16, #tpu.memory_space<vmem>>, vector<1x1x10x160xbf16>
    %5 = vector.shape_cast %4 : vector<1x1x10x160xbf16> to vector<10x160xbf16>
    %c0_11 = arith.constant 0 : index
    %c0_12 = arith.constant 0 : index
    %c0_13 = arith.constant 0 : index
    %c0_14 = arith.constant 0 : index
    %6 = vector.load %arg5[%c0_11, %c0_12, %c0_13, %c0_14] : memref<1x1x10x160xbf16, #tpu.memory_space<vmem>>, vector<1x1x10x160xbf16>
    %7 = vector.shape_cast %6 : vector<1x1x10x160xbf16> to vector<10x160xbf16>
    %c0_15 = arith.constant 0 : index
    %c0_16 = arith.constant 0 : index
    %c0_17 = arith.constant 0 : index
    %c0_18 = arith.constant 0 : index
    %8 = vector.load %arg6[%c0_15, %c0_16, %c0_17, %c0_18] : memref<1x1x10x160xbf16, #tpu.memory_space<vmem>>, vector<1x1x10x160xbf16>
    %9 = vector.shape_cast %8 : vector<1x1x10x160xbf16> to vector<10x160xbf16>
    %c0_19 = arith.constant 0 : index
    %c0_20 = arith.constant 0 : index
    %c0_21 = arith.constant 0 : index
    %c0_22 = arith.constant 0 : index
    %10 = vector.load %arg7[%c0_19, %c0_20, %c0_21, %c0_22] : memref<1x1x10x160xbf16, #tpu.memory_space<vmem>>, vector<1x1x10x160xbf16>
    %11 = vector.shape_cast %10 : vector<1x1x10x160xbf16> to vector<10x160xbf16>
    %c0_23 = arith.constant 0 : index
    %c0_24 = arith.constant 0 : index
    %c0_25 = arith.constant 0 : index
    %c0_26 = arith.constant 0 : index
    %12 = vector.load %arg8[%c0_23, %c0_24, %c0_25, %c0_26] : memref<1x1x10x160xbf16, #tpu.memory_space<vmem>>, vector<1x1x10x160xbf16>
    %13 = vector.shape_cast %12 : vector<1x1x10x160xbf16> to vector<10x160xbf16>
    %14 = vector.extract_strided_slice %1 {offsets = [0, 0], sizes = [8, 160], strides = [1, 1]} : vector<10x160xbf16> to vector<8x160xbf16>
    %15 = vector.extract_strided_slice %3 {offsets = [0, 0], sizes = [8, 160], strides = [1, 1]} : vector<10x160xbf16> to vector<8x160xbf16>
    %16 = vector.extract_strided_slice %5 {offsets = [0, 0], sizes = [8, 160], strides = [1, 1]} : vector<10x160xbf16> to vector<8x160xbf16>
    %17 = vector.extract_strided_slice %7 {offsets = [0, 0], sizes = [8, 160], strides = [1, 1]} : vector<10x160xbf16> to vector<8x160xbf16>
    %18 = vector.extract_strided_slice %9 {offsets = [0, 0], sizes = [8, 160], strides = [1, 1]} : vector<10x160xbf16> to vector<8x160xbf16>
    %19 = tpu.concatenate %14, %15, %16, %17, %18 in 0 : vector<8x160xbf16>, vector<8x160xbf16>, vector<8x160xbf16>, vector<8x160xbf16>, vector<8x160xbf16> -> vector<40x160xbf16>
    %c0_27 = arith.constant 0 : index
    %c0_28 = arith.constant 0 : index
    %c0_29 = arith.constant 0 : index
    %20 = vector.load %arg9[%c0_27, %c0_28, %c0_29] : memref<9x160x128xbf16, #tpu.memory_space<vmem>>, vector<1x160x128xbf16>
    %21 = vector.shape_cast %20 : vector<1x160x128xbf16> to vector<160x128xbf16>
    %cst = arith.constant dense<0.000000e+00> : vector<40x128xf32>
    %22 = tpu.matmul %19, %21, %cst {dimension_numbers = #tpu.dot_dimension_numbers<[1], [0], [0], [1], [0, 0, 1, 1], [], []>} : vector<40x160xbf16>, vector<160x128xbf16>, vector<40x128xf32> -> vector<40x128xf32>
    %23 = vector.extract_strided_slice %1 {offsets = [1, 0], sizes = [8, 160], strides = [1, 1]} : vector<10x160xbf16> to vector<8x160xbf16>
    %24 = vector.extract_strided_slice %3 {offsets = [1, 0], sizes = [8, 160], strides = [1, 1]} : vector<10x160xbf16> to vector<8x160xbf16>
    %25 = vector.extract_strided_slice %5 {offsets = [1, 0], sizes = [8, 160], strides = [1, 1]} : vector<10x160xbf16> to vector<8x160xbf16>
    %26 = vector.extract_strided_slice %7 {offsets = [1, 0], sizes = [8, 160], strides = [1, 1]} : vector<10x160xbf16> to vector<8x160xbf16>
    %27 = vector.extract_strided_slice %9 {offsets = [1, 0], sizes = [8, 160], strides = [1, 1]} : vector<10x160xbf16> to vector<8x160xbf16>
    %28 = tpu.concatenate %23, %24, %25, %26, %27 in 0 : vector<8x160xbf16>, vector<8x160xbf16>, vector<8x160xbf16>, vector<8x160xbf16>, vector<8x160xbf16> -> vector<40x160xbf16>
    %c1 = arith.constant 1 : index
    %c0_30 = arith.constant 0 : index
    %c0_31 = arith.constant 0 : index
    %29 = vector.load %arg9[%c1, %c0_30, %c0_31] : memref<9x160x128xbf16, #tpu.memory_space<vmem>>, vector<1x160x128xbf16>
    %30 = vector.shape_cast %29 : vector<1x160x128xbf16> to vector<160x128xbf16>
    %cst_32 = arith.constant dense<0.000000e+00> : vector<40x128xf32>
    %31 = tpu.matmul %28, %30, %cst_32 {dimension_numbers = #tpu.dot_dimension_numbers<[1], [0], [0], [1], [0, 0, 1, 1], [], []>} : vector<40x160xbf16>, vector<160x128xbf16>, vector<40x128xf32> -> vector<40x128xf32>
    %32 = arith.addf %22, %31 : vector<40x128xf32>
    %33 = vector.extract_strided_slice %1 {offsets = [2, 0], sizes = [8, 160], strides = [1, 1]} : vector<10x160xbf16> to vector<8x160xbf16>
    %34 = vector.extract_strided_slice %3 {offsets = [2, 0], sizes = [8, 160], strides = [1, 1]} : vector<10x160xbf16> to vector<8x160xbf16>
    %35 = vector.extract_strided_slice %5 {offsets = [2, 0], sizes = [8, 160], strides = [1, 1]} : vector<10x160xbf16> to vector<8x160xbf16>
    %36 = vector.extract_strided_slice %7 {offsets = [2, 0], sizes = [8, 160], strides = [1, 1]} : vector<10x160xbf16> to vector<8x160xbf16>
    %37 = vector.extract_strided_slice %9 {offsets = [2, 0], sizes = [8, 160], strides = [1, 1]} : vector<10x160xbf16> to vector<8x160xbf16>
    %38 = tpu.concatenate %33, %34, %35, %36, %37 in 0 : vector<8x160xbf16>, vector<8x160xbf16>, vector<8x160xbf16>, vector<8x160xbf16>, vector<8x160xbf16> -> vector<40x160xbf16>
    %c2 = arith.constant 2 : index
    %c0_33 = arith.constant 0 : index
    %c0_34 = arith.constant 0 : index
    %39 = vector.load %arg9[%c2, %c0_33, %c0_34] : memref<9x160x128xbf16, #tpu.memory_space<vmem>>, vector<1x160x128xbf16>
    %40 = vector.shape_cast %39 : vector<1x160x128xbf16> to vector<160x128xbf16>
    %cst_35 = arith.constant dense<0.000000e+00> : vector<40x128xf32>
    %41 = tpu.matmul %38, %40, %cst_35 {dimension_numbers = #tpu.dot_dimension_numbers<[1], [0], [0], [1], [0, 0, 1, 1], [], []>} : vector<40x160xbf16>, vector<160x128xbf16>, vector<40x128xf32> -> vector<40x128xf32>
    %42 = arith.addf %32, %41 : vector<40x128xf32>
    %43 = vector.extract_strided_slice %3 {offsets = [0, 0], sizes = [8, 160], strides = [1, 1]} : vector<10x160xbf16> to vector<8x160xbf16>
    %44 = vector.extract_strided_slice %5 {offsets = [0, 0], sizes = [8, 160], strides = [1, 1]} : vector<10x160xbf16> to vector<8x160xbf16>
    %45 = vector.extract_strided_slice %7 {offsets = [0, 0], sizes = [8, 160], strides = [1, 1]} : vector<10x160xbf16> to vector<8x160xbf16>
    %46 = vector.extract_strided_slice %9 {offsets = [0, 0], sizes = [8, 160], strides = [1, 1]} : vector<10x160xbf16> to vector<8x160xbf16>
    %47 = vector.extract_strided_slice %11 {offsets = [0, 0], sizes = [8, 160], strides = [1, 1]} : vector<10x160xbf16> to vector<8x160xbf16>
    %48 = tpu.concatenate %43, %44, %45, %46, %47 in 0 : vector<8x160xbf16>, vector<8x160xbf16>, vector<8x160xbf16>, vector<8x160xbf16>, vector<8x160xbf16> -> vector<40x160xbf16>
    %c3 = arith.constant 3 : index
    %c0_36 = arith.constant 0 : index
    %c0_37 = arith.constant 0 : index
    %49 = vector.load %arg9[%c3, %c0_36, %c0_37] : memref<9x160x128xbf16, #tpu.memory_space<vmem>>, vector<1x160x128xbf16>
    %50 = vector.shape_cast %49 : vector<1x160x128xbf16> to vector<160x128xbf16>
    %cst_38 = arith.constant dense<0.000000e+00> : vector<40x128xf32>
    %51 = tpu.matmul %48, %50, %cst_38 {dimension_numbers = #tpu.dot_dimension_numbers<[1], [0], [0], [1], [0, 0, 1, 1], [], []>} : vector<40x160xbf16>, vector<160x128xbf16>, vector<40x128xf32> -> vector<40x128xf32>
    %52 = arith.addf %42, %51 : vector<40x128xf32>
    %53 = vector.extract_strided_slice %3 {offsets = [1, 0], sizes = [8, 160], strides = [1, 1]} : vector<10x160xbf16> to vector<8x160xbf16>
    %54 = vector.extract_strided_slice %5 {offsets = [1, 0], sizes = [8, 160], strides = [1, 1]} : vector<10x160xbf16> to vector<8x160xbf16>
    %55 = vector.extract_strided_slice %7 {offsets = [1, 0], sizes = [8, 160], strides = [1, 1]} : vector<10x160xbf16> to vector<8x160xbf16>
    %56 = vector.extract_strided_slice %9 {offsets = [1, 0], sizes = [8, 160], strides = [1, 1]} : vector<10x160xbf16> to vector<8x160xbf16>
    %57 = vector.extract_strided_slice %11 {offsets = [1, 0], sizes = [8, 160], strides = [1, 1]} : vector<10x160xbf16> to vector<8x160xbf16>
    %58 = tpu.concatenate %53, %54, %55, %56, %57 in 0 : vector<8x160xbf16>, vector<8x160xbf16>, vector<8x160xbf16>, vector<8x160xbf16>, vector<8x160xbf16> -> vector<40x160xbf16>
    %c4 = arith.constant 4 : index
    %c0_39 = arith.constant 0 : index
    %c0_40 = arith.constant 0 : index
    %59 = vector.load %arg9[%c4, %c0_39, %c0_40] : memref<9x160x128xbf16, #tpu.memory_space<vmem>>, vector<1x160x128xbf16>
    %60 = vector.shape_cast %59 : vector<1x160x128xbf16> to vector<160x128xbf16>
    %cst_41 = arith.constant dense<0.000000e+00> : vector<40x128xf32>
    %61 = tpu.matmul %58, %60, %cst_41 {dimension_numbers = #tpu.dot_dimension_numbers<[1], [0], [0], [1], [0, 0, 1, 1], [], []>} : vector<40x160xbf16>, vector<160x128xbf16>, vector<40x128xf32> -> vector<40x128xf32>
    %62 = arith.addf %52, %61 : vector<40x128xf32>
    %63 = vector.extract_strided_slice %3 {offsets = [2, 0], sizes = [8, 160], strides = [1, 1]} : vector<10x160xbf16> to vector<8x160xbf16>
    %64 = vector.extract_strided_slice %5 {offsets = [2, 0], sizes = [8, 160], strides = [1, 1]} : vector<10x160xbf16> to vector<8x160xbf16>
    %65 = vector.extract_strided_slice %7 {offsets = [2, 0], sizes = [8, 160], strides = [1, 1]} : vector<10x160xbf16> to vector<8x160xbf16>
    %66 = vector.extract_strided_slice %9 {offsets = [2, 0], sizes = [8, 160], strides = [1, 1]} : vector<10x160xbf16> to vector<8x160xbf16>
    %67 = vector.extract_strided_slice %11 {offsets = [2, 0], sizes = [8, 160], strides = [1, 1]} : vector<10x160xbf16> to vector<8x160xbf16>
    %68 = tpu.concatenate %63, %64, %65, %66, %67 in 0 : vector<8x160xbf16>, vector<8x160xbf16>, vector<8x160xbf16>, vector<8x160xbf16>, vector<8x160xbf16> -> vector<40x160xbf16>
    %c5 = arith.constant 5 : index
    %c0_42 = arith.constant 0 : index
    %c0_43 = arith.constant 0 : index
    %69 = vector.load %arg9[%c5, %c0_42, %c0_43] : memref<9x160x128xbf16, #tpu.memory_space<vmem>>, vector<1x160x128xbf16>
    %70 = vector.shape_cast %69 : vector<1x160x128xbf16> to vector<160x128xbf16>
    %cst_44 = arith.constant dense<0.000000e+00> : vector<40x128xf32>
    %71 = tpu.matmul %68, %70, %cst_44 {dimension_numbers = #tpu.dot_dimension_numbers<[1], [0], [0], [1], [0, 0, 1, 1], [], []>} : vector<40x160xbf16>, vector<160x128xbf16>, vector<40x128xf32> -> vector<40x128xf32>
    %72 = arith.addf %62, %71 : vector<40x128xf32>
    %73 = vector.extract_strided_slice %5 {offsets = [0, 0], sizes = [8, 160], strides = [1, 1]} : vector<10x160xbf16> to vector<8x160xbf16>
    %74 = vector.extract_strided_slice %7 {offsets = [0, 0], sizes = [8, 160], strides = [1, 1]} : vector<10x160xbf16> to vector<8x160xbf16>
    %75 = vector.extract_strided_slice %9 {offsets = [0, 0], sizes = [8, 160], strides = [1, 1]} : vector<10x160xbf16> to vector<8x160xbf16>
    %76 = vector.extract_strided_slice %11 {offsets = [0, 0], sizes = [8, 160], strides = [1, 1]} : vector<10x160xbf16> to vector<8x160xbf16>
    %77 = vector.extract_strided_slice %13 {offsets = [0, 0], sizes = [8, 160], strides = [1, 1]} : vector<10x160xbf16> to vector<8x160xbf16>
    %78 = tpu.concatenate %73, %74, %75, %76, %77 in 0 : vector<8x160xbf16>, vector<8x160xbf16>, vector<8x160xbf16>, vector<8x160xbf16>, vector<8x160xbf16> -> vector<40x160xbf16>
    %c6 = arith.constant 6 : index
    %c0_45 = arith.constant 0 : index
    %c0_46 = arith.constant 0 : index
    %79 = vector.load %arg9[%c6, %c0_45, %c0_46] : memref<9x160x128xbf16, #tpu.memory_space<vmem>>, vector<1x160x128xbf16>
    %80 = vector.shape_cast %79 : vector<1x160x128xbf16> to vector<160x128xbf16>
    %cst_47 = arith.constant dense<0.000000e+00> : vector<40x128xf32>
    %81 = tpu.matmul %78, %80, %cst_47 {dimension_numbers = #tpu.dot_dimension_numbers<[1], [0], [0], [1], [0, 0, 1, 1], [], []>} : vector<40x160xbf16>, vector<160x128xbf16>, vector<40x128xf32> -> vector<40x128xf32>
    %82 = arith.addf %72, %81 : vector<40x128xf32>
    %83 = vector.extract_strided_slice %5 {offsets = [1, 0], sizes = [8, 160], strides = [1, 1]} : vector<10x160xbf16> to vector<8x160xbf16>
    %84 = vector.extract_strided_slice %7 {offsets = [1, 0], sizes = [8, 160], strides = [1, 1]} : vector<10x160xbf16> to vector<8x160xbf16>
    %85 = vector.extract_strided_slice %9 {offsets = [1, 0], sizes = [8, 160], strides = [1, 1]} : vector<10x160xbf16> to vector<8x160xbf16>
    %86 = vector.extract_strided_slice %11 {offsets = [1, 0], sizes = [8, 160], strides = [1, 1]} : vector<10x160xbf16> to vector<8x160xbf16>
    %87 = vector.extract_strided_slice %13 {offsets = [1, 0], sizes = [8, 160], strides = [1, 1]} : vector<10x160xbf16> to vector<8x160xbf16>
    %88 = tpu.concatenate %83, %84, %85, %86, %87 in 0 : vector<8x160xbf16>, vector<8x160xbf16>, vector<8x160xbf16>, vector<8x160xbf16>, vector<8x160xbf16> -> vector<40x160xbf16>
    %c7 = arith.constant 7 : index
    %c0_48 = arith.constant 0 : index
    %c0_49 = arith.constant 0 : index
    %89 = vector.load %arg9[%c7, %c0_48, %c0_49] : memref<9x160x128xbf16, #tpu.memory_space<vmem>>, vector<1x160x128xbf16>
    %90 = vector.shape_cast %89 : vector<1x160x128xbf16> to vector<160x128xbf16>
    %cst_50 = arith.constant dense<0.000000e+00> : vector<40x128xf32>
    %91 = tpu.matmul %88, %90, %cst_50 {dimension_numbers = #tpu.dot_dimension_numbers<[1], [0], [0], [1], [0, 0, 1, 1], [], []>} : vector<40x160xbf16>, vector<160x128xbf16>, vector<40x128xf32> -> vector<40x128xf32>
    %92 = arith.addf %82, %91 : vector<40x128xf32>
    %93 = vector.extract_strided_slice %5 {offsets = [2, 0], sizes = [8, 160], strides = [1, 1]} : vector<10x160xbf16> to vector<8x160xbf16>
    %94 = vector.extract_strided_slice %7 {offsets = [2, 0], sizes = [8, 160], strides = [1, 1]} : vector<10x160xbf16> to vector<8x160xbf16>
    %95 = vector.extract_strided_slice %9 {offsets = [2, 0], sizes = [8, 160], strides = [1, 1]} : vector<10x160xbf16> to vector<8x160xbf16>
    %96 = vector.extract_strided_slice %11 {offsets = [2, 0], sizes = [8, 160], strides = [1, 1]} : vector<10x160xbf16> to vector<8x160xbf16>
    %97 = vector.extract_strided_slice %13 {offsets = [2, 0], sizes = [8, 160], strides = [1, 1]} : vector<10x160xbf16> to vector<8x160xbf16>
    %98 = tpu.concatenate %93, %94, %95, %96, %97 in 0 : vector<8x160xbf16>, vector<8x160xbf16>, vector<8x160xbf16>, vector<8x160xbf16>, vector<8x160xbf16> -> vector<40x160xbf16>
    %c8 = arith.constant 8 : index
    %c0_51 = arith.constant 0 : index
    %c0_52 = arith.constant 0 : index
    %99 = vector.load %arg9[%c8, %c0_51, %c0_52] : memref<9x160x128xbf16, #tpu.memory_space<vmem>>, vector<1x160x128xbf16>
    %100 = vector.shape_cast %99 : vector<1x160x128xbf16> to vector<160x128xbf16>
    %cst_53 = arith.constant dense<0.000000e+00> : vector<40x128xf32>
    %101 = tpu.matmul %98, %100, %cst_53 {dimension_numbers = #tpu.dot_dimension_numbers<[1], [0], [0], [1], [0, 0, 1, 1], [], []>} : vector<40x160xbf16>, vector<160x128xbf16>, vector<40x128xf32> -> vector<40x128xf32>
    %102 = arith.addf %92, %101 : vector<40x128xf32>
    %c0_54 = arith.constant 0 : index
    %c0_55 = arith.constant 0 : index
    %103 = vector.load %arg10[%c0_54, %c0_55] : memref<1x128xf32, #tpu.memory_space<vmem>>, vector<1x128xf32>
    %104 = vector.broadcast %103 : vector<1x128xf32> to vector<40x128xf32>
    %105 = arith.addf %102, %104 : vector<40x128xf32>
    %c0_56 = arith.constant 0 : index
    %c0_57 = arith.constant 0 : index
    %c0_58 = arith.constant 0 : index
    %106 = vector.load %arg11[%c0_56, %c0_57, %c0_58] : memref<1x40x128xf32, #tpu.memory_space<vmem>>, vector<1x40x128xf32>
    %107 = vector.shape_cast %106 : vector<1x40x128xf32> to vector<40x128xf32>
    %108 = vector.shape_cast %105 : vector<40x128xf32> to vector<1x40x128xf32>
    tpu.vector_store %arg11[%c0_56, %c0_57, %c0_58], %108 {strides = array<i32>} : memref<1x40x128xf32, #tpu.memory_space<vmem>>, vector<1x40x128xf32>,
    return
  }
  func.func @transform_0(%arg0: i32, %arg1: i32) -> (i32, i32, i32, i32) {
    %c5_i32 = arith.constant 5 : i32
    %0 = arith.muli %arg1, %c5_i32 : i32
    %c0_i32 = arith.constant 0 : i32
    %1 = arith.addi %0, %c0_i32 : i32
    %c2_i32 = arith.constant 2 : i32
    %2 = arith.subi %1, %c2_i32 : i32
    %c0_i32_0 = arith.constant 0 : i32
    %3 = arith.maxsi %2, %c0_i32_0 : i32
    %c4_i32 = arith.constant 4 : i32
    %4 = arith.minsi %3, %c4_i32 : i32
    %c0_i32_1 = arith.constant 0 : i32
    %c0_i32_2 = arith.constant 0 : i32
    %c0_i32_3 = arith.constant 0 : i32
    return %arg0, %4, %c0_i32_1, %c0_i32_2 : i32, i32, i32, i32
  }
  func.func @transform_1(%arg0: i32, %arg1: i32) -> (i32, i32, i32, i32) {
    %c5_i32 = arith.constant 5 : i32
    %0 = arith.muli %arg1, %c5_i32 : i32
    %c1_i32 = arith.constant 1 : i32
    %1 = arith.addi %0, %c1_i32 : i32
    %c2_i32 = arith.constant 2 : i32
    %2 = arith.subi %1, %c2_i32 : i32
    %c0_i32 = arith.constant 0 : i32
    %3 = arith.maxsi %2, %c0_i32 : i32
    %c4_i32 = arith.constant 4 : i32
    %4 = arith.minsi %3, %c4_i32 : i32
    %c0_i32_0 = arith.constant 0 : i32
    %c0_i32_1 = arith.constant 0 : i32
    %c0_i32_2 = arith.constant 0 : i32
    return %arg0, %4, %c0_i32_0, %c0_i32_1 : i32, i32, i32, i32
  }
  func.func @transform_2(%arg0: i32, %arg1: i32) -> (i32, i32, i32, i32) {
    %c5_i32 = arith.constant 5 : i32
    %0 = arith.muli %arg1, %c5_i32 : i32
    %c2_i32 = arith.constant 2 : i32
    %1 = arith.addi %0, %c2_i32 : i32
    %c2_i32_0 = arith.constant 2 : i32
    %2 = arith.subi %1, %c2_i32_0 : i32
    %c0_i32 = arith.constant 0 : i32
    %3 = arith.maxsi %2, %c0_i32 : i32
    %c4_i32 = arith.constant 4 : i32
    %4 = arith.minsi %3, %c4_i32 : i32
    %c0_i32_1 = arith.constant 0 : i32
    %c0_i32_2 = arith.constant 0 : i32
    %c0_i32_3 = arith.constant 0 : i32
    return %arg0, %4, %c0_i32_1, %c0_i32_2 : i32, i32, i32, i32
  }
  func.func @transform_3(%arg0: i32, %arg1: i32) -> (i32, i32, i32, i32) {
    %c5_i32 = arith.constant 5 : i32
    %0 = arith.muli %arg1, %c5_i32 : i32
    %c3_i32 = arith.constant 3 : i32
    %1 = arith.addi %0, %c3_i32 : i32
    %c2_i32 = arith.constant 2 : i32
    %2 = arith.subi %1, %c2_i32 : i32
    %c0_i32 = arith.constant 0 : i32
    %3 = arith.maxsi %2, %c0_i32 : i32
    %c4_i32 = arith.constant 4 : i32
    %4 = arith.minsi %3, %c4_i32 : i32
    %c0_i32_0 = arith.constant 0 : i32
    %c0_i32_1 = arith.constant 0 : i32
    %c0_i32_2 = arith.constant 0 : i32
    return %arg0, %4, %c0_i32_0, %c0_i32_1 : i32, i32, i32, i32
  }
  func.func @transform_4(%arg0: i32, %arg1: i32) -> (i32, i32, i32, i32) {
    %c5_i32 = arith.constant 5 : i32
    %0 = arith.muli %arg1, %c5_i32 : i32
    %c4_i32 = arith.constant 4 : i32
    %1 = arith.addi %0, %c4_i32 : i32
    %c2_i32 = arith.constant 2 : i32
    %2 = arith.subi %1, %c2_i32 : i32
    %c0_i32 = arith.constant 0 : i32
    %3 = arith.maxsi %2, %c0_i32 : i32
    %c4_i32_0 = arith.constant 4 : i32
    %4 = arith.minsi %3, %c4_i32_0 : i32
    %c0_i32_1 = arith.constant 0 : i32
    %c0_i32_2 = arith.constant 0 : i32
    %c0_i32_3 = arith.constant 0 : i32
    return %arg0, %4, %c0_i32_1, %c0_i32_2 : i32, i32, i32, i32
  }
  func.func @transform_5(%arg0: i32, %arg1: i32) -> (i32, i32, i32, i32) {
    %c5_i32 = arith.constant 5 : i32
    %0 = arith.muli %arg1, %c5_i32 : i32
    %c5_i32_0 = arith.constant 5 : i32
    %1 = arith.addi %0, %c5_i32_0 : i32
    %c2_i32 = arith.constant 2 : i32
    %2 = arith.subi %1, %c2_i32 : i32
    %c0_i32 = arith.constant 0 : i32
    %3 = arith.maxsi %2, %c0_i32 : i32
    %c4_i32 = arith.constant 4 : i32
    %4 = arith.minsi %3, %c4_i32 : i32
    %c0_i32_1 = arith.constant 0 : i32
    %c0_i32_2 = arith.constant 0 : i32
    %c0_i32_3 = arith.constant 0 : i32
    return %arg0, %4, %c0_i32_1, %c0_i32_2 : i32, i32, i32, i32
  }
  func.func @transform_6(%arg0: i32, %arg1: i32) -> (i32, i32, i32, i32) {
    %c5_i32 = arith.constant 5 : i32
    %0 = arith.muli %arg1, %c5_i32 : i32
    %c6_i32 = arith.constant 6 : i32
    %1 = arith.addi %0, %c6_i32 : i32
    %c2_i32 = arith.constant 2 : i32
    %2 = arith.subi %1, %c2_i32 : i32
    %c0_i32 = arith.constant 0 : i32
    %3 = arith.maxsi %2, %c0_i32 : i32
    %c4_i32 = arith.constant 4 : i32
    %4 = arith.minsi %3, %c4_i32 : i32
    %c0_i32_0 = arith.constant 0 : i32
    %c0_i32_1 = arith.constant 0 : i32
    %c0_i32_2 = arith.constant 0 : i32
    return %arg0, %4, %c0_i32_0, %c0_i32_1 : i32, i32, i32, i32
  }
  func.func @transform_7(%arg0: i32, %arg1: i32) -> (i32, i32, i32) {
    %c0_i32 = arith.constant 0 : i32
    %c0_i32_0 = arith.constant 0 : i32
    %c0_i32_1 = arith.constant 0 : i32
    %c0_i32_2 = arith.constant 0 : i32
    return %c0_i32, %c0_i32_0, %c0_i32_1 : i32, i32, i32
  }
  func.func @transform_8(%arg0: i32, %arg1: i32) -> (i32, i32) {
    %c0_i32 = arith.constant 0 : i32
    %c0_i32_0 = arith.constant 0 : i32
    %c0_i32_1 = arith.constant 0 : i32
    return %c0_i32, %c0_i32_0 : i32, i32
  }
  func.func @transform_9(%arg0: i32, %arg1: i32) -> (i32, i32, i32) {
    %c0_i32 = arith.constant 0 : i32
    %c0_i32_0 = arith.constant 0 : i32
    return %arg0, %arg1, %c0_i32 : i32, i32, i32
  }
}

module attributes {stable_mosaic.version = 11 : i64} {
  func.func @kernel(%arg0: i32, %arg1: memref<6x2048xf32, #tpu.memory_space<vmem>>, %arg2: memref<6x4xf32, #tpu.memory_space<vmem>>, %arg3: memref<6x2xi32, #tpu.memory_space<vmem>>, %arg4: memref<6x2xf32, #tpu.memory_space<vmem>>, %arg5: memref<6x2xf32, #tpu.memory_space<vmem>>, %arg6: memref<4x6xf32, #tpu.memory_space<vmem>>, %arg7: memref<4x1xf32, #tpu.memory_space<vmem>>, %arg8: memref<4x2048xbf16, #tpu.memory_space<vmem>>, %arg9: memref<2x2048xi32, #tpu.memory_space<vmem>>) attributes {dimension_semantics = [#tpu.dimension_semantics<parallel>], iteration_bounds = array<i64: 1>, scalar_prefetch = 0 : i64, scratch_operands = 0 : i64, tpu.core_type = #tpu.core_type<tc>, window_params = [{transform_indices = @transform_0, window_bounds = array<i64: 6, 2048>}, {pipeline_mode = #tpu.pipeline_mode<synchronous>, transform_indices = @transform_1, window_bounds = array<i64: 6, 4>}, {pipeline_mode = #tpu.pipeline_mode<synchronous>, transform_indices = @transform_2, window_bounds = array<i64: 6, 2>}, {pipeline_mode = #tpu.pipeline_mode<synchronous>, transform_indices = @transform_3, window_bounds = array<i64: 6, 2>}, {pipeline_mode = #tpu.pipeline_mode<synchronous>, transform_indices = @transform_4, window_bounds = array<i64: 6, 2>}, {pipeline_mode = #tpu.pipeline_mode<synchronous>, transform_indices = @transform_5, window_bounds = array<i64: 4, 6>}, {pipeline_mode = #tpu.pipeline_mode<synchronous>, transform_indices = @transform_6, window_bounds = array<i64: 4, 1>}, {transform_indices = @transform_7, window_bounds = array<i64: 4, 2048>}, {transform_indices = @transform_8, window_bounds = array<i64: 2, 2048>}]} {
    %c0 = arith.constant 0 : index
    %c0_0 = arith.constant 0 : index
    %0 = vector.load %arg2[%c0, %c0_0] : memref<6x4xf32, #tpu.memory_space<vmem>>, vector<6x1xf32>
    %c0_1 = arith.constant 0 : index
    %c1 = arith.constant 1 : index
    %1 = vector.load %arg2[%c0_1, %c1] : memref<6x4xf32, #tpu.memory_space<vmem>>, vector<6x1xf32>
    %c0_2 = arith.constant 0 : index
    %c2 = arith.constant 2 : index
    %2 = vector.load %arg2[%c0_2, %c2] : memref<6x4xf32, #tpu.memory_space<vmem>>, vector<6x1xf32>
    %c0_3 = arith.constant 0 : index
    %c3 = arith.constant 3 : index
    %3 = vector.load %arg2[%c0_3, %c3] : memref<6x4xf32, #tpu.memory_space<vmem>>, vector<6x1xf32>
    %c0_4 = arith.constant 0 : index
    %c0_5 = arith.constant 0 : index
    %4 = vector.load %arg3[%c0_4, %c0_5] : memref<6x2xi32, #tpu.memory_space<vmem>>, vector<6x1xi32>
    %c0_6 = arith.constant 0 : index
    %c1_7 = arith.constant 1 : index
    %5 = vector.load %arg3[%c0_6, %c1_7] : memref<6x2xi32, #tpu.memory_space<vmem>>, vector<6x1xi32>
    %c0_8 = arith.constant 0 : index
    %c0_9 = arith.constant 0 : index
    %6 = vector.load %arg1[%c0_8, %c0_9] : memref<6x2048xf32, #tpu.memory_space<vmem>>, vector<6x2048xf32>
    %cst = arith.constant 0.000000e+00 : f32
    %7 = vector.broadcast %cst : f32 to vector<6x2048xf32>
    %c0_10 = arith.constant 0 : index
    %c0_11 = arith.constant 0 : index
    %8 = vector.load %arg4[%c0_10, %c0_11] : memref<6x2xf32, #tpu.memory_space<vmem>>, vector<6x1xf32>
    %c0_12 = arith.constant 0 : index
    %c0_13 = arith.constant 0 : index
    %9 = vector.load %arg5[%c0_12, %c0_13] : memref<6x2xf32, #tpu.memory_space<vmem>>, vector<6x1xf32>
    %10 = vector.broadcast %9 : vector<6x1xf32> to vector<6x2048xf32>
    %11 = arith.mulf %6, %10 : vector<6x2048xf32>
    %12 = vector.broadcast %2 : vector<6x1xf32> to vector<6x2048xf32>
    %13 = arith.addf %11, %12 : vector<6x2048xf32>
    %14 = math.tanh %13 : vector<6x2048xf32>
    %15 = vector.broadcast %0 : vector<6x1xf32> to vector<6x2048xf32>
    %16 = arith.mulf %14, %15 : vector<6x2048xf32>
    %17 = vector.broadcast %1 : vector<6x1xf32> to vector<6x2048xf32>
    %18 = arith.subf %16, %17 : vector<6x2048xf32>
    %19 = math.roundeven %18 : vector<6x2048xf32>
    %20 = vector.broadcast %3 : vector<6x1xf32> to vector<6x2048xf32>
    %21 = arith.mulf %19, %20 : vector<6x2048xf32>
    %22 = vector.broadcast %8 : vector<6x1xf32> to vector<6x2048xf32>
    %23 = arith.mulf %21, %22 : vector<6x2048xf32>
    %24 = arith.subf %6, %23 : vector<6x2048xf32>
    %25 = arith.addf %7, %23 : vector<6x2048xf32>
    %26 = arith.fptosi %19 : vector<6x2048xf32> to vector<6x2048xi32>
    %27 = vector.broadcast %4 : vector<6x1xi32> to vector<6x2048xi32>
    %28 = arith.addi %26, %27 : vector<6x2048xi32>
    %29 = vector.broadcast %5 : vector<6x1xi32> to vector<6x2048xi32>
    %30 = arith.muli %28, %29 : vector<6x2048xi32>
    %31 = vector.extract_strided_slice %30 {offsets = [0, 0], sizes = [1, 2048], strides = [1, 1]} : vector<6x2048xi32> to vector<1x2048xi32>
    %32 = vector.extract_strided_slice %30 {offsets = [1, 0], sizes = [1, 2048], strides = [1, 1]} : vector<6x2048xi32> to vector<1x2048xi32>
    %33 = arith.addi %31, %32 : vector<1x2048xi32>
    %34 = vector.extract_strided_slice %30 {offsets = [2, 0], sizes = [1, 2048], strides = [1, 1]} : vector<6x2048xi32> to vector<1x2048xi32>
    %35 = arith.addi %33, %34 : vector<1x2048xi32>
    %36 = vector.extract_strided_slice %30 {offsets = [3, 0], sizes = [1, 2048], strides = [1, 1]} : vector<6x2048xi32> to vector<1x2048xi32>
    %37 = arith.addi %35, %36 : vector<1x2048xi32>
    %38 = vector.extract_strided_slice %30 {offsets = [4, 0], sizes = [1, 2048], strides = [1, 1]} : vector<6x2048xi32> to vector<1x2048xi32>
    %39 = arith.addi %37, %38 : vector<1x2048xi32>
    %40 = vector.extract_strided_slice %30 {offsets = [5, 0], sizes = [1, 2048], strides = [1, 1]} : vector<6x2048xi32> to vector<1x2048xi32>
    %41 = arith.addi %39, %40 : vector<1x2048xi32>
    %c0_14 = arith.constant 0 : index
    %c0_15 = arith.constant 0 : index
    %42 = vector.load %arg9[%c0_14, %c0_15] : memref<2x2048xi32, #tpu.memory_space<vmem>>, vector<1x2048xi32>
    tpu.vector_store %arg9[%c0_14, %c0_15], %41 {strides = array<i32>} : memref<2x2048xi32, #tpu.memory_space<vmem>>, vector<1x2048xi32>,
    %c0_16 = arith.constant 0 : index
    %c1_17 = arith.constant 1 : index
    %43 = vector.load %arg4[%c0_16, %c1_17] : memref<6x2xf32, #tpu.memory_space<vmem>>, vector<6x1xf32>
    %c0_18 = arith.constant 0 : index
    %c1_19 = arith.constant 1 : index
    %44 = vector.load %arg5[%c0_18, %c1_19] : memref<6x2xf32, #tpu.memory_space<vmem>>, vector<6x1xf32>
    %45 = vector.broadcast %44 : vector<6x1xf32> to vector<6x2048xf32>
    %46 = arith.mulf %24, %45 : vector<6x2048xf32>
    %47 = vector.broadcast %2 : vector<6x1xf32> to vector<6x2048xf32>
    %48 = arith.addf %46, %47 : vector<6x2048xf32>
    %49 = math.tanh %48 : vector<6x2048xf32>
    %50 = vector.broadcast %0 : vector<6x1xf32> to vector<6x2048xf32>
    %51 = arith.mulf %49, %50 : vector<6x2048xf32>
    %52 = vector.broadcast %1 : vector<6x1xf32> to vector<6x2048xf32>
    %53 = arith.subf %51, %52 : vector<6x2048xf32>
    %54 = math.roundeven %53 : vector<6x2048xf32>
    %55 = vector.broadcast %3 : vector<6x1xf32> to vector<6x2048xf32>
    %56 = arith.mulf %54, %55 : vector<6x2048xf32>
    %57 = vector.broadcast %43 : vector<6x1xf32> to vector<6x2048xf32>
    %58 = arith.mulf %56, %57 : vector<6x2048xf32>
    %59 = arith.addf %25, %58 : vector<6x2048xf32>
    %60 = arith.fptosi %54 : vector<6x2048xf32> to vector<6x2048xi32>
    %61 = vector.broadcast %4 : vector<6x1xi32> to vector<6x2048xi32>
    %62 = arith.addi %60, %61 : vector<6x2048xi32>
    %63 = vector.broadcast %5 : vector<6x1xi32> to vector<6x2048xi32>
    %64 = arith.muli %62, %63 : vector<6x2048xi32>
    %65 = vector.extract_strided_slice %64 {offsets = [0, 0], sizes = [1, 2048], strides = [1, 1]} : vector<6x2048xi32> to vector<1x2048xi32>
    %66 = vector.extract_strided_slice %64 {offsets = [1, 0], sizes = [1, 2048], strides = [1, 1]} : vector<6x2048xi32> to vector<1x2048xi32>
    %67 = arith.addi %65, %66 : vector<1x2048xi32>
    %68 = vector.extract_strided_slice %64 {offsets = [2, 0], sizes = [1, 2048], strides = [1, 1]} : vector<6x2048xi32> to vector<1x2048xi32>
    %69 = arith.addi %67, %68 : vector<1x2048xi32>
    %70 = vector.extract_strided_slice %64 {offsets = [3, 0], sizes = [1, 2048], strides = [1, 1]} : vector<6x2048xi32> to vector<1x2048xi32>
    %71 = arith.addi %69, %70 : vector<1x2048xi32>
    %72 = vector.extract_strided_slice %64 {offsets = [4, 0], sizes = [1, 2048], strides = [1, 1]} : vector<6x2048xi32> to vector<1x2048xi32>
    %73 = arith.addi %71, %72 : vector<1x2048xi32>
    %74 = vector.extract_strided_slice %64 {offsets = [5, 0], sizes = [1, 2048], strides = [1, 1]} : vector<6x2048xi32> to vector<1x2048xi32>
    %75 = arith.addi %73, %74 : vector<1x2048xi32>
    %c1_20 = arith.constant 1 : index
    %c0_21 = arith.constant 0 : index
    %76 = vector.load %arg9[%c1_20, %c0_21] : memref<2x2048xi32, #tpu.memory_space<vmem>>, vector<1x2048xi32>
    tpu.vector_store %arg9[%c1_20, %c0_21], %75 {strides = array<i32>} : memref<2x2048xi32, #tpu.memory_space<vmem>>, vector<1x2048xi32>,
    %c0_22 = arith.constant 0 : index
    %c0_23 = arith.constant 0 : index
    %77 = vector.load %arg7[%c0_22, %c0_23] : memref<4x1xf32, #tpu.memory_space<vmem>>, vector<4x1xf32>
    %c0_24 = arith.constant 0 : index
    %c0_25 = arith.constant 0 : index
    %78 = vector.load %arg6[%c0_24, %c0_25] : memref<4x6xf32, #tpu.memory_space<vmem>>, vector<4x1xf32>
    %79 = vector.extract_strided_slice %59 {offsets = [0, 0], sizes = [1, 2048], strides = [1, 1]} : vector<6x2048xf32> to vector<1x2048xf32>
    %80 = vector.broadcast %78 : vector<4x1xf32> to vector<4x2048xf32>
    %81 = vector.broadcast %79 : vector<1x2048xf32> to vector<4x2048xf32>
    %82 = arith.mulf %80, %81 : vector<4x2048xf32>
    %83 = vector.broadcast %77 : vector<4x1xf32> to vector<4x2048xf32>
    %84 = arith.addf %83, %82 : vector<4x2048xf32>
    %c0_26 = arith.constant 0 : index
    %c1_27 = arith.constant 1 : index
    %85 = vector.load %arg6[%c0_26, %c1_27] : memref<4x6xf32, #tpu.memory_space<vmem>>, vector<4x1xf32>
    %86 = vector.extract_strided_slice %59 {offsets = [1, 0], sizes = [1, 2048], strides = [1, 1]} : vector<6x2048xf32> to vector<1x2048xf32>
    %87 = vector.broadcast %85 : vector<4x1xf32> to vector<4x2048xf32>
    %88 = vector.broadcast %86 : vector<1x2048xf32> to vector<4x2048xf32>
    %89 = arith.mulf %87, %88 : vector<4x2048xf32>
    %90 = arith.addf %84, %89 : vector<4x2048xf32>
    %c0_28 = arith.constant 0 : index
    %c2_29 = arith.constant 2 : index
    %91 = vector.load %arg6[%c0_28, %c2_29] : memref<4x6xf32, #tpu.memory_space<vmem>>, vector<4x1xf32>
    %92 = vector.extract_strided_slice %59 {offsets = [2, 0], sizes = [1, 2048], strides = [1, 1]} : vector<6x2048xf32> to vector<1x2048xf32>
    %93 = vector.broadcast %91 : vector<4x1xf32> to vector<4x2048xf32>
    %94 = vector.broadcast %92 : vector<1x2048xf32> to vector<4x2048xf32>
    %95 = arith.mulf %93, %94 : vector<4x2048xf32>
    %96 = arith.addf %90, %95 : vector<4x2048xf32>
    %c0_30 = arith.constant 0 : index
    %c3_31 = arith.constant 3 : index
    %97 = vector.load %arg6[%c0_30, %c3_31] : memref<4x6xf32, #tpu.memory_space<vmem>>, vector<4x1xf32>
    %98 = vector.extract_strided_slice %59 {offsets = [3, 0], sizes = [1, 2048], strides = [1, 1]} : vector<6x2048xf32> to vector<1x2048xf32>
    %99 = vector.broadcast %97 : vector<4x1xf32> to vector<4x2048xf32>
    %100 = vector.broadcast %98 : vector<1x2048xf32> to vector<4x2048xf32>
    %101 = arith.mulf %99, %100 : vector<4x2048xf32>
    %102 = arith.addf %96, %101 : vector<4x2048xf32>
    %c0_32 = arith.constant 0 : index
    %c4 = arith.constant 4 : index
    %103 = vector.load %arg6[%c0_32, %c4] : memref<4x6xf32, #tpu.memory_space<vmem>>, vector<4x1xf32>
    %104 = vector.extract_strided_slice %59 {offsets = [4, 0], sizes = [1, 2048], strides = [1, 1]} : vector<6x2048xf32> to vector<1x2048xf32>
    %105 = vector.broadcast %103 : vector<4x1xf32> to vector<4x2048xf32>
    %106 = vector.broadcast %104 : vector<1x2048xf32> to vector<4x2048xf32>
    %107 = arith.mulf %105, %106 : vector<4x2048xf32>
    %108 = arith.addf %102, %107 : vector<4x2048xf32>
    %c0_33 = arith.constant 0 : index
    %c5 = arith.constant 5 : index
    %109 = vector.load %arg6[%c0_33, %c5] : memref<4x6xf32, #tpu.memory_space<vmem>>, vector<4x1xf32>
    %110 = vector.extract_strided_slice %59 {offsets = [5, 0], sizes = [1, 2048], strides = [1, 1]} : vector<6x2048xf32> to vector<1x2048xf32>
    %111 = vector.broadcast %109 : vector<4x1xf32> to vector<4x2048xf32>
    %112 = vector.broadcast %110 : vector<1x2048xf32> to vector<4x2048xf32>
    %113 = arith.mulf %111, %112 : vector<4x2048xf32>
    %114 = arith.addf %108, %113 : vector<4x2048xf32>
    %115 = arith.truncf %114 : vector<4x2048xf32> to vector<4x2048xbf16>
    %c0_34 = arith.constant 0 : index
    %c0_35 = arith.constant 0 : index
    %116 = vector.load %arg8[%c0_34, %c0_35] : memref<4x2048xbf16, #tpu.memory_space<vmem>>, vector<4x2048xbf16>
    tpu.vector_store %arg8[%c0_34, %c0_35], %115 {strides = array<i32>} : memref<4x2048xbf16, #tpu.memory_space<vmem>>, vector<4x2048xbf16>,
    return
  }
  func.func @transform_0(%arg0: i32) -> (i32, i32) {
    %c0_i32 = arith.constant 0 : i32
    %c0_i32_0 = arith.constant 0 : i32
    return %c0_i32, %arg0 : i32, i32
  }
  func.func @transform_1(%arg0: i32) -> (i32, i32) {
    %c0_i32 = arith.constant 0 : i32
    %c0_i32_0 = arith.constant 0 : i32
    %c0_i32_1 = arith.constant 0 : i32
    return %c0_i32, %c0_i32_0 : i32, i32
  }
  func.func @transform_2(%arg0: i32) -> (i32, i32) {
    %c0_i32 = arith.constant 0 : i32
    %c0_i32_0 = arith.constant 0 : i32
    %c0_i32_1 = arith.constant 0 : i32
    return %c0_i32, %c0_i32_0 : i32, i32
  }
  func.func @transform_3(%arg0: i32) -> (i32, i32) {
    %c0_i32 = arith.constant 0 : i32
    %c0_i32_0 = arith.constant 0 : i32
    %c0_i32_1 = arith.constant 0 : i32
    return %c0_i32, %c0_i32_0 : i32, i32
  }
  func.func @transform_4(%arg0: i32) -> (i32, i32) {
    %c0_i32 = arith.constant 0 : i32
    %c0_i32_0 = arith.constant 0 : i32
    %c0_i32_1 = arith.constant 0 : i32
    return %c0_i32, %c0_i32_0 : i32, i32
  }
  func.func @transform_5(%arg0: i32) -> (i32, i32) {
    %c0_i32 = arith.constant 0 : i32
    %c0_i32_0 = arith.constant 0 : i32
    %c0_i32_1 = arith.constant 0 : i32
    return %c0_i32, %c0_i32_0 : i32, i32
  }
  func.func @transform_6(%arg0: i32) -> (i32, i32) {
    %c0_i32 = arith.constant 0 : i32
    %c0_i32_0 = arith.constant 0 : i32
    %c0_i32_1 = arith.constant 0 : i32
    return %c0_i32, %c0_i32_0 : i32, i32
  }
  func.func @transform_7(%arg0: i32) -> (i32, i32) {
    %c0_i32 = arith.constant 0 : i32
    %c0_i32_0 = arith.constant 0 : i32
    return %c0_i32, %arg0 : i32, i32
  }
  func.func @transform_8(%arg0: i32) -> (i32, i32) {
    %c0_i32 = arith.constant 0 : i32
    %c0_i32_0 = arith.constant 0 : i32
    return %c0_i32, %arg0 : i32, i32
  }
}

module attributes {stable_mosaic.version = 11 : i64} {
  func.func @kernel(%arg0: i32, %arg1: i32, %arg2: memref<1x1x10x40xbf16, #tpu.memory_space<vmem>>, %arg3: memref<1x1x10x40xbf16, #tpu.memory_space<vmem>>, %arg4: memref<1x1x10x40xbf16, #tpu.memory_space<vmem>>, %arg5: memref<1x1x10x40xbf16, #tpu.memory_space<vmem>>, %arg6: memref<1x1x10x40xbf16, #tpu.memory_space<vmem>>, %arg7: memref<1x1x10x40xbf16, #tpu.memory_space<vmem>>, %arg8: memref<1x1x10x40xbf16, #tpu.memory_space<vmem>>, %arg9: memref<9x40x128xbf16, #tpu.memory_space<vmem>>, %arg10: memref<1x128xf32, #tpu.memory_space<vmem>>, %arg11: memref<1x40x128xbf16, #tpu.memory_space<vmem>>) attributes {dimension_semantics = [#tpu.dimension_semantics<parallel>, #tpu.dimension_semantics<parallel>], iteration_bounds = array<i64: 2, 1>, scalar_prefetch = 0 : i64, scratch_operands = 0 : i64, tpu.core_type = #tpu.core_type<tc>, window_params = [{transform_indices = @transform_0, window_bounds = array<i64: 1, 1, 10, 40>}, {transform_indices = @transform_1, window_bounds = array<i64: 1, 1, 10, 40>}, {transform_indices = @transform_2, window_bounds = array<i64: 1, 1, 10, 40>}, {transform_indices = @transform_3, window_bounds = array<i64: 1, 1, 10, 40>}, {transform_indices = @transform_4, window_bounds = array<i64: 1, 1, 10, 40>}, {transform_indices = @transform_5, window_bounds = array<i64: 1, 1, 10, 40>}, {transform_indices = @transform_6, window_bounds = array<i64: 1, 1, 10, 40>}, {pipeline_mode = #tpu.pipeline_mode<synchronous>, transform_indices = @transform_7, window_bounds = array<i64: 9, 40, 128>}, {pipeline_mode = #tpu.pipeline_mode<synchronous>, transform_indices = @transform_8, window_bounds = array<i64: 1, 128>}, {transform_indices = @transform_9, window_bounds = array<i64: 1, 40, 128>}]} {
    %c0 = arith.constant 0 : index
    %c0_0 = arith.constant 0 : index
    %c0_1 = arith.constant 0 : index
    %c0_2 = arith.constant 0 : index
    %0 = vector.load %arg2[%c0, %c0_0, %c0_1, %c0_2] : memref<1x1x10x40xbf16, #tpu.memory_space<vmem>>, vector<1x1x10x40xbf16>
    %1 = vector.shape_cast %0 : vector<1x1x10x40xbf16> to vector<10x40xbf16>
    %c0_3 = arith.constant 0 : index
    %c0_4 = arith.constant 0 : index
    %c0_5 = arith.constant 0 : index
    %c0_6 = arith.constant 0 : index
    %2 = vector.load %arg3[%c0_3, %c0_4, %c0_5, %c0_6] : memref<1x1x10x40xbf16, #tpu.memory_space<vmem>>, vector<1x1x10x40xbf16>
    %3 = vector.shape_cast %2 : vector<1x1x10x40xbf16> to vector<10x40xbf16>
    %c0_7 = arith.constant 0 : index
    %c0_8 = arith.constant 0 : index
    %c0_9 = arith.constant 0 : index
    %c0_10 = arith.constant 0 : index
    %4 = vector.load %arg4[%c0_7, %c0_8, %c0_9, %c0_10] : memref<1x1x10x40xbf16, #tpu.memory_space<vmem>>, vector<1x1x10x40xbf16>
    %5 = vector.shape_cast %4 : vector<1x1x10x40xbf16> to vector<10x40xbf16>
    %c0_11 = arith.constant 0 : index
    %c0_12 = arith.constant 0 : index
    %c0_13 = arith.constant 0 : index
    %c0_14 = arith.constant 0 : index
    %6 = vector.load %arg5[%c0_11, %c0_12, %c0_13, %c0_14] : memref<1x1x10x40xbf16, #tpu.memory_space<vmem>>, vector<1x1x10x40xbf16>
    %7 = vector.shape_cast %6 : vector<1x1x10x40xbf16> to vector<10x40xbf16>
    %c0_15 = arith.constant 0 : index
    %c0_16 = arith.constant 0 : index
    %c0_17 = arith.constant 0 : index
    %c0_18 = arith.constant 0 : index
    %8 = vector.load %arg6[%c0_15, %c0_16, %c0_17, %c0_18] : memref<1x1x10x40xbf16, #tpu.memory_space<vmem>>, vector<1x1x10x40xbf16>
    %9 = vector.shape_cast %8 : vector<1x1x10x40xbf16> to vector<10x40xbf16>
    %c0_19 = arith.constant 0 : index
    %c0_20 = arith.constant 0 : index
    %c0_21 = arith.constant 0 : index
    %c0_22 = arith.constant 0 : index
    %10 = vector.load %arg7[%c0_19, %c0_20, %c0_21, %c0_22] : memref<1x1x10x40xbf16, #tpu.memory_space<vmem>>, vector<1x1x10x40xbf16>
    %11 = vector.shape_cast %10 : vector<1x1x10x40xbf16> to vector<10x40xbf16>
    %c0_23 = arith.constant 0 : index
    %c0_24 = arith.constant 0 : index
    %c0_25 = arith.constant 0 : index
    %c0_26 = arith.constant 0 : index
    %12 = vector.load %arg8[%c0_23, %c0_24, %c0_25, %c0_26] : memref<1x1x10x40xbf16, #tpu.memory_space<vmem>>, vector<1x1x10x40xbf16>
    %13 = vector.shape_cast %12 : vector<1x1x10x40xbf16> to vector<10x40xbf16>
    %14 = vector.extract_strided_slice %1 {offsets = [0, 0], sizes = [8, 40], strides = [1, 1]} : vector<10x40xbf16> to vector<8x40xbf16>
    %15 = vector.extract_strided_slice %3 {offsets = [0, 0], sizes = [8, 40], strides = [1, 1]} : vector<10x40xbf16> to vector<8x40xbf16>
    %16 = vector.extract_strided_slice %5 {offsets = [0, 0], sizes = [8, 40], strides = [1, 1]} : vector<10x40xbf16> to vector<8x40xbf16>
    %17 = vector.extract_strided_slice %7 {offsets = [0, 0], sizes = [8, 40], strides = [1, 1]} : vector<10x40xbf16> to vector<8x40xbf16>
    %18 = vector.extract_strided_slice %9 {offsets = [0, 0], sizes = [8, 40], strides = [1, 1]} : vector<10x40xbf16> to vector<8x40xbf16>
    %19 = tpu.concatenate %14, %15, %16, %17, %18 in 0 : vector<8x40xbf16>, vector<8x40xbf16>, vector<8x40xbf16>, vector<8x40xbf16>, vector<8x40xbf16> -> vector<40x40xbf16>
    %c0_27 = arith.constant 0 : index
    %c0_28 = arith.constant 0 : index
    %c0_29 = arith.constant 0 : index
    %20 = vector.load %arg9[%c0_27, %c0_28, %c0_29] : memref<9x40x128xbf16, #tpu.memory_space<vmem>>, vector<1x40x128xbf16>
    %21 = vector.shape_cast %20 : vector<1x40x128xbf16> to vector<40x128xbf16>
    %cst = arith.constant dense<0.000000e+00> : vector<40x128xf32>
    %22 = tpu.matmul %19, %21, %cst {dimension_numbers = #tpu.dot_dimension_numbers<[1], [0], [0], [1], [0, 0, 1, 1], [], []>} : vector<40x40xbf16>, vector<40x128xbf16>, vector<40x128xf32> -> vector<40x128xf32>
    %23 = vector.extract_strided_slice %1 {offsets = [1, 0], sizes = [8, 40], strides = [1, 1]} : vector<10x40xbf16> to vector<8x40xbf16>
    %24 = vector.extract_strided_slice %3 {offsets = [1, 0], sizes = [8, 40], strides = [1, 1]} : vector<10x40xbf16> to vector<8x40xbf16>
    %25 = vector.extract_strided_slice %5 {offsets = [1, 0], sizes = [8, 40], strides = [1, 1]} : vector<10x40xbf16> to vector<8x40xbf16>
    %26 = vector.extract_strided_slice %7 {offsets = [1, 0], sizes = [8, 40], strides = [1, 1]} : vector<10x40xbf16> to vector<8x40xbf16>
    %27 = vector.extract_strided_slice %9 {offsets = [1, 0], sizes = [8, 40], strides = [1, 1]} : vector<10x40xbf16> to vector<8x40xbf16>
    %28 = tpu.concatenate %23, %24, %25, %26, %27 in 0 : vector<8x40xbf16>, vector<8x40xbf16>, vector<8x40xbf16>, vector<8x40xbf16>, vector<8x40xbf16> -> vector<40x40xbf16>
    %c1 = arith.constant 1 : index
    %c0_30 = arith.constant 0 : index
    %c0_31 = arith.constant 0 : index
    %29 = vector.load %arg9[%c1, %c0_30, %c0_31] : memref<9x40x128xbf16, #tpu.memory_space<vmem>>, vector<1x40x128xbf16>
    %30 = vector.shape_cast %29 : vector<1x40x128xbf16> to vector<40x128xbf16>
    %cst_32 = arith.constant dense<0.000000e+00> : vector<40x128xf32>
    %31 = tpu.matmul %28, %30, %cst_32 {dimension_numbers = #tpu.dot_dimension_numbers<[1], [0], [0], [1], [0, 0, 1, 1], [], []>} : vector<40x40xbf16>, vector<40x128xbf16>, vector<40x128xf32> -> vector<40x128xf32>
    %32 = arith.addf %22, %31 : vector<40x128xf32>
    %33 = vector.extract_strided_slice %1 {offsets = [2, 0], sizes = [8, 40], strides = [1, 1]} : vector<10x40xbf16> to vector<8x40xbf16>
    %34 = vector.extract_strided_slice %3 {offsets = [2, 0], sizes = [8, 40], strides = [1, 1]} : vector<10x40xbf16> to vector<8x40xbf16>
    %35 = vector.extract_strided_slice %5 {offsets = [2, 0], sizes = [8, 40], strides = [1, 1]} : vector<10x40xbf16> to vector<8x40xbf16>
    %36 = vector.extract_strided_slice %7 {offsets = [2, 0], sizes = [8, 40], strides = [1, 1]} : vector<10x40xbf16> to vector<8x40xbf16>
    %37 = vector.extract_strided_slice %9 {offsets = [2, 0], sizes = [8, 40], strides = [1, 1]} : vector<10x40xbf16> to vector<8x40xbf16>
    %38 = tpu.concatenate %33, %34, %35, %36, %37 in 0 : vector<8x40xbf16>, vector<8x40xbf16>, vector<8x40xbf16>, vector<8x40xbf16>, vector<8x40xbf16> -> vector<40x40xbf16>
    %c2 = arith.constant 2 : index
    %c0_33 = arith.constant 0 : index
    %c0_34 = arith.constant 0 : index
    %39 = vector.load %arg9[%c2, %c0_33, %c0_34] : memref<9x40x128xbf16, #tpu.memory_space<vmem>>, vector<1x40x128xbf16>
    %40 = vector.shape_cast %39 : vector<1x40x128xbf16> to vector<40x128xbf16>
    %cst_35 = arith.constant dense<0.000000e+00> : vector<40x128xf32>
    %41 = tpu.matmul %38, %40, %cst_35 {dimension_numbers = #tpu.dot_dimension_numbers<[1], [0], [0], [1], [0, 0, 1, 1], [], []>} : vector<40x40xbf16>, vector<40x128xbf16>, vector<40x128xf32> -> vector<40x128xf32>
    %42 = arith.addf %32, %41 : vector<40x128xf32>
    %43 = vector.extract_strided_slice %3 {offsets = [0, 0], sizes = [8, 40], strides = [1, 1]} : vector<10x40xbf16> to vector<8x40xbf16>
    %44 = vector.extract_strided_slice %5 {offsets = [0, 0], sizes = [8, 40], strides = [1, 1]} : vector<10x40xbf16> to vector<8x40xbf16>
    %45 = vector.extract_strided_slice %7 {offsets = [0, 0], sizes = [8, 40], strides = [1, 1]} : vector<10x40xbf16> to vector<8x40xbf16>
    %46 = vector.extract_strided_slice %9 {offsets = [0, 0], sizes = [8, 40], strides = [1, 1]} : vector<10x40xbf16> to vector<8x40xbf16>
    %47 = vector.extract_strided_slice %11 {offsets = [0, 0], sizes = [8, 40], strides = [1, 1]} : vector<10x40xbf16> to vector<8x40xbf16>
    %48 = tpu.concatenate %43, %44, %45, %46, %47 in 0 : vector<8x40xbf16>, vector<8x40xbf16>, vector<8x40xbf16>, vector<8x40xbf16>, vector<8x40xbf16> -> vector<40x40xbf16>
    %c3 = arith.constant 3 : index
    %c0_36 = arith.constant 0 : index
    %c0_37 = arith.constant 0 : index
    %49 = vector.load %arg9[%c3, %c0_36, %c0_37] : memref<9x40x128xbf16, #tpu.memory_space<vmem>>, vector<1x40x128xbf16>
    %50 = vector.shape_cast %49 : vector<1x40x128xbf16> to vector<40x128xbf16>
    %cst_38 = arith.constant dense<0.000000e+00> : vector<40x128xf32>
    %51 = tpu.matmul %48, %50, %cst_38 {dimension_numbers = #tpu.dot_dimension_numbers<[1], [0], [0], [1], [0, 0, 1, 1], [], []>} : vector<40x40xbf16>, vector<40x128xbf16>, vector<40x128xf32> -> vector<40x128xf32>
    %52 = arith.addf %42, %51 : vector<40x128xf32>
    %53 = vector.extract_strided_slice %3 {offsets = [1, 0], sizes = [8, 40], strides = [1, 1]} : vector<10x40xbf16> to vector<8x40xbf16>
    %54 = vector.extract_strided_slice %5 {offsets = [1, 0], sizes = [8, 40], strides = [1, 1]} : vector<10x40xbf16> to vector<8x40xbf16>
    %55 = vector.extract_strided_slice %7 {offsets = [1, 0], sizes = [8, 40], strides = [1, 1]} : vector<10x40xbf16> to vector<8x40xbf16>
    %56 = vector.extract_strided_slice %9 {offsets = [1, 0], sizes = [8, 40], strides = [1, 1]} : vector<10x40xbf16> to vector<8x40xbf16>
    %57 = vector.extract_strided_slice %11 {offsets = [1, 0], sizes = [8, 40], strides = [1, 1]} : vector<10x40xbf16> to vector<8x40xbf16>
    %58 = tpu.concatenate %53, %54, %55, %56, %57 in 0 : vector<8x40xbf16>, vector<8x40xbf16>, vector<8x40xbf16>, vector<8x40xbf16>, vector<8x40xbf16> -> vector<40x40xbf16>
    %c4 = arith.constant 4 : index
    %c0_39 = arith.constant 0 : index
    %c0_40 = arith.constant 0 : index
    %59 = vector.load %arg9[%c4, %c0_39, %c0_40] : memref<9x40x128xbf16, #tpu.memory_space<vmem>>, vector<1x40x128xbf16>
    %60 = vector.shape_cast %59 : vector<1x40x128xbf16> to vector<40x128xbf16>
    %cst_41 = arith.constant dense<0.000000e+00> : vector<40x128xf32>
    %61 = tpu.matmul %58, %60, %cst_41 {dimension_numbers = #tpu.dot_dimension_numbers<[1], [0], [0], [1], [0, 0, 1, 1], [], []>} : vector<40x40xbf16>, vector<40x128xbf16>, vector<40x128xf32> -> vector<40x128xf32>
    %62 = arith.addf %52, %61 : vector<40x128xf32>
    %63 = vector.extract_strided_slice %3 {offsets = [2, 0], sizes = [8, 40], strides = [1, 1]} : vector<10x40xbf16> to vector<8x40xbf16>
    %64 = vector.extract_strided_slice %5 {offsets = [2, 0], sizes = [8, 40], strides = [1, 1]} : vector<10x40xbf16> to vector<8x40xbf16>
    %65 = vector.extract_strided_slice %7 {offsets = [2, 0], sizes = [8, 40], strides = [1, 1]} : vector<10x40xbf16> to vector<8x40xbf16>
    %66 = vector.extract_strided_slice %9 {offsets = [2, 0], sizes = [8, 40], strides = [1, 1]} : vector<10x40xbf16> to vector<8x40xbf16>
    %67 = vector.extract_strided_slice %11 {offsets = [2, 0], sizes = [8, 40], strides = [1, 1]} : vector<10x40xbf16> to vector<8x40xbf16>
    %68 = tpu.concatenate %63, %64, %65, %66, %67 in 0 : vector<8x40xbf16>, vector<8x40xbf16>, vector<8x40xbf16>, vector<8x40xbf16>, vector<8x40xbf16> -> vector<40x40xbf16>
    %c5 = arith.constant 5 : index
    %c0_42 = arith.constant 0 : index
    %c0_43 = arith.constant 0 : index
    %69 = vector.load %arg9[%c5, %c0_42, %c0_43] : memref<9x40x128xbf16, #tpu.memory_space<vmem>>, vector<1x40x128xbf16>
    %70 = vector.shape_cast %69 : vector<1x40x128xbf16> to vector<40x128xbf16>
    %cst_44 = arith.constant dense<0.000000e+00> : vector<40x128xf32>
    %71 = tpu.matmul %68, %70, %cst_44 {dimension_numbers = #tpu.dot_dimension_numbers<[1], [0], [0], [1], [0, 0, 1, 1], [], []>} : vector<40x40xbf16>, vector<40x128xbf16>, vector<40x128xf32> -> vector<40x128xf32>
    %72 = arith.addf %62, %71 : vector<40x128xf32>
    %73 = vector.extract_strided_slice %5 {offsets = [0, 0], sizes = [8, 40], strides = [1, 1]} : vector<10x40xbf16> to vector<8x40xbf16>
    %74 = vector.extract_strided_slice %7 {offsets = [0, 0], sizes = [8, 40], strides = [1, 1]} : vector<10x40xbf16> to vector<8x40xbf16>
    %75 = vector.extract_strided_slice %9 {offsets = [0, 0], sizes = [8, 40], strides = [1, 1]} : vector<10x40xbf16> to vector<8x40xbf16>
    %76 = vector.extract_strided_slice %11 {offsets = [0, 0], sizes = [8, 40], strides = [1, 1]} : vector<10x40xbf16> to vector<8x40xbf16>
    %77 = vector.extract_strided_slice %13 {offsets = [0, 0], sizes = [8, 40], strides = [1, 1]} : vector<10x40xbf16> to vector<8x40xbf16>
    %78 = tpu.concatenate %73, %74, %75, %76, %77 in 0 : vector<8x40xbf16>, vector<8x40xbf16>, vector<8x40xbf16>, vector<8x40xbf16>, vector<8x40xbf16> -> vector<40x40xbf16>
    %c6 = arith.constant 6 : index
    %c0_45 = arith.constant 0 : index
    %c0_46 = arith.constant 0 : index
    %79 = vector.load %arg9[%c6, %c0_45, %c0_46] : memref<9x40x128xbf16, #tpu.memory_space<vmem>>, vector<1x40x128xbf16>
    %80 = vector.shape_cast %79 : vector<1x40x128xbf16> to vector<40x128xbf16>
    %cst_47 = arith.constant dense<0.000000e+00> : vector<40x128xf32>
    %81 = tpu.matmul %78, %80, %cst_47 {dimension_numbers = #tpu.dot_dimension_numbers<[1], [0], [0], [1], [0, 0, 1, 1], [], []>} : vector<40x40xbf16>, vector<40x128xbf16>, vector<40x128xf32> -> vector<40x128xf32>
    %82 = arith.addf %72, %81 : vector<40x128xf32>
    %83 = vector.extract_strided_slice %5 {offsets = [1, 0], sizes = [8, 40], strides = [1, 1]} : vector<10x40xbf16> to vector<8x40xbf16>
    %84 = vector.extract_strided_slice %7 {offsets = [1, 0], sizes = [8, 40], strides = [1, 1]} : vector<10x40xbf16> to vector<8x40xbf16>
    %85 = vector.extract_strided_slice %9 {offsets = [1, 0], sizes = [8, 40], strides = [1, 1]} : vector<10x40xbf16> to vector<8x40xbf16>
    %86 = vector.extract_strided_slice %11 {offsets = [1, 0], sizes = [8, 40], strides = [1, 1]} : vector<10x40xbf16> to vector<8x40xbf16>
    %87 = vector.extract_strided_slice %13 {offsets = [1, 0], sizes = [8, 40], strides = [1, 1]} : vector<10x40xbf16> to vector<8x40xbf16>
    %88 = tpu.concatenate %83, %84, %85, %86, %87 in 0 : vector<8x40xbf16>, vector<8x40xbf16>, vector<8x40xbf16>, vector<8x40xbf16>, vector<8x40xbf16> -> vector<40x40xbf16>
    %c7 = arith.constant 7 : index
    %c0_48 = arith.constant 0 : index
    %c0_49 = arith.constant 0 : index
    %89 = vector.load %arg9[%c7, %c0_48, %c0_49] : memref<9x40x128xbf16, #tpu.memory_space<vmem>>, vector<1x40x128xbf16>
    %90 = vector.shape_cast %89 : vector<1x40x128xbf16> to vector<40x128xbf16>
    %cst_50 = arith.constant dense<0.000000e+00> : vector<40x128xf32>
    %91 = tpu.matmul %88, %90, %cst_50 {dimension_numbers = #tpu.dot_dimension_numbers<[1], [0], [0], [1], [0, 0, 1, 1], [], []>} : vector<40x40xbf16>, vector<40x128xbf16>, vector<40x128xf32> -> vector<40x128xf32>
    %92 = arith.addf %82, %91 : vector<40x128xf32>
    %93 = vector.extract_strided_slice %5 {offsets = [2, 0], sizes = [8, 40], strides = [1, 1]} : vector<10x40xbf16> to vector<8x40xbf16>
    %94 = vector.extract_strided_slice %7 {offsets = [2, 0], sizes = [8, 40], strides = [1, 1]} : vector<10x40xbf16> to vector<8x40xbf16>
    %95 = vector.extract_strided_slice %9 {offsets = [2, 0], sizes = [8, 40], strides = [1, 1]} : vector<10x40xbf16> to vector<8x40xbf16>
    %96 = vector.extract_strided_slice %11 {offsets = [2, 0], sizes = [8, 40], strides = [1, 1]} : vector<10x40xbf16> to vector<8x40xbf16>
    %97 = vector.extract_strided_slice %13 {offsets = [2, 0], sizes = [8, 40], strides = [1, 1]} : vector<10x40xbf16> to vector<8x40xbf16>
    %98 = tpu.concatenate %93, %94, %95, %96, %97 in 0 : vector<8x40xbf16>, vector<8x40xbf16>, vector<8x40xbf16>, vector<8x40xbf16>, vector<8x40xbf16> -> vector<40x40xbf16>
    %c8 = arith.constant 8 : index
    %c0_51 = arith.constant 0 : index
    %c0_52 = arith.constant 0 : index
    %99 = vector.load %arg9[%c8, %c0_51, %c0_52] : memref<9x40x128xbf16, #tpu.memory_space<vmem>>, vector<1x40x128xbf16>
    %100 = vector.shape_cast %99 : vector<1x40x128xbf16> to vector<40x128xbf16>
    %cst_53 = arith.constant dense<0.000000e+00> : vector<40x128xf32>
    %101 = tpu.matmul %98, %100, %cst_53 {dimension_numbers = #tpu.dot_dimension_numbers<[1], [0], [0], [1], [0, 0, 1, 1], [], []>} : vector<40x40xbf16>, vector<40x128xbf16>, vector<40x128xf32> -> vector<40x128xf32>
    %102 = arith.addf %92, %101 : vector<40x128xf32>
    %c0_54 = arith.constant 0 : index
    %c0_55 = arith.constant 0 : index
    %103 = vector.load %arg10[%c0_54, %c0_55] : memref<1x128xf32, #tpu.memory_space<vmem>>, vector<1x128xf32>
    %104 = vector.broadcast %103 : vector<1x128xf32> to vector<40x128xf32>
    %105 = arith.addf %102, %104 : vector<40x128xf32>
    %106 = arith.negf %105 : vector<40x128xf32>
    %107 = math.exp %106 : vector<40x128xf32>
    %cst_56 = arith.constant 1.000000e+00 : f32
    %108 = vector.broadcast %cst_56 : f32 to vector<40x128xf32>
    %109 = arith.addf %108, %107 : vector<40x128xf32>
    %110 = arith.divf %108, %109 : vector<40x128xf32>
    %111 = arith.mulf %105, %110 : vector<40x128xf32>
    %112 = arith.truncf %111 : vector<40x128xf32> to vector<40x128xbf16>
    %c0_57 = arith.constant 0 : index
    %c0_58 = arith.constant 0 : index
    %c0_59 = arith.constant 0 : index
    %113 = vector.load %arg11[%c0_57, %c0_58, %c0_59] : memref<1x40x128xbf16, #tpu.memory_space<vmem>>, vector<1x40x128xbf16>
    %114 = vector.shape_cast %113 : vector<1x40x128xbf16> to vector<40x128xbf16>
    %115 = vector.shape_cast %112 : vector<40x128xbf16> to vector<1x40x128xbf16>
    tpu.vector_store %arg11[%c0_57, %c0_58, %c0_59], %115 {strides = array<i32>} : memref<1x40x128xbf16, #tpu.memory_space<vmem>>, vector<1x40x128xbf16>,
    return
  }
  func.func @transform_0(%arg0: i32, %arg1: i32) -> (i32, i32, i32, i32) {
    %c5_i32 = arith.constant 5 : i32
    %0 = arith.muli %arg1, %c5_i32 : i32
    %c0_i32 = arith.constant 0 : i32
    %1 = arith.addi %0, %c0_i32 : i32
    %c2_i32 = arith.constant 2 : i32
    %2 = arith.subi %1, %c2_i32 : i32
    %c0_i32_0 = arith.constant 0 : i32
    %3 = arith.maxsi %2, %c0_i32_0 : i32
    %c4_i32 = arith.constant 4 : i32
    %4 = arith.minsi %3, %c4_i32 : i32
    %c0_i32_1 = arith.constant 0 : i32
    %c0_i32_2 = arith.constant 0 : i32
    %c0_i32_3 = arith.constant 0 : i32
    return %arg0, %4, %c0_i32_1, %c0_i32_2 : i32, i32, i32, i32
  }
  func.func @transform_1(%arg0: i32, %arg1: i32) -> (i32, i32, i32, i32) {
    %c5_i32 = arith.constant 5 : i32
    %0 = arith.muli %arg1, %c5_i32 : i32
    %c1_i32 = arith.constant 1 : i32
    %1 = arith.addi %0, %c1_i32 : i32
    %c2_i32 = arith.constant 2 : i32
    %2 = arith.subi %1, %c2_i32 : i32
    %c0_i32 = arith.constant 0 : i32
    %3 = arith.maxsi %2, %c0_i32 : i32
    %c4_i32 = arith.constant 4 : i32
    %4 = arith.minsi %3, %c4_i32 : i32
    %c0_i32_0 = arith.constant 0 : i32
    %c0_i32_1 = arith.constant 0 : i32
    %c0_i32_2 = arith.constant 0 : i32
    return %arg0, %4, %c0_i32_0, %c0_i32_1 : i32, i32, i32, i32
  }
  func.func @transform_2(%arg0: i32, %arg1: i32) -> (i32, i32, i32, i32) {
    %c5_i32 = arith.constant 5 : i32
    %0 = arith.muli %arg1, %c5_i32 : i32
    %c2_i32 = arith.constant 2 : i32
    %1 = arith.addi %0, %c2_i32 : i32
    %c2_i32_0 = arith.constant 2 : i32
    %2 = arith.subi %1, %c2_i32_0 : i32
    %c0_i32 = arith.constant 0 : i32
    %3 = arith.maxsi %2, %c0_i32 : i32
    %c4_i32 = arith.constant 4 : i32
    %4 = arith.minsi %3, %c4_i32 : i32
    %c0_i32_1 = arith.constant 0 : i32
    %c0_i32_2 = arith.constant 0 : i32
    %c0_i32_3 = arith.constant 0 : i32
    return %arg0, %4, %c0_i32_1, %c0_i32_2 : i32, i32, i32, i32
  }
  func.func @transform_3(%arg0: i32, %arg1: i32) -> (i32, i32, i32, i32) {
    %c5_i32 = arith.constant 5 : i32
    %0 = arith.muli %arg1, %c5_i32 : i32
    %c3_i32 = arith.constant 3 : i32
    %1 = arith.addi %0, %c3_i32 : i32
    %c2_i32 = arith.constant 2 : i32
    %2 = arith.subi %1, %c2_i32 : i32
    %c0_i32 = arith.constant 0 : i32
    %3 = arith.maxsi %2, %c0_i32 : i32
    %c4_i32 = arith.constant 4 : i32
    %4 = arith.minsi %3, %c4_i32 : i32
    %c0_i32_0 = arith.constant 0 : i32
    %c0_i32_1 = arith.constant 0 : i32
    %c0_i32_2 = arith.constant 0 : i32
    return %arg0, %4, %c0_i32_0, %c0_i32_1 : i32, i32, i32, i32
  }
  func.func @transform_4(%arg0: i32, %arg1: i32) -> (i32, i32, i32, i32) {
    %c5_i32 = arith.constant 5 : i32
    %0 = arith.muli %arg1, %c5_i32 : i32
    %c4_i32 = arith.constant 4 : i32
    %1 = arith.addi %0, %c4_i32 : i32
    %c2_i32 = arith.constant 2 : i32
    %2 = arith.subi %1, %c2_i32 : i32
    %c0_i32 = arith.constant 0 : i32
    %3 = arith.maxsi %2, %c0_i32 : i32
    %c4_i32_0 = arith.constant 4 : i32
    %4 = arith.minsi %3, %c4_i32_0 : i32
    %c0_i32_1 = arith.constant 0 : i32
    %c0_i32_2 = arith.constant 0 : i32
    %c0_i32_3 = arith.constant 0 : i32
    return %arg0, %4, %c0_i32_1, %c0_i32_2 : i32, i32, i32, i32
  }
  func.func @transform_5(%arg0: i32, %arg1: i32) -> (i32, i32, i32, i32) {
    %c5_i32 = arith.constant 5 : i32
    %0 = arith.muli %arg1, %c5_i32 : i32
    %c5_i32_0 = arith.constant 5 : i32
    %1 = arith.addi %0, %c5_i32_0 : i32
    %c2_i32 = arith.constant 2 : i32
    %2 = arith.subi %1, %c2_i32 : i32
    %c0_i32 = arith.constant 0 : i32
    %3 = arith.maxsi %2, %c0_i32 : i32
    %c4_i32 = arith.constant 4 : i32
    %4 = arith.minsi %3, %c4_i32 : i32
    %c0_i32_1 = arith.constant 0 : i32
    %c0_i32_2 = arith.constant 0 : i32
    %c0_i32_3 = arith.constant 0 : i32
    return %arg0, %4, %c0_i32_1, %c0_i32_2 : i32, i32, i32, i32
  }
  func.func @transform_6(%arg0: i32, %arg1: i32) -> (i32, i32, i32, i32) {
    %c5_i32 = arith.constant 5 : i32
    %0 = arith.muli %arg1, %c5_i32 : i32
    %c6_i32 = arith.constant 6 : i32
    %1 = arith.addi %0, %c6_i32 : i32
    %c2_i32 = arith.constant 2 : i32
    %2 = arith.subi %1, %c2_i32 : i32
    %c0_i32 = arith.constant 0 : i32
    %3 = arith.maxsi %2, %c0_i32 : i32
    %c4_i32 = arith.constant 4 : i32
    %4 = arith.minsi %3, %c4_i32 : i32
    %c0_i32_0 = arith.constant 0 : i32
    %c0_i32_1 = arith.constant 0 : i32
    %c0_i32_2 = arith.constant 0 : i32
    return %arg0, %4, %c0_i32_0, %c0_i32_1 : i32, i32, i32, i32
  }
  func.func @transform_7(%arg0: i32, %arg1: i32) -> (i32, i32, i32) {
    %c0_i32 = arith.constant 0 : i32
    %c0_i32_0 = arith.constant 0 : i32
    %c0_i32_1 = arith.constant 0 : i32
    %c0_i32_2 = arith.constant 0 : i32
    return %c0_i32, %c0_i32_0, %c0_i32_1 : i32, i32, i32
  }
  func.func @transform_8(%arg0: i32, %arg1: i32) -> (i32, i32) {
    %c0_i32 = arith.constant 0 : i32
    %c0_i32_0 = arith.constant 0 : i32
    %c0_i32_1 = arith.constant 0 : i32
    return %c0_i32, %c0_i32_0 : i32, i32
  }
  func.func @transform_9(%arg0: i32, %arg1: i32) -> (i32, i32, i32) {
    %c0_i32 = arith.constant 0 : i32
    %c0_i32_0 = arith.constant 0 : i32
    return %arg0, %arg1, %c0_i32 : i32, i32, i32
  }
}

</mosaic_0001>

<bundles_post_ra>
// kernel: tokenizer_forward.5
= control target key start
LH: loop header
LB: loop body
LE: loop exit
PB: predicated region body
PF: predicated region fallthrough
CT: control target
= control target key end

     0   :  { %s2580_s30 = smov 0   ;;  %s2582_s10 = smov 0   ;;  %s2984_s0 = inlined_call_operand.vmem [shape: bf16[2,5,10,30], index: 0, kind: input, shape index: {}, may-alias: {0,1,2,3,4,5,6}]   ;;  %s2985_s1 = inlined_call_operand.vmem [shape: bf16[2,5,10,30], index: 1, kind: input, shape index: {}, may-alias: {0,1,2,3,4,5,6}]   ;;  %s2986_s2 = inlined_call_operand.vmem [shape: bf16[2,5,10,30], index: 2, kind: input, shape index: {}, may-alias: {0,1,2,3,4,5,6}]   ;;  %s2987_s3 = inlined_call_operand.vmem [shape: bf16[2,5,10,30], index: 3, kind: input, shape index: {}, may-alias: {0,1,2,3,4,5,6}]   ;;  %s2988_s4 = inlined_call_operand.vmem [shape: bf16[2,5,10,30], index: 4, kind: input, shape index: {}, may-alias: {0,1,2,3,4,5,6}]   ;;  %s2989_s5 = inlined_call_operand.vmem [shape: bf16[2,5,10,30], index: 5, kind: input, shape index: {}, may-alias: {0,1,2,3,4,5,6}]   ;;  %s2990_s6 = inlined_call_operand.vmem [shape: bf16[2,5,10,30], index: 6, kind: input, shape index: {}, may-alias: {0,1,2,3,4,5,6}]   ;;  %s2991_s7 = inlined_call_operand.vmem [shape: bf16[9,30,128], index: 7, kind: input, shape index: {}]   ;;  %s2992_s8 = inlined_call_operand.vmem [shape: f32[1,128], index: 8, kind: input, shape index: {}]   ;;  %s2993_s9 = inlined_call_operand.vmem [shape: bf16[2,40,128], index: 9, kind: output, shape index: {}]  }
   0x1   :  { %s2584_s11 = smov 0  }
   0x2 LB: > { %s31_s12 = sadd.s32 1, %s2522_s10  ;;  %p2096_p0 = scmp.ge.s32.totalorder %s2526_s11, 1  ;;  %s2526_s11 = sphi %s2584_s11, %s19_s11   ;;  %s2522_s10 = sphi %s2582_s10, %s2995_s10   ;;  %s2518_s30 = sphi %s2580_s30, %s2994_s30  }
   0x3   : > { %p33_p1 = scmp.ge.s32.totalorder %s31_s12, 2  ;;  %p567_p2 = scmp.lt.s32.totalorder %s2526_s11, 3 }
   0x5   : > { %s2997_s12 = smov (%p33_p1, %s31_s12), 0  ;;  %p568_p3 = pnand %p2096_p0, %p567_p2 }
   0x6   : > { %p712_p4 = scmp.lt.s32.totalorder (!%p568_p3), %s2518_s30, 1 }
   0x7   : > { %571 = sbr.rel (%p568_p3) target bundleno = 368 (0x170), region = 56 }
   0xc   : > { %vm981_vm0 = vcmask 1046528   ;;  %v2528_v0 = vmov 0.0   ;;  %v2454_v1 = vld [vmem:[%s2991_s7 + $0x18] sm:$0x7f]   ;;  %vm2529_vm1 = vmmov 0   ;;  %v2455_v3 = vld [vmem:[%s2991_s7 + $0x10] sm:$0xff]  }
   0xd   : > { %2420 = vmatprep.subr.bf16.mxu1 %v2528_v0  ;;  %2276 = vmatprep.subr.bf16.mxu0 %v2528_v0  ;;  %v983_v2 = vsel %vm981_vm0, %v2454_v1, 0  ;;  %s2999_s30 = smov (!%p712_p4, %s2518_s30), 1  ;;  %v2458_v21 = vld [vmem:[%s2991_s7 + $0x8] sm:$0x7f]   ;;  %vm882_vm2 = vcmask 1043456   ;;  %vm973_vm3 = vcmask 244736  }
   0xe   : > { %2284 = vmatprep.mubr.msk.bf16.mxu1 %vm2529_vm1, %v2528_v0  ;;  %2280 = vmatprep.mubr.msk.bf16.mxu0 %vm2529_vm1, %v2528_v0  ;;  %s2616_s17 = smul.u32 40, %s2999_s30  ;;  %v2461_v28 = vld [vmem:[%s2991_s7 + $0x28] sm:$0x7f]   ;;  %v1060_v36 = vsel %vm981_vm0, %v2458_v21, 0  ;;  %v2463_v45 = vld [vmem:[%s2991_s7] sm:$0xff]  }
   0xf   : > { %2422 = vmatpush3.bf16.msra.mxu1 %v983_v2  ;;  %2277 = vmatpush3.bf16.msra.mxu0 %v983_v2  ;;  %v1153_v44 = vsel %vm981_vm0, %v2461_v28, 0  ;;  %v2464_v47 = vld [vmem:[%s2991_s7 + $0x20] sm:$0xff]   ;;  %v2467_v48 = vld [vmem:[%s2991_s7 + $0x48] sm:$0x7f]   ;;  %v2466_v61 = vld [vmem:[%s2991_s7 + $0x38] sm:$0x7f]  }
  0x10   : > { %2421 = vmatprep.subr.bf16.mxu1 %v2528_v0  ;;  %2278 = vmatprep.subr.bf16.mxu0 %v2528_v0  ;;  %s761_s20 = scalar_lea.vmem %s2986_s2, %s2616_s17  ;;  %s2208_s21 = sadd.s32 8, %s2616_s17  ;;  %v1363_v62 = vsel %vm981_vm0, %v2467_v48, 0  ;;  %v1248_v28 = vsel %vm981_vm0, %v2466_v61, 0 }
  0x11   : > { %s781_s24 = scalar_lea.vmem %s2987_s3, %s2208_s21  ;;  %v2627_v4 = vld [vmem:[%s761_s20] sm:$0xf]  ;;  %v867_v5 = vld [vmem:[%s761_s20 + $0x4] sm:$0x1]  ;;  %s720_s27 = scalar_lea.vmem %s2984_s0, %s2616_s17 }
  0x12   : > { %v2634_v6 = vld [vmem:[%s781_s24] sm:$0xf]  ;;  %v869_v7 = vld [vmem:[%s781_s24 + $0x4] sm:$0x1]  ;;  %v2637_v8 = vcombine.low %v2627_v4, %v867_v5  ;;  %s741_s13 = scalar_lea.vmem %s2985_s1, %s2616_s17  ;;  %s2210_s14 = sadd.s32 16, %s2616_s17 }
  0x13   : > { %2423 = vmatpush3.bf16.msra.mxu1 %v2455_v3  ;;  %2279 = vmatpush3.bf16.msra.mxu0 %v2455_v3  ;;  %v2643_v9 = vld [vmem:[%s720_s27] sm:$0xf]  ;;  %v2646_v10 = vcombine.low %v2634_v6, %v869_v7  ;;  %v863_v11 = vld [vmem:[%s720_s27 + $0x4] sm:$0x1]  ;;  %s802_s18 = scalar_lea.vmem %s2988_s4, %s2210_s14  ;;  %s2212_s23 = sadd.s32 24, %s2616_s17 }
  0x14   : > { %2292 = vmatprep.subr.bf16.mxu1 %v2528_v0  ;;  %2308 = vmatprep.subr.bf16.mxu0 %v2528_v0  ;;  %v2648_v12 = vld [vmem:[%s741_s13] sm:$0xf]  ;;  %v865_v13 = vld [vmem:[%s741_s13 + $0x4] sm:$0x1]  ;;  %v922_v14 = vshrl.u32 %v2637_v8, 16  ;;  %v924_v15 = vshll.u32 %v2637_v8, 16  ;;  %v2653_v16 = vcombine.low %v2643_v9, %v863_v11  ;;  %s823_s26 = scalar_lea.vmem %s2989_s5, %s2212_s23 }
  0x15   : > { %v2656_v17 = vcombine.low %v2648_v12, %v865_v13  ;;  %v932_v18 = vshrl.u32 %v2646_v10, 16  ;;  %v935_v19 = vshll.u32 %v2646_v10, 16  ;;  %v2670_v23 = vld [vmem:[%s802_s18] sm:$0xf]  ;;  %v871_v29 = vld [vmem:[%s802_s18 + $0x4] sm:$0x1]  ;;  %v2105_v2 = vcombine.low %v2648_v12, %v2648_v12 }
  0x16   : > { %v926_v20 = vrot.slane %v924_v15, 1  ;;  %v899_v22 = vshrl.u32 %v2653_v16, 16  ;;  %v901_v26 = vshll.u32 %v2653_v16, 16  ;;  %v2685_v32 = vcombine.low %v2670_v23, %v871_v29  ;;  %v2720_v49 = vld [vmem:[%s823_s26] sm:$0xf]  ;;  %s2214_s23 = sadd.s32 32, %s2616_s17 }
  0x17   : > { %v934_v24 = vrot.slane %v932_v18, 4  ;;  %v937_v25 = vrot.slane %v935_v19, 5  ;;  %v909_v27 = vshrl.u32 %v2656_v17, 16  ;;  %v912_v31 = vshll.u32 %v2656_v17, 16  ;;  %v873_v50 = vld [vmem:[%s823_s26 + $0x4] sm:$0x1]  ;;  %s844_s26 = scalar_lea.vmem %s2990_s6, %s2214_s23 }
  0x18   : > { %v927_v30 = vor.u32 %v926_v20, %v922_v14  ;;  %v903_v34 = vrot.slane %v901_v26, 1  ;;  %v947_v38 = vshll.u32 %v2685_v32, 16  ;;  %v945_v42 = vshrl.u32 %v2685_v32, 16  ;;  %s2426_s28 = smul.u32 20, %s2999_s30 }
  0x19   : > { %v938_v33 = vor.u32 %v937_v25, %v934_v24  ;;  %v911_v35 = vrot.slane %v909_v27, 4  ;;  %v914_v37 = vrot.slane %v912_v31, 5  ;;  %v1118_v52 = vrot.slane %v2653_v16, 1 }
  0x1a   : > { %v904_v40 = vor.u32 %v903_v34, %v899_v22  ;;  %v949_v43 = vrot.slane %v947_v38, 1  ;;  %v1119_v53 = vrot.slane %v2656_v17, 5  ;;  %v1426_v54 = vrot.slane %v2656_v17, 1  ;;  %v2470_v22 = vld [vmem:[%s2991_s7 + $0x40] sm:$0xff]   ;;  %v2469_v34 = vld [vmem:[%s2991_s7 + $0x30] sm:$0xff]   ;;  %s859_s14 = scalar_lea.vmem %s2993_s9, %s2426_s28 }
  0x1b   : > { %v2695_v39 = vsel %vm882_vm2, %v927_v30, %v938_v33  ;;  %v915_v41 = vor.u32 %v914_v37, %v911_v35  ;;  %v1427_v55 = vrot.slane %v2637_v8, 5  ;;  %v2733_v56 = vcombine.low %v2720_v49, %v873_v50  ;;  %v2478_v50 = vld [vmem:[%s2991_s7 + $0x78] sm:$0x7f]  }
  0x1c   : > { %2285 = vmatmul.mubr.msk.bf16.vlgmr.msra.gmra.mxu1 %vm973_vm3, %v2695_v39  ;;  %v950_v51 = vor.u32 %v949_v43, %v945_v42  ;;  %v2165_v57 = vcombine.low %v2720_v49, %v2720_v49  ;;  %v1428_v59 = vrot.slane %v2646_v10, 1  ;;  %v1125_v60 = vsel %vm882_vm2, %v1118_v52, %v1119_v53  ;;  %v2482_v52 = vld [vmem:[%s2991_s7 + $0x70] sm:$0xff]   ;;  %v874_v53 = vld [vmem:[%s844_s26] sm:$0xf] }
  0x1d   : > { %2293 = vmatpush3.bf16.msra.mxu1 %v1060_v36  ;;  %2288 = vmatprep.mubr.msk.bf16.mxu1 %vm2529_vm1, %v2528_v0  ;;  %v953_v46 = vsel %vm882_vm2, %v904_v40, %v915_v41  ;;  %v2738_v58 = vsel %vm882_vm2, %v1426_v54, %v1427_v55  ;;  %v1429_v1 = vrot.slane %v2685_v32, 5  ;;  %v1122_v3 = vrot.slane %v2685_v32, 1  ;;  %v875_v55 = vld [vmem:[%s844_s26 + $0x4] sm:$0x1] }
  0x1e   : > { %2294 = vmatprep.subr.bf16.mxu1 %v2528_v0  ;;  %2281 = vmatmul.mubr.msk.bf16.vlgmr.msra.gmra.mxu0 %vm973_vm3, %v953_v46  ;;  %v2749_v63 = vsel %vm882_vm2, %v2670_v23, %v2165_v57  ;;  %v1327_v5 = vshrl.u32 %v2733_v56, 16  ;;  %v1329_v7 = vshll.u32 %v2733_v56, 16  ;;  %v1714_v13 = vrot.slane %v2733_v56, 5 }
  0x1f   : > { %2309 = vmatpush3.bf16.msra.mxu0 %v1153_v44  ;;  %2312 = vmatprep.mubr.msk.bf16.mxu0 %vm2529_vm1, %v2528_v0  ;;  %v2761_v11 = vsel %vm882_vm2, %v1428_v59, %v1429_v1  ;;  %v1120_v20 = vrot.slane %v2637_v8, 1  ;;  %v1121_v21 = vrot.slane %v2646_v10, 5  ;;  %v885_v26 = vsel %vm882_vm2, %v2643_v9, %v2105_v2  ;;  %v2473_v8 = vld [vmem:[%s2991_s7 + $0x68] sm:$0x7f]  }
  0x20   : > { %2310 = vmatprep.subr.bf16.mxu0 %v2528_v0  ;;  %v1612_v16 = vrot.slane %v1327_v5, 4  ;;  %v2775_v24 = vsel %vm882_vm2, %v1122_v3, %v1714_v13  ;;  %v1613_v25 = vrot.slane %v1329_v7, 5  ;;  %v2106_v9 = vcombine.low %v2634_v6, %v2634_v6 }
  0x21   : > { %2295 = vmatpush3.bf16.msra.mxu1 %v2463_v45  ;;  %v2785_v30 = vsel %vm882_vm2, %v1120_v20, %v1121_v21  ;;  %v1313_v36 = vrot.slane %v922_v14, 4  ;;  %v1314_v37 = vrot.slane %v924_v15, 5  ;;  %v1311_v40 = vrot.slane %v912_v31, 1  ;;  %v2472_v45 = vld [vmem:[%s2991_s7 + $0x58] sm:$0x7f]  }
  0x22   : > { %2324 = vmatprep.subr.bf16.mxu1 %v2528_v0  ;;  %v1614_v29 = vor.u32 %v1613_v25, %v1612_v16  ;;  %v888_v35 = vsel %vm882_vm2, %v2627_v4, %v2106_v9  ;;  %v1316_v31 = vrot.slane %v935_v19, 1  ;;  %v1318_v43 = vrot.slane %v945_v42, 4 }
  0x23   : > { %2311 = vmatpush3.bf16.msra.mxu0 %v2464_v47  ;;  %v1312_v41 = vor.u32 %v1311_v40, %v909_v27  ;;  %v1315_v14 = vor.u32 %v1314_v37, %v1313_v36  ;;  %v1319_v17 = vrot.slane %v947_v38, 5  ;;  %v2135_v27 = vcombine.low %v2627_v4, %v2627_v4  ;;  %v2477_v4 = vld [vmem:[%s2991_s7 + $0x60] sm:$0xff]  }
  0x24   : > { %2289 = vmatmul.mubr.msk.bf16.gmra.mxu1 %vm973_vm3, %v950_v51  ;;  %2340 = vmatprep.subr.bf16.mxu0 %v2528_v0  ;;  %v2788_v33 = vsel %vm882_vm2, %v950_v51, %v1614_v29  ;;  %v1549_v44 = vsel %vm981_vm0, %v2473_v8, 0  ;;  %v1317_v19 = vor.u32 %v1316_v31, %v932_v18  ;;  %v1461_v42 = vsel %vm981_vm0, %v2472_v45, 0 }
  0x25   : > { %2296 = vmatprep.mubr.msk.bf16.mxu1 %vm2529_vm1, %v2528_v0  ;;  %v1335_v15 = vsel %vm882_vm2, %v1312_v41, %v1315_v14  ;;  %v1320_v32 = vor.u32 %v1319_v17, %v1318_v43  ;;  %v1220_v38 = vsel %vm882_vm2, %v2648_v12, %v2135_v27  ;;  %v2136_v10 = vcombine.low %v2670_v23, %v2670_v23  ;;  %v2476_v12 = vld [vmem:[%s2991_s7 + $0x50] sm:$0xff]  }
  0x26   : > { %2313 = vmatmul.mubr.msk.bf16.vlgmr.msra.gmra.mxu0 %vm973_vm3, %v1125_v60  ;;  %v1331_v18 = vrot.slane %v1329_v7, 1  ;;  %v1651_v51 = vsel %vm981_vm0, %v2478_v50, 0  ;;  %v1430_v54 = vrot.slane %v2733_v56, 1  ;;  %v2175_v57 = vcombine.low %v874_v53, %v875_v55 }
  0x27   : > { %2341 = vmatpush3.bf16.msra.mxu0 %v1363_v62  ;;  %2316 = vmatprep.mubr.msk.bf16.mxu0 %vm2529_vm1, %v2528_v0  ;;  %v1338_v46 = vsel %vm882_vm2, %v1317_v19, %v1320_v32  ;;  %v1223_v47 = vsel %vm882_vm2, %v2634_v6, %v2136_v10  ;;  %v2479_v6 = vld [vmem:[%s2991_s7 + $0x88] sm:$0x7f]  }
  0x28   : > { %2342 = vmatprep.subr.bf16.mxu0 %v2528_v0  ;;  %v1740_v48 = vsel %vm981_vm0, %v2479_v6, 0  ;;  %v1623_v56 = vshll.u32 %v2175_v57, 16  ;;  %v1621_v59 = vshrl.u32 %v2175_v57, 16 }
  0x2a   : > { %v1625_v60 = vrot.slane %v1623_v56, 1 }
  0x2b   : > { %2343 = vmatpush3.bf16.msra.mxu0 %v2470_v22 }
  0x2c   : > { %2297 = vmatmul.mubr.msk.bf16.vlgmr.msra.gmra.mxu1 %vm973_vm3, %v885_v26  ;;  %2372 = vmatprep.subr.bf16.mxu0 %v2528_v0 }
  0x2d   : > { %2325 = vmatpush3.bf16.msra.mxu1 %v1248_v28  ;;  %2300 = vmatprep.mubr.msk.bf16.mxu1 %vm2529_vm1, %v2528_v0 }
  0x2e   : > { %2326 = vmatprep.subr.bf16.mxu1 %v2528_v0  ;;  %2317 = vmatmul.mubr.msk.bf16.gmra.mxu0 %vm973_vm3, %v2785_v30 }
  0x2f   : > { %2320 = vmatprep.mubr.msk.bf16.mxu0 %vm2529_vm1, %v2528_v0 }
  0x31   : > { %2327 = vmatpush3.bf16.msra.mxu1 %v2469_v34 }
  0x32   : > { %2356 = vmatprep.subr.bf16.mxu1 %v2528_v0 }
  0x34   : > { %2301 = vmatmul.mubr.msk.bf16.gmra.mxu1 %vm973_vm3, %v888_v35 }
  0x35   : > { %2304 = vmatprep.mubr.msk.bf16.mxu1 %vm2529_vm1, %v2528_v0 }
  0x36   : > { %2321 = vmatmul.mubr.msk.bf16.gmra.mxu0 %vm973_vm3, %v1122_v3 }
  0x37   : > { %2344 = vmatprep.mubr.msk.bf16.mxu0 %vm2529_vm1, %v2528_v0 }
  0x3c   : > { %2305 = vmatmul.mubr.msk.bf16.gmra.mxu1 %vm973_vm3, %v2670_v23  ;;  %v1332_v23 = vor.u32 %v1331_v18, %v1327_v5 }
  0x3d   : > { %2328 = vmatprep.mubr.msk.bf16.mxu1 %vm2529_vm1, %v2528_v0 }
  0x3e   : > { %2345 = vmatmul.mubr.msk.bf16.vlgmr.msra.gmra.mxu0 %vm973_vm3, %v1335_v15 }
  0x3f   : > { %2373 = vmatpush3.bf16.msra.mxu0 %v1549_v44  ;;  %2348 = vmatprep.mubr.msk.bf16.mxu0 %vm2529_vm1, %v2528_v0 }
  0x40   : > { %2374 = vmatprep.subr.bf16.mxu0 %v2528_v0 }
  0x43   : > { %2375 = vmatpush3.bf16.msra.mxu0 %v2477_v4 }
  0x44   : > { %2329 = vmatmul.mubr.msk.bf16.vlgmr.msra.gmra.mxu1 %vm973_vm3, %v1220_v38  ;;  %2404 = vmatprep.subr.bf16.mxu0 %v2528_v0 }
  0x45   : > { %2357 = vmatpush3.bf16.msra.mxu1 %v1461_v42  ;;  %2332 = vmatprep.mubr.msk.bf16.mxu1 %vm2529_vm1, %v2528_v0 }
  0x46   : > { %2358 = vmatprep.subr.bf16.mxu1 %v2528_v0  ;;  %2349 = vmatmul.mubr.msk.bf16.gmra.mxu0 %vm973_vm3, %v1338_v46 }
  0x47   : > { %2352 = vmatprep.mubr.msk.bf16.mxu0 %vm2529_vm1, %v2528_v0 }
  0x49   : > { %2359 = vmatpush3.bf16.msra.mxu1 %v2476_v12 }
  0x4a   : > { %2388 = vmatprep.subr.bf16.mxu1 %v2528_v0 }
  0x4c   : > { %2333 = vmatmul.mubr.msk.bf16.gmra.mxu1 %vm973_vm3, %v1223_v47 }
  0x4d   : > { %2336 = vmatprep.mubr.msk.bf16.mxu1 %vm2529_vm1, %v2528_v0 }
  0x4e   : > { %2353 = vmatmul.mubr.msk.bf16.gmra.mxu0 %vm973_vm3, %v1332_v23 }
  0x4f   : > { %2376 = vmatprep.mubr.msk.bf16.mxu0 %vm2529_vm1, %v2528_v0 }
  0x54   : > { %2337 = vmatmul.mubr.msk.bf16.gmra.mxu1 %vm973_vm3, %v2720_v49  ;;  %v2483_v49 = vld [vmem:[%s2991_s7 + $0x80] sm:$0xff]  }
  0x55   : > { %2360 = vmatprep.mubr.msk.bf16.mxu1 %vm2529_vm1, %v2528_v0 }
  0x56   : > { %2377 = vmatmul.mubr.msk.bf16.vlgmr.msra.gmra.mxu0 %vm973_vm3, %v888_v35 }
  0x57   : > { %2405 = vmatpush3.bf16.msra.mxu0 %v1740_v48  ;;  %2380 = vmatprep.mubr.msk.bf16.mxu0 %vm2529_vm1, %v2528_v0 }
  0x58   : > { %2406 = vmatprep.subr.bf16.mxu0 %v2528_v0 }
  0x5b   : > { %2407 = vmatpush3.bf16.msra.mxu0 %v2483_v49 }
  0x5c   : > { %2361 = vmatmul.mubr.msk.bf16.vlgmr.msra.gmra.mxu1 %vm973_vm3, %v2738_v58  ;;  %v1715_v58 = vrot.slane %v2175_v57, 1 }
  0x5d   : > { %2389 = vmatpush3.bf16.msra.mxu1 %v1651_v51  ;;  %2364 = vmatprep.mubr.msk.bf16.mxu1 %vm2529_vm1, %v2528_v0 }
  0x5e   : > { %2390 = vmatprep.subr.bf16.mxu1 %v2528_v0  ;;  %2381 = vmatmul.mubr.msk.bf16.gmra.mxu0 %vm973_vm3, %v2749_v63 }
  0x5f   : > { %2384 = vmatprep.mubr.msk.bf16.mxu0 %vm2529_vm1, %v2528_v0 }
  0x61   : > { %2391 = vmatpush3.bf16.msra.mxu1 %v2482_v52 }
  0x64   : > { %2365 = vmatmul.mubr.msk.bf16.gmra.mxu1 %vm973_vm3, %v2761_v11 }
  0x65   : > { %2368 = vmatprep.mubr.msk.bf16.mxu1 %vm2529_vm1, %v2528_v0 }
  0x66   : > { %2385 = vmatmul.mubr.msk.bf16.gmra.mxu0 %vm973_vm3, %v874_v53 }
  0x67   : > { %2408 = vmatprep.mubr.msk.bf16.mxu0 %vm2529_vm1, %v2528_v0 }
  0x6c   : > { %2369 = vmatmul.mubr.msk.bf16.gmra.mxu1 %vm973_vm3, %v1430_v54 }
  0x6d   : > { %2392 = vmatprep.mubr.msk.bf16.mxu1 %vm2529_vm1, %v2528_v0 }
  0x6e   : > { %2409 = vmatmul.mubr.msk.bf16.vlgmr.msra.gmra.mxu0 %vm973_vm3, %v2785_v30 }
  0x6f   : > { %2412 = vmatprep.mubr.msk.bf16.mxu0 %vm2529_vm1, %v2528_v0 }
  0x74   : > { %2393 = vmatmul.mubr.msk.bf16.vlgmr.msra.gmra.mxu1 %vm973_vm3, %v2695_v39  ;;  %v1626_v39 = vor.u32 %v1625_v60, %v1621_v59 }
  0x75   : > { %2396 = vmatprep.mubr.msk.bf16.mxu1 %vm2529_vm1, %v2528_v0 }
  0x76   : > { %2413 = vmatmul.mubr.msk.bf16.gmra.mxu0 %vm973_vm3, %v2775_v24 }
  0x77   : > { %2416 = vmatprep.mubr.msk.bf16.mxu0 %vm2529_vm1, %v2528_v0 }
  0x7c   : > { %2397 = vmatmul.mubr.msk.bf16.gmra.mxu1 %vm973_vm3, %v2788_v33 }
  0x7d   : > { %2400 = vmatprep.mubr.msk.bf16.mxu1 %vm2529_vm1, %v2528_v0 }
  0x7e   : > { %2417 = vmatmul.mubr.msk.bf16.gmra.mxu0 %vm973_vm3, %v1715_v58 }
  0x84   : > { %2401 = vmatmul.mubr.msk.bf16.gmra.mxu1 %vm973_vm3, %v1626_v39 }
  0xdc   : > { %v1027_v61 = vpop.f32.mrf.mxu1 }
  0xde   : > { %v2286_v62 = vpop.f32.mrf.mxu1  ;;  %v1019_v63 = vpop.f32.mrf.mxu0 }
  0xe0   : > { %v1030_v1 = vpop.f32.mrf.mxu1  ;;  %v2282_v2 = vpop.f32.mrf.mxu0 }
  0xe2   : > { %v2287_v3 = vpop.f32.mrf.mxu1  ;;  %v1022_v5 = vpop.f32.mrf.mxu0 }
  0xe4   : > { %v1035_v7 = vpop.f32.mrf.mxu1  ;;  %v2283_v11 = vpop.f32.mrf.mxu0 }
  0xe6   : > { %v2290_v13 = vpop.f32.mrf.mxu1  ;;  %v1189_v16 = vpop.f32.mrf.mxu0 }
  0xe8   : > { %v1038_v20 = vpop.f32.mrf.mxu1  ;;  %v2314_v21 = vpop.f32.mrf.mxu0 }
  0xea   : > { %v2291_v22 = vpop.f32.mrf.mxu1  ;;  %v1192_v0 = vpop.f32.mrf.mxu0 }
  0xec   : > { %v1096_v24 = vpop.f32.mrf.mxu1  ;;  %v2315_v26 = vpop.f32.mrf.mxu0 }
  0xed   : > { %v1097_v25 = vadd.f32 %v1096_v24, %v1019_v63 }
  0xee   : > { %v2298_v28 = vpop.f32.mrf.mxu1  ;;  %v1197_v29 = vpop.f32.mrf.mxu0 }
  0xef   : > { %v2943_v30 = vadd.f32 %v1189_v16, %v1097_v25 }
  0xf0   : > { %v1099_v33 = vpop.f32.mrf.mxu1  ;;  %v2318_v34 = vpop.f32.mrf.mxu0 }
  0xf1   : > { %v1100_v9 = vadd.f32 %v1099_v33, %v1022_v5 }
  0xf2   : > { %v2299_v35 = vpop.f32.mrf.mxu1  ;;  %v1200_v36 = vpop.f32.mrf.mxu0 }
  0xf3   : > { %v2945_v37 = vadd.f32 %v1192_v0, %v1100_v9 }
  0xf4   : > { %v1104_v40 = vpop.f32.mrf.mxu1  ;;  %v2319_v14 = vpop.f32.mrf.mxu0 }
  0xf5   : > { %v1105_v41 = vadd.f32 %v1104_v40, %v1027_v61 }
  0xf6   : > { %v2302_v8 = vpop.f32.mrf.mxu1  ;;  %v1205_v15 = vpop.f32.mrf.mxu0 }
  0xf7   : > { %v2947_v31 = vadd.f32 %v1197_v29, %v1105_v41 }
  0xf8   : > { %v1107_v43 = vpop.f32.mrf.mxu1  ;;  %v2322_v27 = vpop.f32.mrf.mxu0 }
  0xf9   : > { %v1108_v17 = vadd.f32 %v1107_v43, %v1030_v1 }
  0xfa   : > { %v2303_v44 = vpop.f32.mrf.mxu1  ;;  %v1208_v45 = vpop.f32.mrf.mxu0 }
  0xfb   : > { %v2949_v19 = vadd.f32 %v1200_v36, %v1108_v17 }
  0xfc   : > { %v1112_v32 = vpop.f32.mrf.mxu1  ;;  %v2323_v38 = vpop.f32.mrf.mxu0 }
  0xfd   : > { %v1113_v4 = vadd.f32 %v1112_v32, %v1035_v7 }
  0xfe   : > { %v2306_v42 = vpop.f32.mrf.mxu1  ;;  %v1399_v46 = vpop.f32.mrf.mxu0 }
  0xff   : > { %v2951_v10 = vadd.f32 %v1205_v15, %v1113_v4 }
 0x100   : > { %v1115_v12 = vpop.f32.mrf.mxu1  ;;  %v2346_v18 = vpop.f32.mrf.mxu0 }
 0x102   : > { %v2307_v47 = vpop.f32.mrf.mxu1  ;;  %v1402_v23 = vpop.f32.mrf.mxu0 }
 0x104   : > { %v1284_v6 = vpop.f32.mrf.mxu1  ;;  %v2347_v48 = vpop.f32.mrf.mxu0 }
 0x105   : > { %v1306_v34 = vadd.f32 %v1284_v6, %v2943_v30 }
 0x106   : > { %v2330_v50 = vpop.f32.mrf.mxu1  ;;  %v1407_v49 = vpop.f32.mrf.mxu0 }
 0x107   : > { %v1421_v8 = vadd.f32 %v1399_v46, %v1306_v34  ;;  %v2194_v46 = vld [vmem:[%s2992_s8] ss:$0 sm:$0xff] }
 0x108   : > { %v1287_v51 = vpop.f32.mrf.mxu1  ;;  %v2350_v52 = vpop.f32.mrf.mxu0 }
 0x109   : > { %v1307_v14 = vadd.f32 %v1287_v51, %v2945_v37 }
 0x10a   : > { %v2331_v53 = vpop.f32.mrf.mxu1  ;;  %v1410_v54 = vpop.f32.mrf.mxu0 }
 0x10b   : > { %v1422_v32 = vadd.f32 %v1402_v23, %v1307_v14 }
 0x10c   : > { %v1292_v55 = vpop.f32.mrf.mxu1  ;;  %v2351_v57 = vpop.f32.mrf.mxu0 }
 0x10d   : > { %v1308_v45 = vadd.f32 %v1292_v55, %v2947_v31 }
 0x10e   : > { %v2334_v56 = vpop.f32.mrf.mxu1  ;;  %v2953_v58 = vpop.f32.mrf.mxu0 }
 0x10f   : > { %v1423_v6 = vadd.f32 %v1407_v49, %v1308_v45 }
 0x110   : > { %v1295_v59 = vpop.f32.mrf.mxu1  ;;  %v2354_v60 = vpop.f32.mrf.mxu0 }
 0x111   : > { %v1309_v47 = vadd.f32 %v1295_v59, %v2949_v19 }
 0x112   : > { %v2335_v39 = vpop.f32.mrf.mxu1  ;;  %v1418_v61 = vpop.f32.mrf.mxu0 }
 0x113   : > { %v1424_v57 = vadd.f32 %v1410_v54, %v1309_v47 }
 0x114   : > { %v1300_v62 = vpop.f32.mrf.mxu1  ;;  %v2355_v63 = vpop.f32.mrf.mxu0 }
 0x115   : > { %v1310_v55 = vadd.f32 %v1300_v62, %v2951_v10 }
 0x116   : > { %v2338_v1 = vpop.f32.mrf.mxu1  ;;  %v1585_v2 = vpop.f32.mrf.mxu0 }
 0x118   : > { %v1303_v3 = vpop.f32.mrf.mxu1  ;;  %v2378_v5 = vpop.f32.mrf.mxu0 }
 0x119   : > { %v1425_v3 = vadd.f32 %v2953_v58, %v1310_v55 }
 0x11a   : > { %v2339_v7 = vpop.f32.mrf.mxu1  ;;  %v1588_v11 = vpop.f32.mrf.mxu0 }
 0x11c   : > { %v1497_v13 = vpop.f32.mrf.mxu1  ;;  %v2379_v16 = vpop.f32.mrf.mxu0 }
 0x11d   : > { %v1519_v17 = vadd.f32 %v1497_v13, %v1421_v8 }
 0x11e   : > { %v2362_v20 = vpop.f32.mrf.mxu1  ;;  %v1593_v21 = vpop.f32.mrf.mxu0 }
 0x11f   : > { %v1607_v12 = vadd.f32 %v1585_v2, %v1519_v17 }
 0x120   : > { %v1500_v22 = vpop.f32.mrf.mxu1  ;;  %v2382_v0 = vpop.f32.mrf.mxu0 }
 0x121   : > { %v1520_v42 = vadd.f32 %v1500_v22, %v1422_v32 }
 0x122   : > { %v2363_v24 = vpop.f32.mrf.mxu1  ;;  %v1596_v25 = vpop.f32.mrf.mxu0 }
 0x123   : > { %v1608_v31 = vadd.f32 %v1588_v11, %v1520_v42 }
 0x124   : > { %v1505_v26 = vpop.f32.mrf.mxu1  ;;  %v2383_v28 = vpop.f32.mrf.mxu0 }
 0x125   : > { %v1521_v51 = vadd.f32 %v1505_v26, %v1423_v6 }
 0x126   : > { %v2366_v29 = vpop.f32.mrf.mxu1  ;;  %v2955_v33 = vpop.f32.mrf.mxu0 }
 0x127   : > { %v1609_v63 = vadd.f32 %v1593_v21, %v1521_v51 }
 0x128   : > { %v1508_v9 = vpop.f32.mrf.mxu1  ;;  %v2386_v35 = vpop.f32.mrf.mxu0 }
 0x129   : > { %v1522_v59 = vadd.f32 %v1508_v9, %v1424_v57 }
 0x12a   : > { %v2367_v36 = vpop.f32.mrf.mxu1  ;;  %v1604_v40 = vpop.f32.mrf.mxu0 }
 0x12b   : > { %v1610_v16 = vadd.f32 %v1596_v25, %v1522_v59 }
 0x12c   : > { %v1513_v41 = vpop.f32.mrf.mxu1  ;;  %v2387_v15 = vpop.f32.mrf.mxu0 }
 0x12d   : > { %v1523_v54 = vadd.f32 %v1513_v41, %v1425_v3 }
 0x12e   : > { %v2370_v43 = vpop.f32.mrf.mxu1  ;;  %v1776_v27 = vpop.f32.mrf.mxu0 }
 0x12f   : > { %v1611_v58 = vadd.f32 %v2955_v33, %v1523_v54 }
 0x130   : > { %v1516_v44 = vpop.f32.mrf.mxu1  ;;  %v2410_v4 = vpop.f32.mrf.mxu0 }
 0x132   : > { %v2371_v38 = vpop.f32.mrf.mxu1  ;;  %v1779_v30 = vpop.f32.mrf.mxu0 }
 0x134   : > { %v1687_v18 = vpop.f32.mrf.mxu1  ;;  %v2411_v37 = vpop.f32.mrf.mxu0 }
 0x135   : > { %v1709_v48 = vadd.f32 %v1687_v18, %v1607_v12 }
 0x136   : > { %v2394_v50 = vpop.f32.mrf.mxu1  ;;  %v1784_v23 = vpop.f32.mrf.mxu0 }
 0x137   : > { %v1798_v52 = vadd.f32 %v1776_v27, %v1709_v48 }
 0x138   : > { %v1690_v53 = vpop.f32.mrf.mxu1  ;;  %v2414_v19 = vpop.f32.mrf.mxu0 }
 0x139   : > { %v2965_v56 = vadd.f32 %v2194_v46, %v1798_v52  ;;  %v1710_v60 = vadd.f32 %v1690_v53, %v1608_v31 }
 0x13a   : > { %v2395_v49 = vpop.f32.mrf.mxu1  ;;  %v1787_v1 = vpop.f32.mrf.mxu0 }
 0x13b   : > { %v2195_v39 = vmul.f32 -1.442695, %v2965_v56  ;;  %v1799_v61 = vadd.f32 %v1779_v30, %v1710_v60 }
 0x13c   : > { %v1695_v2 = vpop.f32.mrf.mxu1  ;;  %v2415_v11 = vpop.f32.mrf.mxu0 }
 0x13d   : > { %2484 = vpow2.f32 %v2195_v39  ;;  %v1811_v5 = vadd.f32 %v2194_v46, %v1799_v61  ;;  %v1711_v7 = vadd.f32 %v1695_v2, %v1609_v63 }
 0x13e   : > { %v2398_v10 = vpop.f32.mrf.mxu1  ;;  %v1792_v20 = vpop.f32.mrf.mxu0 }
 0x13f   : > { %v2196_v62 = vmul.f32 -1.442695, %v1811_v5  ;;  %v1800_v13 = vadd.f32 %v1784_v23, %v1711_v7 }
 0x140   : > { %v1698_v22 = vpop.f32.mrf.mxu1  ;;  %v2418_v26 = vpop.f32.mrf.mxu0 }
 0x141   : > { %2486 = vpow2.f32 %v2196_v62  ;;  %v1812_v0 = vadd.f32 %v2194_v46, %v1800_v13  ;;  %v1712_v24 = vadd.f32 %v1698_v22, %v1610_v16 }
 0x142   : > { %v2399_v21 = vpop.f32.mrf.mxu1  ;;  %v1795_v9 = vpop.f32.mrf.mxu0 }
 0x143   : > { %v2197_v28 = vmul.f32 -1.442695, %v1812_v0  ;;  %v1801_v29 = vadd.f32 %v1787_v1, %v1712_v24 }
 0x144   : > { %v1703_v34 = vpop.f32.mrf.mxu1  ;;  %v2419_v40 = vpop.f32.mrf.mxu0 }
 0x145   : > { %2488 = vpow2.f32 %v2197_v28  ;;  %v1813_v35 = vadd.f32 %v2194_v46, %v1801_v29  ;;  %v1713_v36 = vadd.f32 %v1703_v34, %v1611_v58 }
 0x146   : > { %v2402_v41 = vpop.f32.mrf.mxu1 }
 0x147   : > { %v2198_v14 = vmul.f32 -1.442695, %v1813_v35  ;;  %v1802_v25 = vadd.f32 %v1792_v20, %v1713_v36 }
 0x148   : > { %v1706_v8 = vpop.f32.mrf.mxu1 }
 0x149   : > { %2490 = vpow2.f32 %v2198_v14  ;;  %v1814_v15 = vadd.f32 %v2194_v46, %v1802_v25 }
 0x14a   : > { %v2485_v43 = vpop.eup %2484  ;;  %v2403_v17 = vpop.f32.mrf.mxu1 }
 0x14b   : > { %v1830_v27 = vadd.f32 1.0, %v2485_v43  ;;  %v2199_v44 = vmul.f32 -1.442695, %v1814_v15 }
 0x14d   : > { %2492 = vpow2.f32 %v2199_v44 }
 0x14e   : > { %v2487_v45 = vpop.eup %2486  ;;  %2494 = vrcp.f32 %v1830_v27 }
 0x14f   : > { %v1831_v33 = vadd.f32 1.0, %v2487_v45 }
 0x151   : > { %2496 = vrcp.f32 %v1831_v33 }
 0x152   : > { %v2489_v32 = vpop.eup %2488 }
 0x153   : > { %v1832_v4 = vadd.f32 1.0, %v2489_v32 }
 0x155   : > { %2498 = vrcp.f32 %v1832_v4 }
 0x156   : > { %v2491_v38 = vpop.eup %2490 }
 0x157   : > { %v1833_v42 = vadd.f32 1.0, %v2491_v38 }
 0x159   : > { %2500 = vrcp.f32 %v1833_v42 }
 0x15a   : > { %v2493_v12 = vpop.eup %2492 }
 0x15b   : > { %v2495_v30 = vpop.eup %2494  ;;  %v1834_v18 = vadd.f32 1.0, %v2493_v12 }
 0x15c   : > { %v1845_v6 = vmul.f32 %v2495_v30, %v2965_v56 }
 0x15d   : > { %2502 = vrcp.f32 %v1834_v18 }
 0x15e   : > { %v2497_v47 = vpop.eup %2496 }
 0x15f   : > { %v1846_v48 = vmul.f32 %v2497_v47, %v1811_v5 }
 0x161   : > { %v2223_v37 = vpack.c.bf16 %v1846_v48, %v1845_v6 }
 0x162   : > { %v2499_v46 = vpop.eup %2498 }
 0x163   : > { %2224 = vst [vmem:[%s859_s14] sm:$0xff] %v2223_v37   ;;  %v1847_v51 = vmul.f32 %v2499_v46, %v1812_v0 }
 0x166   : > { %v2501_v50 = vpop.eup %2500 }
 0x167   : > { %v1848_v52 = vmul.f32 %v2501_v50, %v1813_v35 }
 0x169   : > { %v2228_v31 = vpack.c.bf16 %v1848_v52, %v1847_v51 }
 0x16a   : > { %v2503_v23 = vpop.eup %2502 }
 0x16b   : > { %2230 = vst [vmem:[%s859_s14 + $0x8] sm:$0xff] %v2228_v31   ;;  %v1849_v53 = vmul.f32 %v2503_v23, %v1814_v15 }
 0x16d   : > { %v2219_v55 = vpack.c.bf16 %v1849_v53, %v1849_v53 }
 0x16f   : > { %1875 = vst [vmem:[%s859_s14 + $0x10] sm:$0xf] %v2219_v55 }
 0x170 PF: > { %s19_s11 = sadd.s32 1, %s2526_s11   ;;  %s2994_s30 = smov %s2522_s10 }
 0x171   : > { %p16_p5 = scmp.ge.s32.totalorder %s19_s11, 4   ;;  %s2995_s10 = smov %s2997_s12 }
 0x173   :  { %18 = sbr.rel (!%p16_p5) target bundleno = 2 (0x2), region = 112 }

// kernel: tokenizer_forward.6
= control target key start
LH: loop header
LB: loop body
LE: loop exit
PB: predicated region body
PF: predicated region fallthrough
CT: control target
= control target key end

     0   :  { %s3330_s30 = smov 0   ;;  %s3332_s10 = smov 0   ;;  %s4111_s0 = inlined_call_operand.vmem [shape: bf16[2,5,10,160], index: 0, kind: input, shape index: {}, may-alias: {0,1,2,3,4,5,6}]   ;;  %s4112_s1 = inlined_call_operand.vmem [shape: bf16[2,5,10,160], index: 1, kind: input, shape index: {}, may-alias: {0,1,2,3,4,5,6}]   ;;  %s4113_s2 = inlined_call_operand.vmem [shape: bf16[2,5,10,160], index: 2, kind: input, shape index: {}, may-alias: {0,1,2,3,4,5,6}]   ;;  %s4114_s3 = inlined_call_operand.vmem [shape: bf16[2,5,10,160], index: 3, kind: input, shape index: {}, may-alias: {0,1,2,3,4,5,6}]   ;;  %s4115_s4 = inlined_call_operand.vmem [shape: bf16[2,5,10,160], index: 4, kind: input, shape index: {}, may-alias: {0,1,2,3,4,5,6}]   ;;  %s4116_s5 = inlined_call_operand.vmem [shape: bf16[2,5,10,160], index: 5, kind: input, shape index: {}, may-alias: {0,1,2,3,4,5,6}]   ;;  %s4117_s6 = inlined_call_operand.vmem [shape: bf16[2,5,10,160], index: 6, kind: input, shape index: {}, may-alias: {0,1,2,3,4,5,6}]   ;;  %s4118_s7 = inlined_call_operand.vmem [shape: bf16[9,160,128], index: 7, kind: input, shape index: {}]   ;;  %s4119_s8 = inlined_call_operand.vmem [shape: f32[1,128], index: 8, kind: input, shape index: {}]   ;;  %s4120_s9 = inlined_call_operand.vmem [shape: f32[2,40,128], index: 9, kind: output, shape index: {}]  }
   0x1   :  { %s3334_s11 = smov 0  }
   0x2 LB: > { %s31_s12 = sadd.s32 1, %s3273_s10  ;;  %p2763_p0 = scmp.ge.s32.totalorder %s3277_s11, 1  ;;  %s3277_s11 = sphi %s3334_s11, %s19_s11   ;;  %s3273_s10 = sphi %s3332_s10, %s4122_s10   ;;  %s3269_s30 = sphi %s3330_s30, %s4121_s30  }
   0x3   : > { %p33_p1 = scmp.ge.s32.totalorder %s31_s12, 2  ;;  %p567_p2 = scmp.lt.s32.totalorder %s3277_s11, 3 }
   0x5   : > { %s4124_s12 = smov (%p33_p1, %s31_s12), 0  ;;  %p568_p3 = pnand %p2763_p0, %p567_p2 }
   0x6   : > { %p712_p4 = scmp.lt.s32.totalorder (!%p568_p3), %s3269_s30, 1 }
   0x7   : > { %571 = sbr.rel (%p568_p3) target bundleno = 420 (0x1a4), region = 56 }
   0xc   : > { %v3137_v0 = vld [vmem:[%s4118_s7 + $0x88] sm:$0xff]   ;;  %v3279_v1 = vmov 0   ;;  %v3138_v2 = vld [vmem:[%s4118_s7 + $0x38] sm:$0xff]   ;;  %v3139_v3 = vld [vmem:[%s4118_s7 + $0x80] sm:$0xff]   ;;  %s4126_s30 = smov (!%p712_p4, %s3269_s30), 1  ;;  %vm902_vm0 = vcmask 1043456  }
   0xd   : > { %1140 = vmatprep.subr.bf16.mxu0 %v3279_v1  ;;  %1263 = vmatprep.subr.bf16.mxu1 %v3279_v1  ;;  %v3140_v4 = vld [vmem:[%s4118_s7 + $0x30] sm:$0xff]   ;;  %v3141_v5 = vld [vmem:[%s4118_s7 + $0x78] sm:$0xff]   ;;  %v3142_v6 = vld [vmem:[%s4118_s7 + $0x28] sm:$0xff]   ;;  %s3383_s29 = smul.u32 80, %s4126_s30  ;;  %vm1132_vm1 = vcmask 261120  }
   0xe   : > { %1141 = vmatpush1.bf16.msra.mxu0 %v3137_v0  ;;  %1264 = vmatpush1.bf16.msra.mxu1 %v3138_v2  ;;  %v3143_v7 = vld [vmem:[%s4118_s7 + $0x70] sm:$0xff]   ;;  %v3144_v8 = vld [vmem:[%s4118_s7 + $0x20] sm:$0xff]   ;;  %v3145_v9 = vld [vmem:[%s4118_s7 + $0x68] sm:$0xff]  }
   0xf   : > { %1142 = vmatprep.subr.bf16.mxu0 %v3279_v1  ;;  %1265 = vmatprep.subr.bf16.mxu1 %v3279_v1  ;;  %v3146_v10 = vld [vmem:[%s4118_s7 + $0x18] sm:$0xff]   ;;  %s720_s19 = scalar_lea.vmem %s4111_s0, %s3383_s29  ;;  %s741_s22 = scalar_lea.vmem %s4112_s1, %s3383_s29  ;;  %v3147_v11 = vld [vmem:[%s4118_s7 + $0x60] sm:$0xff]   ;;  %v3148_v12 = vld [vmem:[%s4118_s7 + $0x10] sm:$0xff]  }
  0x10   : > { %v3409_v13 = vld [vmem:[%s720_s19] sm:$0xff]  ;;  %v863_v14 = vld [vmem:[%s720_s19 + $0x8] sm:$0x11]  ;;  %v3149_v21 = vld [vmem:[%s4118_s7 + $0x58] sm:$0xff]   ;;  %s3081_s15 = sadd.s32 16, %s3383_s29  ;;  %s761_s24 = scalar_lea.vmem %s4113_s2, %s3383_s29 }
  0x11   : > { %v864_v15 = vld [vmem:[%s741_s22] sm:$0xff]  ;;  %v865_v16 = vld [vmem:[%s741_s22 + $0x8] sm:$0x11]  ;;  %v3412_v17 = vcombine.high %v3409_v13, %v863_v14  ;;  %v2773_v18 = vcombine.high %v3409_v13, %v3409_v13  ;;  %v3419_v20 = vcombine.low %v3409_v13, %v863_v14  ;;  %v3151_v34 = vld [vmem:[%s4118_s7 + $0x50] sm:$0xff]   ;;  %s781_s27 = scalar_lea.vmem %s4114_s3, %s3081_s15  ;;  %v2772_v47 = vcombine.low %v3409_v13, %v3409_v13  ;;  %s3083_s15 = sadd.s32 32, %s3383_s29 }
  0x12   : > { %1143 = vmatpush1.bf16.msra.mxu0 %v3139_v3  ;;  %1266 = vmatpush1.bf16.msra.mxu1 %v3140_v4  ;;  %v3416_v19 = vcombine.high %v864_v15, %v864_v15  ;;  %v3424_v22 = vcombine.high %v864_v15, %v865_v16  ;;  %v3426_v23 = vcombine.low %v864_v15, %v865_v16  ;;  %v3150_v24 = vld [vmem:[%s4118_s7 + $0x8] sm:$0xff]   ;;  %v3152_v35 = vld [vmem:[%s4118_s7] sm:$0xff]   ;;  %v3153_v44 = vld [vmem:[%s4118_s7 + $0x98] sm:$0xff]   ;;  %s802_s25 = scalar_lea.vmem %s4115_s4, %s3083_s15  ;;  %s3085_s18 = sadd.s32 48, %s3383_s29 }
  0x13   : > { %1144 = vmatprep.subr.bf16.mxu0 %v3279_v1  ;;  %1267 = vmatprep.subr.bf16.mxu1 %v3279_v1  ;;  %v950_v25 = vshrl.u32 %v3412_v17, 16  ;;  %v952_v26 = vshll.u32 %v3412_v17, 16  ;;  %v945_v30 = vshll.u32 %v3419_v20, 16  ;;  %v943_v39 = vshrl.u32 %v3419_v20, 16  ;;  %v3154_v46 = vld [vmem:[%s4118_s7 + $0x48] sm:$0xff]   ;;  %v3155_v49 = vld [vmem:[%s4118_s7 + $0x90] sm:$0xff]  }
  0x14   : > { %v909_v27 = vsel %vm902_vm0, %v2773_v18, %v3416_v19  ;;  %v970_v28 = vshrl.u32 %v3424_v22, 16  ;;  %v973_v29 = vshll.u32 %v3424_v22, 16  ;;  %v962_v31 = vshrl.u32 %v3426_v23, 16  ;;  %v866_v52 = vld [vmem:[%s761_s24] sm:$0xff]  ;;  %v867_v53 = vld [vmem:[%s761_s24 + $0x8] sm:$0x11] }
  0x15   : > { %2835 = vmatprep.mubr.msk.bf16.mxu1 %vm1132_vm1, %v909_v27  ;;  %v954_v32 = vrot.slane %v952_v26, 1  ;;  %v965_v33 = vshll.u32 %v3426_v23, 16  ;;  %v947_v40 = vrot.slane %v945_v30, 1  ;;  %v3478_v48 = vcombine.low %v864_v15, %v864_v15  ;;  %v868_v54 = vld [vmem:[%s781_s27] sm:$0xff]  ;;  %v869_v55 = vld [vmem:[%s781_s27 + $0x8] sm:$0x11] }
  0x16   : > { %1145 = vmatpush1.bf16.msra.mxu0 %v3141_v5  ;;  %1268 = vmatpush1.bf16.msra.mxu1 %v3142_v6  ;;  %v972_v36 = vrot.slane %v970_v28, 4  ;;  %v975_v37 = vrot.slane %v973_v29, 5  ;;  %v964_v42 = vrot.slane %v962_v31, 4  ;;  %v3486_v56 = vcombine.low %v866_v52, %v867_v53  ;;  %v3156_v58 = vld [vmem:[%s4118_s7 + $0x40] sm:$0xff]   ;;  %v3165_v63 = vld [vmem:[%s4118_s7 + $0xd8] sm:$0xff]   ;;  %v3166_v4 = vld [vmem:[%s4118_s7 + $0x128] sm:$0xff]  }
  0x17   : > { %1146 = vmatprep.subr.bf16.mxu0 %v3279_v1  ;;  %1269 = vmatprep.subr.bf16.mxu1 %v3279_v1  ;;  %v955_v38 = vor.u32 %v954_v32, %v950_v25  ;;  %v967_v43 = vrot.slane %v965_v33, 5  ;;  %v948_v50 = vor.u32 %v947_v40, %v943_v39  ;;  %v3488_v57 = vcombine.high %v866_v52, %v867_v53  ;;  %v870_v25 = vld [vmem:[%s802_s25] sm:$0xff]  ;;  %v871_v26 = vld [vmem:[%s802_s25 + $0x8] sm:$0x11]  ;;  %s3628_s25 = scalar_lea.vmem %s4116_s5, %s3085_s18  ;;  %s3087_s27 = sadd.s32 64, %s3383_s29 }
  0x18   : > { %v976_v41 = vor.u32 %v975_v37, %v972_v36  ;;  %v905_v59 = vsel %vm902_vm0, %v2772_v47, %v3478_v48  ;;  %v3496_v60 = vcombine.low %v868_v54, %v869_v55  ;;  %v3498_v61 = vcombine.high %v868_v54, %v869_v55  ;;  %v3168_v37 = vld [vmem:[%s4118_s7 + $0x120] sm:$0xff]   ;;  %v3169_v47 = vld [vmem:[%s4118_s7 + $0xc8] sm:$0xff]   ;;  %s844_s17 = scalar_lea.vmem %s4117_s6, %s3087_s27  ;;  %s3110_s24 = smul.u32 40, %s4126_s30 }
  0x19   : > { %v968_v51 = vor.u32 %v967_v43, %v964_v42  ;;  %v3505_v0 = vcombine.high %v866_v52, %v866_v52  ;;  %v990_v2 = vshrl.u32 %v3488_v57, 16  ;;  %v992_v3 = vshll.u32 %v3488_v57, 16  ;;  %v3171_v55 = vld [vmem:[%s4118_s7 + $0xc0] sm:$0xff]  }
  0x1a   : > { %1147 = vmatpush1.bf16.msra.mxu0 %v3143_v7  ;;  %1270 = vmatpush1.bf16.msra.mxu1 %v3144_v8  ;;  %v1043_v45 = vsel %vm902_vm0, %v955_v38, %v976_v41  ;;  %v3512_v5 = vcombine.high %v868_v54, %v868_v54  ;;  %v1010_v6 = vshrl.u32 %v3498_v61, 16  ;;  %v1013_v7 = vshll.u32 %v3498_v61, 16  ;;  %s859_s13 = scalar_lea.vmem %s4120_s9, %s3110_s24 }
  0x1b   : > { %1148 = vmatprep.subr.bf16.mxu0 %v3279_v1  ;;  %1271 = vmatprep.subr.bf16.mxu1 %v3279_v1  ;;  %v1039_v62 = vsel %vm902_vm0, %v948_v50, %v968_v51  ;;  %v985_v8 = vshll.u32 %v3486_v56, 16  ;;  %v1657_v16 = vrot.slane %v973_v29, 1  ;;  %v1655_v27 = vrot.slane %v965_v33, 1  ;;  %v3170_v50 = vld [vmem:[%s4118_s7 + $0x118] sm:$0xff]  }
  0x1c   : > { %2822 = vmatprep.mubr.msk.bf16.mxu0 %vm1132_vm1, %v1043_v45  ;;  %v1012_v13 = vrot.slane %v1010_v6, 4  ;;  %v1015_v14 = vrot.slane %v1013_v7, 5  ;;  %v3546_v29 = vsel %vm902_vm0, %v3505_v0, %v3512_v5  ;;  %v3548_v32 = vcombine.high %v870_v25, %v871_v26 }
  0x1d   : > { %v987_v15 = vrot.slane %v985_v8, 1  ;;  %v3555_v33 = vcombine.low %v870_v25, %v871_v26  ;;  %v3561_v38 = vcombine.low %v866_v52, %v866_v52  ;;  %v3563_v39 = vcombine.low %v868_v54, %v868_v54 }
  0x1e   : > { %1149 = vmatpush1.bf16.msra.mxu0 %v3145_v9  ;;  %1272 = vmatpush1.bf16.msra.mxu1 %v3146_v10  ;;  %v994_v9 = vrot.slane %v992_v3, 1  ;;  %v983_v10 = vshrl.u32 %v3486_v56, 16  ;;  %v1016_v30 = vor.u32 %v1015_v14, %v1012_v13  ;;  %v1032_v41 = vshll.u32 %v3548_v32, 16  ;;  %v3173_v13 = vld [vmem:[%s4118_s7 + $0xb8] sm:$0xff]  }
  0x1f   : > { %1150 = vmatprep.subr.bf16.mxu0 %v3279_v1  ;;  %1273 = vmatprep.subr.bf16.mxu1 %v3279_v1  ;;  %v1030_v42 = vshrl.u32 %v3548_v32, 16  ;;  %v1658_v45 = vor.u32 %v1657_v16, %v970_v28  ;;  %v3597_v28 = vsel %vm902_vm0, %v3561_v38, %v3563_v39  ;;  %v1320_v51 = vrot.slane %v3412_v17, 1 }
  0x20   : > { %v995_v18 = vor.u32 %v994_v9, %v990_v2  ;;  %v1034_v43 = vrot.slane %v1032_v41, 1  ;;  %v1023_v53 = vshrl.u32 %v3555_v33, 16  ;;  %v1322_v17 = vrot.slane %v3424_v22, 5 }
  0x21   : > { %v1663_v9 = vrot.slane %v992_v3, 5  ;;  %v3644_v14 = vcombine.low %v870_v25, %v870_v25  ;;  %v1660_v3 = vrot.slane %v985_v8, 5 }
  0x22   : > { %1151 = vmatpush1.bf16.msra.mxu0 %v3147_v11  ;;  %1274 = vmatpush1.bf16.msra.mxu1 %v3148_v12  ;;  %v1002_v11 = vshrl.u32 %v3496_v60, 16  ;;  %v1005_v12 = vshll.u32 %v3496_v60, 16  ;;  %v3566_v40 = vsel %vm902_vm0, %v995_v18, %v1016_v30  ;;  %v3607_v52 = vor.u32 %v1034_v43, %v1030_v42 }
  0x23   : > { %1152 = vmatprep.subr.bf16.mxu0 %v3279_v1  ;;  %1275 = vmatprep.subr.bf16.mxu1 %v3279_v1  ;;  %v1860_v18 = vrot.slane %v3486_v56, 5  ;;  %v1672_v43 = vrot.slane %v1030_v42, 4  ;;  %v1673_v42 = vrot.slane %v1032_v41, 5 }
  0x26   : > { %1153 = vmatpush1.bf16.msra.mxu0 %v3149_v21  ;;  %1276 = vmatpush1.bf16.msra.mxu1 %v3150_v24  ;;  %v1004_v21 = vrot.slane %v1002_v11, 4  ;;  %v1007_v24 = vrot.slane %v1005_v12, 5 }
  0x27   : > { %1154 = vmatprep.subr.bf16.mxu0 %v3279_v1  ;;  %1277 = vmatprep.subr.bf16.mxu1 %v3279_v1 }
  0x28   : > { %v1008_v36 = vor.u32 %v1007_v24, %v1004_v21  ;;  %v1336_v21 = vsel %vm902_vm0, %v1320_v51, %v1322_v17  ;;  %v1674_v51 = vor.u32 %v1673_v42, %v1672_v43  ;;  %v3190_v17 = vld [vmem:[%s4118_s7 + $0xa0] sm:$0xff]  }
  0x2a   : > { %1155 = vmatpush1.bf16.msra.mxu0 %v3151_v34  ;;  %1278 = vmatpush1.bf16.msra.mxu1 %v3152_v35  ;;  %v3167_v34 = vld [vmem:[%s4118_s7 + $0xd0] sm:$0xff]   ;;  %v988_v35 = vor.u32 %v987_v15, %v983_v10  ;;  %v872_v15 = vld [vmem:[%s3628_s25] sm:$0xff] }
  0x2b   : > { %1168 = vmatprep.subr.bf16.mxu0 %v3279_v1  ;;  %1291 = vmatprep.subr.bf16.mxu1 %v3279_v1  ;;  %v3657_v24 = vcombine.high %v872_v15, %v872_v15 }
  0x2e   : > { %1169 = vmatpush2.bf16.msra.mxu0 %v3153_v44  ;;  %1292 = vmatpush2.bf16.msra.mxu1 %v3154_v46  ;;  %v1025_v44 = vshll.u32 %v3555_v33, 16  ;;  %v3582_v46 = vor.u32 %v1655_v27, %v962_v31  ;;  %v3600_v31 = vcombine.high %v870_v25, %v870_v25  ;;  %v3659_v25 = vcombine.low %v872_v15, %v872_v15  ;;  %v3183_v27 = vld [vmem:[%s4118_s7 + $0xb0] sm:$0xff]  }
  0x2f   : > { %1170 = vmatprep.subr.bf16.mxu0 %v3279_v1  ;;  %1293 = vmatprep.subr.bf16.mxu1 %v3279_v1 }
  0x30   : > { %v1027_v54 = vrot.slane %v1025_v44, 1 }
  0x32   : > { %1171 = vmatpush2.bf16.msra.mxu0 %v3155_v49  ;;  %1294 = vmatpush2.bf16.msra.mxu1 %v3156_v58  ;;  %v3588_v49 = vsel %vm902_vm0, %v988_v35, %v1008_v36  ;;  %v3172_v58 = vld [vmem:[%s4118_s7 + $0x110] sm:$0xff]   ;;  %v1667_v35 = vrot.slane %v1013_v7, 1  ;;  %v3184_v36 = vld [vmem:[%s4118_s7 + $0x100] sm:$0xff]   ;;  %v3693_v7 = vsel %vm902_vm0, %v3644_v14, %v3659_v25 }
  0x33   : > { %1432 = vmatprep.subr.bf16.mxu0 %v3279_v1  ;;  %1594 = vmatprep.subr.bf16.mxu1 %v3279_v1 }
  0x35   : > { %1173 = vmatmul.mubr.bf16.vlgmr.msra.gmra.mxu0 %v1039_v62  ;;  %1296 = vmatmul.mubr.bf16.vlgmr.msra.gmra.mxu1 %v905_v59  ;;  %v1859_v59 = vrot.slane %v3424_v22, 1  ;;  %v1662_v62 = vrot.slane %v990_v2, 4  ;;  %v3637_v22 = vor.u32 %v1027_v54, %v1023_v53  ;;  %v1861_v2 = vrot.slane %v3488_v57, 5 }
  0x36   : > { %1433 = vmatpush1.bf16.msra.mxu0 %v3165_v63  ;;  %1595 = vmatpush1.bf16.msra.mxu1 %v3166_v4  ;;  %v1858_v63 = vrot.slane %v3426_v23, 1  ;;  %v1659_v4 = vrot.slane %v983_v10, 4  ;;  %v3174_v10 = vld [vmem:[%s4118_s7 + $0x108] sm:$0xff]  }
  0x37   : > { %1434 = vmatprep.subr.bf16.mxu0 %v3279_v1  ;;  %1596 = vmatprep.subr.bf16.mxu1 %v3279_v1  ;;  %v1664_v16 = vor.u32 %v1663_v9, %v1662_v62  ;;  %v3662_v26 = vsel %vm902_vm0, %v1859_v59, %v1861_v2  ;;  %v1864_v62 = vrot.slane %v3555_v33, 5  ;;  %v3193_v2 = vld [vmem:[%s4118_s7 + $0xe8] sm:$0xff]  }
  0x38   : > { %2836 = vmatprep.mubr.msk.bf16.mxu1 %vm1132_vm1, %v3546_v29  ;;  %2823 = vmatprep.mubr.msk.bf16.mxu0 %vm1132_vm1, %v3566_v40  ;;  %v1661_v30 = vor.u32 %v1660_v3, %v1659_v4  ;;  %v873_v4 = vld [vmem:[%s3628_s25 + $0x8] sm:$0x11] }
  0x39   : > { %v3669_v8 = vsel %vm902_vm0, %v1658_v45, %v1664_v16  ;;  %v3688_v45 = vsel %vm902_vm0, %v3600_v31, %v3657_v24  ;;  %v3751_v16 = vcombine.high %v872_v15, %v873_v4  ;;  %v3753_v3 = vcombine.low %v872_v15, %v873_v4  ;;  %v3196_v15 = vld [vmem:[%s4118_s7 + $0x130] sm:$0xff]  }
  0x3a   : > { %1435 = vmatpush1.bf16.msra.mxu0 %v3167_v34  ;;  %1597 = vmatpush1.bf16.msra.mxu1 %v3168_v37  ;;  %v3672_v34 = vsel %vm902_vm0, %v1858_v63, %v1860_v18  ;;  %v1501_v37 = vsel %vm902_vm0, %v3416_v19, %v3505_v0  ;;  %v3698_v19 = vsel %vm902_vm0, %v3582_v46, %v1661_v30  ;;  %v1670_v46 = vrot.slane %v1025_v44, 5  ;;  %v3191_v63 = vld [vmem:[%s4118_s7 + $0xf0] sm:$0xff]   ;;  %v3194_v18 = vld [vmem:[%s4118_s7 + $0x138] sm:$0xff]  }
  0x3b   : > { %1436 = vmatprep.subr.bf16.mxu0 %v3279_v1  ;;  %1598 = vmatprep.subr.bf16.mxu1 %v3279_v1  ;;  %v1668_v0 = vor.u32 %v1667_v35, %v1010_v6  ;;  %v3185_v6 = vld [vmem:[%s4118_s7 + $0xa8] sm:$0xff]   ;;  %v1681_v30 = vshrl.u32 %v3753_v3, 16  ;;  %v1690_v35 = vshll.u32 %v3751_v16, 16  ;;  %v3210_v4 = vld [vmem:[%s4118_s7 + $0x150] sm:$0xff]  }
  0x3d   : > { %1181 = vmatmul.mubr.bf16.gmra.mxu0 %v3588_v49  ;;  %1304 = vmatmul.mubr.bf16.gmra.mxu1 %v3597_v28  ;;  %v3722_v44 = vsel %vm902_vm0, %v1668_v0, %v1674_v51  ;;  %v2193_v43 = vrot.slane %v1690_v35, 5 }
  0x3e   : > { %1437 = vmatpush1.bf16.msra.mxu0 %v3169_v47  ;;  %1599 = vmatpush1.bf16.msra.mxu1 %v3170_v50  ;;  %v1669_v47 = vrot.slane %v1023_v53, 4  ;;  %v1665_v50 = vrot.slane %v1005_v12, 1  ;;  %v1863_v53 = vrot.slane %v3498_v61, 1  ;;  %v3186_v12 = vld [vmem:[%s4118_s7 + $0xf8] sm:$0xff]  }
  0x3f   : > { %1438 = vmatprep.subr.bf16.mxu0 %v3279_v1  ;;  %1600 = vmatprep.subr.bf16.mxu1 %v3279_v1 }
  0x40   : > { %2837 = vmatprep.mubr.msk.bf16.mxu1 %vm1132_vm1, %v3600_v31  ;;  %2824 = vmatprep.mubr.msk.bf16.mxu0 %vm1132_vm1, %v3607_v52  ;;  %v1666_v41 = vor.u32 %v1665_v50, %v1002_v11  ;;  %v1671_v54 = vor.u32 %v1670_v46, %v1669_v47  ;;  %v1862_v11 = vrot.slane %v3496_v60, 1  ;;  %v3198_v47 = vld [vmem:[%s4118_s7 + $0x1c8] sm:$0xff]   ;;  %v1328_v50 = vrot.slane %v3548_v32, 1 }
  0x41   : > { %v2369_v46 = vrot.slane %v3751_v16, 5 }
  0x42   : > { %1439 = vmatpush1.bf16.msra.mxu0 %v3171_v55  ;;  %1601 = vmatpush1.bf16.msra.mxu1 %v3172_v58  ;;  %v1865_v55 = vrot.slane %v3548_v32, 5  ;;  %v3731_v58 = vsel %vm902_vm0, %v1666_v41, %v1671_v54  ;;  %v3743_v9 = vsel %vm902_vm0, %v1862_v11, %v1864_v62  ;;  %v1327_v41 = vrot.slane %v3555_v33, 1  ;;  %v3203_v62 = vld [vmem:[%s4118_s7 + $0x160] sm:$0xff]  }
  0x43   : > { %1440 = vmatprep.subr.bf16.mxu0 %v3279_v1  ;;  %1602 = vmatprep.subr.bf16.mxu1 %v3279_v1  ;;  %v3803_v54 = vsel %vm902_vm0, %v1328_v50, %v2369_v46  ;;  %v1325_v11 = vrot.slane %v3496_v60, 5  ;;  %v875_v46 = vld [vmem:[%s844_s17 + $0x8] sm:$0x11] }
  0x44   : > { %v3734_v59 = vsel %vm902_vm0, %v1863_v53, %v1865_v55 }
  0x45   : > { %1189 = vmatmul.mubr.bf16.gmra.mxu0 %v3637_v22  ;;  %1312 = vmatmul.mubr.bf16.gmra.mxu1 %v3644_v14 }
  0x46   : > { %1441 = vmatpush1.bf16.msra.mxu0 %v3173_v13  ;;  %1603 = vmatpush1.bf16.msra.mxu1 %v3174_v10  ;;  %v1319_v13 = vrot.slane %v3419_v20, 1  ;;  %v1321_v10 = vrot.slane %v3426_v23, 5  ;;  %v1324_v20 = vrot.slane %v3488_v57, 1  ;;  %v1326_v23 = vrot.slane %v3498_v61, 5 }
  0x47   : > { %1442 = vmatprep.subr.bf16.mxu0 %v3279_v1  ;;  %1604 = vmatprep.subr.bf16.mxu1 %v3279_v1  ;;  %v1683_v57 = vshll.u32 %v3753_v3, 16 }
  0x48   : > { %2868 = vmatprep.mubr.msk.bf16.mxu0 %vm1132_vm1, %v1336_v21  ;;  %2903 = vmatprep.mubr.msk.bf16.mxu1 %vm1132_vm1, %v1501_v37  ;;  %v3195_v21 = vld [vmem:[%s4118_s7 + $0xe0] sm:$0xff]   ;;  %v3197_v37 = vld [vmem:[%s4118_s7 + $0x178] sm:$0xff]   ;;  %v1332_v42 = vsel %vm902_vm0, %v1319_v13, %v1321_v10  ;;  %v3806_v55 = vsel %vm902_vm0, %v1324_v20, %v1326_v23  ;;  %v3219_v20 = vld [vmem:[%s4118_s7 + $0x1d0] sm:$0xff]  }
  0x49   : > { %v2190_v0 = vrot.slane %v1683_v57, 5  ;;  %v3213_v13 = vld [vmem:[%s4118_s7 + $0x198] sm:$0xff]   ;;  %v3221_v23 = vld [vmem:[%s4118_s7 + $0x268] sm:$0xff]  }
  0x4a   : > { %1443 = vmatpush1.bf16.msra.mxu0 %v3183_v27  ;;  %1605 = vmatpush1.bf16.msra.mxu1 %v3184_v36  ;;  %v1688_v27 = vshrl.u32 %v3751_v16, 16  ;;  %v2189_v36 = vrot.slane %v1681_v30, 4  ;;  %v3217_v10 = vld [vmem:[%s4118_s7 + $0x1d8] sm:$0xff]  }
  0x4b   : > { %1444 = vmatprep.subr.bf16.mxu0 %v3279_v1  ;;  %1606 = vmatprep.subr.bf16.mxu1 %v3279_v1 }
  0x4c   : > { %v2192_v61 = vrot.slane %v1688_v27, 4  ;;  %v2191_v53 = vor.u32 %v2190_v0, %v2189_v36  ;;  %v3223_v36 = vld [vmem:[%s4118_s7 + $0x260] sm:$0xff]   ;;  %v3237_v0 = vld [vmem:[%s4118_s7 + $0x228] sm:$0xff]  }
  0x4e   : > { %1445 = vmatpush1.bf16.msra.mxu0 %v3185_v6  ;;  %1607 = vmatpush1.bf16.msra.mxu1 %v3186_v12  ;;  %v2194_v51 = vor.u32 %v2193_v43, %v2192_v61  ;;  %v1499_v6 = vsel %vm902_vm0, %v3478_v48, %v3561_v38  ;;  %v2368_v12 = vrot.slane %v3753_v3, 5  ;;  %v1323_v48 = vrot.slane %v3486_v56, 1  ;;  %v3200_v56 = vld [vmem:[%s4118_s7 + $0x1c0] sm:$0xff]   ;;  %v3225_v61 = vld [vmem:[%s4118_s7 + $0x258] sm:$0xff]   ;;  %v3233_v43 = vld [vmem:[%s4118_s7 + $0x1e8] sm:$0xff]  }
  0x4f   : > { %1446 = vmatprep.subr.bf16.mxu0 %v3279_v1  ;;  %1608 = vmatprep.subr.bf16.mxu1 %v3279_v1  ;;  %v3811_v33 = vsel %vm902_vm0, %v3637_v22, %v2191_v53  ;;  %v1503_v22 = vsel %vm902_vm0, %v3563_v39, %v3644_v14  ;;  %v3207_v39 = vld [vmem:[%s4118_s7 + $0x158] sm:$0xff]   ;;  %v3208_v14 = vld [vmem:[%s4118_s7 + $0x1a8] sm:$0xff]  }
  0x50   : > { %v3800_v32 = vsel %vm902_vm0, %v3607_v52, %v2194_v51  ;;  %v3814_v38 = vsel %vm902_vm0, %v1327_v41, %v2368_v12  ;;  %v3199_v52 = vld [vmem:[%s4118_s7 + $0x170] sm:$0xff]   ;;  %v3832_v60 = vsel %vm902_vm0, %v1323_v48, %v1325_v11  ;;  %v874_v51 = vld [vmem:[%s844_s17] sm:$0xff]  ;;  %v3241_v53 = vld [vmem:[%s4118_s7 + $0x2b8] sm:$0xff]  }
  0x51   : > { %v3242_v48 = vld [vmem:[%s4118_s7 + $0x2b0] sm:$0xff]   ;;  %v3243_v11 = vld [vmem:[%s4118_s7 + $0x2a8] sm:$0xff]  }
  0x52   : > { %1447 = vmatpush1.bf16.msra.mxu0 %v3190_v17  ;;  %1609 = vmatpush1.bf16.msra.mxu1 %v3191_v63  ;;  %v1505_v17 = vsel %vm902_vm0, %v3512_v5, %v3600_v31  ;;  %v3201_v5 = vld [vmem:[%s4118_s7 + $0x168] sm:$0xff]   ;;  %v3202_v31 = vld [vmem:[%s4118_s7 + $0x1b8] sm:$0xff]   ;;  %v3204_v63 = vld [vmem:[%s4118_s7 + $0x1b0] sm:$0xff]  }
  0x53   : > { %1460 = vmatprep.subr.bf16.mxu0 %v3279_v1  ;;  %1622 = vmatprep.subr.bf16.mxu1 %v3279_v1 }
  0x56   : > { %1461 = vmatpush2.bf16.msra.mxu0 %v3193_v2  ;;  %1623 = vmatpush2.bf16.msra.mxu1 %v3194_v18  ;;  %v3216_v2 = vld [vmem:[%s4118_s7 + $0x188] sm:$0xff]   ;;  %v3218_v18 = vld [vmem:[%s4118_s7 + $0x180] sm:$0xff]  }
  0x57   : > { %1462 = vmatprep.subr.bf16.mxu0 %v3279_v1  ;;  %1624 = vmatprep.subr.bf16.mxu1 %v3279_v1 }
  0x5a   : > { %1463 = vmatpush2.bf16.msra.mxu0 %v3195_v21  ;;  %1625 = vmatpush2.bf16.msra.mxu1 %v3196_v15  ;;  %v3220_v21 = vld [vmem:[%s4118_s7 + $0x218] sm:$0xff]   ;;  %v3222_v15 = vld [vmem:[%s4118_s7 + $0x210] sm:$0xff]  }
  0x5b   : > { %1797 = vmatprep.subr.bf16.mxu0 %v3279_v1  ;;  %1971 = vmatprep.subr.bf16.mxu1 %v3279_v1 }
  0x5d   : > { %1465 = vmatmul.mubr.bf16.vlgmr.msra.gmra.mxu0 %v1332_v42  ;;  %1627 = vmatmul.mubr.bf16.vlgmr.msra.gmra.mxu1 %v1499_v6  ;;  %v3238_v42 = vld [vmem:[%s4118_s7 + $0x278] sm:$0xff]   ;;  %v3240_v6 = vld [vmem:[%s4118_s7 + $0x270] sm:$0xff]  }
  0x5e   : > { %1798 = vmatpush1.bf16.msra.mxu0 %v3197_v37  ;;  %1972 = vmatpush1.bf16.msra.mxu1 %v3198_v47  ;;  %v3226_v37 = vld [vmem:[%s4118_s7 + $0x200] sm:$0xff]   ;;  %v3234_v47 = vld [vmem:[%s4118_s7 + $0x238] sm:$0xff]  }
  0x5f   : > { %1799 = vmatprep.subr.bf16.mxu0 %v3279_v1  ;;  %1973 = vmatprep.subr.bf16.mxu1 %v3279_v1 }
  0x60   : > { %2869 = vmatprep.mubr.msk.bf16.mxu0 %vm1132_vm1, %v3806_v55  ;;  %2904 = vmatprep.mubr.msk.bf16.mxu1 %vm1132_vm1, %v1505_v17 }
  0x62   : > { %1800 = vmatpush1.bf16.msra.mxu0 %v3199_v52  ;;  %1974 = vmatpush1.bf16.msra.mxu1 %v3200_v56  ;;  %v4031_v52 = vcombine.low %v874_v51, %v875_v46  ;;  %v2975_v56 = vcombine.high %v874_v51, %v874_v51 }
  0x63   : > { %1801 = vmatprep.subr.bf16.mxu0 %v3279_v1  ;;  %1975 = vmatprep.subr.bf16.mxu1 %v3279_v1 }
  0x64   : > { %v2203_v17 = vshll.u32 %v4031_v52, 16 }
  0x65   : > { %1473 = vmatmul.mubr.bf16.gmra.mxu0 %v3832_v60  ;;  %1635 = vmatmul.mubr.bf16.gmra.mxu1 %v1503_v22  ;;  %v2974_v22 = vcombine.low %v874_v51, %v874_v51 }
  0x66   : > { %1802 = vmatpush1.bf16.msra.mxu0 %v3201_v5  ;;  %1976 = vmatpush1.bf16.msra.mxu1 %v3202_v31  ;;  %v2201_v5 = vshrl.u32 %v4031_v52, 16  ;;  %v2205_v31 = vrot.slane %v2203_v17, 1 }
  0x67   : > { %1803 = vmatprep.subr.bf16.mxu0 %v3279_v1  ;;  %1977 = vmatprep.subr.bf16.mxu1 %v3279_v1 }
  0x68   : > { %2870 = vmatprep.mubr.msk.bf16.mxu0 %vm1132_vm1, %v1328_v50  ;;  %2905 = vmatprep.mubr.msk.bf16.mxu1 %vm1132_vm1, %v3657_v24  ;;  %v3211_v24 = vld [vmem:[%s4118_s7 + $0x1a0] sm:$0xff]  }
  0x69   : > { %v3239_v50 = vld [vmem:[%s4118_s7 + $0x220] sm:$0xff]  }
  0x6a   : > { %1804 = vmatpush1.bf16.msra.mxu0 %v3203_v62  ;;  %1978 = vmatpush1.bf16.msra.mxu1 %v3204_v63  ;;  %v3250_v62 = vld [vmem:[%s4118_s7 + $0x290] sm:$0xff]   ;;  %v3251_v63 = vld [vmem:[%s4118_s7 + $0x288] sm:$0xff]  }
  0x6b   : > { %1805 = vmatprep.subr.bf16.mxu0 %v3279_v1  ;;  %1979 = vmatprep.subr.bf16.mxu1 %v3279_v1 }
  0x6d   : > { %1481 = vmatmul.mubr.bf16.gmra.mxu0 %v1327_v41  ;;  %1643 = vmatmul.mubr.bf16.gmra.mxu1 %v3659_v25  ;;  %v3212_v25 = vld [vmem:[%s4118_s7 + $0x148] sm:$0xff]   ;;  %v4018_v41 = vcombine.high %v874_v51, %v875_v46 }
  0x6e   : > { %1806 = vmatpush1.bf16.msra.mxu0 %v3207_v39  ;;  %1980 = vmatpush1.bf16.msra.mxu1 %v3208_v14  ;;  %v3252_v39 = vld [vmem:[%s4118_s7 + $0x280] sm:$0xff]  }
  0x6f   : > { %1807 = vmatprep.subr.bf16.mxu0 %v3279_v1  ;;  %1981 = vmatprep.subr.bf16.mxu1 %v3279_v1  ;;  %v2210_v12 = vshll.u32 %v4018_v41, 16  ;;  %v2371_v14 = vrot.slane %v4018_v41, 1 }
  0x70   : > { %2938 = vmatprep.mubr.msk.bf16.mxu0 %vm1132_vm1, %v3669_v8  ;;  %2971 = vmatprep.mubr.msk.bf16.mxu1 %vm1132_vm1, %v3662_v26  ;;  %v3214_v8 = vld [vmem:[%s4118_s7 + $0x140] sm:$0xff]   ;;  %v3215_v26 = vld [vmem:[%s4118_s7 + $0x190] sm:$0xff]  }
  0x72   : > { %1808 = vmatpush1.bf16.msra.mxu0 %v3210_v4  ;;  %1982 = vmatpush1.bf16.msra.mxu1 %v3211_v24  ;;  %v2370_v4 = vrot.slane %v4031_v52, 1 }
  0x73   : > { %1809 = vmatprep.subr.bf16.mxu0 %v3279_v1  ;;  %1983 = vmatprep.subr.bf16.mxu1 %v3279_v1 }
  0x76   : > { %1810 = vmatpush1.bf16.msra.mxu0 %v3212_v25  ;;  %1984 = vmatpush1.bf16.msra.mxu1 %v3213_v13 }
  0x77   : > { %1811 = vmatprep.subr.bf16.mxu0 %v3279_v1  ;;  %1985 = vmatprep.subr.bf16.mxu1 %v3279_v1 }
  0x7a   : > { %1812 = vmatpush1.bf16.msra.mxu0 %v3214_v8  ;;  %1986 = vmatpush1.bf16.msra.mxu1 %v3215_v26 }
  0x7b   : > { %1825 = vmatprep.subr.bf16.mxu0 %v3279_v1  ;;  %1999 = vmatprep.subr.bf16.mxu1 %v3279_v1 }
  0x7e   : > { %1826 = vmatpush2.bf16.msra.mxu0 %v3216_v2  ;;  %2000 = vmatpush2.bf16.msra.mxu1 %v3217_v10 }
  0x7f   : > { %1827 = vmatprep.subr.bf16.mxu0 %v3279_v1  ;;  %2001 = vmatprep.subr.bf16.mxu1 %v3279_v1 }
  0x82   : > { %1828 = vmatpush2.bf16.msra.mxu0 %v3218_v18  ;;  %2002 = vmatpush2.bf16.msra.mxu1 %v3219_v20 }
  0x83   : > { %2128 = vmatprep.subr.bf16.mxu0 %v3279_v1  ;;  %2307 = vmatprep.subr.bf16.mxu1 %v3279_v1 }
  0x85   : > { %1830 = vmatmul.mubr.bf16.vlgmr.msra.gmra.mxu0 %v3698_v19  ;;  %2004 = vmatmul.mubr.bf16.vlgmr.msra.gmra.mxu1 %v3672_v34  ;;  %v1692_v34 = vrot.slane %v1690_v35, 1  ;;  %v3224_v19 = vld [vmem:[%s4118_s7 + $0x208] sm:$0xff]   ;;  %v1867_v35 = vrot.slane %v3751_v16, 1  ;;  %v1866_v16 = vrot.slane %v3753_v3, 1  ;;  %v3232_v3 = vld [vmem:[%s4118_s7 + $0x240] sm:$0xff]  }
  0x86   : > { %2129 = vmatpush1.bf16.msra.mxu0 %v3220_v21  ;;  %2308 = vmatpush1.bf16.msra.mxu1 %v3221_v23 }
  0x87   : > { %2130 = vmatprep.subr.bf16.mxu0 %v3279_v1  ;;  %2309 = vmatprep.subr.bf16.mxu1 %v3279_v1 }
  0x88   : > { %2939 = vmatprep.mubr.msk.bf16.mxu0 %vm1132_vm1, %v3722_v44  ;;  %2972 = vmatprep.mubr.msk.bf16.mxu1 %vm1132_vm1, %v3734_v59  ;;  %v1693_v44 = vor.u32 %v1692_v34, %v1688_v27  ;;  %v1685_v59 = vrot.slane %v1683_v57, 1  ;;  %v3227_v27 = vld [vmem:[%s4118_s7 + $0x250] sm:$0xff]   ;;  %v3230_v57 = vld [vmem:[%s4118_s7 + $0x248] sm:$0xff]  }
  0x8a   : > { %2131 = vmatpush1.bf16.msra.mxu0 %v3222_v15  ;;  %2310 = vmatpush1.bf16.msra.mxu1 %v3223_v36 }
  0x8b   : > { %2132 = vmatprep.subr.bf16.mxu0 %v3279_v1  ;;  %2311 = vmatprep.subr.bf16.mxu1 %v3279_v1 }
  0x8d   : > { %1838 = vmatmul.mubr.bf16.gmra.mxu0 %v3731_v58  ;;  %2012 = vmatmul.mubr.bf16.gmra.mxu1 %v3743_v9  ;;  %v1686_v58 = vor.u32 %v1685_v59, %v1681_v30  ;;  %v3229_v9 = vld [vmem:[%s4118_s7 + $0x1f8] sm:$0xff]   ;;  %v3231_v30 = vld [vmem:[%s4118_s7 + $0x1f0] sm:$0xff]  }
  0x8e   : > { %2133 = vmatpush1.bf16.msra.mxu0 %v3224_v19  ;;  %2312 = vmatpush1.bf16.msra.mxu1 %v3225_v61 }
  0x8f   : > { %2134 = vmatprep.subr.bf16.mxu0 %v3279_v1  ;;  %2313 = vmatprep.subr.bf16.mxu1 %v3279_v1 }
  0x90   : > { %2940 = vmatprep.mubr.msk.bf16.mxu0 %vm1132_vm1, %v1693_v44  ;;  %2973 = vmatprep.mubr.msk.bf16.mxu1 %vm1132_vm1, %v1867_v35 }
  0x92   : > { %2135 = vmatpush1.bf16.msra.mxu0 %v3226_v37  ;;  %2314 = vmatpush1.bf16.msra.mxu1 %v3227_v27 }
  0x93   : > { %2136 = vmatprep.subr.bf16.mxu0 %v3279_v1  ;;  %2315 = vmatprep.subr.bf16.mxu1 %v3279_v1 }
  0x95   : > { %1846 = vmatmul.mubr.bf16.gmra.mxu0 %v1686_v58  ;;  %2020 = vmatmul.mubr.bf16.gmra.mxu1 %v1866_v16 }
  0x96   : > { %2137 = vmatpush1.bf16.msra.mxu0 %v3229_v9  ;;  %2316 = vmatpush1.bf16.msra.mxu1 %v3230_v57 }
  0x97   : > { %2138 = vmatprep.subr.bf16.mxu0 %v3279_v1  ;;  %2317 = vmatprep.subr.bf16.mxu1 %v3279_v1 }
  0x98   : > { %3006 = vmatprep.mubr.msk.bf16.mxu0 %vm1132_vm1, %v3546_v29  ;;  %3041 = vmatprep.mubr.msk.bf16.mxu1 %vm1132_vm1, %v3566_v40  ;;  %v3235_v29 = vld [vmem:[%s4118_s7 + $0x1e0] sm:$0xff]   ;;  %v3236_v40 = vld [vmem:[%s4118_s7 + $0x230] sm:$0xff]  }
  0x9a   : > { %2139 = vmatpush1.bf16.msra.mxu0 %v3231_v30  ;;  %2318 = vmatpush1.bf16.msra.mxu1 %v3232_v3 }
  0x9b   : > { %2140 = vmatprep.subr.bf16.mxu0 %v3279_v1  ;;  %2319 = vmatprep.subr.bf16.mxu1 %v3279_v1 }
  0x9e   : > { %2141 = vmatpush1.bf16.msra.mxu0 %v3233_v43  ;;  %2320 = vmatpush1.bf16.msra.mxu1 %v3234_v47 }
  0x9f   : > { %2142 = vmatprep.subr.bf16.mxu0 %v3279_v1  ;;  %2321 = vmatprep.subr.bf16.mxu1 %v3279_v1 }
  0xa2   : > { %2143 = vmatpush1.bf16.msra.mxu0 %v3235_v29  ;;  %2322 = vmatpush1.bf16.msra.mxu1 %v3236_v40 }
  0xa3   : > { %2156 = vmatprep.subr.bf16.mxu0 %v3279_v1  ;;  %2335 = vmatprep.subr.bf16.mxu1 %v3279_v1 }
  0xa6   : > { %2157 = vmatpush2.bf16.msra.mxu0 %v3237_v0  ;;  %2336 = vmatpush2.bf16.msra.mxu1 %v3238_v42 }
  0xa7   : > { %2158 = vmatprep.subr.bf16.mxu0 %v3279_v1  ;;  %2337 = vmatprep.subr.bf16.mxu1 %v3279_v1 }
  0xaa   : > { %2159 = vmatpush2.bf16.msra.mxu0 %v3239_v50  ;;  %2338 = vmatpush2.bf16.msra.mxu1 %v3240_v6 }
  0xab   : > { %2465 = vmatprep.subr.bf16.mxu0 %v3279_v1  ;;  %3088 = vmatprep.subr.bf16.mxu1 %v3279_v1 }
  0xad   : > { %2161 = vmatmul.mubr.bf16.vlgmr.msra.gmra.mxu0 %v3597_v28  ;;  %2340 = vmatmul.mubr.bf16.vlgmr.msra.gmra.mxu1 %v3588_v49  ;;  %v2208_v49 = vshrl.u32 %v4018_v41, 16  ;;  %v2212_v28 = vrot.slane %v2210_v12, 1 }
  0xae   : > { %2466 = vmatpush1.bf16.msra.mxu0 %v3241_v53  ;;  %3098 = vmatpush1.bf16.msra.mxu1 %v3241_v53 }
  0xaf   : > { %2467 = vmatprep.subr.bf16.mxu0 %v3279_v1  ;;  %3089 = vmatprep.subr.bf16.mxu1 %v3279_v1 }
  0xb0   : > { %3007 = vmatprep.mubr.msk.bf16.mxu0 %vm1132_vm1, %v3688_v45  ;;  %3042 = vmatprep.mubr.msk.bf16.mxu1 %vm1132_vm1, %v3800_v32  ;;  %v2213_v45 = vor.u32 %v2212_v28, %v2208_v49  ;;  %v3244_v32 = vld [vmem:[%s4118_s7 + $0x2a0] sm:$0xff]  }
  0xb2   : > { %2468 = vmatpush1.bf16.msra.mxu0 %v3242_v48  ;;  %3099 = vmatpush1.bf16.msra.mxu1 %v3242_v48 }
  0xb3   : > { %2469 = vmatprep.subr.bf16.mxu0 %v3279_v1  ;;  %3090 = vmatprep.subr.bf16.mxu1 %v3279_v1 }
  0xb5   : > { %2169 = vmatmul.mubr.bf16.gmra.mxu0 %v3693_v7  ;;  %2348 = vmatmul.mubr.bf16.gmra.mxu1 %v3811_v33  ;;  %v3248_v7 = vld [vmem:[%s4118_s7 + $0x298] sm:$0xff]   ;;  %v2206_v33 = vor.u32 %v2205_v31, %v2201_v5 }
  0xb6   : > { %2470 = vmatpush1.bf16.msra.mxu0 %v3243_v11  ;;  %3100 = vmatpush1.bf16.msra.mxu1 %v3243_v11 }
  0xb7   : > { %2471 = vmatprep.subr.bf16.mxu0 %v3279_v1  ;;  %3091 = vmatprep.subr.bf16.mxu1 %v3279_v1 }
  0xb8   : > { %3008 = vmatprep.mubr.msk.bf16.mxu0 %vm1132_vm1, %v2975_v56  ;;  %3043 = vmatprep.mubr.msk.bf16.mxu1 %vm1132_vm1, %v2213_v45 }
  0xba   : > { %2472 = vmatpush1.bf16.msra.mxu0 %v3244_v32  ;;  %3101 = vmatpush1.bf16.msra.mxu1 %v3244_v32 }
  0xbb   : > { %2473 = vmatprep.subr.bf16.mxu0 %v3279_v1  ;;  %3092 = vmatprep.subr.bf16.mxu1 %v3279_v1 }
  0xbd   : > { %2177 = vmatmul.mubr.bf16.gmra.mxu0 %v2974_v22  ;;  %2356 = vmatmul.mubr.bf16.gmra.mxu1 %v2206_v33 }
  0xbe   : > { %2474 = vmatpush1.bf16.msra.mxu0 %v3248_v7  ;;  %3102 = vmatpush1.bf16.msra.mxu1 %v3248_v7 }
  0xbf   : > { %2475 = vmatprep.subr.bf16.mxu0 %v3279_v1  ;;  %3093 = vmatprep.subr.bf16.mxu1 %v3279_v1 }
  0xc0   : > { %3074 = vmatprep.mubr.msk.bf16.mxu0 %vm1132_vm1, %v3806_v55  ;;  %3075 = vmatprep.mubr.msk.bf16.mxu1 %vm1132_vm1, %v3803_v54  ;;  %v3253_v54 = vld [vmem:[%s4118_s7 + $0x2c8] sm:$0xff]   ;;  %v3254_v55 = vld [vmem:[%s4118_s7 + $0x2c0] sm:$0xff]  }
  0xc2   : > { %2476 = vmatpush1.bf16.msra.mxu0 %v3250_v62  ;;  %3103 = vmatpush1.bf16.msra.mxu1 %v3250_v62 }
  0xc3   : > { %2477 = vmatprep.subr.bf16.mxu0 %v3279_v1  ;;  %3094 = vmatprep.subr.bf16.mxu1 %v3279_v1 }
  0xc6   : > { %2478 = vmatpush1.bf16.msra.mxu0 %v3251_v63  ;;  %3104 = vmatpush1.bf16.msra.mxu1 %v3251_v63 }
  0xc7   : > { %2479 = vmatprep.subr.bf16.mxu0 %v3279_v1  ;;  %3095 = vmatprep.subr.bf16.mxu1 %v3279_v1 }
  0xca   : > { %2480 = vmatpush1.bf16.msra.mxu0 %v3252_v39  ;;  %3105 = vmatpush1.bf16.msra.mxu1 %v3252_v39 }
  0xcb   : > { %2493 = vmatprep.subr.bf16.mxu0 %v3279_v1  ;;  %3096 = vmatprep.subr.bf16.mxu1 %v3279_v1 }
  0xce   : > { %2494 = vmatpush2.bf16.msra.mxu0 %v3253_v54  ;;  %3106 = vmatpush2.bf16.msra.mxu1 %v3253_v54 }
  0xcf   : > { %2495 = vmatprep.subr.bf16.mxu0 %v3279_v1  ;;  %3097 = vmatprep.subr.bf16.mxu1 %v3279_v1 }
  0xd2   : > { %2496 = vmatpush2.bf16.msra.mxu0 %v3254_v55  ;;  %3107 = vmatpush2.bf16.msra.mxu1 %v3254_v55 }
  0xd5   : > { %2498 = vmatmul.mubr.bf16.vlgmr.msra.gmra.mxu0 %v3832_v60  ;;  %2506 = vmatmul.mubr.bf16.vlgmr.msra.gmra.mxu1 %v3814_v38 }
  0xd6   : > { %3076 = vmatprep.mubr.msk.bf16.mxu1 %vm1132_vm1, %v2371_v14 }
  0xdd   : > { %2514 = vmatmul.mubr.bf16.gmra.mxu1 %v2370_v4 }
  0xf5   : > { %v1174_v24 = vpop.f32.mrf.mxu0  ;;  %v1297_v25 = vpop.f32.mrf.mxu1 }
  0xf6   : > { %v1298_v13 = vadd.f32 %v1297_v25, %v1174_v24 }
  0xf7   : > { %v1176_v8 = vpop.f32.mrf.mxu0  ;;  %v1299_v26 = vpop.f32.mrf.mxu1 }
  0xf9   : > { %v1177_v2 = vpop.f32.mrf.mxu0  ;;  %v1300_v1 = vpop.f32.mrf.mxu1 }
  0xfa   : > { %v1301_v10 = vadd.f32 %v1300_v1, %v1177_v2 }
  0xfb   : > { %v1179_v18 = vpop.f32.mrf.mxu0  ;;  %v1302_v20 = vpop.f32.mrf.mxu1 }
  0xfd   : > { %v1182_v21 = vpop.f32.mrf.mxu0  ;;  %v1305_v23 = vpop.f32.mrf.mxu1 }
  0xfe   : > { %v1306_v60 = vadd.f32 %v1305_v23, %v1182_v21 }
  0xff   : > { %v1184_v15 = vpop.f32.mrf.mxu0  ;;  %v1307_v38 = vpop.f32.mrf.mxu1 }
 0x101   : > { %v1185_v36 = vpop.f32.mrf.mxu0  ;;  %v1308_v34 = vpop.f32.mrf.mxu1 }
 0x102   : > { %v1309_v19 = vadd.f32 %v1308_v34, %v1185_v36 }
 0x103   : > { %v1187_v61 = vpop.f32.mrf.mxu0  ;;  %v1310_v44 = vpop.f32.mrf.mxu1 }
 0x105   : > { %v1190_v59 = vpop.f32.mrf.mxu0  ;;  %v1313_v35 = vpop.f32.mrf.mxu1 }
 0x106   : > { %v1314_v37 = vadd.f32 %v1313_v35, %v1190_v59 }
 0x107   : > { %v1192_v27 = vpop.f32.mrf.mxu0  ;;  %v1315_v58 = vpop.f32.mrf.mxu1 }
 0x109   : > { %v1193_v9 = vpop.f32.mrf.mxu0  ;;  %v1316_v16 = vpop.f32.mrf.mxu1 }
 0x10b   : > { %v1194_v57 = vpop.f32.mrf.mxu0  ;;  %v1317_v30 = vpop.f32.mrf.mxu1 }
 0x11d   : > { %v1466_v3 = vpop.f32.mrf.mxu0  ;;  %v1628_v47 = vpop.f32.mrf.mxu1 }
 0x11e   : > { %v1488_v43 = vadd.f32 %v1466_v3, %v1298_v13 }
 0x11f   : > { %v1468_v29 = vpop.f32.mrf.mxu0  ;;  %v1630_v0 = vpop.f32.mrf.mxu1 }
 0x120   : > { %v1650_v40 = vadd.f32 %v1628_v47, %v1488_v43 }
 0x121   : > { %v1469_v42 = vpop.f32.mrf.mxu0  ;;  %v1631_v51 = vpop.f32.mrf.mxu1 }
 0x122   : > { %v1489_v50 = vadd.f32 %v1469_v42, %v1301_v10 }
 0x123   : > { %v1471_v46 = vpop.f32.mrf.mxu0  ;;  %v1633_v41 = vpop.f32.mrf.mxu1 }
 0x124   : > { %v1651_v6 = vadd.f32 %v1631_v51, %v1489_v50 }
 0x125   : > { %v1474_v53 = vpop.f32.mrf.mxu0  ;;  %v1636_v48 = vpop.f32.mrf.mxu1 }
 0x126   : > { %v1490_v12 = vadd.f32 %v1474_v53, %v1306_v60 }
 0x127   : > { %v1476_v52 = vpop.f32.mrf.mxu0  ;;  %v1638_v28 = vpop.f32.mrf.mxu1 }
 0x128   : > { %v1652_v49 = vadd.f32 %v1636_v48, %v1490_v12 }
 0x129   : > { %v1477_v11 = vpop.f32.mrf.mxu0  ;;  %v1639_v56 = vpop.f32.mrf.mxu1 }
 0x12a   : > { %v1491_v17 = vadd.f32 %v1477_v11, %v1309_v19 }
 0x12b   : > { %v1479_v45 = vpop.f32.mrf.mxu0  ;;  %v1641_v5 = vpop.f32.mrf.mxu1 }
 0x12c   : > { %v1653_v32 = vadd.f32 %v1639_v56, %v1491_v17 }
 0x12d   : > { %v1482_v31 = vpop.f32.mrf.mxu0  ;;  %v1644_v7 = vpop.f32.mrf.mxu1 }
 0x12e   : > { %v1492_v22 = vadd.f32 %v1482_v31, %v1314_v37 }
 0x12f   : > { %v1484_v33 = vpop.f32.mrf.mxu0  ;;  %v1646_v63 = vpop.f32.mrf.mxu1 }
 0x130   : > { %v1654_v62 = vadd.f32 %v1644_v7, %v1492_v22 }
 0x131   : > { %v1485_v39 = vpop.f32.mrf.mxu0  ;;  %v1647_v54 = vpop.f32.mrf.mxu1 }
 0x133   : > { %v1486_v55 = vpop.f32.mrf.mxu0  ;;  %v1648_v14 = vpop.f32.mrf.mxu1 }
 0x145   : > { %v1831_v4 = vpop.f32.mrf.mxu0  ;;  %v2005_v25 = vpop.f32.mrf.mxu1 }
 0x146   : > { %v1853_v24 = vadd.f32 %v1831_v4, %v1650_v40 }
 0x147   : > { %v1833_v13 = vpop.f32.mrf.mxu0  ;;  %v2007_v26 = vpop.f32.mrf.mxu1 }
 0x148   : > { %v2027_v8 = vadd.f32 %v2005_v25, %v1853_v24  ;;  %v3077_v24 = vld [vmem:[%s4119_s8] ss:$0 sm:$0xff] }
 0x149   : > { %v1834_v2 = vpop.f32.mrf.mxu0  ;;  %v2008_v10 = vpop.f32.mrf.mxu1 }
 0x14a   : > { %v1854_v1 = vadd.f32 %v1834_v2, %v1651_v6 }
 0x14b   : > { %v1836_v18 = vpop.f32.mrf.mxu0  ;;  %v2010_v21 = vpop.f32.mrf.mxu1 }
 0x14c   : > { %v2028_v20 = vadd.f32 %v2008_v10, %v1854_v1 }
 0x14d   : > { %v1839_v23 = vpop.f32.mrf.mxu0  ;;  %v2013_v15 = vpop.f32.mrf.mxu1 }
 0x14e   : > { %v1855_v60 = vadd.f32 %v1839_v23, %v1652_v49 }
 0x14f   : > { %v1841_v38 = vpop.f32.mrf.mxu0  ;;  %v2015_v34 = vpop.f32.mrf.mxu1 }
 0x150   : > { %v2029_v36 = vadd.f32 %v2013_v15, %v1855_v60 }
 0x151   : > { %v1842_v19 = vpop.f32.mrf.mxu0  ;;  %v2016_v44 = vpop.f32.mrf.mxu1 }
 0x152   : > { %v1856_v61 = vadd.f32 %v1842_v19, %v1653_v32 }
 0x153   : > { %v1844_v59 = vpop.f32.mrf.mxu0  ;;  %v2018_v37 = vpop.f32.mrf.mxu1 }
 0x154   : > { %v2030_v35 = vadd.f32 %v2016_v44, %v1856_v61 }
 0x155   : > { %v1847_v27 = vpop.f32.mrf.mxu0  ;;  %v2021_v9 = vpop.f32.mrf.mxu1 }
 0x156   : > { %v1857_v58 = vadd.f32 %v1847_v27, %v1654_v62 }
 0x157   : > { %v1849_v16 = vpop.f32.mrf.mxu0  ;;  %v2023_v30 = vpop.f32.mrf.mxu1 }
 0x158   : > { %v2031_v57 = vadd.f32 %v2021_v9, %v1857_v58 }
 0x159   : > { %v1850_v3 = vpop.f32.mrf.mxu0  ;;  %v2024_v43 = vpop.f32.mrf.mxu1 }
 0x15b   : > { %v1851_v47 = vpop.f32.mrf.mxu0  ;;  %v2025_v29 = vpop.f32.mrf.mxu1 }
 0x16d   : > { %v2162_v40 = vpop.f32.mrf.mxu0  ;;  %v2341_v0 = vpop.f32.mrf.mxu1 }
 0x16e   : > { %v2184_v62 = vadd.f32 %v2162_v40, %v2027_v8 }
 0x16f   : > { %v2164_v42 = vpop.f32.mrf.mxu0  ;;  %v2343_v50 = vpop.f32.mrf.mxu1 }
 0x170   : > { %v2363_v39 = vadd.f32 %v2341_v0, %v2184_v62 }
 0x171   : > { %v2165_v51 = vpop.f32.mrf.mxu0  ;;  %v2344_v46 = vpop.f32.mrf.mxu1 }
 0x172   : > { %v2185_v54 = vadd.f32 %v2165_v51, %v2028_v20 }
 0x173   : > { %v2167_v6 = vpop.f32.mrf.mxu0  ;;  %v2346_v41 = vpop.f32.mrf.mxu1 }
 0x174   : > { %v2364_v8 = vadd.f32 %v2344_v46, %v2185_v54 }
 0x175   : > { %v2170_v53 = vpop.f32.mrf.mxu0  ;;  %v2349_v12 = vpop.f32.mrf.mxu1 }
 0x176   : > { %v2186_v63 = vadd.f32 %v2170_v53, %v2029_v36 }
 0x177   : > { %v2172_v48 = vpop.f32.mrf.mxu0  ;;  %v2351_v52 = vpop.f32.mrf.mxu1 }
 0x178   : > { %v2365_v55 = vadd.f32 %v2349_v12, %v2186_v63 }
 0x179   : > { %v2173_v49 = vpop.f32.mrf.mxu0  ;;  %v2352_v28 = vpop.f32.mrf.mxu1 }
 0x17a   : > { %v2187_v14 = vadd.f32 %v2173_v49, %v2030_v35 }
 0x17b   : > { %v2175_v11 = vpop.f32.mrf.mxu0  ;;  %v2354_v17 = vpop.f32.mrf.mxu1 }
 0x17c   : > { %v2366_v18 = vadd.f32 %v2352_v28, %v2187_v14 }
 0x17d   : > { %v2178_v56 = vpop.f32.mrf.mxu0  ;;  %v2357_v45 = vpop.f32.mrf.mxu1 }
 0x17e   : > { %v2188_v20 = vadd.f32 %v2178_v56, %v2031_v57 }
 0x17f   : > { %v2180_v32 = vpop.f32.mrf.mxu0  ;;  %v2359_v5 = vpop.f32.mrf.mxu1 }
 0x180   : > { %v2367_v61 = vadd.f32 %v2357_v45, %v2188_v20 }
 0x181   : > { %v2181_v31 = vpop.f32.mrf.mxu0  ;;  %v2360_v22 = vpop.f32.mrf.mxu1 }
 0x183   : > { %v2182_v7 = vpop.f32.mrf.mxu0  ;;  %v2361_v33 = vpop.f32.mrf.mxu1 }
 0x195   : > { %v2499_v4 = vpop.f32.mrf.mxu0  ;;  %v2507_v13 = vpop.f32.mrf.mxu1 }
 0x196   : > { %v2521_v25 = vadd.f32 %v2499_v4, %v2363_v39  ;;  %v2523_v26 = vadd.f32 %v2507_v13, %v2365_v55 }
 0x197   : > { %v2501_v2 = vpop.f32.mrf.mxu0  ;;  %v2509_v10 = vpop.f32.mrf.mxu1 }
 0x198   : > { %v2533_v1 = vadd.f32 %v3077_v24, %v2521_v25  ;;  %v2535_v21 = vadd.f32 %v3077_v24, %v2523_v26 }
 0x199   : > { %v2502_v23 = vpop.f32.mrf.mxu0  ;;  %v2510_v15 = vpop.f32.mrf.mxu1 }
 0x19a   : > { %2538 = vst [vmem:[%s859_s13] sm:$0xff] %v2533_v1  ;;  %v2522_v60 = vadd.f32 %v2502_v23, %v2364_v8  ;;  %2540 = vst [vmem:[%s859_s13 + $0x10] sm:$0xff] %v2535_v21  ;;  %v2524_v38 = vadd.f32 %v2510_v15, %v2366_v18 }
 0x19b   : > { %v2504_v36 = vpop.f32.mrf.mxu0  ;;  %v2512_v19 = vpop.f32.mrf.mxu1 }
 0x19c   : > { %v2534_v34 = vadd.f32 %v3077_v24, %v2522_v60  ;;  %v2536_v44 = vadd.f32 %v3077_v24, %v2524_v38 }
 0x19d   : > { %v2515_v59 = vpop.f32.mrf.mxu1 }
 0x19e   : > { %2539 = vst [vmem:[%s859_s13 + $0x8] sm:$0xff] %v2534_v34  ;;  %2541 = vst [vmem:[%s859_s13 + $0x18] sm:$0xff] %v2536_v44  ;;  %v2525_v35 = vadd.f32 %v2515_v59, %v2367_v61 }
 0x19f   : > { %v2517_v37 = vpop.f32.mrf.mxu1 }
 0x1a0   : > { %v2537_v27 = vadd.f32 %v3077_v24, %v2525_v35 }
 0x1a1   : > { %v2518_v58 = vpop.f32.mrf.mxu1 }
 0x1a2   : > { %2542 = vst [vmem:[%s859_s13 + $0x20] sm:$0xff] %v2537_v27 }
 0x1a3   : > { %v2519_v9 = vpop.f32.mrf.mxu1 }
 0x1a4 PF: > { %s19_s11 = sadd.s32 1, %s3277_s11   ;;  %s4121_s30 = smov %s3273_s10 }
 0x1a5   : > { %p16_p5 = scmp.ge.s32.totalorder %s19_s11, 4   ;;  %s4122_s10 = smov %s4124_s12 }
 0x1a7   :  { %18 = sbr.rel (!%p16_p5) target bundleno = 2 (0x2), region = 112 }

// kernel: tokenizer_forward.7
= control target key start
LH: loop header
LB: loop body
LE: loop exit
PB: predicated region body
PF: predicated region fallthrough
CT: control target
= control target key end

     0   :  { %v2193_v0 = vmov 0   ;;  %v2194_v3 = vmov 2   ;;  %v2195_v4 = vmov 1   ;;  %v2196_v6 = vmov 3   ;;  %s4034_s4 = inlined_call_operand.vmem [shape: f32[6,2], index: 4, kind: input, shape index: {}]   ;;  %s4035_s1 = inlined_call_operand.vmem [shape: f32[6,4], index: 1, kind: input, shape index: {}]   ;;  %s4036_s3 = inlined_call_operand.vmem [shape: f32[6,2], index: 3, kind: input, shape index: {}]   ;;  %s4037_s2 = inlined_call_operand.vmem [shape: s32[6,2], index: 2, kind: input, shape index: {}]   ;;  %s4038_s6 = inlined_call_operand.vmem [shape: f32[4,1], index: 6, kind: input, shape index: {}]   ;;  %s4039_s5 = inlined_call_operand.vmem [shape: f32[4,6], index: 5, kind: input, shape index: {}]   ;;  %s4040_s0 = inlined_call_operand.vmem [shape: f32[6,2048], index: 0, kind: input, shape index: {}]   ;;  %s4041_s8 = inlined_call_operand.vmem [shape: s32[2,2048], index: 8, kind: output, shape index: {1}]   ;;  %s4042_s7 = inlined_call_operand.vmem [shape: bf16[4,2048], index: 7, kind: output, shape index: {0}]  }
   0x1   :  { %2111 = vset.pattern.permute.xlu0 %v2193_v0  ;;  %v47_v1 = vld [vmem:[%s4034_s4] sm:$0x3f]  ;;  %2113 = vset.pattern.permute.xlu1 %v2193_v0  ;;  %v2197_v12 = vmov 5   ;;  %v2198_v13 = vmov 4   ;;  %v2278_v16 = vld [vmem:[%s4040_s0 + $0x8] sm:$0x3f] }
   0x2   :  { %v28_v2 = vld [vmem:[%s4035_s1] sm:$0x3f]  ;;  %50 = vperm.xlu0 %2111, %v47_v1   ;;  %4168 = vst [vmem:[#allocation3_spill] sm:$0xff] %v2278_v16  ;;  %v2283_v17 = vld [vmem:[%s4040_s0 + $0x10] sm:$0x3f] }
   0x3   :  { %107 = vperm.xlu1 %2113, %v28_v2   ;;  %v46_v5 = vld [vmem:[%s4036_s3] sm:$0x3f]  ;;  %4169 = vst [vmem:[#allocation4_spill] sm:$0xff] %v2283_v17  ;;  %v2288_v18 = vld [vmem:[%s4040_s0 + $0x18] sm:$0x3f] }
   0x4   :  { %v551_v7 = vld [vmem:[%s4034_s4] sm:$0x3f]  ;;  %4170 = vst [vmem:[#allocation5_spill] sm:$0xff] %v2288_v18  ;;  %v2302_v23 = vld [vmem:[%s4040_s0 + $0x28] sm:$0x3f] }
   0x5   :  { %v550_v8 = vld [vmem:[%s4036_s3] sm:$0x3f]  ;;  %4173 = vst [vmem:[#allocation8_spill] sm:$0xff] %v2302_v23  ;;  %v2309_v26 = vld [vmem:[%s4040_s0 + $0x30] sm:$0x3f] }
   0x6   :  { %2112 = vset.pattern.permute.xlu0 %v2194_v3  ;;  %v29_v9 = vld [vmem:[%s4037_s2] sm:$0x3f]  ;;  %4174 = vst [vmem:[#allocation9_spill] sm:$0xff] %v2309_v26  ;;  %v2316_v29 = vld [vmem:[%s4040_s0 + $0x38] sm:$0x3f] }
   0x7   :  { %2114 = vset.pattern.permute.xlu1 %v2195_v4  ;;  %71 = vperm.xlu0 %2112, %v28_v2   ;;  %v1016_v10 = vld [vmem:[%s4038_s6] sm:$0xf]  ;;  %4175 = vst [vmem:[#allocation10_spill] sm:$0xff] %v2316_v29  ;;  %v2330_v35 = vld [vmem:[%s4040_s0 + $0x48] sm:$0x3f] }
   0x8   :  { %127 = vperm.xlu1 %2114, %v28_v2   ;;  %v1017_v11 = vld [vmem:[%s4039_s5] sm:$0xf]  ;;  %4177 = vst [vmem:[#allocation12_spill] sm:$0xff] %v2330_v35  ;;  %v2337_v38 = vld [vmem:[%s4040_s0 + $0x50] sm:$0x3f] }
   0x9   :  { %v2273_v15 = vld [vmem:[%s4040_s0] sm:$0x3f]  ;;  %4178 = vst [vmem:[#allocation13_spill] sm:$0xff] %v2337_v38  ;;  %v2344_v41 = vld [vmem:[%s4040_s0 + $0x58] sm:$0x3f] }
   0xa   :  { %4167 = vst [vmem:[#allocation2_spill] sm:$0xff] %v2273_v15  ;;  %v2294_v20 = vld [vmem:[%s4040_s0 + $0x20] sm:$0x3f]  ;;  %4179 = vst [vmem:[#allocation14_spill] sm:$0xff] %v2344_v41  ;;  %v2358_v47 = vld [vmem:[%s4040_s0 + $0x68] sm:$0x3f] }
   0xb   :  { %2116 = vset.pattern.permute.xlu0 %v2193_v0  ;;  %4171 = vst [vmem:[#allocation6_spill] sm:$0xff] %v2294_v20  ;;  %v2323_v32 = vld [vmem:[%s4040_s0 + $0x40] sm:$0x3f]  ;;  %4181 = vst [vmem:[#allocation16_spill] sm:$0xff] %v2358_v47  ;;  %v2365_v50 = vld [vmem:[%s4040_s0 + $0x70] sm:$0x3f] }
   0xc   :  { %2115 = vset.pattern.permute.xlu1 %v2196_v6  ;;  %184 = vperm.xlu0 %2116, %v46_v5   ;;  %4176 = vst [vmem:[#allocation11_spill] sm:$0xff] %v2323_v32  ;;  %v2351_v44 = vld [vmem:[%s4040_s0 + $0x60] sm:$0x3f]  ;;  %4182 = vst [vmem:[#allocation17_spill] sm:$0xff] %v2365_v50  ;;  %v2374_v55 = vld [vmem:[%s4040_s0 + $0x78] sm:$0x3f] }
   0xd   :  { %163 = vperm.xlu1 %2115, %v28_v2   ;;  %4180 = vst [vmem:[#allocation15_spill] sm:$0xff] %v2351_v44  ;;  %4183 = vst [vmem:[#allocation18_spill] sm:$0xff] %v2374_v55 }
  0x10   :  { %2119 = vset.pattern.permute.xlu0 %v2195_v4 }
  0x11   :  { %2117 = vset.pattern.permute.xlu1 %v2195_v4  ;;  %671 = vperm.xlu0 %2119, %v550_v8  }
  0x12   :  { %554 = vperm.xlu1 %2117, %v551_v7  }
  0x15   :  { %2122 = vset.pattern.permute.xlu0 %v2193_v0 }
  0x16   :  { %2118 = vset.pattern.permute.xlu1 %v2193_v0  ;;  %1105 = vperm.xlu0 %2122, %v1016_v10  }
  0x17   :  { %252 = vperm.xlu1 %2118, %v29_v9  }
  0x1a   :  { %2125 = vset.pattern.permute.xlu0 %v2196_v6 }
  0x1b   :  { %2120 = vset.pattern.permute.xlu1 %v2195_v4  ;;  %1325 = vperm.xlu0 %2125, %v1017_v11  }
  0x1c   :  { %271 = vperm.xlu1 %2120, %v29_v9  }
  0x1f   :  { %2128 = vset.pattern.permute.xlu0 %v2197_v12 }
  0x20   :  { %2121 = vset.pattern.permute.xlu1 %v2193_v0 }
  0x21   :  { %1020 = vperm.xlu1 %2121, %v1017_v11  }
  0x25   :  { %2123 = vset.pattern.permute.xlu1 %v2195_v4 }
  0x26   :  { %1125 = vperm.xlu1 %2123, %v1017_v11  }
  0x2a   :  { %2124 = vset.pattern.permute.xlu1 %v2194_v3 }
  0x2b   :  { %1225 = vperm.xlu1 %2124, %v1017_v11  }
  0x2f   :  { %2126 = vset.pattern.permute.xlu1 %v2198_v13 }
  0x30   :  { %1425 = vperm.xlu1 %2126, %v1017_v11  }
  0x34   :  { %2127 = vset.pattern.permute.xlu1 %v2197_v12 }
  0x35   :  { %1525 = vperm.xlu1 %2127, %v1017_v11  }
  0x7d   :  { %v51_v14 = vpop.permute.xlu0 %50 }
  0x7e   :  { %v53_v19 = vmul.f32 %v51_v14, %v2273_v15  ;;  %v54_v21 = vmul.f32 %v51_v14, %v2278_v16  ;;  %v55_v24 = vmul.f32 %v51_v14, %v2283_v17  ;;  %v56_v27 = vmul.f32 %v51_v14, %v2288_v18  ;;  %v2380_v60 = vpop.permute.xlu1 %107 }
  0x7f   :  { %v57_v30 = vmul.f32 %v51_v14, %v2294_v20  ;;  %v58_v33 = vmul.f32 %v51_v14, %v2302_v23  ;;  %v59_v36 = vmul.f32 %v51_v14, %v2309_v26  ;;  %v60_v39 = vmul.f32 %v51_v14, %v2316_v29  ;;  %4184 = vst [vmem:[#allocation19_spill] sm:$0xff] %v2380_v60 }
  0x80   :  { %v61_v42 = vmul.f32 %v51_v14, %v2323_v32  ;;  %v62_v45 = vmul.f32 %v51_v14, %v2330_v35  ;;  %v63_v48 = vmul.f32 %v51_v14, %v2337_v38  ;;  %v64_v51 = vmul.f32 %v51_v14, %v2344_v41 }
  0x81   :  { %v65_v53 = vmul.f32 %v51_v14, %v2351_v44  ;;  %v66_v56 = vmul.f32 %v51_v14, %v2358_v47  ;;  %v67_v58 = vmul.f32 %v51_v14, %v2365_v50  ;;  %v68_v62 = vmul.f32 %v51_v14, %v2374_v55 }
  0x82   :  { %v2297_v22 = vpop.permute.xlu0 %71  ;;  %v2199_v38 = vmov 1966171168  }
  0x83   :  { %4172 = vst [vmem:[#allocation7_spill] sm:$0xff] %v2297_v22  ;;  %v74_v25 = vadd.f32 %v2297_v22, %v53_v19  ;;  %v75_v28 = vadd.f32 %v2297_v22, %v54_v21  ;;  %v76_v31 = vadd.f32 %v2297_v22, %v55_v24  ;;  %v77_v34 = vadd.f32 %v2297_v22, %v56_v27  ;;  %v2387_v5 = vpop.permute.xlu1 %127 }
  0x84   :  { %v78_v37 = vadd.f32 %v2297_v22, %v57_v30  ;;  %v79_v40 = vadd.f32 %v2297_v22, %v58_v33  ;;  %v80_v43 = vadd.f32 %v2297_v22, %v59_v36  ;;  %v81_v46 = vadd.f32 %v2297_v22, %v60_v39  ;;  %4185 = vst [vmem:[#allocation20_spill] sm:$0xff] %v2387_v5 }
  0x85   :  { %2129 = vtanh.f32 %v74_v25  ;;  %v82_v49 = vadd.f32 %v2297_v22, %v61_v42  ;;  %v83_v52 = vadd.f32 %v2297_v22, %v62_v45  ;;  %v84_v54 = vadd.f32 %v2297_v22, %v63_v48 }
  0x86   :  { %2131 = vtanh.f32 %v75_v28  ;;  %v85_v57 = vadd.f32 %v2297_v22, %v64_v51  ;;  %v86_v59 = vadd.f32 %v2297_v22, %v65_v53  ;;  %v87_v61 = vadd.f32 %v2297_v22, %v66_v56 }
  0x87   :  { %2133 = vtanh.f32 %v76_v31  ;;  %v88_v63 = vadd.f32 %v2297_v22, %v67_v58  ;;  %v89_v0 = vadd.f32 %v2297_v22, %v68_v62  ;;  %v454_v35 = vunpack.c.l.s4 %v2199_v38 }
  0x88   :  { %2135 = vtanh.f32 %v77_v34 }
  0x89   :  { %2137 = vtanh.f32 %v78_v37 }
  0x8a   :  { %2139 = vtanh.f32 %v79_v40 }
  0x8b   :  { %2141 = vtanh.f32 %v80_v43 }
  0x8c   :  { %2143 = vtanh.f32 %v81_v46 }
  0x8d   :  { %2145 = vtanh.f32 %v82_v49 }
  0x8e   :  { %2147 = vtanh.f32 %v83_v52 }
  0x8f   :  { %2149 = vtanh.f32 %v84_v54 }
  0x90   :  { %2151 = vtanh.f32 %v85_v57 }
  0x91   :  { %2153 = vtanh.f32 %v86_v59 }
  0x92   :  { %v2130_v1 = vpop.eup %2129  ;;  %2155 = vtanh.f32 %v87_v61 }
  0x93   :  { %v2132_v2 = vpop.eup %2131  ;;  %2157 = vtanh.f32 %v88_v63  ;;  %v110_v3 = vmul.f32 %v2130_v1, %v2380_v60 }
  0x94   :  { %v2134_v4 = vpop.eup %2133  ;;  %v111_v6 = vmul.f32 %v2132_v2, %v2380_v60  ;;  %2159 = vtanh.f32 %v89_v0 }
  0x95   :  { %v2136_v7 = vpop.eup %2135  ;;  %v112_v8 = vmul.f32 %v2134_v4, %v2380_v60  ;;  %v2392_v9 = vsub.f32 %v110_v3, %v2387_v5 }
  0x96   :  { %v2138_v10 = vpop.eup %2137  ;;  %v113_v11 = vmul.f32 %v2136_v7, %v2380_v60  ;;  %v2396_v12 = vsub.f32 %v111_v6, %v2387_v5 }
  0x97   :  { %v2140_v13 = vpop.eup %2139  ;;  %v114_v14 = vmul.f32 %v2138_v10, %v2380_v60  ;;  %v1751_v19 = vand.u32 2147483647, %v2392_v9  ;;  %v4050_v21 = vcvt.f32.s32 %v2392_v9  ;;  %v2403_v28 = vsub.f32 %v112_v8, %v2387_v5 }
  0x98   :  { %v2142_v24 = vpop.eup %2141  ;;  %v115_v25 = vmul.f32 %v2140_v13, %v2380_v60  ;;  %v1759_v31 = vand.u32 2147483647, %v2396_v12  ;;  %v2410_v36 = vsub.f32 %v113_v11, %v2387_v5  ;;  %v4048_v37 = vcvt.f32.s32 %v2396_v12 }
  0x99   :  { %v2144_v27 = vpop.eup %2143  ;;  %v1754_v30 = vcvt.s32.f32 %v4050_v21  ;;  %v116_v34 = vmul.f32 %v2142_v24, %v2380_v60  ;;  %v2414_v40 = vsub.f32 %v114_v14, %v2387_v5  ;;  %vm2416_vm0 = vcmp.lt.f32.partialorder %v1751_v19, 8388608.0 }
  0x9a   :  { %v2146_v33 = vpop.eup %2145  ;;  %v1756_v45 = vand.u32 2147483648, %v2392_v9  ;;  %v117_v48 = vmul.f32 %v2144_v27, %v2380_v60  ;;  %v2424_v51 = vsub.f32 %v115_v25, %v2387_v5  ;;  %v1762_v52 = vcvt.s32.f32 %v4048_v37 }
  0x9b   :  { %v2148_v39 = vpop.eup %2147  ;;  %v1755_v43 = vand.u32 2147483647, %v1754_v30  ;;  %v118_v49 = vmul.f32 %v2146_v33, %v2380_v60  ;;  %vm2431_vm1 = vcmp.lt.f32.partialorder %v1759_v31, 8388608.0  ;;  %v4046_v58 = vcvt.f32.s32 %v2403_v28 }
  0x9c   :  { %v2150_v46 = vpop.eup %2149  ;;  %v119_v54 = vmul.f32 %v2148_v39, %v2380_v60  ;;  %v2437_v61 = vsub.f32 %v116_v34, %v2387_v5  ;;  %v1763_v62 = vand.u32 2147483647, %v1762_v52  ;;  %v1764_v63 = vand.u32 2147483648, %v2396_v12 }
  0x9d   :  { %v2152_v53 = vpop.eup %2151  ;;  %v2429_v56 = vor.u32 %v1756_v45, %v1755_v43  ;;  %v1767_v0 = vand.u32 2147483647, %v2403_v28  ;;  %v120_v2 = vmul.f32 %v2150_v46, %v2380_v60  ;;  %v1770_v6 = vcvt.s32.f32 %v4046_v58 }
  0x9e   :  { %v2154_v59 = vpop.eup %2153  ;;  %v121_v3 = vmul.f32 %v2152_v53, %v2380_v60  ;;  %v2451_v10 = vsub.f32 %v117_v48, %v2387_v5  ;;  %v2454_v11 = vsub.f32 %v118_v49, %v2387_v5  ;;  %v2456_v13 = vor.u32 %v1764_v63, %v1763_v62 }
  0x9f   :  { %v2156_v1 = vpop.eup %2155  ;;  %v122_v8 = vmul.f32 %v2154_v59, %v2380_v60  ;;  %v2460_v19 = vsub.f32 %v119_v54, %v2387_v5  ;;  %v1771_v24 = vand.u32 2147483647, %v1770_v6  ;;  %v1772_v25 = vand.u32 2147483648, %v2403_v28 }
  0xa0   :  { %v2158_v7 = vpop.eup %2157  ;;  %v123_v14 = vmul.f32 %v2156_v1, %v2380_v60  ;;  %vm2468_vm2 = vcmp.lt.f32.partialorder %v1767_v0, 8388608.0  ;;  %v4044_v34 = vcvt.f32.s32 %v2410_v36  ;;  %v2474_v39 = vsub.f32 %v120_v2, %v2387_v5 }
  0xa1   :  { %v2160_v27 = vpop.eup %2159  ;;  %v124_v30 = vmul.f32 %v2158_v7, %v2380_v60  ;;  %v2477_v43 = vsub.f32 %v121_v3, %v2387_v5  ;;  %v2479_v45 = vor.u32 %v1772_v25, %v1771_v24  ;;  %v1775_v46 = vand.u32 2147483647, %v2410_v36 }
  0xa2   :  { %v2483_v48 = vsub.f32 %v122_v8, %v2387_v5  ;;  %v1778_v49 = vcvt.s32.f32 %v4044_v34  ;;  %v1783_v52 = vand.u32 2147483647, %v2414_v40  ;;  %v4043_v53 = vcvt.f32.s32 %v2414_v40 }
  0xa3   :  { %v125_v54 = vmul.f32 %v2160_v27, %v2380_v60  ;;  %v2491_v59 = vsub.f32 %v123_v14, %v2387_v5  ;;  %v4045_v63 = vcvt.f32.s32 %v2424_v51  ;;  %v2499_v0 = vsub.f32 %v124_v30, %v2387_v5 }
  0xa4   :  { %v1779_v1 = vand.u32 2147483647, %v1778_v49  ;;  %v1780_v2 = vand.u32 2147483648, %v2410_v36  ;;  %v1786_v3 = vcvt.s32.f32 %v4043_v53  ;;  %vm2504_vm3 = vcmp.lt.f32.partialorder %v1775_v46, 8388608.0 }
  0xa5   :  { %v1788_v7 = vand.u32 2147483648, %v2414_v40  ;;  %v1794_v8 = vcvt.s32.f32 %v4045_v63  ;;  %v4047_v14 = vcvt.f32.s32 %v2437_v61  ;;  %vm2514_vm4 = vcmp.lt.f32.partialorder %v1783_v52, 8388608.0 }
  0xa6   :  { %v2512_v24 = vor.u32 %v1780_v2, %v1779_v1  ;;  %v1787_v27 = vand.u32 2147483647, %v1786_v3  ;;  %v1791_v30 = vand.u32 2147483647, %v2424_v51  ;;  %v1796_v49 = vand.u32 2147483648, %v2424_v51 }
  0xa7   :  { %v1795_v46 = vand.u32 2147483647, %v1794_v8  ;;  %v1802_v53 = vcvt.s32.f32 %v4047_v14  ;;  %v4049_v34 = vcvt.f32.s32 %v2451_v10  ;;  %v1799_v2 = vand.u32 2147483647, %v2437_v61 }
  0xa8   :  { %v2527_v52 = vor.u32 %v1788_v7, %v1787_v27  ;;  %v1804_v3 = vand.u32 2147483648, %v2437_v61  ;;  %v1807_v58 = vand.u32 2147483647, %v2451_v10  ;;  %vm2540_vm5 = vcmp.lt.f32.partialorder %v1791_v30, 8388608.0 }
  0xa9   :  { %v2531_v63 = vor.u32 %v1796_v49, %v1795_v46  ;;  %v1803_v8 = vand.u32 2147483647, %v1802_v53  ;;  %v1810_v14 = vcvt.s32.f32 %v4049_v34  ;;  %v1812_v27 = vand.u32 2147483648, %v2451_v10 }
  0xaa   :  { %v4051_v46 = vcvt.f32.s32 %v2454_v11  ;;  %v1815_v21 = vand.u32 2147483647, %v2454_v11  ;;  %v2554_v37 = vsub.f32 %v125_v54, %v2387_v5  ;;  %vm2556_vm6 = vcmp.lt.f32.partialorder %v1799_v2, 8388608.0 }
  0xab   :  { %v2550_v49 = vor.u32 %v1804_v3, %v1803_v8  ;;  %v1811_v34 = vand.u32 2147483647, %v1810_v14  ;;  %v4054_v62 = vcvt.f32.s32 %v2460_v19  ;;  %vm2567_vm7 = vcmp.lt.f32.partialorder %v1807_v58, 8388608.0 }
  0xac   :  { %v1818_v1 = vcvt.s32.f32 %v4051_v46  ;;  %v4058_v2 = vcvt.f32.s32 %v2474_v39  ;;  %v1820_v53 = vand.u32 2147483648, %v2454_v11  ;;  %v1823_v46 = vand.u32 2147483647, %v2460_v19 }
  0xad   :  { %v2571_v54 = vor.u32 %v1812_v27, %v1811_v34  ;;  %v1826_v31 = vcvt.s32.f32 %v4054_v62  ;;  %vm2582_vm8 = vcmp.lt.f32.partialorder %v1815_v21, 8388608.0  ;;  %v1828_v5 = vand.u32 2147483648, %v2460_v19 }
  0xae   :  { %v1819_v8 = vand.u32 2147483647, %v1818_v1  ;;  %v1834_v34 = vcvt.s32.f32 %v4058_v2  ;;  %v4061_v1 = vcvt.f32.s32 %v2477_v43  ;;  %v1831_v62 = vand.u32 2147483647, %v2474_v39 }
  0xaf   :  { %v1827_v4 = vand.u32 2147483647, %v1826_v31  ;;  %v1836_v55 = vand.u32 2147483648, %v2474_v39  ;;  %v4063_v58 = vcvt.f32.s32 %v2483_v48  ;;  %vm2601_vm9 = vcmp.lt.f32.partialorder %v1823_v46, 8388608.0 }
  0xb0   :  { %v2589_v27 = vor.u32 %v1820_v53, %v1819_v8  ;;  %v1835_v60 = vand.u32 2147483647, %v1834_v34  ;;  %v1842_v21 = vcvt.s32.f32 %v4061_v1  ;;  %v1839_v8 = vand.u32 2147483647, %v2477_v43 }
  0xb1   :  { %v1829_v31 = vor.u32 %v1828_v5, %v1827_v4  ;;  %v1844_v47 = vand.u32 2147483648, %v2477_v43  ;;  %v1850_v1 = vcvt.s32.f32 %v4063_v58  ;;  %vm2612_vm10 = vcmp.lt.f32.partialorder %v1831_v62, 8388608.0 }
  0xb2   :  { %v1822_v2 = vsel %vm2582_vm8, %v2589_v27, %v2454_v11  ;;  %v1837_v34 = vor.u32 %v1836_v55, %v1835_v60  ;;  %v1843_v50 = vand.u32 2147483647, %v1842_v21  ;;  %v1847_v46 = vand.u32 2147483647, %v2483_v48  ;;  %v2622_v21 = vpop.permute.xlu1 %163 }
  0xb3   :  { %v1830_v44 = vsel %vm2601_vm9, %v1829_v31, %v2460_v19  ;;  %v4065_v5 = vcvt.f32.s32 %v2491_v59  ;;  %v1851_v4 = vand.u32 2147483647, %v1850_v1  ;;  %v1852_v27 = vand.u32 2147483648, %v2483_v48  ;;  %4208 = vst [vmem:[#allocation21_spill] sm:$0xff] %v2622_v21 }
  0xb4   :  { %v1838_v55 = vsel %vm2612_vm10, %v1837_v34, %v2474_v39  ;;  %v1845_v60 = vor.u32 %v1844_v47, %v1843_v50  ;;  %v456_v53 = vlaneseq  ;;  %vm2624_vm11 = vcmp.lt.f32.partialorder %v1839_v8, 8388608.0 }
  0xb5   :  { %v1858_v31 = vcvt.s32.f32 %v4065_v5  ;;  %v4071_v58 = vcvt.f32.s32 %v2499_v0  ;;  %v1853_v47 = vor.u32 %v1852_v27, %v1851_v4  ;;  %v1855_v50 = vand.u32 2147483647, %v2491_v59 }
  0xb6   :  { %v1846_v34 = vsel %vm2624_vm11, %v1845_v60, %v2477_v43  ;;  %v4072_v1 = vcvt.f32.s32 %v2554_v37  ;;  %vm2636_vm12 = vcmp.lt.f32.partialorder %v1847_v46, 8388608.0  ;;  %v1860_v41 = vand.u32 2147483648, %v2491_v59  ;;  %v2656_v3 = vpop.permute.xlu1 %554 }
  0xb7   :  { %v1859_v8 = vand.u32 2147483647, %v1858_v31  ;;  %v1866_v5 = vcvt.s32.f32 %v4071_v58  ;;  %v1854_v60 = vsel %vm2636_vm12, %v1853_v47, %v2483_v48  ;;  %v1863_v4 = vand.u32 2147483647, %v2499_v0  ;;  %4215 = vst [vmem:[#allocation22_spill] sm:$0xff] %v2656_v3 }
  0xb8   :  { %v1874_v46 = vcvt.s32.f32 %v4072_v1  ;;  %v1868_v31 = vand.u32 2147483648, %v2499_v0  ;;  %v1871_v22 = vand.u32 2147483647, %v2554_v37  ;;  %vm2651_vm13 = vcmp.lt.f32.partialorder %v1855_v50, 8388608.0 }
  0xb9   :  { %v1861_v27 = vor.u32 %v1860_v41, %v1859_v8  ;;  %v1867_v62 = vand.u32 2147483647, %v1866_v5  ;;  %v1876_v58 = vand.u32 2147483648, %v2554_v37  ;;  %vm2661_vm14 = vcmp.lt.f32.partialorder %v1863_v4, 8388608.0 }
  0xba   :  { %v1875_v38 = vand.u32 2147483647, %v1874_v46  ;;  %v455_v8 = vunpack.c.0.s8 %v454_v35  ;;  %v2665_v50 = vshrl.u32 %v456_v53, 7  ;;  %vm2670_vm15 = vcmp.lt.f32.partialorder %v1871_v22, 8388608.0  ;;  %v2697_v4 = vpop.permute.xlu1 %252 }
  0xbb   :  { %v1862_v47 = vsel %vm2651_vm13, %v1861_v27, %v2491_v59  ;;  %v1869_v1 = vor.u32 %v1868_v31, %v1867_v62  ;;  %v4221_v35 = vsel %vm2416_vm0, %v2429_v56, %v2392_v9  ;;  %v4222_v22 = vsel %vm2431_vm1, %v2456_v13, %v2396_v12  ;;  %4225 = vst [vmem:[#allocation25_spill] sm:$0xff] %v2697_v4 }
  0xbc   :  { %v1877_v5 = vor.u32 %v1876_v58, %v1875_v38  ;;  %4218 = vst [vmem:[#allocation23_spill] sm:$0xff] %v2665_v50  ;;  %v166_v58 = vmul.f32 %v4221_v35, %v2622_v21  ;;  %v167_v53 = vmul.f32 %v4222_v22, %v2622_v21  ;;  %v4224_v29 = vsel %vm2468_vm2, %v2479_v45, %v2403_v28 }
  0xbd   :  { %v1870_v46 = vsel %vm2661_vm14, %v1869_v1, %v2499_v0  ;;  %v2689_v1 = vpop.permute.xlu0 %184  ;;  %v168_v42 = vmul.f32 %v4224_v29, %v2622_v21  ;;  %v2700_v56 = vsub.s32 %v455_v8, %v2665_v50  ;;  %v4227_v57 = vsel %vm2504_vm3, %v2512_v24, %v2410_v36 }
  0xbe   :  { %v1878_v32 = vsel %vm2670_vm15, %v1877_v5, %v2554_v37  ;;  %4223 = vst [vmem:[#allocation24_spill] sm:$0xff] %v2689_v1  ;;  %v169_v13 = vmul.f32 %v4227_v57, %v2622_v21  ;;  %v4228_v33 = vsel %vm2514_vm4, %v2527_v52, %v2414_v40  ;;  %v4229_v27 = vsel %vm2540_vm5, %v2531_v63, %v2424_v51 }
  0xbf   :  { %4226 = vst [vmem:[#allocation26_spill] sm:$0xff] %v2700_v56  ;;  %v170_v45 = vmul.f32 %v4228_v33, %v2622_v21  ;;  %v171_v62 = vmul.f32 %v4229_v27, %v2622_v21  ;;  %v4230_v6 = vsel %vm2556_vm6, %v2550_v49, %v2437_v61  ;;  %v4231_v25 = vsel %vm2567_vm7, %v2571_v54, %v2451_v10 }
  0xc0   :  { %v172_v24 = vmul.f32 %v4230_v6, %v2622_v21  ;;  %v173_v52 = vmul.f32 %v4231_v25, %v2622_v21  ;;  %v2733_v7 = vmul.f32 %v1822_v2, %v2622_v21  ;;  %v2736_v63 = vmul.f32 %v1830_v44, %v2622_v21 }
  0xc1   :  { %v2739_v31 = vmul.f32 %v1838_v55, %v2622_v21  ;;  %v2742_v30 = vmul.f32 %v1846_v34, %v2622_v21  ;;  %v2745_v49 = vmul.f32 %v2689_v1, %v166_v58  ;;  %v2748_v14 = vmul.f32 %v2689_v1, %v167_v53  ;;  %v2786_v58 = vpop.permute.xlu1 %271 }
  0xc2   :  { %4232 = vst [vmem:[#allocation27_spill] sm:$0xff] %v2733_v7  ;;  %4233 = vst [vmem:[#allocation28_spill] sm:$0xff] %v2736_v63  ;;  %v2751_v54 = vmul.f32 %v1854_v60, %v2622_v21  ;;  %v2754_v2 = vmul.f32 %v1862_v47, %v2622_v21  ;;  %v2757_v44 = vmul.f32 %v1870_v46, %v2622_v21  ;;  %v4248_v8 = vcvt.f32.s32 %v2392_v9 }
  0xc3   :  { %4234 = vst [vmem:[#allocation29_spill] sm:$0xff] %v2739_v31  ;;  %4235 = vst [vmem:[#allocation30_spill] sm:$0xff] %v2742_v30  ;;  %v2760_v55 = vmul.f32 %v2689_v1, %v168_v42  ;;  %v2763_v34 = vmul.f32 %v1878_v32, %v2622_v21  ;;  %v2766_v38 = vmul.f32 %v2689_v1, %v169_v13  ;;  %v4249_v32 = vcvt.f32.s32 %v2396_v12 }
  0xc4   :  { %4236 = vst [vmem:[#allocation31_spill] sm:$0xff] %v2745_v49  ;;  %4237 = vst [vmem:[#allocation32_spill] sm:$0xff] %v2748_v14  ;;  %v2769_v41 = vmul.f32 %v2689_v1, %v170_v45  ;;  %v2772_v60 = vmul.f32 %v2689_v1, %v171_v62  ;;  %v2775_v47 = vmul.f32 %v2689_v1, %v172_v24  ;;  %v4251_v29 = vcvt.f32.s32 %v2403_v28 }
  0xc5   :  { %4238 = vst [vmem:[#allocation33_spill] sm:$0xff] %v2751_v54  ;;  %4239 = vst [vmem:[#allocation34_spill] sm:$0xff] %v2754_v2  ;;  %v2778_v5 = vmul.f32 %v2689_v1, %v173_v52  ;;  %v254_v46 = vadd.s32 %v4248_v8, %v2697_v4  ;;  %v255_v35 = vadd.s32 %v4249_v32, %v2697_v4  ;;  %v4252_v9 = vcvt.f32.s32 %v2410_v36 }
  0xc6   :  { %4240 = vst [vmem:[#allocation35_spill] sm:$0xff] %v2757_v44  ;;  %4241 = vst [vmem:[#allocation36_spill] sm:$0xff] %v2760_v55  ;;  %v256_v42 = vadd.s32 %v4251_v29, %v2697_v4  ;;  %v4253_v12 = vcvt.f32.s32 %v2414_v40  ;;  %v4254_v33 = vcvt.f32.s32 %v2424_v51  ;;  %v4255_v27 = vcvt.f32.s32 %v2437_v61 }
  0xc7   :  { %4242 = vst [vmem:[#allocation37_spill] sm:$0xff] %v2763_v34  ;;  %4243 = vst [vmem:[#allocation38_spill] sm:$0xff] %v2766_v38  ;;  %v257_v57 = vadd.s32 %v4252_v9, %v2697_v4  ;;  %v4256_v28 = vcvt.f32.s32 %v2451_v10  ;;  %v4257_v36 = vcvt.f32.s32 %v2454_v11  ;;  %v4258_v40 = vcvt.f32.s32 %v2460_v19 }
  0xc8   :  { %4244 = vst [vmem:[#allocation39_spill] sm:$0xff] %v2769_v41  ;;  %4245 = vst [vmem:[#allocation40_spill] sm:$0xff] %v2772_v60  ;;  %v258_v13 = vadd.s32 %v4253_v12, %v2697_v4  ;;  %v259_v45 = vadd.s32 %v4254_v33, %v2697_v4  ;;  %v260_v62 = vadd.s32 %v4255_v27, %v2697_v4  ;;  %v4259_v51 = vcvt.f32.s32 %v2474_v39 }
  0xc9   :  { %4246 = vst [vmem:[#allocation41_spill] sm:$0xff] %v2775_v47  ;;  %4247 = vst [vmem:[#allocation42_spill] sm:$0xff] %v2778_v5  ;;  %v261_v6 = vadd.s32 %v4256_v28, %v2697_v4  ;;  %v262_v24 = vadd.s32 %v4257_v36, %v2697_v4  ;;  %v263_v25 = vadd.s32 %v4258_v40, %v2697_v4  ;;  %v4260_v61 = vcvt.f32.s32 %v2477_v43 }
  0xca   :  { %4250 = vst [vmem:[#allocation43_spill] sm:$0xff] %v2786_v58  ;;  %v264_v52 = vadd.s32 %v4259_v51, %v2697_v4  ;;  %v4261_v10 = vcvt.f32.s32 %v2483_v48  ;;  %v4262_v11 = vcvt.f32.s32 %v2491_v59  ;;  %v2829_v9 = vmul.u32 %v2786_v58, %v254_v46 }
  0xcb   :  { %v265_v8 = vadd.s32 %v4260_v61, %v2697_v4  ;;  %v2832_v19 = vmul.u32 %v2786_v58, %v255_v35  ;;  %v4263_v39 = vcvt.f32.s32 %v2499_v0  ;;  %v4264_v43 = vcvt.f32.s32 %v2554_v37 }
  0xcc   :  { %v266_v32 = vadd.s32 %v4261_v10, %v2697_v4  ;;  %v267_v29 = vadd.s32 %v4262_v11, %v2697_v4  ;;  %v2841_v48 = vmul.u32 %v2786_v58, %v256_v42  ;;  %v2844_v59 = vmul.u32 %v2786_v58, %v257_v57 }
  0xcd   :  { %v268_v12 = vadd.s32 %v4263_v39, %v2697_v4  ;;  %v269_v33 = vadd.s32 %v4264_v43, %v2697_v4  ;;  %v2847_v46 = vmul.u32 %v2786_v58, %v258_v13  ;;  %v2850_v35 = vmul.u32 %v2786_v58, %v259_v45 }
  0xce   :  { %v289_v27 = vrot.slane %v2829_v9, 1  ;;  %v290_v0 = vrot.slane %v2832_v19, 1  ;;  %v2855_v28 = vmul.u32 %v2786_v58, %v260_v62  ;;  %v2858_v37 = vmul.u32 %v2786_v58, %v261_v6 }
  0xcf   :  { %v291_v42 = vrot.slane %v2841_v48, 1  ;;  %v292_v57 = vrot.slane %v2844_v59, 1  ;;  %v2863_v13 = vmul.u32 %v2786_v58, %v262_v24  ;;  %v2866_v45 = vmul.u32 %v2786_v58, %v263_v25 }
  0xd0   :  { %v293_v36 = vrot.slane %v2847_v46, 1  ;;  %v294_v40 = vrot.slane %v2850_v35, 1  ;;  %v2871_v62 = vmul.u32 %v2786_v58, %v264_v52  ;;  %v2874_v6 = vmul.u32 %v2786_v58, %v265_v8 }
  0xd1   :  { %v295_v51 = vrot.slane %v2855_v28, 1  ;;  %v296_v61 = vrot.slane %v2858_v37, 1  ;;  %v2879_v24 = vmul.u32 %v2786_v58, %v266_v32  ;;  %v2882_v25 = vmul.u32 %v2786_v58, %v267_v29 }
  0xd2   :  { %v297_v10 = vrot.slane %v2863_v13, 1  ;;  %v298_v11 = vrot.slane %v2866_v45, 1  ;;  %v2887_v52 = vmul.u32 %v2786_v58, %v268_v12  ;;  %v2890_v8 = vmul.u32 %v2786_v58, %v269_v33 }
  0xd3   :  { %v299_v39 = vrot.slane %v2871_v62, 1  ;;  %v300_v43 = vrot.slane %v2874_v6, 1  ;;  %v301_v32 = vrot.slane %v2879_v24, 1  ;;  %v302_v53 = vrot.slane %v2882_v25, 1 }
  0xd4   :  { %4265 = vst [vmem:[#allocation44_spill] sm:$0xff] %v2887_v52  ;;  %4266 = vst [vmem:[#allocation45_spill] sm:$0xff] %v2890_v8  ;;  %v305_v29 = vadd.s32 %v289_v27, %v2829_v9  ;;  %v306_v22 = vadd.s32 %v290_v0, %v2832_v19  ;;  %v303_v4 = vrot.slane %v2887_v52, 1  ;;  %v304_v12 = vrot.slane %v2890_v8, 1 }
  0xd5   :  { %v307_v21 = vadd.s32 %v291_v42, %v2841_v48  ;;  %v308_v33 = vadd.s32 %v292_v57, %v2844_v59  ;;  %v309_v58 = vadd.s32 %v293_v36, %v2847_v46  ;;  %v310_v50 = vadd.s32 %v294_v40, %v2850_v35 }
  0xd6   :  { %v311_v34 = vadd.s32 %v295_v51, %v2855_v28  ;;  %v312_v44 = vadd.s32 %v296_v61, %v2858_v37  ;;  %v313_v27 = vadd.s32 %v297_v10, %v2863_v13  ;;  %v314_v0 = vadd.s32 %v298_v11, %v2866_v45 }
  0xd7   :  { %v315_v2 = vadd.s32 %v299_v39, %v2871_v62  ;;  %v316_v54 = vadd.s32 %v300_v43, %v2874_v6  ;;  %v317_v42 = vadd.s32 %v301_v32, %v2879_v24  ;;  %v318_v57 = vadd.s32 %v302_v53, %v2882_v25 }
  0xd8   :  { %v319_v36 = vadd.s32 %v303_v4, %v2887_v52  ;;  %v320_v40 = vadd.s32 %v304_v12, %v2890_v8  ;;  %v321_v51 = vrot.slane %v2829_v9, 2  ;;  %v322_v61 = vrot.slane %v2832_v19, 2 }
  0xd9   :  { %v323_v10 = vrot.slane %v2841_v48, 2  ;;  %v324_v11 = vrot.slane %v2844_v59, 2  ;;  %v325_v39 = vrot.slane %v2847_v46, 2  ;;  %v326_v43 = vrot.slane %v2850_v35, 2 }
  0xda   :  { %v327_v32 = vrot.slane %v2855_v28, 2  ;;  %v328_v53 = vrot.slane %v2858_v37, 2  ;;  %v329_v4 = vrot.slane %v2863_v13, 2  ;;  %v330_v12 = vrot.slane %v2866_v45, 2 }
  0xdb   :  { %v331_v5 = vrot.slane %v2871_v62, 2  ;;  %v332_v30 = vrot.slane %v2874_v6, 2  ;;  %v333_v26 = vrot.slane %v2879_v24, 2  ;;  %v334_v47 = vrot.slane %v2882_v25, 2 }
  0xdc   :  { %v335_v31 = vrot.slane %v2887_v52, 2  ;;  %v336_v14 = vrot.slane %v2890_v8, 2  ;;  %v337_v16 = vadd.s32 %v321_v51, %v305_v29  ;;  %v338_v23 = vadd.s32 %v322_v61, %v306_v22  ;;  %v4268_v29 = vld [vmem:[#allocation45_spill] sm:$0xff] }
  0xdd   :  { %v339_v60 = vadd.s32 %v323_v10, %v307_v21  ;;  %v340_v3 = vadd.s32 %v324_v11, %v308_v33  ;;  %v341_v49 = vadd.s32 %v325_v39, %v309_v58  ;;  %v342_v15 = vadd.s32 %v326_v43, %v310_v50 }
  0xde   :  { %v343_v20 = vadd.s32 %v327_v32, %v311_v34  ;;  %v344_v41 = vadd.s32 %v328_v53, %v312_v44  ;;  %v345_v18 = vadd.s32 %v329_v4, %v313_v27  ;;  %v346_v38 = vadd.s32 %v330_v12, %v314_v0 }
  0xdf   :  { %v347_v63 = vadd.s32 %v331_v5, %v315_v2  ;;  %v348_v17 = vadd.s32 %v332_v30, %v316_v54  ;;  %v349_v55 = vadd.s32 %v333_v26, %v317_v42  ;;  %v350_v1 = vadd.s32 %v334_v47, %v318_v57  ;;  %v4267_v5 = vld [vmem:[#allocation44_spill] sm:$0xff] }
  0xe0   :  { %v351_v7 = vadd.s32 %v335_v31, %v319_v36  ;;  %v352_v56 = vadd.s32 %v336_v14, %v320_v40  ;;  %v353_v52 = vrot.slane %v2829_v9, 3  ;;  %v354_v8 = vrot.slane %v2832_v19, 3 }
  0xe1   :  { %v355_v22 = vrot.slane %v2841_v48, 3  ;;  %v356_v21 = vrot.slane %v2844_v59, 3  ;;  %v357_v50 = vrot.slane %v2847_v46, 3  ;;  %v358_v44 = vrot.slane %v2850_v35, 3 }
  0xe2   :  { %v359_v34 = vrot.slane %v2855_v28, 3  ;;  %v360_v30 = vrot.slane %v2858_v37, 3  ;;  %v361_v26 = vrot.slane %v2863_v13, 3  ;;  %v362_v31 = vrot.slane %v2866_v45, 3 }
  0xe3   :  { %v363_v14 = vrot.slane %v2871_v62, 3  ;;  %v364_v54 = vrot.slane %v2874_v6, 3  ;;  %v365_v2 = vrot.slane %v2879_v24, 3  ;;  %v366_v47 = vrot.slane %v2882_v25, 3 }
  0xe4   :  { %v367_v58 = vrot.slane %v4267_v5, 3  ;;  %v368_v33 = vrot.slane %v4268_v29, 3  ;;  %v369_v27 = vadd.s32 %v353_v52, %v337_v16  ;;  %v370_v0 = vadd.s32 %v354_v8, %v338_v23 }
  0xe5   :  { %v371_v42 = vadd.s32 %v355_v22, %v339_v60  ;;  %v372_v57 = vadd.s32 %v356_v21, %v340_v3  ;;  %v373_v36 = vadd.s32 %v357_v50, %v341_v49  ;;  %v374_v40 = vadd.s32 %v358_v44, %v342_v15 }
  0xe6   :  { %v375_v51 = vadd.s32 %v359_v34, %v343_v20  ;;  %v376_v61 = vadd.s32 %v360_v30, %v344_v41  ;;  %v377_v10 = vadd.s32 %v361_v26, %v345_v18  ;;  %v378_v11 = vadd.s32 %v362_v31, %v346_v38  ;;  %v4270_v41 = vld [vmem:[#allocation45_spill] sm:$0xff] }
  0xe7   :  { %v379_v39 = vadd.s32 %v363_v14, %v347_v63  ;;  %v380_v43 = vadd.s32 %v364_v54, %v348_v17  ;;  %v381_v32 = vadd.s32 %v365_v2, %v349_v55  ;;  %v382_v53 = vadd.s32 %v366_v47, %v350_v1  ;;  %v4269_v55 = vld [vmem:[#allocation44_spill] sm:$0xff] }
  0xe8   :  { %v383_v4 = vadd.s32 %v367_v58, %v351_v7  ;;  %v384_v12 = vadd.s32 %v368_v33, %v352_v56  ;;  %v385_v5 = vrot.slane %v2829_v9, 4  ;;  %v386_v29 = vrot.slane %v2832_v19, 4 }
  0xe9   :  { %v387_v16 = vrot.slane %v2841_v48, 4  ;;  %v388_v23 = vrot.slane %v2844_v59, 4  ;;  %v389_v15 = vrot.slane %v2847_v46, 4  ;;  %v390_v20 = vrot.slane %v2850_v35, 4 }
  0xea   :  { %v391_v18 = vrot.slane %v2855_v28, 4  ;;  %v392_v17 = vrot.slane %v2858_v37, 4  ;;  %v393_v3 = vrot.slane %v2863_v13, 4  ;;  %v394_v1 = vrot.slane %v2866_v45, 4 }
  0xeb   :  { %v395_v56 = vrot.slane %v2871_v62, 4  ;;  %v396_v7 = vrot.slane %v2874_v6, 4  ;;  %v397_v63 = vrot.slane %v2879_v24, 4  ;;  %v398_v49 = vrot.slane %v2882_v25, 4 }
  0xec   :  { %v399_v38 = vrot.slane %v4269_v55, 4  ;;  %v400_v60 = vrot.slane %v4270_v41, 4  ;;  %v401_v52 = vadd.s32 %v385_v5, %v369_v27  ;;  %v402_v8 = vadd.s32 %v386_v29, %v370_v0 }
  0xed   :  { %v403_v22 = vadd.s32 %v387_v16, %v371_v42  ;;  %v404_v21 = vadd.s32 %v388_v23, %v372_v57  ;;  %v405_v50 = vadd.s32 %v389_v15, %v373_v36  ;;  %v406_v44 = vadd.s32 %v390_v20, %v374_v40 }
  0xee   :  { %v407_v34 = vadd.s32 %v391_v18, %v375_v51  ;;  %v408_v30 = vadd.s32 %v392_v17, %v376_v61  ;;  %v409_v26 = vadd.s32 %v393_v3, %v377_v10  ;;  %v410_v31 = vadd.s32 %v394_v1, %v378_v11  ;;  %v4271_v51 = vld [vmem:[#allocation44_spill] sm:$0xff]  ;;  %v4272_v61 = vld [vmem:[#allocation45_spill] sm:$0xff] }
  0xef   :  { %v411_v14 = vadd.s32 %v395_v56, %v379_v39  ;;  %v412_v54 = vadd.s32 %v396_v7, %v380_v43  ;;  %v413_v2 = vadd.s32 %v397_v63, %v381_v32  ;;  %v414_v47 = vadd.s32 %v398_v49, %v382_v53  ;;  %v4273_v56 = vld [vmem:[#allocation26_spill] sm:$0xff] }
  0xf0   :  { %v415_v58 = vadd.s32 %v399_v38, %v383_v4  ;;  %v416_v33 = vadd.s32 %v400_v60, %v384_v12  ;;  %v417_v55 = vrot.slane %v2829_v9, 5  ;;  %v418_v41 = vrot.slane %v2832_v19, 5 }
  0xf1   :  { %v419_v5 = vrot.slane %v2841_v48, 5  ;;  %v420_v29 = vrot.slane %v2844_v59, 5  ;;  %v421_v27 = vrot.slane %v2847_v46, 5  ;;  %v422_v0 = vrot.slane %v2850_v35, 5 }
  0xf2   :  { %v423_v42 = vrot.slane %v2855_v28, 5  ;;  %v424_v57 = vrot.slane %v2858_v37, 5  ;;  %v425_v36 = vrot.slane %v2863_v13, 5  ;;  %v426_v40 = vrot.slane %v2866_v45, 5 }
  0xf3   :  { %v427_v9 = vrot.slane %v2871_v62, 5  ;;  %v428_v19 = vrot.slane %v2874_v6, 5  ;;  %v429_v48 = vrot.slane %v2879_v24, 5  ;;  %v430_v59 = vrot.slane %v2882_v25, 5 }
  0xf4   :  { %v431_v46 = vrot.slane %v4271_v51, 5  ;;  %v432_v35 = vrot.slane %v4272_v61, 5  ;;  %v433_v10 = vadd.s32 %v417_v55, %v401_v52  ;;  %v434_v28 = vadd.s32 %v418_v41, %v402_v8  ;;  %v4274_v8 = vld [vmem:[#allocation27_spill] sm:$0xff] }
  0xf5   :  { %v435_v11 = vadd.s32 %v419_v5, %v403_v22  ;;  %v436_v37 = vadd.s32 %v420_v29, %v404_v21  ;;  %v437_v39 = vadd.s32 %v421_v27, %v405_v50  ;;  %v438_v13 = vadd.s32 %v422_v0, %v406_v44  ;;  %v4275_v22 = vld [vmem:[#allocation24_spill] sm:$0xff]  ;;  %v4281_v5 = vld [vmem:[#allocation39_spill] sm:$0xff]  ;;  %v4282_v29 = vld [vmem:[#allocation6_spill] sm:$0xff] }
  0xf6   :  { %v439_v43 = vadd.s32 %v423_v42, %v407_v34  ;;  %v440_v45 = vadd.s32 %v424_v57, %v408_v30  ;;  %v441_v32 = vadd.s32 %v425_v36, %v409_v26  ;;  %v442_v62 = vadd.s32 %v426_v40, %v410_v31  ;;  %v4276_v50 = vld [vmem:[#allocation36_spill] sm:$0xff]  ;;  %v4283_v57 = vld [vmem:[#allocation2_spill] sm:$0xff]  ;;  %v4284_v36 = vld [vmem:[#allocation31_spill] sm:$0xff] }
  0xf7   :  { %v443_v53 = vadd.s32 %v427_v9, %v411_v14  ;;  %v444_v6 = vadd.s32 %v428_v19, %v412_v54  ;;  %v445_v4 = vadd.s32 %v429_v48, %v413_v2  ;;  %v446_v24 = vadd.s32 %v430_v59, %v414_v47  ;;  %v4277_v44 = vld [vmem:[#allocation4_spill] sm:$0xff]  ;;  %v4279_v54 = vld [vmem:[#allocation38_spill] sm:$0xff]  ;;  %v4280_v2 = vld [vmem:[#allocation5_spill] sm:$0xff] }
  0xf8   :  { %v447_v12 = vadd.s32 %v431_v46, %v415_v58  ;;  %v448_v25 = vadd.s32 %v432_v35, %v416_v33  ;;  %v449_v16 = vcombine.low %v433_v10, %v434_v28  ;;  %v450_v23 = vcombine.low %v435_v11, %v436_v37  ;;  %v4278_v31 = vld [vmem:[#allocation28_spill] sm:$0xff]  ;;  %v4286_v9 = vld [vmem:[#allocation22_spill] sm:$0xff]  ;;  %v4289_v35 = vld [vmem:[#allocation3_spill] sm:$0xff] }
  0xf9   :  { %v451_v15 = vcombine.low %v437_v39, %v438_v13  ;;  %v452_v20 = vcombine.low %v439_v43, %v440_v45  ;;  %v498_v18 = vcombine.low %v441_v32, %v442_v62  ;;  %v499_v17 = vcombine.low %v443_v53, %v444_v6  ;;  %v4287_v48 = vld [vmem:[#allocation40_spill] sm:$0xff]  ;;  %v4292_v37 = vld [vmem:[#allocation29_spill] sm:$0xff]  ;;  %v4295_v53 = vld [vmem:[#allocation30_spill] sm:$0xff] }
  0xfa   :  { %v500_v3 = vcombine.low %v445_v4, %v446_v24  ;;  %v501_v1 = vcombine.low %v447_v12, %v448_v25  ;;  %v459_v7 = vrot.slane %v449_v16, %v4273_v56  ;;  %v466_v63 = vrot.slane %v450_v23, %v4273_v56  ;;  %v4288_v59 = vld [vmem:[#allocation8_spill] sm:$0xff]  ;;  %v4293_v13 = vld [vmem:[#allocation41_spill] sm:$0xff]  ;;  %v4296_v4 = vld [vmem:[#allocation42_spill] sm:$0xff] }
  0xfb   :  { %v473_v49 = vrot.slane %v451_v15, %v4273_v56  ;;  %v480_v55 = vrot.slane %v452_v20, %v4273_v56  ;;  %v508_v38 = vrot.slane %v498_v18, %v4273_v56  ;;  %v515_v41 = vrot.slane %v499_v17, %v4273_v56  ;;  %v4290_v10 = vld [vmem:[#allocation32_spill] sm:$0xff]  ;;  %v4294_v43 = vld [vmem:[#allocation9_spill] sm:$0xff]  ;;  %v4297_v24 = vld [vmem:[#allocation10_spill] sm:$0xff] }
  0xfc   :  { %v522_v60 = vrot.slane %v500_v3, %v4273_v56  ;;  %v529_v52 = vrot.slane %v501_v1, %v4273_v56  ;;  %v2988_v21 = vmul.f32 %v4275_v22, %v4274_v8  ;;  %v205_v34 = vsub.f32 %v4277_v44, %v4276_v50  ;;  %v4298_v23 = vld [vmem:[#allocation33_spill] sm:$0xff]  ;;  %v4299_v20 = vld [vmem:[#allocation11_spill] sm:$0xff] }
  0xfd   :  { %v481_v30 = vcombine.low %v459_v7, %v466_v63  ;;  %v482_v26 = vcombine.low %v473_v49, %v480_v55  ;;  %v2994_v14 = vmul.f32 %v4275_v22, %v4278_v31  ;;  %v206_v47 = vsub.f32 %v4280_v2, %v4279_v54  ;;  %v4300_v3 = vld [vmem:[#allocation7_spill] sm:$0xff]  ;;  %v4301_v7 = vld [vmem:[#allocation34_spill] sm:$0xff]  ;;  %v4302_v49 = vld [vmem:[#allocation12_spill] sm:$0xff] }
  0xfe   :  { %v530_v58 = vcombine.low %v508_v38, %v515_v41  ;;  %v531_v33 = vcombine.low %v522_v60, %v529_v52  ;;  %v207_v27 = vsub.f32 %v4282_v29, %v4281_v5  ;;  %v4285_v40 = vsub.f32 %v4283_v57, %v4284_v36  ;;  %v4303_v60 = vld [vmem:[#allocation35_spill] sm:$0xff]  ;;  %v4305_v8 = vld [vmem:[#allocation13_spill] sm:$0xff]  ;;  %v4308_v2 = vld [vmem:[#allocation14_spill] sm:$0xff] }
  0xff   :  { %v489_v0 = vrot.slane %v481_v30, %v4273_v56  ;;  %v496_v42 = vrot.slane %v482_v26, %v4273_v56  ;;  %v208_v51 = vsub.f32 %v4288_v59, %v4287_v48  ;;  %v4291_v28 = vsub.f32 %v4289_v35, %v4290_v10  ;;  %v4306_v26 = vld [vmem:[#allocation37_spill] sm:$0xff]  ;;  %v4309_v29 = vld [vmem:[#allocation15_spill] sm:$0xff]  ;;  %v4310_v57 = vld [vmem:[#allocation16_spill] sm:$0xff] }
 0x100   :  { %v557_v19 = vmul.f32 %v4286_v9, %v4285_v40  ;;  %v538_v46 = vrot.slane %v530_v58, %v4273_v56  ;;  %v545_v61 = vrot.slane %v531_v33, %v4273_v56  ;;  %v3016_v39 = vmul.f32 %v4275_v22, %v4292_v37  ;;  %v4311_v59 = vld [vmem:[#allocation17_spill] sm:$0xff]  ;;  %v4312_v35 = vld [vmem:[#allocation18_spill] sm:$0xff] }
 0x101   :  { %v558_v11 = vmul.f32 %v4286_v9, %v4291_v28  ;;  %v209_v45 = vsub.f32 %v4294_v43, %v4293_v13  ;;  %v497_v32 = vcombine.low %v489_v0, %v496_v42  ;;  %v559_v62 = vmul.f32 %v4286_v9, %v205_v34 }
 0x102   :  { %v3023_v6 = vmul.f32 %v4275_v22, %v4295_v53  ;;  %v210_v12 = vsub.f32 %v4297_v24, %v4296_v4  ;;  %v546_v25 = vcombine.low %v538_v46, %v545_v61  ;;  %v560_v16 = vmul.f32 %v4286_v9, %v206_v47 }
 0x103   :  { %v3030_v15 = vmul.f32 %v4275_v22, %v4298_v23  ;;  %v211_v18 = vsub.f32 %v4299_v20, %v2988_v21  ;;  %547 = vst [vmem:[%s4041_s8] ss:$2 sm:$0xff] %v497_v32  ;;  %v561_v17 = vmul.f32 %v4286_v9, %v207_v27  ;;  %v573_v1 = vadd.f32 %v557_v19, %v4300_v3 }
 0x104   :  { %v3041_v63 = vmul.f32 %v4275_v22, %v4301_v7  ;;  %v212_v55 = vsub.f32 %v4302_v49, %v2994_v14  ;;  %1740 = vst [vmem:[%s4041_s8 + $0x10] ss:$2 sm:$0xff] %v546_v25  ;;  %v562_v38 = vmul.f32 %v4286_v9, %v208_v51  ;;  %v574_v41 = vadd.f32 %v558_v11, %v4300_v3 }
 0x105   :  { %v3052_v52 = vmul.f32 %v4275_v22, %v4303_v60  ;;  %v213_v44 = vsub.f32 %v4305_v8, %v3016_v39  ;;  %v563_v34 = vmul.f32 %v4286_v9, %v209_v45  ;;  %v575_v30 = vadd.f32 %v559_v62, %v4300_v3 }
 0x106   :  { %v3060_v31 = vmul.f32 %v4275_v22, %v4306_v26  ;;  %v214_v47 = vsub.f32 %v4308_v2, %v3023_v6  ;;  %v564_v58 = vmul.f32 %v4286_v9, %v210_v12  ;;  %v576_v33 = vadd.f32 %v560_v16, %v4300_v3  ;;  %v4318_v2 = vld [vmem:[#allocation20_spill] sm:$0xff] }
 0x107   :  { %4304 = vst [vmem:[#allocation44_spill] sm:$0xff] %v3052_v52  ;;  %v215_v27 = vsub.f32 %v4309_v29, %v3030_v15  ;;  %v565_v0 = vmul.f32 %v4286_v9, %v211_v18  ;;  %v577_v42 = vadd.f32 %v561_v17, %v4300_v3  ;;  %2161 = vtanh.f32 %v573_v1 }
 0x108   :  { %4307 = vst [vmem:[#allocation45_spill] sm:$0xff] %v3060_v31  ;;  %v216_v40 = vsub.f32 %v4310_v57, %v3041_v63  ;;  %v566_v22 = vmul.f32 %v4286_v9, %v212_v55  ;;  %v578_v19 = vadd.f32 %v562_v38, %v4300_v3  ;;  %2163 = vtanh.f32 %v574_v41  ;;  %v4313_v55 = vld [vmem:[#allocation19_spill] sm:$0xff] }
 0x109   :  { %v217_v51 = vsub.f32 %v4311_v59, %v3052_v52  ;;  %v567_v46 = vmul.f32 %v4286_v9, %v213_v44  ;;  %v579_v61 = vadd.f32 %v563_v34, %v4300_v3  ;;  %2165 = vtanh.f32 %v575_v30  ;;  %v4314_v41 = vld [vmem:[#allocation23_spill] sm:$0xff] }
 0x10a   :  { %v218_v28 = vsub.f32 %v4312_v35, %v3060_v31  ;;  %v568_v11 = vmul.f32 %v4286_v9, %v214_v47  ;;  %v580_v37 = vadd.f32 %v564_v58, %v4300_v3  ;;  %2167 = vtanh.f32 %v576_v33 }
 0x10b   :  { %v569_v43 = vmul.f32 %v4286_v9, %v215_v27  ;;  %v581_v45 = vadd.f32 %v565_v0, %v4300_v3  ;;  %2169 = vtanh.f32 %v577_v42  ;;  %v570_v32 = vmul.f32 %v4286_v9, %v216_v40 }
 0x10c   :  { %v582_v62 = vadd.f32 %v566_v22, %v4300_v3  ;;  %2171 = vtanh.f32 %v578_v19  ;;  %v571_v53 = vmul.f32 %v4286_v9, %v217_v51  ;;  %v583_v24 = vadd.f32 %v567_v46, %v4300_v3 }
 0x10d   :  { %2173 = vtanh.f32 %v579_v61  ;;  %v572_v12 = vmul.f32 %v4286_v9, %v218_v28  ;;  %v584_v25 = vadd.f32 %v568_v11, %v4300_v3  ;;  %v585_v16 = vadd.f32 %v569_v43, %v4300_v3 }
 0x10e   :  { %2175 = vtanh.f32 %v580_v37  ;;  %v586_v23 = vadd.f32 %v570_v32, %v4300_v3  ;;  %v2200_v20 = vmov 1983009808   ;;  %v587_v17 = vadd.f32 %v571_v53, %v4300_v3 }
 0x10f   :  { %2177 = vtanh.f32 %v581_v45  ;;  %v1659_v18 = vunpack.c.l.s4 %v2200_v20  ;;  %v588_v1 = vadd.f32 %v572_v12, %v4300_v3  ;;  %v3096_v60 = vsub.s32 5, %v4314_v41 }
 0x110   :  { %2179 = vtanh.f32 %v582_v62  ;;  %v3100_v34 = vsub.s32 0, %v4314_v41  ;;  %v3103_v3 = vsub.s32 1, %v4314_v41  ;;  %v3110_v58 = vsub.s32 2, %v4314_v41 }
 0x111   :  { %2181 = vtanh.f32 %v583_v24  ;;  %v1660_v9 = vunpack.c.0.s8 %v1659_v18  ;;  %4315 = vst [vmem:[#allocation27_spill] sm:$0xff] %v3096_v60  ;;  %v3113_v33 = vsub.s32 3, %v4314_v41  ;;  %v3120_v42 = vsub.s32 4, %v4314_v41 }
 0x112   :  { %2183 = vtanh.f32 %v584_v25  ;;  %4316 = vst [vmem:[#allocation24_spill] sm:$0xff] %v3100_v34  ;;  %4317 = vst [vmem:[#allocation36_spill] sm:$0xff] %v3103_v3 }
 0x113   :  { %2185 = vtanh.f32 %v585_v16  ;;  %4319 = vst [vmem:[#allocation4_spill] sm:$0xff] %v3110_v58  ;;  %4320 = vst [vmem:[#allocation28_spill] sm:$0xff] %v3113_v33  ;;  %v3123_v57 = vsub.s32 %v1660_v9, %v4314_v41 }
 0x114   :  { %v2162_v7 = vpop.eup %2161  ;;  %2187 = vtanh.f32 %v586_v23  ;;  %4321 = vst [vmem:[#allocation38_spill] sm:$0xff] %v3120_v42 }
 0x115   :  { %v2164_v49 = vpop.eup %2163  ;;  %2189 = vtanh.f32 %v587_v17  ;;  %v605_v38 = vmul.f32 %v2162_v7, %v4313_v55  ;;  %4322 = vst [vmem:[#allocation5_spill] sm:$0xff] %v3123_v57 }
 0x116   :  { %v2166_v8 = vpop.eup %2165  ;;  %2191 = vtanh.f32 %v588_v1  ;;  %v606_v44 = vmul.f32 %v2164_v49, %v4313_v55 }
 0x117   :  { %v2168_v30 = vpop.eup %2167  ;;  %v607_v26 = vmul.f32 %v2166_v8, %v4313_v55  ;;  %v3107_v47 = vsub.f32 %v605_v38, %v4318_v2 }
 0x118   :  { %v2170_v29 = vpop.eup %2169  ;;  %v608_v27 = vmul.f32 %v2168_v30, %v4313_v55  ;;  %v3117_v0 = vsub.f32 %v606_v44, %v4318_v2 }
 0x119   :  { %v2172_v40 = vpop.eup %2171  ;;  %v609_v22 = vmul.f32 %v2170_v29, %v4313_v55  ;;  %v3127_v19 = vsub.f32 %v607_v26, %v4318_v2  ;;  %v1927_v59 = vand.u32 2147483647, %v3107_v47  ;;  %v4110_v51 = vcvt.f32.s32 %v3107_v47 }
 0x11a   :  { %v2174_v46 = vpop.eup %2173  ;;  %v610_v61 = vmul.f32 %v2172_v40, %v4313_v55  ;;  %v3133_v35 = vsub.f32 %v608_v27, %v4318_v2  ;;  %v1932_v28 = vand.u32 2147483648, %v3107_v47  ;;  %v1935_v11 = vand.u32 2147483647, %v3117_v0 }
 0x11b   :  { %v2176_v37 = vpop.eup %2175  ;;  %v611_v43 = vmul.f32 %v2174_v46, %v4313_v55  ;;  %v3139_v45 = vsub.f32 %v609_v22, %v4318_v2  ;;  %vm3141_vm0 = vcmp.lt.f32.partialorder %v1927_v59, 8388608.0  ;;  %v1930_v62 = vcvt.s32.f32 %v4110_v51 }
 0x11c   :  { %v2178_v53 = vpop.eup %2177  ;;  %v612_v24 = vmul.f32 %v2176_v37, %v4313_v55  ;;  %v3149_v12 = vsub.f32 %v610_v61, %v4318_v2  ;;  %vm3151_vm1 = vcmp.lt.f32.partialorder %v1935_v11, 8388608.0  ;;  %v4109_v16 = vcvt.f32.s32 %v3117_v0 }
 0x11d   :  { %v2180_v23 = vpop.eup %2179  ;;  %v613_v20 = vmul.f32 %v2178_v53, %v4313_v55  ;;  %v3158_v18 = vsub.f32 %v611_v43, %v4318_v2  ;;  %v1931_v17 = vand.u32 2147483647, %v1930_v62  ;;  %v1940_v1 = vand.u32 2147483648, %v3117_v0 }
 0x11e   :  { %v2182_v7 = vpop.eup %2181  ;;  %v614_v9 = vmul.f32 %v2180_v23, %v4313_v55  ;;  %v3163_v49 = vsub.f32 %v612_v24, %v4318_v2  ;;  %v1938_v38 = vcvt.s32.f32 %v4109_v16  ;;  %v1943_v41 = vand.u32 2147483647, %v3127_v19 }
 0x11f   :  { %4327 = vst [vmem:[#allocation39_spill] sm:$0xff] %v3158_v18  ;;  %v2184_v8 = vpop.eup %2183  ;;  %v615_v44 = vmul.f32 %v2182_v7, %v4313_v55  ;;  %v3170_v30 = vsub.f32 %v613_v20, %v4318_v2  ;;  %v3172_v26 = vor.u32 %v1932_v28, %v1931_v17  ;;  %v4108_v29 = vcvt.f32.s32 %v3127_v19 }
 0x120   :  { %4328 = vst [vmem:[#allocation6_spill] sm:$0xff] %v3163_v49  ;;  %v2186_v27 = vpop.eup %2185  ;;  %v616_v40 = vmul.f32 %v2184_v8, %v4313_v55  ;;  %v3177_v22 = vsub.f32 %v614_v9, %v4318_v2  ;;  %v1939_v59 = vand.u32 2147483647, %v1938_v38  ;;  %vm3179_vm2 = vcmp.lt.f32.partialorder %v1943_v41, 8388608.0 }
 0x121   :  { %v2188_v61 = vpop.eup %2187  ;;  %v617_v11 = vmul.f32 %v2186_v27, %v4313_v55  ;;  %v3185_v37 = vsub.f32 %v615_v44, %v4318_v2  ;;  %v1946_v43 = vcvt.s32.f32 %v4108_v29  ;;  %v1948_v20 = vand.u32 2147483648, %v3127_v19 }
 0x122   :  { %4329 = vst [vmem:[#allocation2_spill] sm:$0xff] %v3177_v22  ;;  %v2190_v62 = vpop.eup %2189  ;;  %v618_v53 = vmul.f32 %v2188_v61, %v4313_v55  ;;  %v3195_v24 = vsub.f32 %v616_v40, %v4318_v2  ;;  %v3197_v23 = vor.u32 %v1940_v1, %v1939_v59  ;;  %v1951_v41 = vand.u32 2147483647, %v3133_v35 }
 0x123   :  { %v2192_v17 = vpop.eup %2191  ;;  %v619_v7 = vmul.f32 %v2190_v62, %v4313_v55  ;;  %v3202_v9 = vsub.f32 %v617_v11, %v4318_v2  ;;  %v1947_v38 = vand.u32 2147483647, %v1946_v43  ;;  %v4107_v27 = vcvt.f32.s32 %v3133_v35 }
 0x124   :  { %v620_v8 = vmul.f32 %v2192_v17, %v4313_v55  ;;  %v3207_v44 = vsub.f32 %v618_v53, %v4318_v2  ;;  %vm3219_vm3 = vcmp.lt.f32.partialorder %v1951_v41, 8388608.0  ;;  %v1956_v55 = vand.u32 2147483648, %v3133_v35 }
 0x125   :  { %v3215_v40 = vsub.f32 %v619_v7, %v4318_v2  ;;  %v3217_v59 = vor.u32 %v1948_v20, %v1947_v38  ;;  %v1954_v43 = vcvt.s32.f32 %v4107_v27  ;;  %v1959_v62 = vand.u32 2147483647, %v3139_v45 }
 0x126   :  { %v3225_v11 = vsub.f32 %v620_v8, %v4318_v2  ;;  %v4111_v53 = vcvt.f32.s32 %v3139_v45  ;;  %v1964_v17 = vand.u32 2147483648, %v3139_v45  ;;  %v1967_v7 = vand.u32 2147483647, %v3149_v12 }
 0x127   :  { %v4113_v38 = vcvt.f32.s32 %v3149_v12  ;;  %v1955_v2 = vand.u32 2147483647, %v1954_v43  ;;  %vm3238_vm4 = vcmp.lt.f32.partialorder %v1959_v62, 8388608.0  ;;  %v1972_v27 = vand.u32 2147483648, %v3149_v12 }
 0x128   :  { %v1962_v8 = vcvt.s32.f32 %v4111_v53  ;;  %vm3245_vm5 = vcmp.lt.f32.partialorder %v1967_v7, 8388608.0  ;;  %v1975_v51 = vand.u32 2147483647, %v3158_v18  ;;  %v4115_v43 = vcvt.f32.s32 %v3158_v18 }
 0x129   :  { %v1970_v16 = vcvt.s32.f32 %v4113_v38  ;;  %v3253_v62 = vor.u32 %v1956_v55, %v1955_v2  ;;  %v1980_v1 = vand.u32 2147483648, %v3158_v18  ;;  %v1983_v53 = vand.u32 2147483647, %v3163_v49 }
 0x12a   :  { %v1963_v20 = vand.u32 2147483647, %v1962_v8  ;;  %vm3257_vm6 = vcmp.lt.f32.partialorder %v1975_v51, 8388608.0  ;;  %v1978_v57 = vcvt.s32.f32 %v4115_v43  ;;  %v4117_v38 = vcvt.f32.s32 %v3163_v49 }
 0x12b   :  { %v1971_v28 = vand.u32 2147483647, %v1970_v16  ;;  %vm3270_vm7 = vcmp.lt.f32.partialorder %v1983_v53, 8388608.0  ;;  %v1988_v51 = vand.u32 2147483648, %v3163_v49  ;;  %v1991_v33 = vand.u32 2147483647, %v3170_v30 }
 0x12c   :  { %v3268_v2 = vor.u32 %v1964_v17, %v1963_v20  ;;  %v1979_v42 = vand.u32 2147483647, %v1978_v57  ;;  %v1986_v43 = vcvt.s32.f32 %v4117_v38  ;;  %v4121_v53 = vcvt.f32.s32 %v3170_v30 }
 0x12d   :  { %v3275_v16 = vor.u32 %v1972_v27, %v1971_v28  ;;  %v1996_v17 = vand.u32 2147483648, %v3170_v30  ;;  %v1999_v55 = vand.u32 2147483647, %v3177_v22  ;;  %vm3293_vm8 = vcmp.lt.f32.partialorder %v1991_v33, 8388608.0 }
 0x12e   :  { %v3291_v28 = vor.u32 %v1980_v1, %v1979_v42  ;;  %v1987_v27 = vand.u32 2147483647, %v1986_v43  ;;  %v1994_v20 = vcvt.s32.f32 %v4121_v53  ;;  %v4124_v3 = vcvt.f32.s32 %v3177_v22 }
 0x12f   :  { %vm3299_vm9 = vcmp.lt.f32.partialorder %v1999_v55, 8388608.0  ;;  %v2004_v34 = vand.u32 2147483648, %v3177_v22  ;;  %v2007_v1 = vand.u32 2147483647, %v3185_v37  ;;  %v4127_v43 = vcvt.f32.s32 %v3185_v37 }
 0x130   :  { %v1982_v42 = vsel %vm3257_vm6, %v3291_v28, %v3158_v18  ;;  %v1989_v33 = vor.u32 %v1988_v51, %v1987_v27  ;;  %v1995_v57 = vand.u32 2147483647, %v1994_v20  ;;  %v2002_v55 = vcvt.s32.f32 %v4124_v3 }
 0x131   :  { %v2012_v53 = vand.u32 2147483648, %v3185_v37  ;;  %v2015_v56 = vand.u32 2147483647, %v3195_v24  ;;  %vm3318_vm10 = vcmp.lt.f32.partialorder %v2007_v1, 8388608.0  ;;  %v2010_v51 = vcvt.s32.f32 %v4127_v43 }
 0x132   :  { %v1990_v60 = vsel %vm3270_vm7, %v1989_v33, %v3163_v49  ;;  %v4129_v20 = vcvt.f32.s32 %v3195_v24  ;;  %v1997_v28 = vor.u32 %v1996_v17, %v1995_v57  ;;  %v2003_v27 = vand.u32 2147483647, %v2002_v55 }
 0x133   :  { %vm3325_vm11 = vcmp.lt.f32.partialorder %v2015_v56, 8388608.0  ;;  %v2020_v18 = vand.u32 2147483648, %v3195_v24  ;;  %v2011_v31 = vand.u32 2147483647, %v2010_v51  ;;  %v2023_v33 = vand.u32 2147483647, %v3202_v9 }
 0x134   :  { %v2018_v8 = vcvt.s32.f32 %v4129_v20  ;;  %v4131_v1 = vcvt.f32.s32 %v3202_v9  ;;  %v1998_v43 = vsel %vm3293_vm8, %v1997_v28, %v3170_v30  ;;  %v2005_v17 = vor.u32 %v2004_v34, %v2003_v27 }
 0x135   :  { %v2028_v56 = vand.u32 2147483648, %v3202_v9  ;;  %v2031_v57 = vand.u32 2147483647, %v3207_v44  ;;  %v2013_v55 = vor.u32 %v2012_v53, %v2011_v31  ;;  %vm3339_vm12 = vcmp.lt.f32.partialorder %v2023_v33, 8388608.0 }
 0x136   :  { %v2019_v49 = vand.u32 2147483647, %v2018_v8  ;;  %v2026_v20 = vcvt.s32.f32 %v4131_v1  ;;  %v2006_v52 = vsel %vm3299_vm9, %v2005_v17, %v3177_v22  ;;  %v4133_v34 = vcvt.f32.s32 %v3207_v44 }
 0x137   :  { %vm3348_vm13 = vcmp.lt.f32.partialorder %v2031_v57, 8388608.0  ;;  %v2036_v31 = vand.u32 2147483648, %v3207_v44  ;;  %v2014_v53 = vsel %vm3318_vm10, %v2013_v55, %v3185_v37  ;;  %v2039_v8 = vand.u32 2147483647, %v3215_v40 }
 0x138   :  { %v2021_v28 = vor.u32 %v2020_v18, %v2019_v49  ;;  %v2027_v27 = vand.u32 2147483647, %v2026_v20  ;;  %v2034_v58 = vcvt.s32.f32 %v4133_v34  ;;  %v4134_v33 = vcvt.f32.s32 %v3215_v40 }
 0x139   :  { %v2044_v17 = vand.u32 2147483648, %v3215_v40  ;;  %v2047_v57 = vand.u32 2147483647, %v3225_v11  ;;  %vm3366_vm14 = vcmp.lt.f32.partialorder %v2039_v8, 8388608.0  ;;  %v2049_v18 = vcvt.f32.s32 %v3225_v11 }
 0x13a   :  { %v2022_v1 = vsel %vm3325_vm11, %v2021_v28, %v3195_v24  ;;  %v2029_v22 = vor.u32 %v2028_v56, %v2027_v27  ;;  %v2035_v49 = vand.u32 2147483647, %v2034_v58  ;;  %v2042_v20 = vcvt.s32.f32 %v4134_v33  ;;  %v4358_v28 = vld [vmem:[#allocation21_spill] sm:$0xff] }
 0x13b   :  { %vm3373_vm15 = vcmp.lt.f32.partialorder %v2047_v57, 8388608.0  ;;  %v2052_v34 = vand.u32 2147483648, %v3225_v11  ;;  %v2050_v56 = vcvt.s32.f32 %v2049_v18  ;;  %v4359_v27 = vsel %vm3141_vm0, %v3172_v26, %v3107_v47 }
 0x13c   :  { %v2030_v3 = vsel %vm3339_vm12, %v2029_v22, %v3202_v9  ;;  %v653_v8 = vmul.f32 %v4359_v27, %v4358_v28  ;;  %v4360_v58 = vsel %vm3151_vm1, %v3197_v23, %v3117_v0  ;;  %v2037_v33 = vor.u32 %v2036_v31, %v2035_v49 }
 0x13d   :  { %v654_v57 = vmul.f32 %v4360_v58, %v4358_v28  ;;  %v2043_v51 = vand.u32 2147483647, %v2042_v20  ;;  %v4361_v22 = vsel %vm3179_vm2, %v3217_v59, %v3127_v19  ;;  %v4362_v26 = vsel %vm3219_vm3, %v3253_v62, %v3133_v35 }
 0x13e   :  { %v655_v32 = vmul.f32 %v4361_v22, %v4358_v28  ;;  %v656_v25 = vmul.f32 %v4362_v26, %v4358_v28  ;;  %v2051_v27 = vand.u32 2147483647, %v2050_v56  ;;  %v4363_v23 = vsel %vm3238_vm4, %v3268_v2, %v3139_v45  ;;  %v672_v2 = vpop.permute.xlu0 %671 }
 0x13f   :  { %v657_v31 = vmul.f32 %v4363_v23, %v4358_v28  ;;  %v4364_v46 = vsel %vm3245_vm5, %v3275_v16, %v3149_v12  ;;  %v659_v61 = vmul.f32 %v1982_v42, %v4358_v28  ;;  %v2038_v62 = vsel %vm3348_vm13, %v2037_v33, %v3207_v44 }
 0x140   :  { %v658_v59 = vmul.f32 %v4364_v46, %v4358_v28  ;;  %v2045_v49 = vor.u32 %v2044_v17, %v2043_v51  ;;  %v660_v41 = vmul.f32 %v1990_v60, %v4358_v28  ;;  %v661_v20 = vmul.f32 %v1998_v43, %v4358_v28 }
 0x141   :  { %v2053_v56 = vor.u32 %v2052_v34, %v2051_v27  ;;  %v662_v58 = vmul.f32 %v2006_v52, %v4358_v28  ;;  %v663_v29 = vmul.f32 %v2014_v53, %v4358_v28  ;;  %v664_v16 = vmul.f32 %v2022_v1, %v4358_v28 }
 0x142   :  { %v2046_v42 = vsel %vm3366_vm14, %v2045_v49, %v3215_v40  ;;  %v665_v38 = vmul.f32 %v2030_v3, %v4358_v28  ;;  %v666_v33 = vmul.f32 %v2038_v62, %v4358_v28  ;;  %v674_v17 = vmul.f32 %v672_v2, %v653_v8 }
 0x143   :  { %v2054_v60 = vsel %vm3373_vm15, %v2053_v56, %v3225_v11  ;;  %v667_v43 = vmul.f32 %v2046_v42, %v4358_v28  ;;  %v675_v52 = vmul.f32 %v672_v2, %v654_v57  ;;  %v676_v34 = vmul.f32 %v672_v2, %v655_v32 }
 0x144   :  { %v668_v53 = vmul.f32 %v2054_v60, %v4358_v28  ;;  %v677_v1 = vmul.f32 %v672_v2, %v656_v25  ;;  %v678_v51 = vmul.f32 %v672_v2, %v657_v31  ;;  %v679_v22 = vmul.f32 %v672_v2, %v658_v59  ;;  %v4392_v60 = vld [vmem:[#allocation6_spill] sm:$0xff] }
 0x145   :  { %v680_v7 = vmul.f32 %v672_v2, %v659_v61  ;;  %v681_v26 = vmul.f32 %v672_v2, %v660_v41  ;;  %v682_v27 = vmul.f32 %v672_v2, %v661_v20  ;;  %v683_v3 = vmul.f32 %v672_v2, %v662_v58 }
 0x146   :  { %v684_v23 = vmul.f32 %v672_v2, %v663_v29  ;;  %v685_v46 = vmul.f32 %v672_v2, %v664_v16  ;;  %v686_v8 = vmul.f32 %v672_v2, %v665_v38  ;;  %v687_v62 = vmul.f32 %v672_v2, %v666_v33  ;;  %v4390_v33 = vld [vmem:[#allocation39_spill] sm:$0xff] }
 0x147   :  { %v688_v49 = vmul.f32 %v672_v2, %v667_v43  ;;  %v689_v55 = vmul.f32 %v672_v2, %v668_v53  ;;  %v3439_v56 = vadd.f32 %v674_v17, %v4284_v36  ;;  %v3442_v57 = vadd.f32 %v675_v52, %v4290_v10 }
 0x148   :  { %v3445_v28 = vadd.f32 %v676_v34, %v4276_v50  ;;  %v3448_v32 = vadd.f32 %v677_v1, %v4279_v54  ;;  %v3451_v25 = vadd.f32 %v678_v51, %v4281_v5  ;;  %v3454_v31 = vadd.f32 %v679_v22, %v4287_v48  ;;  %v4395_v34 = vld [vmem:[#allocation2_spill] sm:$0xff] }
 0x149   :  { %4365 = vst [vmem:[#allocation31_spill] sm:$0xff] %v3439_v56  ;;  %4366 = vst [vmem:[#allocation22_spill] sm:$0xff] %v3442_v57  ;;  %v3457_v59 = vadd.f32 %v680_v7, %v4293_v13  ;;  %v3460_v36 = vadd.f32 %v681_v26, %v4296_v4  ;;  %v3463_v10 = vadd.f32 %v682_v27, %v2988_v21  ;;  %v4379_v4 = vld [vmem:[#allocation44_spill] sm:$0xff]  ;;  %v4381_v21 = vld [vmem:[#allocation45_spill] sm:$0xff]  ;;  %v4384_v20 = vcvt.f32.s32 %v3107_v47 }
 0x14a   :  { %4367 = vst [vmem:[#allocation40_spill] sm:$0xff] %v3445_v28  ;;  %4368 = vst [vmem:[#allocation8_spill] sm:$0xff] %v3448_v32  ;;  %v3466_v50 = vadd.f32 %v683_v3, %v2994_v14  ;;  %v3469_v54 = vadd.f32 %v684_v23, %v3016_v39  ;;  %v3472_v5 = vadd.f32 %v685_v46, %v3023_v6  ;;  %v4383_v14 = vld [vmem:[#allocation25_spill] sm:$0xff]  ;;  %v4385_v6 = vcvt.f32.s32 %v3117_v0  ;;  %v4402_v46 = vld [vmem:[#allocation43_spill] sm:$0xff] }
 0x14b   :  { %4369 = vst [vmem:[#allocation3_spill] sm:$0xff] %v3451_v25  ;;  %4370 = vst [vmem:[#allocation32_spill] sm:$0xff] %v3454_v31  ;;  %v3475_v48 = vadd.f32 %v686_v8, %v3030_v15  ;;  %v3478_v13 = vadd.f32 %v687_v62, %v3041_v63  ;;  %v3481_v61 = vadd.f32 %v688_v49, %v4379_v4  ;;  %v4386_v15 = vcvt.f32.s32 %v3127_v19 }
 0x14c   :  { %4371 = vst [vmem:[#allocation29_spill] sm:$0xff] %v3457_v59  ;;  %4372 = vst [vmem:[#allocation41_spill] sm:$0xff] %v3460_v36  ;;  %v3484_v41 = vadd.f32 %v689_v55, %v4381_v21  ;;  %v722_v39 = vadd.s32 %v4384_v20, %v4383_v14  ;;  %v723_v2 = vadd.s32 %v4385_v6, %v4383_v14  ;;  %v4387_v63 = vcvt.f32.s32 %v3133_v35 }
 0x14d   :  { %4373 = vst [vmem:[#allocation9_spill] sm:$0xff] %v3463_v10  ;;  %4374 = vst [vmem:[#allocation30_spill] sm:$0xff] %v3466_v50  ;;  %v724_v58 = vadd.s32 %v4386_v15, %v4383_v14  ;;  %v4388_v16 = vcvt.f32.s32 %v3139_v45  ;;  %v4389_v47 = vcvt.f32.s32 %v3149_v12  ;;  %v4391_v0 = vcvt.f32.s32 %v4390_v33 }
 0x14e   :  { %4375 = vst [vmem:[#allocation42_spill] sm:$0xff] %v3469_v54  ;;  %4376 = vst [vmem:[#allocation10_spill] sm:$0xff] %v3472_v5  ;;  %v725_v29 = vadd.s32 %v4387_v63, %v4383_v14  ;;  %v4393_v19 = vcvt.f32.s32 %v4392_v60  ;;  %v4394_v35 = vcvt.f32.s32 %v3170_v30  ;;  %v4396_v45 = vcvt.f32.s32 %v4395_v34 }
 0x14f   :  { %4377 = vst [vmem:[#allocation33_spill] sm:$0xff] %v3475_v48  ;;  %4378 = vst [vmem:[#allocation11_spill] sm:$0xff] %v3478_v13  ;;  %v726_v42 = vadd.s32 %v4388_v16, %v4383_v14  ;;  %v727_v38 = vadd.s32 %v4389_v47, %v4383_v14  ;;  %v728_v17 = vadd.s32 %v4391_v0, %v4383_v14  ;;  %v4397_v12 = vcvt.f32.s32 %v3185_v37 }
 0x150   :  { %4380 = vst [vmem:[#allocation7_spill] sm:$0xff] %v3481_v61  ;;  %4382 = vst [vmem:[#allocation34_spill] sm:$0xff] %v3484_v41  ;;  %v729_v43 = vadd.s32 %v4393_v19, %v4383_v14  ;;  %v730_v52 = vadd.s32 %v4394_v35, %v4383_v14  ;;  %v731_v53 = vadd.s32 %v4396_v45, %v4383_v14  ;;  %v4398_v51 = vcvt.f32.s32 %v3195_v24 }
 0x151   :  { %v732_v1 = vadd.s32 %v4397_v12, %v4383_v14  ;;  %v4399_v7 = vcvt.f32.s32 %v3202_v9  ;;  %v4400_v30 = vcvt.f32.s32 %v3207_v44  ;;  %v4401_v3 = vcvt.f32.s32 %v3215_v40 }
 0x152   :  { %v733_v22 = vadd.s32 %v4398_v51, %v4383_v14  ;;  %v737_v37 = vadd.s32 %v2049_v18, %v4383_v14  ;;  %v3535_v8 = vmul.u32 %v722_v39, %v4402_v46  ;;  %v3538_v24 = vmul.u32 %v723_v2, %v4402_v46 }
 0x153   :  { %v734_v26 = vadd.s32 %v4399_v7, %v4383_v14  ;;  %v735_v27 = vadd.s32 %v4400_v30, %v4383_v14  ;;  %v736_v23 = vadd.s32 %v4401_v3, %v4383_v14  ;;  %v3541_v9 = vmul.u32 %v724_v58, %v4402_v46 }
 0x154   :  { %v3544_v44 = vmul.u32 %v725_v29, %v4402_v46  ;;  %v3551_v11 = vmul.u32 %v726_v42, %v4402_v46  ;;  %v754_v55 = vrot.slane %v3535_v8, 1  ;;  %v755_v4 = vrot.slane %v3538_v24, 1 }
 0x155   :  { %v3554_v18 = vmul.u32 %v727_v38, %v4402_v46  ;;  %v3559_v21 = vmul.u32 %v728_v17, %v4402_v46  ;;  %v756_v20 = vrot.slane %v3541_v9, 1 }
 0x156   :  { %v3562_v14 = vmul.u32 %v729_v43, %v4402_v46  ;;  %v757_v39 = vrot.slane %v3544_v44, 1  ;;  %v3567_v6 = vmul.u32 %v730_v52, %v4402_v46  ;;  %v758_v15 = vrot.slane %v3551_v11, 1 }
 0x157   :  { %v3570_v2 = vmul.u32 %v731_v53, %v4402_v46  ;;  %v759_v58 = vrot.slane %v3554_v18, 1  ;;  %v3575_v63 = vmul.u32 %v732_v1, %v4402_v46  ;;  %v760_v16 = vrot.slane %v3559_v21, 1 }
 0x158   :  { %v3578_v29 = vmul.u32 %v733_v22, %v4402_v46  ;;  %v761_v42 = vrot.slane %v3562_v14, 1  ;;  %v3583_v47 = vmul.u32 %v734_v26, %v4402_v46  ;;  %v762_v33 = vrot.slane %v3567_v6, 1 }
 0x159   :  { %v3586_v38 = vmul.u32 %v735_v27, %v4402_v46  ;;  %v763_v0 = vrot.slane %v3570_v2, 1  ;;  %v3591_v17 = vmul.u32 %v736_v23, %v4402_v46  ;;  %v764_v19 = vrot.slane %v3575_v63, 1 }
 0x15a   :  { %v3594_v60 = vmul.u32 %v737_v37, %v4402_v46  ;;  %v765_v43 = vrot.slane %v3578_v29, 1  ;;  %v766_v35 = vrot.slane %v3583_v47, 1  ;;  %v770_v34 = vadd.s32 %v754_v55, %v3535_v8 }
 0x15b   :  { %4404 = vst [vmem:[#allocation12_spill] sm:$0xff] %v3591_v17  ;;  %v767_v52 = vrot.slane %v3586_v38, 1  ;;  %v771_v45 = vadd.s32 %v755_v4, %v3538_v24  ;;  %v768_v53 = vrot.slane %v3591_v17, 1  ;;  %v772_v1 = vadd.s32 %v756_v20, %v3541_v9 }
 0x15c   :  { %4405 = vst [vmem:[#allocation35_spill] sm:$0xff] %v3594_v60  ;;  %v769_v12 = vrot.slane %v3594_v60, 1  ;;  %v773_v51 = vadd.s32 %v757_v39, %v3544_v44  ;;  %v774_v22 = vadd.s32 %v758_v15, %v3551_v11  ;;  %v775_v7 = vadd.s32 %v759_v58, %v3554_v18 }
 0x15d   :  { %v776_v26 = vadd.s32 %v760_v16, %v3559_v21  ;;  %v777_v30 = vadd.s32 %v761_v42, %v3562_v14  ;;  %v778_v27 = vadd.s32 %v762_v33, %v3567_v6  ;;  %v779_v3 = vadd.s32 %v763_v0, %v3570_v2 }
 0x15e   :  { %v780_v23 = vadd.s32 %v764_v19, %v3575_v63  ;;  %v781_v37 = vadd.s32 %v765_v43, %v3578_v29  ;;  %v782_v46 = vadd.s32 %v766_v35, %v3583_v47  ;;  %v783_v55 = vadd.s32 %v767_v52, %v3586_v38 }
 0x15f   :  { %v784_v4 = vadd.s32 %v768_v53, %v3591_v17  ;;  %v785_v20 = vadd.s32 %v769_v12, %v3594_v60  ;;  %v786_v39 = vrot.slane %v3535_v8, 2  ;;  %v787_v15 = vrot.slane %v3538_v24, 2 }
 0x160   :  { %v788_v58 = vrot.slane %v3541_v9, 2  ;;  %v789_v16 = vrot.slane %v3544_v44, 2  ;;  %v790_v42 = vrot.slane %v3551_v11, 2  ;;  %v791_v33 = vrot.slane %v3554_v18, 2 }
 0x161   :  { %v792_v0 = vrot.slane %v3559_v21, 2  ;;  %v793_v19 = vrot.slane %v3562_v14, 2  ;;  %v794_v43 = vrot.slane %v3567_v6, 2  ;;  %v795_v35 = vrot.slane %v3570_v2, 2 }
 0x162   :  { %v796_v52 = vrot.slane %v3575_v63, 2  ;;  %v797_v53 = vrot.slane %v3578_v29, 2  ;;  %v798_v12 = vrot.slane %v3583_v47, 2  ;;  %v799_v49 = vrot.slane %v3586_v38, 2 }
 0x163   :  { %v800_v40 = vrot.slane %v3591_v17, 2  ;;  %v801_v57 = vrot.slane %v3594_v60, 2  ;;  %v802_v56 = vadd.s32 %v786_v39, %v770_v34  ;;  %v803_v41 = vadd.s32 %v787_v15, %v771_v45 }
 0x164   :  { %v804_v61 = vadd.s32 %v788_v58, %v772_v1  ;;  %v805_v13 = vadd.s32 %v789_v16, %v773_v51  ;;  %v806_v48 = vadd.s32 %v790_v42, %v774_v22  ;;  %v807_v5 = vadd.s32 %v791_v33, %v775_v7 }
 0x165   :  { %v808_v54 = vadd.s32 %v792_v0, %v776_v26  ;;  %v809_v50 = vadd.s32 %v793_v19, %v777_v30  ;;  %v810_v10 = vadd.s32 %v794_v43, %v778_v27  ;;  %v811_v36 = vadd.s32 %v795_v35, %v779_v3  ;;  %v4406_v3 = vld [vmem:[#allocation12_spill] sm:$0xff]  ;;  %v3650_v35 = vpop.permute.xlu1 %1020 }
 0x166   :  { %v812_v59 = vadd.s32 %v796_v52, %v780_v23  ;;  %v813_v31 = vadd.s32 %v797_v53, %v781_v37  ;;  %v814_v25 = vadd.s32 %v798_v12, %v782_v46  ;;  %v815_v32 = vadd.s32 %v799_v49, %v783_v55  ;;  %v4407_v37 = vld [vmem:[#allocation35_spill] sm:$0xff]  ;;  %4408 = vst [vmem:[#allocation13_spill] sm:$0xff] %v3650_v35 }
 0x167   :  { %v816_v28 = vadd.s32 %v800_v40, %v784_v4  ;;  %v817_v62 = vadd.s32 %v801_v57, %v785_v20  ;;  %v818_v17 = vrot.slane %v3535_v8, 3  ;;  %v819_v60 = vrot.slane %v3538_v24, 3 }
 0x168   :  { %v820_v34 = vrot.slane %v3541_v9, 3  ;;  %v821_v45 = vrot.slane %v3544_v44, 3  ;;  %v822_v1 = vrot.slane %v3551_v11, 3  ;;  %v823_v51 = vrot.slane %v3554_v18, 3 }
 0x169   :  { %v824_v22 = vrot.slane %v3559_v21, 3  ;;  %v825_v7 = vrot.slane %v3562_v14, 3  ;;  %v826_v49 = vrot.slane %v3567_v6, 3  ;;  %v827_v57 = vrot.slane %v3570_v2, 3 }
 0x16a   :  { %v828_v40 = vrot.slane %v3575_v63, 3  ;;  %v829_v26 = vrot.slane %v3578_v29, 3  ;;  %v830_v30 = vrot.slane %v3583_v47, 3  ;;  %v831_v27 = vrot.slane %v3586_v38, 3 }
 0x16b   :  { %v832_v23 = vrot.slane %v4406_v3, 3  ;;  %v833_v46 = vrot.slane %v4407_v37, 3  ;;  %v834_v55 = vadd.s32 %v818_v17, %v802_v56  ;;  %v835_v4 = vadd.s32 %v819_v60, %v803_v41 }
 0x16c   :  { %v836_v20 = vadd.s32 %v820_v34, %v804_v61  ;;  %v837_v39 = vadd.s32 %v821_v45, %v805_v13  ;;  %v838_v15 = vadd.s32 %v822_v1, %v806_v48  ;;  %v839_v58 = vadd.s32 %v823_v51, %v807_v5  ;;  %v4409_v61 = vld [vmem:[#allocation12_spill] sm:$0xff]  ;;  %v3668_v51 = vpop.permute.xlu1 %1125 }
 0x16d   :  { %v840_v16 = vadd.s32 %v824_v22, %v808_v54  ;;  %v841_v42 = vadd.s32 %v825_v7, %v809_v50  ;;  %v842_v33 = vadd.s32 %v826_v49, %v810_v10  ;;  %v843_v0 = vadd.s32 %v827_v57, %v811_v36 }
 0x16e   :  { %v844_v19 = vadd.s32 %v828_v40, %v812_v59  ;;  %v845_v43 = vadd.s32 %v829_v26, %v813_v31  ;;  %v846_v52 = vadd.s32 %v830_v30, %v814_v25  ;;  %v847_v53 = vadd.s32 %v831_v27, %v815_v32 }
 0x16f   :  { %v848_v12 = vadd.s32 %v832_v23, %v816_v28  ;;  %v849_v3 = vadd.s32 %v833_v46, %v817_v62  ;;  %v850_v37 = vrot.slane %v3535_v8, 4  ;;  %v851_v56 = vrot.slane %v3538_v24, 4  ;;  %v4410_v62 = vld [vmem:[#allocation35_spill] sm:$0xff] }
 0x170   :  { %v852_v13 = vrot.slane %v3541_v9, 4  ;;  %v853_v5 = vrot.slane %v3544_v44, 4  ;;  %v854_v50 = vrot.slane %v3551_v11, 4  ;;  %v855_v36 = vrot.slane %v3554_v18, 4 }
 0x171   :  { %v856_v31 = vrot.slane %v3559_v21, 4  ;;  %v857_v59 = vrot.slane %v3562_v14, 4  ;;  %v858_v32 = vrot.slane %v3567_v6, 4  ;;  %v859_v28 = vrot.slane %v3570_v2, 4 }
 0x172   :  { %v860_v25 = vrot.slane %v3575_v63, 4  ;;  %v861_v10 = vrot.slane %v3578_v29, 4  ;;  %v862_v54 = vrot.slane %v3583_v47, 4  ;;  %v863_v48 = vrot.slane %v3586_v38, 4 }
 0x173   :  { %v864_v41 = vrot.slane %v4409_v61, 4  ;;  %v865_v17 = vrot.slane %v4410_v62, 4  ;;  %v866_v60 = vadd.s32 %v850_v37, %v834_v55  ;;  %v867_v34 = vadd.s32 %v851_v56, %v835_v4 }
 0x174   :  { %v868_v45 = vadd.s32 %v852_v13, %v836_v20  ;;  %v869_v1 = vadd.s32 %v853_v5, %v837_v39  ;;  %v870_v22 = vadd.s32 %v854_v50, %v838_v15  ;;  %v871_v7 = vadd.s32 %v855_v36, %v839_v58 }
 0x175   :  { %v872_v49 = vadd.s32 %v856_v31, %v840_v16  ;;  %v873_v57 = vadd.s32 %v857_v59, %v841_v42  ;;  %v874_v40 = vadd.s32 %v858_v32, %v842_v33  ;;  %v875_v26 = vadd.s32 %v859_v28, %v843_v0  ;;  %v3682_v42 = vpop.permute.xlu1 %1225  ;;  %v4413_v33 = vld [vmem:[#allocation35_spill] sm:$0xff] }
 0x176   :  { %v876_v30 = vadd.s32 %v860_v25, %v844_v19  ;;  %v877_v27 = vadd.s32 %v861_v10, %v845_v43  ;;  %v878_v23 = vadd.s32 %v862_v54, %v846_v52  ;;  %v879_v46 = vadd.s32 %v863_v48, %v847_v53  ;;  %4411 = vst [vmem:[#allocation37_spill] sm:$0xff] %v3682_v42  ;;  %v4415_v48 = vld [vmem:[#allocation26_spill] sm:$0xff] }
 0x177   :  { %v880_v35 = vadd.s32 %v864_v41, %v848_v12  ;;  %v881_v61 = vadd.s32 %v865_v17, %v849_v3  ;;  %v882_v62 = vrot.slane %v3535_v8, 5  ;;  %v883_v37 = vrot.slane %v3538_v24, 5 }
 0x178   :  { %v884_v55 = vrot.slane %v3541_v9, 5  ;;  %v885_v4 = vrot.slane %v3544_v44, 5  ;;  %v886_v20 = vrot.slane %v3551_v11, 5  ;;  %v887_v39 = vrot.slane %v3554_v18, 5  ;;  %v4412_v11 = vld [vmem:[#allocation12_spill] sm:$0xff] }
 0x179   :  { %v888_v15 = vrot.slane %v3559_v21, 5  ;;  %v889_v58 = vrot.slane %v3562_v14, 5  ;;  %v890_v16 = vrot.slane %v3567_v6, 5  ;;  %v891_v3 = vrot.slane %v3570_v2, 5  ;;  %v3688_v54 = vpop.permute.xlu1 %1425 }
 0x17a   :  { %v892_v8 = vrot.slane %v3575_v63, 5  ;;  %v893_v24 = vrot.slane %v3578_v29, 5  ;;  %v894_v9 = vrot.slane %v3583_v47, 5  ;;  %v895_v44 = vrot.slane %v3586_v38, 5  ;;  %4414 = vst [vmem:[#allocation14_spill] sm:$0xff] %v3688_v54 }
 0x17b   :  { %v896_v18 = vrot.slane %v4412_v11, 5  ;;  %v897_v21 = vrot.slane %v4413_v33, 5  ;;  %v898_v0 = vadd.s32 %v882_v62, %v866_v60  ;;  %v899_v14 = vadd.s32 %v883_v37, %v867_v34  ;;  %v4420_v37 = vld [vmem:[#allocation32_spill] sm:$0xff]  ;;  %v4424_v11 = vld [vmem:[#allocation30_spill] sm:$0xff] }
 0x17c   :  { %v900_v19 = vadd.s32 %v884_v55, %v868_v45  ;;  %v901_v6 = vadd.s32 %v885_v4, %v869_v1  ;;  %v902_v43 = vadd.s32 %v886_v20, %v870_v22  ;;  %v903_v2 = vadd.s32 %v887_v39, %v871_v7  ;;  %v4416_v7 = vld [vmem:[#allocation27_spill] sm:$0xff]  ;;  %v4421_v39 = vld [vmem:[#allocation29_spill] sm:$0xff] }
 0x17d   :  { %v904_v52 = vadd.s32 %v888_v15, %v872_v49  ;;  %v905_v63 = vadd.s32 %v889_v58, %v873_v57  ;;  %v906_v53 = vadd.s32 %v890_v16, %v874_v40  ;;  %v907_v29 = vadd.s32 %v891_v3, %v875_v26  ;;  %v4417_v49 = vld [vmem:[#allocation40_spill] sm:$0xff]  ;;  %v4422_v58 = vld [vmem:[#allocation41_spill] sm:$0xff] }
 0x17e   :  { %v908_v12 = vadd.s32 %v892_v8, %v876_v30  ;;  %v909_v56 = vadd.s32 %v893_v24, %v877_v27  ;;  %v910_v13 = vadd.s32 %v894_v9, %v878_v23  ;;  %v911_v47 = vadd.s32 %v895_v44, %v879_v46  ;;  %v4418_v40 = vld [vmem:[#allocation8_spill] sm:$0xff]  ;;  %v4419_v23 = vld [vmem:[#allocation3_spill] sm:$0xff]  ;;  %v1526_v24 = vpop.permute.xlu1 %1525  ;;  %v4423_v9 = vld [vmem:[#allocation9_spill] sm:$0xff] }
 0x17f   :  { %v912_v5 = vadd.s32 %v896_v18, %v880_v35  ;;  %v913_v38 = vadd.s32 %v897_v21, %v881_v61  ;;  %v914_v50 = vcombine.low %v898_v0, %v899_v14  ;;  %v915_v36 = vcombine.low %v900_v19, %v901_v6  ;;  %v4425_v21 = vld [vmem:[#allocation42_spill] sm:$0xff]  ;;  %v4427_v6 = vld [vmem:[#allocation33_spill] sm:$0xff] }
 0x180   :  { %v916_v31 = vcombine.low %v902_v43, %v903_v2  ;;  %v917_v59 = vcombine.low %v904_v52, %v905_v63  ;;  %v963_v32 = vcombine.low %v906_v53, %v907_v29  ;;  %v964_v28 = vcombine.low %v908_v12, %v909_v56  ;;  %v4426_v14 = vld [vmem:[#allocation10_spill] sm:$0xff]  ;;  %v4428_v52 = vld [vmem:[#allocation11_spill] sm:$0xff] }
 0x181   :  { %v965_v25 = vcombine.low %v910_v13, %v911_v47  ;;  %v966_v10 = vcombine.low %v912_v5, %v913_v38  ;;  %v924_v41 = vrot.slane %v914_v50, %v4415_v48  ;;  %v931_v62 = vrot.slane %v915_v36, %v4415_v48  ;;  %v4429_v53 = vld [vmem:[#allocation7_spill] sm:$0xff]  ;;  %v4430_v12 = vld [vmem:[#allocation34_spill] sm:$0xff] }
 0x182   :  { %v938_v17 = vrot.slane %v916_v31, %v4415_v48  ;;  %v945_v60 = vrot.slane %v917_v59, %v4415_v48  ;;  %v973_v35 = vrot.slane %v963_v32, %v4415_v48  ;;  %v980_v61 = vrot.slane %v964_v28, %v4415_v48  ;;  %v4431_v13 = vld [vmem:[#allocation31_spill] sm:$0xff]  ;;  %v4434_v38 = vld [vmem:[#allocation22_spill] sm:$0xff] }
 0x183   :  { %v987_v34 = vrot.slane %v965_v25, %v4415_v48  ;;  %v994_v45 = vrot.slane %v966_v10, %v4415_v48  ;;  %v946_v1 = vcombine.low %v924_v41, %v931_v62  ;;  %v1539_v57 = vrot.slane %v4417_v49, %v4416_v7 }
 0x184   :  { %v947_v22 = vcombine.low %v938_v17, %v945_v60  ;;  %v1543_v26 = vrot.slane %v4418_v40, %v4416_v7  ;;  %v995_v30 = vcombine.low %v973_v35, %v980_v61  ;;  %v1547_v46 = vrot.slane %v4419_v23, %v4416_v7 }
 0x185   :  { %v996_v27 = vcombine.low %v987_v34, %v994_v45  ;;  %v1551_v55 = vrot.slane %v4420_v37, %v4416_v7  ;;  %v954_v4 = vrot.slane %v946_v1, %v4415_v48  ;;  %v1555_v15 = vrot.slane %v4421_v39, %v4416_v7  ;;  %v4451_v45 = vld [vmem:[#allocation24_spill] sm:$0xff] }
 0x186   :  { %v961_v20 = vrot.slane %v947_v22, %v4415_v48  ;;  %v1559_v16 = vrot.slane %v4422_v58, %v4416_v7  ;;  %v1003_v3 = vrot.slane %v995_v30, %v4415_v48  ;;  %v1563_v44 = vrot.slane %v4423_v9, %v4416_v7 }
 0x187   :  { %v1010_v8 = vrot.slane %v996_v27, %v4415_v48  ;;  %v1567_v18 = vrot.slane %v4424_v11, %v4416_v7  ;;  %v1571_v0 = vrot.slane %v4425_v21, %v4416_v7  ;;  %v1575_v19 = vrot.slane %v4426_v14, %v4416_v7 }
 0x188   :  { %v962_v33 = vcombine.low %v954_v4, %v961_v20  ;;  %v1579_v43 = vrot.slane %v4427_v6, %v4416_v7  ;;  %v1583_v63 = vrot.slane %v4428_v52, %v4416_v7  ;;  %v1587_v29 = vrot.slane %v4429_v53, %v4416_v7 }
 0x189   :  { %v1011_v2 = vcombine.low %v1003_v3, %v1010_v8  ;;  %v1591_v56 = vrot.slane %v4430_v12, %v4416_v7  ;;  %v4432_v47 = vrot.slane %v4431_v13, %v4416_v7  ;;  %v4435_v50 = vrot.slane %v4434_v38, %v4416_v7 }
 0x18a   :  { %1741 = vst [vmem:[%s4041_s8 + $0x1] ss:$2 sm:$0xff] %v962_v33  ;;  %v3743_v31 = vmul.f32 %v1539_v57, %v1526_v24  ;;  %v3745_v59 = vmul.f32 %v1543_v26, %v1526_v24  ;;  %v3750_v32 = vmul.f32 %v1547_v46, %v1526_v24  ;;  %v3752_v28 = vmul.f32 %v1551_v55, %v1526_v24 }
 0x18b   :  { %v3736_v5 = vmul.f32 %v4432_v47, %v1526_v24  ;;  %v3741_v36 = vmul.f32 %v4435_v50, %v1526_v24  ;;  %1742 = vst [vmem:[%s4041_s8 + $0x11] ss:$2 sm:$0xff] %v1011_v2  ;;  %v3754_v25 = vmul.f32 %v1555_v15, %v1526_v24  ;;  %v3756_v10 = vmul.f32 %v1559_v16, %v1526_v24 }
 0x18c   :  { %4437 = vst [vmem:[#allocation17_spill] sm:$0xff] %v3743_v31  ;;  %4438 = vst [vmem:[#allocation18_spill] sm:$0xff] %v3745_v59  ;;  %v3758_v48 = vmul.f32 %v1563_v44, %v1526_v24  ;;  %v3760_v41 = vmul.f32 %v1567_v18, %v1526_v24  ;;  %v3762_v62 = vmul.f32 %v1571_v0, %v1526_v24  ;;  %v4452_v44 = vld [vmem:[#allocation13_spill] sm:$0xff] }
 0x18d   :  { %4433 = vst [vmem:[#allocation15_spill] sm:$0xff] %v3736_v5  ;;  %4436 = vst [vmem:[#allocation16_spill] sm:$0xff] %v3741_v36  ;;  %v3764_v17 = vmul.f32 %v1575_v19, %v1526_v24  ;;  %v3766_v60 = vmul.f32 %v1579_v43, %v1526_v24  ;;  %v3768_v35 = vmul.f32 %v1583_v63, %v1526_v24 }
 0x18e   :  { %4439 = vst [vmem:[#allocation19_spill] sm:$0xff] %v3750_v32  ;;  %4440 = vst [vmem:[#allocation23_spill] sm:$0xff] %v3752_v28  ;;  %v3770_v61 = vmul.f32 %v1587_v29, %v1526_v24  ;;  %v3772_v34 = vmul.f32 %v1591_v56, %v1526_v24  ;;  %v1026_v1 = vrot.slane %v4431_v13, %v4451_v45 }
 0x18f   :  { %4441 = vst [vmem:[#allocation20_spill] sm:$0xff] %v3754_v25  ;;  %4442 = vst [vmem:[#allocation21_spill] sm:$0xff] %v3756_v10  ;;  %v1030_v22 = vrot.slane %v4434_v38, %v4451_v45  ;;  %v1034_v7 = vrot.slane %v4417_v49, %v4451_v45  ;;  %v1038_v57 = vrot.slane %v4418_v40, %v4451_v45 }
 0x190   :  { %4443 = vst [vmem:[#allocation44_spill] sm:$0xff] %v3758_v48  ;;  %4444 = vst [vmem:[#allocation45_spill] sm:$0xff] %v3760_v41  ;;  %v1042_v26 = vrot.slane %v4419_v23, %v4451_v45  ;;  %v1046_v30 = vrot.slane %v4420_v37, %v4451_v45  ;;  %v1050_v27 = vrot.slane %v4421_v39, %v4451_v45  ;;  %v4453_v48 = vld [vmem:[#allocation36_spill] sm:$0xff] }
 0x191   :  { %4445 = vst [vmem:[#allocation25_spill] sm:$0xff] %v3762_v62  ;;  %4446 = vst [vmem:[#allocation39_spill] sm:$0xff] %v3764_v17  ;;  %v1054_v46 = vrot.slane %v4422_v58, %v4451_v45  ;;  %v1058_v55 = vrot.slane %v4423_v9, %v4451_v45  ;;  %v1062_v4 = vrot.slane %v4424_v11, %v4451_v45 }
 0x192   :  { %4447 = vst [vmem:[#allocation6_spill] sm:$0xff] %v3766_v60  ;;  %4448 = vst [vmem:[#allocation2_spill] sm:$0xff] %v3768_v35  ;;  %v1066_v20 = vrot.slane %v4425_v21, %v4451_v45  ;;  %v1070_v15 = vrot.slane %v4426_v14, %v4451_v45  ;;  %v1074_v16 = vrot.slane %v4427_v6, %v4451_v45 }
 0x193   :  { %4449 = vst [vmem:[#allocation43_spill] sm:$0xff] %v3770_v61  ;;  %4450 = vst [vmem:[#allocation12_spill] sm:$0xff] %v3772_v34  ;;  %v1078_v3 = vrot.slane %v4428_v52, %v4451_v45  ;;  %v1082_v8 = vrot.slane %v4429_v53, %v4451_v45  ;;  %v1086_v24 = vrot.slane %v4430_v12, %v4451_v45 }
 0x194   :  { %v1087_v18 = vmul.f32 %v1026_v1, %v4452_v44  ;;  %v1088_v33 = vmul.f32 %v1030_v22, %v4452_v44  ;;  %v1089_v0 = vmul.f32 %v1034_v7, %v4452_v44  ;;  %v1090_v19 = vmul.f32 %v1038_v57, %v4452_v44  ;;  %v1106_v1 = vpop.permute.xlu0 %1105 }
 0x195   :  { %v1091_v43 = vmul.f32 %v1042_v26, %v4452_v44  ;;  %v1092_v2 = vmul.f32 %v1046_v30, %v4452_v44  ;;  %v1093_v63 = vmul.f32 %v1050_v27, %v4452_v44  ;;  %v1094_v29 = vmul.f32 %v1054_v46, %v4452_v44 }
 0x196   :  { %v1095_v56 = vmul.f32 %v1058_v55, %v4452_v44  ;;  %v1096_v47 = vmul.f32 %v1062_v4, %v4452_v44  ;;  %v1097_v50 = vmul.f32 %v1066_v20, %v4452_v44  ;;  %v1098_v45 = vmul.f32 %v1070_v15, %v4452_v44 }
 0x197   :  { %v1099_v22 = vmul.f32 %v1074_v16, %v4452_v44  ;;  %v1100_v7 = vmul.f32 %v1078_v3, %v4452_v44  ;;  %v1101_v57 = vmul.f32 %v1082_v8, %v4452_v44  ;;  %v1102_v26 = vmul.f32 %v1086_v24, %v4452_v44 }
 0x198   :  { %v1108_v30 = vadd.f32 %v1106_v1, %v1087_v18  ;;  %v1109_v27 = vadd.f32 %v1106_v1, %v1088_v33  ;;  %v1110_v46 = vadd.f32 %v1106_v1, %v1089_v0  ;;  %v1111_v34 = vadd.f32 %v1106_v1, %v1090_v19 }
 0x199   :  { %v1112_v55 = vadd.f32 %v1106_v1, %v1091_v43  ;;  %v1113_v61 = vadd.f32 %v1106_v1, %v1092_v2  ;;  %v1114_v4 = vadd.f32 %v1106_v1, %v1093_v63  ;;  %v1115_v35 = vadd.f32 %v1106_v1, %v1094_v29 }
 0x19a   :  { %v1116_v20 = vadd.f32 %v1106_v1, %v1095_v56  ;;  %v1117_v60 = vadd.f32 %v1106_v1, %v1096_v47  ;;  %v1118_v15 = vadd.f32 %v1106_v1, %v1097_v50  ;;  %v1119_v17 = vadd.f32 %v1106_v1, %v1098_v45 }
 0x19b   :  { %v1120_v62 = vadd.f32 %v1106_v1, %v1099_v22  ;;  %v1121_v16 = vadd.f32 %v1106_v1, %v1100_v7  ;;  %v1122_v41 = vadd.f32 %v1106_v1, %v1101_v57  ;;  %v1123_v3 = vadd.f32 %v1106_v1, %v1102_v26 }
 0x19c   :  { %v1131_v8 = vrot.slane %v4431_v13, %v4453_v48  ;;  %v1135_v24 = vrot.slane %v4434_v38, %v4453_v48  ;;  %v1139_v44 = vrot.slane %v4417_v49, %v4453_v48  ;;  %v1143_v18 = vrot.slane %v4418_v40, %v4453_v48 }
 0x19d   :  { %v1147_v33 = vrot.slane %v4419_v23, %v4453_v48  ;;  %v1151_v0 = vrot.slane %v4420_v37, %v4453_v48  ;;  %v1155_v19 = vrot.slane %v4421_v39, %v4453_v48  ;;  %v1159_v43 = vrot.slane %v4422_v58, %v4453_v48 }
 0x19e   :  { %v1163_v2 = vrot.slane %v4423_v9, %v4453_v48  ;;  %v1167_v63 = vrot.slane %v4424_v11, %v4453_v48  ;;  %v1171_v29 = vrot.slane %v4425_v21, %v4453_v48  ;;  %v1175_v56 = vrot.slane %v4426_v14, %v4453_v48 }
 0x19f   :  { %v1179_v47 = vrot.slane %v4427_v6, %v4453_v48  ;;  %v1183_v50 = vrot.slane %v4428_v52, %v4453_v48  ;;  %v1187_v45 = vrot.slane %v4429_v53, %v4453_v48  ;;  %v1191_v1 = vrot.slane %v4430_v12, %v4453_v48  ;;  %v4454_v6 = vld [vmem:[#allocation4_spill] sm:$0xff] }
 0x1a0   :  { %v1192_v22 = vmul.f32 %v1131_v8, %v3668_v51  ;;  %v1193_v7 = vmul.f32 %v1135_v24, %v3668_v51  ;;  %v1194_v57 = vmul.f32 %v1139_v44, %v3668_v51  ;;  %v1195_v26 = vmul.f32 %v1143_v18, %v3668_v51 }
 0x1a1   :  { %v1196_v10 = vmul.f32 %v1147_v33, %v3668_v51  ;;  %v1197_v25 = vmul.f32 %v1151_v0, %v3668_v51  ;;  %v1198_v28 = vmul.f32 %v1155_v19, %v3668_v51  ;;  %v1199_v32 = vmul.f32 %v1159_v43, %v3668_v51 }
 0x1a2   :  { %v1200_v59 = vmul.f32 %v1163_v2, %v3668_v51  ;;  %v1201_v48 = vmul.f32 %v1167_v63, %v3668_v51  ;;  %v1202_v8 = vmul.f32 %v1171_v29, %v3668_v51  ;;  %v1203_v24 = vmul.f32 %v1175_v56, %v3668_v51 }
 0x1a3   :  { %v1204_v44 = vmul.f32 %v1179_v47, %v3668_v51  ;;  %v1205_v18 = vmul.f32 %v1183_v50, %v3668_v51  ;;  %v1206_v33 = vmul.f32 %v1187_v45, %v3668_v51  ;;  %v1207_v0 = vmul.f32 %v1191_v1, %v3668_v51 }
 0x1a4   :  { %v1208_v31 = vadd.f32 %v1192_v22, %v1108_v30  ;;  %v1209_v19 = vadd.f32 %v1193_v7, %v1109_v27  ;;  %v1210_v36 = vadd.f32 %v1194_v57, %v1110_v46  ;;  %v1211_v43 = vadd.f32 %v1195_v26, %v1111_v34  ;;  %v4456_v30 = vld [vmem:[#allocation11_spill] sm:$0xff] }
 0x1a5   :  { %v1212_v5 = vadd.f32 %v1196_v10, %v1112_v55  ;;  %v1213_v2 = vadd.f32 %v1197_v25, %v1113_v61  ;;  %v1214_v54 = vadd.f32 %v1198_v28, %v1114_v4  ;;  %v1215_v63 = vadd.f32 %v1199_v32, %v1115_v35  ;;  %v4455_v61 = vld [vmem:[#allocation33_spill] sm:$0xff]  ;;  %v4457_v46 = vld [vmem:[#allocation7_spill] sm:$0xff]  ;;  %v4458_v4 = vld [vmem:[#allocation34_spill] sm:$0xff] }
 0x1a6   :  { %v1216_v42 = vadd.f32 %v1200_v59, %v1116_v20  ;;  %v1217_v29 = vadd.f32 %v1201_v48, %v1117_v60  ;;  %v1218_v12 = vadd.f32 %v1202_v8, %v1118_v15  ;;  %v1219_v56 = vadd.f32 %v1203_v24, %v1119_v17  ;;  %v4459_v15 = vld [vmem:[#allocation37_spill] sm:$0xff] }
 0x1a7   :  { %v1220_v53 = vadd.f32 %v1204_v44, %v1120_v62  ;;  %v1221_v47 = vadd.f32 %v1205_v18, %v1121_v16  ;;  %v1222_v52 = vadd.f32 %v1206_v33, %v1122_v41  ;;  %v1223_v50 = vadd.f32 %v1207_v0, %v1123_v3 }
 0x1a8   :  { %v1231_v45 = vrot.slane %v4431_v13, %v4454_v6  ;;  %v1235_v51 = vrot.slane %v4434_v38, %v4454_v6  ;;  %v1239_v10 = vrot.slane %v4417_v49, %v4454_v6  ;;  %v1243_v32 = vrot.slane %v4418_v40, %v4454_v6 }
 0x1a9   :  { %v1247_v59 = vrot.slane %v4419_v23, %v4454_v6  ;;  %v1251_v28 = vrot.slane %v4420_v37, %v4454_v6  ;;  %v1255_v25 = vrot.slane %v4421_v39, %v4454_v6  ;;  %v1259_v41 = vrot.slane %v4422_v58, %v4454_v6 }
 0x1aa   :  { %v1263_v62 = vrot.slane %v4423_v9, %v4454_v6  ;;  %v1267_v17 = vrot.slane %v4424_v11, %v4454_v6  ;;  %v1271_v60 = vrot.slane %v4425_v21, %v4454_v6  ;;  %v1275_v35 = vrot.slane %v4426_v14, %v4454_v6 }
 0x1ab   :  { %v1279_v34 = vrot.slane %v4455_v61, %v4454_v6  ;;  %v1283_v27 = vrot.slane %v4456_v30, %v4454_v6  ;;  %v1287_v55 = vrot.slane %v4457_v46, %v4454_v6  ;;  %v1291_v20 = vrot.slane %v4458_v4, %v4454_v6  ;;  %v4460_v61 = vld [vmem:[#allocation28_spill] sm:$0xff] }
 0x1ac   :  { %v1292_v16 = vmul.f32 %v1231_v45, %v4459_v15  ;;  %v1293_v3 = vmul.f32 %v1235_v51, %v4459_v15  ;;  %v1294_v1 = vmul.f32 %v1239_v10, %v4459_v15  ;;  %v1295_v22 = vmul.f32 %v1243_v32, %v4459_v15 }
 0x1ad   :  { %v1296_v7 = vmul.f32 %v1247_v59, %v4459_v15  ;;  %v1297_v57 = vmul.f32 %v1251_v28, %v4459_v15  ;;  %v1298_v26 = vmul.f32 %v1255_v25, %v4459_v15  ;;  %v1299_v48 = vmul.f32 %v1259_v41, %v4459_v15 }
 0x1ae   :  { %v1300_v8 = vmul.f32 %v1263_v62, %v4459_v15  ;;  %v1301_v6 = vmul.f32 %v1267_v17, %v4459_v15  ;;  %v1302_v24 = vmul.f32 %v1271_v60, %v4459_v15  ;;  %v1303_v44 = vmul.f32 %v1275_v35, %v4459_v15 }
 0x1af   :  { %v1304_v18 = vmul.f32 %v1279_v34, %v4459_v15  ;;  %v1305_v33 = vmul.f32 %v1283_v27, %v4459_v15  ;;  %v1306_v0 = vmul.f32 %v1287_v55, %v4459_v15  ;;  %v1307_v45 = vmul.f32 %v1291_v20, %v4459_v15  ;;  %v4463_v20 = vld [vmem:[#allocation7_spill] sm:$0xff] }
 0x1b0   :  { %v1308_v51 = vadd.f32 %v1292_v16, %v1208_v31  ;;  %v1309_v10 = vadd.f32 %v1293_v3, %v1209_v19  ;;  %v1310_v32 = vadd.f32 %v1294_v1, %v1210_v36  ;;  %v1311_v59 = vadd.f32 %v1295_v22, %v1211_v43  ;;  %v4464_v16 = vld [vmem:[#allocation34_spill] sm:$0xff] }
 0x1b1   :  { %v1312_v28 = vadd.f32 %v1296_v7, %v1212_v5  ;;  %v1313_v25 = vadd.f32 %v1297_v57, %v1213_v2  ;;  %v1314_v41 = vadd.f32 %v1298_v26, %v1214_v54  ;;  %v1315_v62 = vadd.f32 %v1299_v48, %v1215_v63 }
 0x1b2   :  { %v1316_v17 = vadd.f32 %v1300_v8, %v1216_v42  ;;  %v1317_v60 = vadd.f32 %v1301_v6, %v1217_v29  ;;  %v1318_v4 = vadd.f32 %v1302_v24, %v1218_v12  ;;  %v1319_v35 = vadd.f32 %v1303_v44, %v1219_v56  ;;  %v1326_v42 = vpop.permute.xlu0 %1325  ;;  %v4461_v29 = vld [vmem:[#allocation33_spill] sm:$0xff] }
 0x1b3   :  { %v1320_v46 = vadd.f32 %v1304_v18, %v1220_v53  ;;  %v1321_v34 = vadd.f32 %v1305_v33, %v1221_v47  ;;  %v1322_v30 = vadd.f32 %v1306_v0, %v1222_v52  ;;  %v1323_v27 = vadd.f32 %v1307_v45, %v1223_v50  ;;  %v4462_v47 = vld [vmem:[#allocation11_spill] sm:$0xff] }
 0x1b4   :  { %v1331_v55 = vrot.slane %v4431_v13, %v4460_v61  ;;  %v1335_v31 = vrot.slane %v4434_v38, %v4460_v61  ;;  %v1339_v5 = vrot.slane %v4417_v49, %v4460_v61  ;;  %v1343_v54 = vrot.slane %v4418_v40, %v4460_v61 }
 0x1b5   :  { %v1347_v12 = vrot.slane %v4419_v23, %v4460_v61  ;;  %v1351_v52 = vrot.slane %v4420_v37, %v4460_v61  ;;  %v1355_v53 = vrot.slane %v4421_v39, %v4460_v61  ;;  %v1359_v36 = vrot.slane %v4422_v58, %v4460_v61 }
 0x1b6   :  { %v1363_v19 = vrot.slane %v4423_v9, %v4460_v61  ;;  %v1367_v43 = vrot.slane %v4424_v11, %v4460_v61  ;;  %v1371_v2 = vrot.slane %v4425_v21, %v4460_v61  ;;  %v1375_v63 = vrot.slane %v4426_v14, %v4460_v61 }
 0x1b7   :  { %v1379_v56 = vrot.slane %v4461_v29, %v4460_v61  ;;  %v1383_v50 = vrot.slane %v4462_v47, %v4460_v61  ;;  %v1387_v15 = vrot.slane %v4463_v20, %v4460_v61  ;;  %v1391_v3 = vrot.slane %v4464_v16, %v4460_v61 }
 0x1b8   :  { %v1392_v1 = vmul.f32 %v1331_v55, %v1326_v42  ;;  %v1393_v22 = vmul.f32 %v1335_v31, %v1326_v42  ;;  %v1394_v7 = vmul.f32 %v1339_v5, %v1326_v42  ;;  %v1395_v57 = vmul.f32 %v1343_v54, %v1326_v42 }
 0x1b9   :  { %v1396_v26 = vmul.f32 %v1347_v12, %v1326_v42  ;;  %v1397_v48 = vmul.f32 %v1351_v52, %v1326_v42  ;;  %v1398_v8 = vmul.f32 %v1355_v53, %v1326_v42  ;;  %v1399_v6 = vmul.f32 %v1359_v36, %v1326_v42 }
 0x1ba   :  { %v1400_v24 = vmul.f32 %v1363_v19, %v1326_v42  ;;  %v1401_v44 = vmul.f32 %v1367_v43, %v1326_v42  ;;  %v1402_v18 = vmul.f32 %v1371_v2, %v1326_v42  ;;  %v1403_v33 = vmul.f32 %v1375_v63, %v1326_v42 }
 0x1bb   :  { %v1404_v0 = vmul.f32 %v1379_v56, %v1326_v42  ;;  %v1405_v45 = vmul.f32 %v1383_v50, %v1326_v42  ;;  %v1406_v47 = vmul.f32 %v1387_v15, %v1326_v42  ;;  %v1407_v29 = vmul.f32 %v1391_v3, %v1326_v42  ;;  %v4465_v56 = vld [vmem:[#allocation38_spill] sm:$0xff] }
 0x1bc   :  { %v1408_v20 = vadd.f32 %v1392_v1, %v1308_v51  ;;  %v1409_v14 = vadd.f32 %v1393_v22, %v1309_v10  ;;  %v1410_v21 = vadd.f32 %v1394_v7, %v1310_v32  ;;  %v1411_v61 = vadd.f32 %v1395_v57, %v1311_v59 }
 0x1bd   :  { %v1412_v55 = vadd.f32 %v1396_v26, %v1312_v28  ;;  %v1413_v31 = vadd.f32 %v1397_v48, %v1313_v25  ;;  %v1414_v5 = vadd.f32 %v1398_v8, %v1314_v41  ;;  %v1415_v54 = vadd.f32 %v1399_v6, %v1315_v62 }
 0x1be   :  { %v1416_v12 = vadd.f32 %v1400_v24, %v1316_v17  ;;  %v1417_v52 = vadd.f32 %v1401_v44, %v1317_v60  ;;  %v1418_v53 = vadd.f32 %v1402_v18, %v1318_v4  ;;  %v1419_v36 = vadd.f32 %v1403_v33, %v1319_v35  ;;  %v4471_v17 = vld [vmem:[#allocation14_spill] sm:$0xff] }
 0x1bf   :  { %v1420_v19 = vadd.f32 %v1404_v0, %v1320_v46  ;;  %v1421_v43 = vadd.f32 %v1405_v45, %v1321_v34  ;;  %v1422_v2 = vadd.f32 %v1406_v47, %v1322_v30  ;;  %v1423_v63 = vadd.f32 %v1407_v29, %v1323_v27 }
 0x1c0   :  { %v1431_v50 = vrot.slane %v4431_v13, %v4465_v56  ;;  %v1435_v51 = vrot.slane %v4434_v38, %v4465_v56  ;;  %v1439_v10 = vrot.slane %v4417_v49, %v4465_v56  ;;  %v1443_v32 = vrot.slane %v4418_v40, %v4465_v56  ;;  %v4466_v40 = vld [vmem:[#allocation42_spill] sm:$0xff] }
 0x1c1   :  { %v1447_v4 = vrot.slane %v4419_v23, %v4465_v56  ;;  %v1451_v46 = vrot.slane %v4420_v37, %v4465_v56  ;;  %v1455_v30 = vrot.slane %v4421_v39, %v4465_v56  ;;  %v1459_v13 = vrot.slane %v4422_v58, %v4465_v56  ;;  %v4467_v23 = vld [vmem:[#allocation10_spill] sm:$0xff]  ;;  %v4468_v37 = vld [vmem:[#allocation33_spill] sm:$0xff]  ;;  %v4469_v39 = vld [vmem:[#allocation11_spill] sm:$0xff] }
 0x1c2   :  { %v1463_v38 = vrot.slane %v4423_v9, %v4465_v56  ;;  %v1467_v49 = vrot.slane %v4424_v11, %v4465_v56  ;;  %v1471_v59 = vrot.slane %v4466_v40, %v4465_v56  ;;  %v1475_v28 = vrot.slane %v4467_v23, %v4465_v56  ;;  %v4470_v58 = vld [vmem:[#allocation7_spill] sm:$0xff]  ;;  %v4482_v40 = vld [vmem:[#allocation25_spill] sm:$0xff] }
 0x1c3   :  { %v1479_v25 = vrot.slane %v4468_v37, %v4465_v56  ;;  %v1483_v41 = vrot.slane %v4469_v39, %v4465_v56  ;;  %v1487_v62 = vrot.slane %v4470_v58, %v4465_v56  ;;  %v1491_v9 = vrot.slane %v4464_v16, %v4465_v56  ;;  %v4483_v23 = vld [vmem:[#allocation39_spill] sm:$0xff]  ;;  %v4484_v37 = vld [vmem:[#allocation6_spill] sm:$0xff] }
 0x1c4   :  { %v1492_v11 = vmul.f32 %v1431_v50, %v4471_v17  ;;  %v1493_v60 = vmul.f32 %v1435_v51, %v4471_v17  ;;  %v1494_v35 = vmul.f32 %v1439_v10, %v4471_v17  ;;  %v1495_v34 = vmul.f32 %v1443_v32, %v4471_v17  ;;  %v4485_v39 = vld [vmem:[#allocation2_spill] sm:$0xff]  ;;  %v4486_v58 = vld [vmem:[#allocation43_spill] sm:$0xff] }
 0x1c5   :  { %v1496_v27 = vmul.f32 %v1447_v4, %v4471_v17  ;;  %v1497_v42 = vmul.f32 %v1451_v46, %v4471_v17  ;;  %v1498_v29 = vmul.f32 %v1455_v30, %v4471_v17  ;;  %v1499_v47 = vmul.f32 %v1459_v13, %v4471_v17  ;;  %v4472_v30 = vld [vmem:[#allocation15_spill] sm:$0xff] }
 0x1c6   :  { %v1500_v15 = vmul.f32 %v1463_v38, %v4471_v17  ;;  %v1501_v16 = vmul.f32 %v1467_v49, %v4471_v17  ;;  %v1502_v3 = vmul.f32 %v1471_v59, %v4471_v17  ;;  %v1503_v1 = vmul.f32 %v1475_v28, %v4471_v17  ;;  %v4473_v38 = vld [vmem:[#allocation16_spill] sm:$0xff] }
 0x1c7   :  { %v1504_v22 = vmul.f32 %v1479_v25, %v4471_v17  ;;  %v1505_v7 = vmul.f32 %v1483_v41, %v4471_v17  ;;  %v1506_v57 = vmul.f32 %v1487_v62, %v4471_v17  ;;  %v1507_v26 = vmul.f32 %v1491_v9, %v4471_v17  ;;  %v4487_v9 = vld [vmem:[#allocation12_spill] sm:$0xff] }
 0x1c8   :  { %v1508_v48 = vadd.f32 %v1492_v11, %v1408_v20  ;;  %v1509_v8 = vadd.f32 %v1493_v60, %v1409_v14  ;;  %v1510_v6 = vadd.f32 %v1494_v35, %v1410_v21  ;;  %v1511_v24 = vadd.f32 %v1495_v34, %v1411_v61  ;;  %v4474_v20 = vld [vmem:[#allocation17_spill] sm:$0xff]  ;;  %v4475_v21 = vld [vmem:[#allocation18_spill] sm:$0xff] }
 0x1c9   :  { %v1512_v44 = vadd.f32 %v1496_v27, %v1412_v55  ;;  %v1513_v18 = vadd.f32 %v1497_v42, %v1413_v31  ;;  %v1514_v33 = vadd.f32 %v1498_v29, %v1414_v5  ;;  %v1515_v0 = vadd.f32 %v1499_v47, %v1415_v54  ;;  %v4476_v55 = vld [vmem:[#allocation19_spill] sm:$0xff] }
 0x1ca   :  { %v1516_v45 = vadd.f32 %v1500_v15, %v1416_v12  ;;  %v1517_v56 = vadd.f32 %v1501_v16, %v1417_v52  ;;  %v1518_v50 = vadd.f32 %v1502_v3, %v1418_v53  ;;  %v1519_v51 = vadd.f32 %v1503_v1, %v1419_v36  ;;  %v4477_v5 = vld [vmem:[#allocation23_spill] sm:$0xff]  ;;  %v4478_v12 = vld [vmem:[#allocation20_spill] sm:$0xff]  ;;  %v4479_v53 = vld [vmem:[#allocation21_spill] sm:$0xff] }
 0x1cb   :  { %v1520_v10 = vadd.f32 %v1504_v22, %v1420_v19  ;;  %v1521_v32 = vadd.f32 %v1505_v7, %v1421_v43  ;;  %v1522_v4 = vadd.f32 %v1506_v57, %v1422_v2  ;;  %v1523_v46 = vadd.f32 %v1507_v26, %v1423_v63  ;;  %v4480_v19 = vld [vmem:[#allocation44_spill] sm:$0xff]  ;;  %v4481_v2 = vld [vmem:[#allocation45_spill] sm:$0xff] }
 0x1cc   :  { %v1608_v13 = vadd.f32 %v4472_v30, %v1508_v48  ;;  %v1609_v49 = vadd.f32 %v4473_v38, %v1509_v8  ;;  %v1610_v14 = vadd.f32 %v4474_v20, %v1510_v6  ;;  %v1611_v61 = vadd.f32 %v4475_v21, %v1511_v24  ;;  %v4488_v15 = vld [vmem:[#allocation5_spill] sm:$0xff] }
 0x1cd   :  { %v1612_v31 = vadd.f32 %v4476_v55, %v1512_v44  ;;  %v1613_v54 = vadd.f32 %v4477_v5, %v1513_v18  ;;  %v1614_v52 = vadd.f32 %v4478_v12, %v1514_v33  ;;  %v1615_v36 = vadd.f32 %v4479_v53, %v1515_v0 }
 0x1ce   :  { %v1616_v43 = vadd.f32 %v4480_v19, %v1516_v45  ;;  %v1617_v63 = vadd.f32 %v4481_v2, %v1517_v56  ;;  %v1618_v59 = vadd.f32 %v4482_v40, %v1518_v50  ;;  %v1619_v28 = vadd.f32 %v4483_v23, %v1519_v51 }
 0x1cf   :  { %v1620_v25 = vadd.f32 %v4484_v37, %v1520_v10  ;;  %v1621_v41 = vadd.f32 %v4485_v39, %v1521_v32  ;;  %v1622_v62 = vadd.f32 %v4486_v58, %v1522_v4  ;;  %v1623_v17 = vadd.f32 %v4487_v9, %v1523_v46 }
 0x1d0   :  { %v1743_v11 = vpack.c.bf16 %v1609_v49, %v1608_v13  ;;  %v1744_v60 = vpack.c.bf16 %v1611_v61, %v1610_v14  ;;  %v1745_v35 = vpack.c.bf16 %v1613_v54, %v1612_v31  ;;  %v1746_v34 = vpack.c.bf16 %v1615_v36, %v1614_v52 }
 0x1d1   :  { %v1747_v27 = vpack.c.bf16 %v1617_v63, %v1616_v43  ;;  %v1748_v42 = vpack.c.bf16 %v1619_v28, %v1618_v59  ;;  %v1749_v29 = vpack.c.bf16 %v1621_v41, %v1620_v25  ;;  %v1750_v47 = vpack.c.bf16 %v1623_v17, %v1622_v62 }
 0x1d2   :  { %v1664_v16 = vrot.slane %v1743_v11, %v4488_v15  ;;  %v1671_v3 = vrot.slane %v1744_v60, %v4488_v15  ;;  %v1681_v1 = vrot.slane %v1745_v35, %v4488_v15  ;;  %v1688_v22 = vrot.slane %v1746_v34, %v4488_v15 }
 0x1d3   :  { %v1698_v7 = vrot.slane %v1747_v27, %v4488_v15  ;;  %v1705_v57 = vrot.slane %v1748_v42, %v4488_v15  ;;  %v1715_v26 = vrot.slane %v1749_v29, %v4488_v15  ;;  %v1722_v48 = vrot.slane %v1750_v47, %v4488_v15 }
 0x1d4   :  { %v1672_v8 = vcombine.low %v1664_v16, %v1671_v3  ;;  %v1689_v6 = vcombine.low %v1681_v1, %v1688_v22 }
 0x1d5   :  { %v1706_v24 = vcombine.low %v1698_v7, %v1705_v57  ;;  %v1723_v44 = vcombine.low %v1715_v26, %v1722_v48 }
 0x1d6   :  { %1728 = vst [vmem:[%s4042_s7] sm:$0xff] %v1672_v8  ;;  %1729 = vst [vmem:[%s4042_s7 + $0x8] sm:$0xff] %v1689_v6 }
 0x1d7   :  { %1730 = vst [vmem:[%s4042_s7 + $0x10] sm:$0xff] %v1706_v24  ;;  %1731 = vst [vmem:[%s4042_s7 + $0x18] sm:$0xff] %v1723_v44 }

// kernel: tokenizer_forward.8
= control target key start
LH: loop header
LB: loop body
LE: loop exit
PB: predicated region body
PF: predicated region fallthrough
CT: control target
= control target key end

     0   :  { %s2679_s30 = smov 0   ;;  %s2681_s10 = smov 0   ;;  %s3149_s0 = inlined_call_operand.vmem [shape: bf16[2,5,10,40], index: 0, kind: input, shape index: {}, may-alias: {0,1,2,3,4,5,6}]   ;;  %s3150_s1 = inlined_call_operand.vmem [shape: bf16[2,5,10,40], index: 1, kind: input, shape index: {}, may-alias: {0,1,2,3,4,5,6}]   ;;  %s3151_s2 = inlined_call_operand.vmem [shape: bf16[2,5,10,40], index: 2, kind: input, shape index: {}, may-alias: {0,1,2,3,4,5,6}]   ;;  %s3152_s3 = inlined_call_operand.vmem [shape: bf16[2,5,10,40], index: 3, kind: input, shape index: {}, may-alias: {0,1,2,3,4,5,6}]   ;;  %s3153_s4 = inlined_call_operand.vmem [shape: bf16[2,5,10,40], index: 4, kind: input, shape index: {}, may-alias: {0,1,2,3,4,5,6}]   ;;  %s3154_s5 = inlined_call_operand.vmem [shape: bf16[2,5,10,40], index: 5, kind: input, shape index: {}, may-alias: {0,1,2,3,4,5,6}]   ;;  %s3155_s6 = inlined_call_operand.vmem [shape: bf16[2,5,10,40], index: 6, kind: input, shape index: {}, may-alias: {0,1,2,3,4,5,6}]   ;;  %s3156_s7 = inlined_call_operand.vmem [shape: bf16[9,40,128], index: 7, kind: input, shape index: {}]   ;;  %s3157_s8 = inlined_call_operand.vmem [shape: f32[1,128], index: 8, kind: input, shape index: {}]   ;;  %s3158_s9 = inlined_call_operand.vmem [shape: bf16[2,40,128], index: 9, kind: output, shape index: {}]  }
   0x1   :  { %s2683_s11 = smov 0  }
   0x2 LB: > { %s31_s12 = sadd.s32 1, %s2621_s10  ;;  %p2140_p0 = scmp.ge.s32.totalorder %s2625_s11, 1  ;;  %s2625_s11 = sphi %s2683_s11, %s19_s11   ;;  %s2621_s10 = sphi %s2681_s10, %s3160_s10   ;;  %s2617_s30 = sphi %s2679_s30, %s3159_s30  }
   0x3   : > { %p33_p1 = scmp.ge.s32.totalorder %s31_s12, 2  ;;  %p567_p2 = scmp.lt.s32.totalorder %s2625_s11, 3 }
   0x5   : > { %s3162_s12 = smov (%p33_p1, %s31_s12), 0  ;;  %p568_p3 = pnand %p2140_p0, %p567_p2 }
   0x6   : > { %p712_p4 = scmp.lt.s32.totalorder (!%p568_p3), %s2617_s30, 1 }
   0x7   : > { %571 = sbr.rel (%p568_p3) target bundleno = 366 (0x16e), region = 56 }
   0xc   : > { %vm882_vm0 = vcmask 1043456   ;;  %v2544_v0 = vld [vmem:[%s3156_s7 + $0x24] ss:$0 sps:$4 sm:$0xff]   ;;  %v2627_v1 = vmov 0.0   ;;  %vm2628_vm1 = vmmov 0   ;;  %v2545_v3 = vld [vmem:[%s3156_s7 + $0x1c] sm:$0xff]  }
   0xd   : > { %2346 = vmatprep.subr.bf16.mxu0 %v2627_v1  ;;  %2508 = vmatprep.subr.bf16.mxu1 %v2627_v1  ;;  %v988_v2 = vsel %vm882_vm0, %v2544_v0, 0  ;;  %s3164_s30 = smov (!%p712_p4, %s2617_s30), 1  ;;  %v2546_v4 = vld [vmem:[%s3156_s7 + $0x14] sm:$0xff]   ;;  %vm979_vm2 = vcmask 326656   ;;  %v2550_v29 = vld [vmem:[%s3156_s7 + $0x10] ss:$0 sps:$4 sm:$0xff]  }
   0xe   : > { %2352 = vmatprep.mubr.msk.bf16.mxu0 %vm2628_vm1, %v2627_v1  ;;  %2360 = vmatprep.mubr.msk.bf16.mxu1 %vm2628_vm1, %v2627_v1  ;;  %s2718_s19 = smul.u32 40, %s3164_s30  ;;  %v2551_v24 = vld [vmem:[%s3156_s7 + $0x38] ss:$0 sps:$4 sm:$0xff]   ;;  %v1069_v44 = vsel %vm882_vm0, %v2550_v29, 0  ;;  %v2553_v45 = vld [vmem:[%s3156_s7 + $0x30] sm:$0xff]   ;;  %v2552_v48 = vld [vmem:[%s3156_s7 + $0x8] sm:$0xff]  }
   0xf   : > { %2347 = vmatpush3.bf16.msra.mxu0 %v988_v2  ;;  %2511 = vmatpush3.bf16.msra.mxu1 %v988_v2  ;;  %v1167_v39 = vsel %vm882_vm0, %v2551_v24, 0  ;;  %v2558_v49 = vld [vmem:[%s3156_s7 + $0x28] sm:$0xff]   ;;  %v2556_v54 = vld [vmem:[%s3156_s7] sm:$0xff]  }
  0x10   : > { %2348 = vmatprep.subr.bf16.mxu0 %v2627_v1  ;;  %2509 = vmatprep.subr.bf16.mxu1 %v2627_v1  ;;  %s720_s22 = scalar_lea.vmem %s3149_s0, %s2718_s19  ;;  %s741_s25 = scalar_lea.vmem %s3150_s1, %s2718_s19  ;;  %v2559_v59 = vld [vmem:[%s3156_s7 + $0x4c] ss:$0 sps:$4 sm:$0xff]  }
  0x11   : > { %v2730_v5 = vld [vmem:[%s720_s22] sm:$0xf]  ;;  %v863_v6 = vld [vmem:[%s720_s22 + $0x4] sm:$0x1]  ;;  %s761_s28 = scalar_lea.vmem %s3151_s2, %s2718_s19  ;;  %s2271_s29 = sadd.s32 16, %s2718_s19 }
  0x12   : > { %v2732_v7 = vld [vmem:[%s741_s25] sm:$0xf]  ;;  %v865_v8 = vld [vmem:[%s741_s25 + $0x4] sm:$0x1]  ;;  %v2739_v9 = vcombine.low %v2730_v5, %v863_v6  ;;  %s2269_s13 = sadd.s32 8, %s2718_s19  ;;  %s802_s16 = scalar_lea.vmem %s3153_s4, %s2271_s29 }
  0x13   : > { %2349 = vmatpush3.bf16.msra.mxu0 %v2545_v3  ;;  %2512 = vmatpush3.bf16.msra.mxu1 %v2545_v3  ;;  %v2743_v10 = vld [vmem:[%s761_s28] sm:$0xf]  ;;  %v2748_v11 = vcombine.low %v2732_v7, %v865_v8  ;;  %s781_s20 = scalar_lea.vmem %s3152_s3, %s2269_s13  ;;  %v867_v12 = vld [vmem:[%s761_s28 + $0x4] sm:$0x1]  ;;  %s2273_s25 = sadd.s32 24, %s2718_s19  ;;  %v2149_v55 = vcombine.low %v2732_v7, %v2732_v7 }
  0x14   : > { %2350 = vmatprep.subr.bf16.mxu0 %v2627_v1  ;;  %2510 = vmatprep.subr.bf16.mxu1 %v2627_v1  ;;  %v900_v13 = vshrl.u32 %v2739_v9, 16  ;;  %v902_v14 = vshll.u32 %v2739_v9, 16  ;;  %v2758_v15 = vld [vmem:[%s802_s16] sm:$0xf]  ;;  %v871_v16 = vld [vmem:[%s802_s16 + $0x4] sm:$0x1]  ;;  %v2761_v17 = vcombine.low %v2743_v10, %v867_v12  ;;  %s823_s13 = scalar_lea.vmem %s3154_s5, %s2273_s25 }
  0x15   : > { %v910_v18 = vshrl.u32 %v2748_v11, 16  ;;  %v913_v19 = vshll.u32 %v2748_v11, 16  ;;  %v2766_v20 = vcombine.low %v2758_v15, %v871_v16  ;;  %v2768_v21 = vld [vmem:[%s781_s20] sm:$0xf]  ;;  %v869_v22 = vld [vmem:[%s781_s20 + $0x4] sm:$0x1] }
  0x16   : > { %v904_v23 = vrot.slane %v902_v14, 1  ;;  %v925_v25 = vshll.u32 %v2761_v17, 16  ;;  %v2775_v26 = vcombine.low %v2768_v21, %v869_v22  ;;  %v923_v35 = vshrl.u32 %v2761_v17, 16  ;;  %v2831_v51 = vld [vmem:[%s823_s13] sm:$0xf]  ;;  %s2275_s25 = sadd.s32 32, %s2718_s19 }
  0x17   : > { %2351 = vmatpush3.bf16.msra.mxu0 %v2546_v4  ;;  %2513 = vmatpush3.bf16.msra.mxu1 %v2546_v4  ;;  %v912_v27 = vrot.slane %v910_v18, 4  ;;  %v915_v28 = vrot.slane %v913_v19, 5  ;;  %v946_v31 = vshrl.u32 %v2766_v20, 16  ;;  %v948_v32 = vshll.u32 %v2766_v20, 16  ;;  %v873_v52 = vld [vmem:[%s823_s13 + $0x4] sm:$0x1]  ;;  %s844_s28 = scalar_lea.vmem %s3155_s6, %s2275_s25 }
  0x18   : > { %2364 = vmatprep.subr.bf16.mxu1 %v2627_v1  ;;  %2382 = vmatprep.subr.bf16.mxu0 %v2627_v1  ;;  %v905_v30 = vor.u32 %v904_v23, %v900_v13  ;;  %v933_v33 = vshrl.u32 %v2775_v26, 16  ;;  %v927_v36 = vrot.slane %v925_v25, 1  ;;  %v936_v37 = vshll.u32 %v2775_v26, 16  ;;  %v2560_v3 = vld [vmem:[%s3156_s7 + $0x60] ss:$0 sps:$4 sm:$0xff]   ;;  %s2516_s13 = smul.u32 20, %s3164_s30 }
  0x19   : > { %v916_v34 = vor.u32 %v915_v28, %v912_v27  ;;  %v950_v38 = vrot.slane %v948_v32, 1  ;;  %v2220_v53 = vcombine.low %v2831_v51, %v2831_v51  ;;  %v2842_v56 = vcombine.low %v2831_v51, %v873_v52  ;;  %v2562_v27 = vld [vmem:[%s3156_s7 + $0x44] sm:$0xff]  }
  0x1a   : > { %v935_v40 = vrot.slane %v933_v33, 4  ;;  %v938_v42 = vrot.slane %v936_v37, 5  ;;  %v928_v46 = vor.u32 %v927_v36, %v923_v35  ;;  %v1450_v57 = vrot.slane %v2748_v11, 1  ;;  %v2563_v36 = vld [vmem:[%s3156_s7 + $0x58] sm:$0xff]   ;;  %s859_s16 = scalar_lea.vmem %s3158_s9, %s2516_s13 }
  0x1b   : > { %v954_v41 = vsel %vm882_vm0, %v905_v30, %v916_v34  ;;  %v2803_v43 = vor.u32 %v950_v38, %v946_v31  ;;  %v1451_v58 = vrot.slane %v2761_v17, 5  ;;  %v1127_v60 = vrot.slane %v2739_v9, 1 }
  0x1c   : > { %2353 = vmatmul.mubr.msk.bf16.vlgmr.msra.gmra.mxu0 %vm979_vm2, %v954_v41  ;;  %v939_v47 = vor.u32 %v938_v42, %v935_v40  ;;  %v1128_v61 = vrot.slane %v2748_v11, 5  ;;  %v2856_v62 = vsel %vm882_vm0, %v2758_v15, %v2220_v53  ;;  %v1452_v0 = vrot.slane %v2775_v26, 1  ;;  %v2564_v40 = vld [vmem:[%s3156_s7 + $0x3c] sm:$0xff]   ;;  %v2565_v42 = vld [vmem:[%s3156_s7 + $0x50] sm:$0xff]   ;;  %v2574_v53 = vld [vmem:[%s3156_s7 + $0x64] sm:$0xff]  }
  0x1d   : > { %2383 = vmatpush3.bf16.msra.mxu0 %v1167_v39  ;;  %2356 = vmatprep.mubr.msk.bf16.mxu0 %vm2628_vm1, %v2627_v1  ;;  %v2861_v63 = vsel %vm882_vm0, %v1450_v57, %v1451_v58  ;;  %v1453_v2 = vrot.slane %v2766_v20, 5  ;;  %v885_v4 = vsel %vm882_vm0, %v2730_v5, %v2149_v55  ;;  %v1346_v6 = vshrl.u32 %v2842_v56, 16  ;;  %v2576_v55 = vld [vmem:[%s3156_s7 + $0x9c] ss:$0 sps:$4 sm:$0xff]   ;;  %v2577_v57 = vld [vmem:[%s3156_s7 + $0xb0] ss:$0 sps:$4 sm:$0xff]  }
  0x1e   : > { %2361 = vmatmul.mubr.msk.bf16.vlgmr.msra.gmra.mxu1 %vm979_vm2, %v2803_v43  ;;  %2384 = vmatprep.subr.bf16.mxu0 %v2627_v1  ;;  %v2829_v50 = vsel %vm882_vm0, %v928_v46, %v939_v47  ;;  %v1348_v8 = vshll.u32 %v2842_v56, 16  ;;  %v1267_v12 = vsel %vm882_vm0, %v2559_v59, 0  ;;  %v1134_v13 = vsel %vm882_vm0, %v1127_v60, %v1128_v61  ;;  %v2578_v59 = vld [vmem:[%s3156_s7 + $0x94] sm:$0xff]   ;;  %v2579_v60 = vld [vmem:[%s3156_s7 + $0xa8] sm:$0xff]  }
  0x1f   : > { %2365 = vmatpush3.bf16.msra.mxu1 %v1069_v44  ;;  %2370 = vmatprep.mubr.msk.bf16.mxu1 %vm2628_vm1, %v2627_v1  ;;  %v2874_v9 = vsel %vm882_vm0, %v1452_v0, %v1453_v2  ;;  %v1131_v14 = vrot.slane %v2766_v20, 1  ;;  %v1646_v16 = vrot.slane %v1346_v6, 4  ;;  %v1753_v22 = vrot.slane %v2842_v56, 5  ;;  %v2580_v61 = vld [vmem:[%s3156_s7 + $0x8c] sm:$0xff]   ;;  %v874_v2 = vld [vmem:[%s844_s28] sm:$0xf] }
  0x20   : > { %2366 = vmatprep.subr.bf16.mxu1 %v2627_v1  ;;  %v1647_v5 = vrot.slane %v1348_v8, 5  ;;  %v1387_v23 = vsel %vm882_vm0, %v2560_v3, 0  ;;  %v2150_v24 = vcombine.low %v2768_v21, %v2768_v21  ;;  %v1129_v30 = vrot.slane %v2761_v17, 1 }
  0x21   : > { %2385 = vmatpush3.bf16.msra.mxu0 %v2553_v45  ;;  %v2895_v29 = vsel %vm882_vm0, %v1131_v14, %v1753_v22  ;;  %v1130_v34 = vrot.slane %v2775_v26, 5  ;;  %v1332_v44 = vrot.slane %v923_v35, 4  ;;  %v1333_v45 = vrot.slane %v925_v25, 5  ;;  %v2568_v35 = vld [vmem:[%s3156_s7 + $0x88] ss:$0 sps:$4 sm:$0xff]  }
  0x22   : > { %2386 = vmatprep.subr.bf16.mxu0 %v2627_v1  ;;  %v1648_v28 = vor.u32 %v1647_v5, %v1646_v16  ;;  %v2913_v39 = vsel %vm882_vm0, %v2743_v10, %v2150_v24  ;;  %v2184_v46 = vcombine.low %v2743_v10, %v2743_v10  ;;  %v1337_v52 = vrot.slane %v946_v31, 4 }
  0x23   : > { %2367 = vmatpush3.bf16.msra.mxu1 %v2552_v48  ;;  %v2920_v41 = vsel %vm882_vm0, %v1129_v30, %v1130_v34  ;;  %v1334_v25 = vor.u32 %v1333_v45, %v1332_v44  ;;  %v1338_v11 = vrot.slane %v948_v32, 5  ;;  %v1690_v58 = vsel %vm882_vm0, %v2576_v55, 0 }
  0x24   : > { %2368 = vmatprep.subr.bf16.mxu1 %v2627_v1  ;;  %2357 = vmatmul.mubr.msk.bf16.gmra.mxu0 %vm979_vm2, %v2829_v50  ;;  %v2908_v38 = vsel %vm882_vm0, %v2803_v43, %v1648_v28  ;;  %v1330_v43 = vrot.slane %v913_v19, 1  ;;  %v2567_v19 = vld [vmem:[%s3156_s7 + $0x74] ss:$0 sps:$4 sm:$0xff]   ;;  %v1234_v10 = vsel %vm882_vm0, %v2732_v7, %v2184_v46  ;;  %v2185_v7 = vcombine.low %v2758_v15, %v2758_v15 }
  0x25   : > { %2387 = vmatpush3.bf16.msra.mxu0 %v2558_v49  ;;  %2388 = vmatprep.mubr.msk.bf16.mxu0 %vm2628_vm1, %v2627_v1  ;;  %v1490_v47 = vsel %vm882_vm0, %v2567_v19, 0  ;;  %v1335_v49 = vrot.slane %v936_v37, 1  ;;  %v2570_v37 = vld [vmem:[%s3156_s7 + $0x6c] sm:$0xff]   ;;  %v1339_v31 = vor.u32 %v1338_v11, %v1337_v52  ;;  %v1454_v0 = vrot.slane %v2842_v56, 1 }
  0x26   : > { %2418 = vmatprep.subr.bf16.mxu0 %v2627_v1  ;;  %v1331_v17 = vor.u32 %v1330_v43, %v910_v18  ;;  %v1583_v18 = vsel %vm882_vm0, %v2568_v35, 0  ;;  %v1237_v32 = vsel %vm882_vm0, %v2768_v21, %v2185_v7  ;;  %v1350_v21 = vrot.slane %v1348_v8, 1 }
  0x27   : > { %2369 = vmatpush3.bf16.msra.mxu1 %v2556_v54  ;;  %v1336_v20 = vor.u32 %v1335_v49, %v933_v33  ;;  %v2575_v33 = vld [vmem:[%s3156_s7 + $0x78] sm:$0xff]  }
  0x28   : > { %2400 = vmatprep.subr.bf16.mxu1 %v2627_v1  ;;  %v1354_v48 = vsel %vm882_vm0, %v1331_v17, %v1334_v25  ;;  %v1351_v54 = vor.u32 %v1350_v21, %v1346_v6 }
  0x29   : > { %v1357_v26 = vsel %vm882_vm0, %v1336_v20, %v1339_v31 }
  0x2a   : > { %2371 = vmatmul.mubr.msk.bf16.vlgmr.msra.gmra.mxu1 %vm979_vm2, %v885_v4 }
  0x2b   : > { %2401 = vmatpush3.bf16.msra.mxu1 %v1267_v12  ;;  %2374 = vmatprep.mubr.msk.bf16.mxu1 %vm2628_vm1, %v2627_v1 }
  0x2c   : > { %2389 = vmatmul.mubr.msk.bf16.vlgmr.msra.gmra.mxu0 %vm979_vm2, %v1134_v13  ;;  %2402 = vmatprep.subr.bf16.mxu1 %v2627_v1 }
  0x2d   : > { %2419 = vmatpush3.bf16.msra.mxu0 %v1387_v23  ;;  %2392 = vmatprep.mubr.msk.bf16.mxu0 %vm2628_vm1, %v2627_v1 }
  0x2e   : > { %2420 = vmatprep.subr.bf16.mxu0 %v2627_v1 }
  0x2f   : > { %2403 = vmatpush3.bf16.msra.mxu1 %v2562_v27 }
  0x30   : > { %2404 = vmatprep.subr.bf16.mxu1 %v2627_v1 }
  0x31   : > { %2421 = vmatpush3.bf16.msra.mxu0 %v2563_v36 }
  0x32   : > { %2375 = vmatmul.mubr.msk.bf16.gmra.mxu1 %vm979_vm2, %v2913_v39  ;;  %2422 = vmatprep.subr.bf16.mxu0 %v2627_v1 }
  0x33   : > { %2378 = vmatprep.mubr.msk.bf16.mxu1 %vm2628_vm1, %v2627_v1  ;;  %2405 = vmatpush3.bf16.msra.mxu1 %v2564_v40 }
  0x34   : > { %2393 = vmatmul.mubr.msk.bf16.gmra.mxu0 %vm979_vm2, %v2920_v41  ;;  %2436 = vmatprep.subr.bf16.mxu1 %v2627_v1 }
  0x35   : > { %2396 = vmatprep.mubr.msk.bf16.mxu0 %vm2628_vm1, %v2627_v1  ;;  %2423 = vmatpush3.bf16.msra.mxu0 %v2565_v42 }
  0x36   : > { %2454 = vmatprep.subr.bf16.mxu0 %v2627_v1 }
  0x3a   : > { %2379 = vmatmul.mubr.msk.bf16.gmra.mxu1 %vm979_vm2, %v2758_v15  ;;  %v2571_v15 = vld [vmem:[%s3156_s7 + $0x80] sm:$0xff]  }
  0x3b   : > { %2406 = vmatprep.mubr.msk.bf16.mxu1 %vm2628_vm1, %v2627_v1 }
  0x3c   : > { %2397 = vmatmul.mubr.msk.bf16.gmra.mxu0 %vm979_vm2, %v1131_v14 }
  0x3d   : > { %2424 = vmatprep.mubr.msk.bf16.mxu0 %vm2628_vm1, %v2627_v1 }
  0x42   : > { %2407 = vmatmul.mubr.msk.bf16.vlgmr.msra.gmra.mxu1 %vm979_vm2, %v1234_v10 }
  0x43   : > { %2437 = vmatpush3.bf16.msra.mxu1 %v1490_v47  ;;  %2410 = vmatprep.mubr.msk.bf16.mxu1 %vm2628_vm1, %v2627_v1 }
  0x44   : > { %2425 = vmatmul.mubr.msk.bf16.vlgmr.msra.gmra.mxu0 %vm979_vm2, %v1354_v48  ;;  %2438 = vmatprep.subr.bf16.mxu1 %v2627_v1 }
  0x45   : > { %2455 = vmatpush3.bf16.msra.mxu0 %v1583_v18  ;;  %2428 = vmatprep.mubr.msk.bf16.mxu0 %vm2628_vm1, %v2627_v1 }
  0x46   : > { %2456 = vmatprep.subr.bf16.mxu0 %v2627_v1 }
  0x47   : > { %2439 = vmatpush3.bf16.msra.mxu1 %v2570_v37 }
  0x48   : > { %2440 = vmatprep.subr.bf16.mxu1 %v2627_v1 }
  0x49   : > { %2457 = vmatpush3.bf16.msra.mxu0 %v2571_v15 }
  0x4a   : > { %2411 = vmatmul.mubr.msk.bf16.gmra.mxu1 %vm979_vm2, %v1237_v32  ;;  %2458 = vmatprep.subr.bf16.mxu0 %v2627_v1 }
  0x4b   : > { %2414 = vmatprep.mubr.msk.bf16.mxu1 %vm2628_vm1, %v2627_v1  ;;  %2441 = vmatpush3.bf16.msra.mxu1 %v2574_v53 }
  0x4c   : > { %2429 = vmatmul.mubr.msk.bf16.gmra.mxu0 %vm979_vm2, %v1357_v26  ;;  %2472 = vmatprep.subr.bf16.mxu1 %v2627_v1 }
  0x4d   : > { %2432 = vmatprep.mubr.msk.bf16.mxu0 %vm2628_vm1, %v2627_v1  ;;  %2459 = vmatpush3.bf16.msra.mxu0 %v2575_v33 }
  0x4e   : > { %2490 = vmatprep.subr.bf16.mxu0 %v2627_v1 }
  0x52   : > { %2415 = vmatmul.mubr.msk.bf16.gmra.mxu1 %vm979_vm2, %v2831_v51  ;;  %v1784_v51 = vsel %vm882_vm0, %v2577_v57, 0 }
  0x53   : > { %2442 = vmatprep.mubr.msk.bf16.mxu1 %vm2628_vm1, %v2627_v1 }
  0x54   : > { %2433 = vmatmul.mubr.msk.bf16.gmra.mxu0 %vm979_vm2, %v1351_v54 }
  0x55   : > { %2460 = vmatprep.mubr.msk.bf16.mxu0 %vm2628_vm1, %v2627_v1 }
  0x5a   : > { %2443 = vmatmul.mubr.msk.bf16.vlgmr.msra.gmra.mxu1 %vm979_vm2, %v2861_v63  ;;  %v2582_v63 = vld [vmem:[%s3156_s7 + $0xa0] sm:$0xff]  }
  0x5b   : > { %2473 = vmatpush3.bf16.msra.mxu1 %v1690_v58  ;;  %2446 = vmatprep.mubr.msk.bf16.mxu1 %vm2628_vm1, %v2627_v1 }
  0x5c   : > { %2461 = vmatmul.mubr.msk.bf16.vlgmr.msra.gmra.mxu0 %vm979_vm2, %v2913_v39  ;;  %2474 = vmatprep.subr.bf16.mxu1 %v2627_v1 }
  0x5d   : > { %2491 = vmatpush3.bf16.msra.mxu0 %v1784_v51  ;;  %2464 = vmatprep.mubr.msk.bf16.mxu0 %vm2628_vm1, %v2627_v1 }
  0x5e   : > { %2492 = vmatprep.subr.bf16.mxu0 %v2627_v1 }
  0x5f   : > { %2475 = vmatpush3.bf16.msra.mxu1 %v2578_v59 }
  0x60   : > { %2476 = vmatprep.subr.bf16.mxu1 %v2627_v1 }
  0x61   : > { %2493 = vmatpush3.bf16.msra.mxu0 %v2579_v60 }
  0x62   : > { %2447 = vmatmul.mubr.msk.bf16.gmra.mxu1 %vm979_vm2, %v2874_v9  ;;  %2494 = vmatprep.subr.bf16.mxu0 %v2627_v1 }
  0x63   : > { %2450 = vmatprep.mubr.msk.bf16.mxu1 %vm2628_vm1, %v2627_v1  ;;  %2477 = vmatpush3.bf16.msra.mxu1 %v2580_v61 }
  0x64   : > { %2465 = vmatmul.mubr.msk.bf16.gmra.mxu0 %vm979_vm2, %v2856_v62  ;;  %v875_v62 = vld [vmem:[%s844_s28 + $0x4] sm:$0x1] }
  0x65   : > { %2468 = vmatprep.mubr.msk.bf16.mxu0 %vm2628_vm1, %v2627_v1  ;;  %2495 = vmatpush3.bf16.msra.mxu0 %v2582_v63  ;;  %v2232_v3 = vcombine.low %v874_v2, %v875_v62 }
  0x67   : > { %v1657_v56 = vshll.u32 %v2232_v3, 16  ;;  %v1655_v4 = vshrl.u32 %v2232_v3, 16  ;;  %v1754_v8 = vrot.slane %v2232_v3, 1 }
  0x69   : > { %v1659_v6 = vrot.slane %v1657_v56, 1 }
  0x6a   : > { %2451 = vmatmul.mubr.msk.bf16.gmra.mxu1 %vm979_vm2, %v1454_v0 }
  0x6b   : > { %2478 = vmatprep.mubr.msk.bf16.mxu1 %vm2628_vm1, %v2627_v1 }
  0x6c   : > { %2469 = vmatmul.mubr.msk.bf16.gmra.mxu0 %vm979_vm2, %v874_v2 }
  0x6d   : > { %2496 = vmatprep.mubr.msk.bf16.mxu0 %vm2628_vm1, %v2627_v1 }
  0x72   : > { %2479 = vmatmul.mubr.msk.bf16.vlgmr.msra.gmra.mxu1 %vm979_vm2, %v2829_v50  ;;  %v1660_v50 = vor.u32 %v1659_v6, %v1655_v4 }
  0x73   : > { %2482 = vmatprep.mubr.msk.bf16.mxu1 %vm2628_vm1, %v2627_v1 }
  0x74   : > { %2497 = vmatmul.mubr.msk.bf16.vlgmr.msra.gmra.mxu0 %vm979_vm2, %v2920_v41 }
  0x75   : > { %2500 = vmatprep.mubr.msk.bf16.mxu0 %vm2628_vm1, %v2627_v1 }
  0x7a   : > { %2483 = vmatmul.mubr.msk.bf16.gmra.mxu1 %vm979_vm2, %v2908_v38 }
  0x7b   : > { %2486 = vmatprep.mubr.msk.bf16.mxu1 %vm2628_vm1, %v2627_v1 }
  0x7c   : > { %2501 = vmatmul.mubr.msk.bf16.gmra.mxu0 %vm979_vm2, %v2895_v29 }
  0x7d   : > { %2504 = vmatprep.mubr.msk.bf16.mxu0 %vm2628_vm1, %v2627_v1 }
  0x82   : > { %2487 = vmatmul.mubr.msk.bf16.gmra.mxu1 %vm979_vm2, %v1660_v50 }
  0x84   : > { %2505 = vmatmul.mubr.msk.bf16.gmra.mxu0 %vm979_vm2, %v1754_v8 }
  0xdc   : > { %v1024_v9 = vpop.f32.mrf.mxu0 }
  0xde   : > { %v3087_v12 = vpop.f32.mrf.mxu1  ;;  %v2354_v13 = vpop.f32.mrf.mxu0 }
  0xe0   : > { %v2362_v14 = vpop.f32.mrf.mxu1  ;;  %v3089_v16 = vpop.f32.mrf.mxu0 }
  0xe2   : > { %v1043_v5 = vpop.f32.mrf.mxu1  ;;  %v2355_v22 = vpop.f32.mrf.mxu0 }
  0xe4   : > { %v2363_v23 = vpop.f32.mrf.mxu1  ;;  %v1032_v24 = vpop.f32.mrf.mxu0 }
  0xe6   : > { %v2358_v27 = vpop.f32.mrf.mxu0 }
  0xe8   : > { %v3091_v28 = vpop.f32.mrf.mxu0 }
  0xea   : > { %v1105_v1 = vpop.f32.mrf.mxu1  ;;  %v2359_v29 = vpop.f32.mrf.mxu0 }
  0xeb   : > { %v1106_v30 = vadd.f32 %v1105_v1, %v1024_v9 }
  0xec   : > { %v2372_v34 = vpop.f32.mrf.mxu1  ;;  %v1203_v36 = vpop.f32.mrf.mxu0 }
  0xed   : > { %v3093_v38 = vadd.f32 %v1203_v36, %v1106_v30 }
  0xee   : > { %v3095_v39 = vpop.f32.mrf.mxu1  ;;  %v2390_v40 = vpop.f32.mrf.mxu0 }
  0xf0   : > { %v2373_v41 = vpop.f32.mrf.mxu1  ;;  %v3097_v42 = vpop.f32.mrf.mxu0 }
  0xf2   : > { %v1113_v43 = vpop.f32.mrf.mxu1  ;;  %v2391_v44 = vpop.f32.mrf.mxu0 }
  0xf3   : > { %v1114_v45 = vadd.f32 %v1113_v43, %v1032_v24 }
  0xf4   : > { %v2376_v46 = vpop.f32.mrf.mxu1  ;;  %v1211_v19 = vpop.f32.mrf.mxu0 }
  0xf5   : > { %v3099_v17 = vadd.f32 %v1211_v19, %v1114_v45  ;;  %v1109_v45 = vadd.f32 %v3095_v39, %v3089_v16 }
  0xf6   : > { %v3101_v25 = vpop.f32.mrf.mxu1  ;;  %v2394_v35 = vpop.f32.mrf.mxu0 }
  0xf7   : > { %v1117_v16 = vadd.f32 %v3101_v25, %v3091_v28 }
  0xf8   : > { %v2377_v10 = vpop.f32.mrf.mxu1  ;;  %v3103_v47 = vpop.f32.mrf.mxu0 }
  0xf9   : > { %v1226_v10 = vadd.f32 %v3097_v42, %v1109_v45 }
  0xfa   : > { %v3105_v48 = vpop.f32.mrf.mxu1  ;;  %v2395_v49 = vpop.f32.mrf.mxu0 }
  0xfc   : > { %v2380_v52 = vpop.f32.mrf.mxu1  ;;  %v3107_v11 = vpop.f32.mrf.mxu0 }
  0xfe   : > { %v1124_v18 = vpop.f32.mrf.mxu1  ;;  %v2398_v7 = vpop.f32.mrf.mxu0 }
 0x100   : > { %v2381_v37 = vpop.f32.mrf.mxu1  ;;  %v1222_v20 = vpop.f32.mrf.mxu0 }
 0x102   : > { %v1303_v31 = vpop.f32.mrf.mxu1  ;;  %v2399_v15 = vpop.f32.mrf.mxu0 }
 0x103   : > { %v1325_v46 = vadd.f32 %v1303_v31, %v3093_v38 }
 0x104   : > { %v2408_v32 = vpop.f32.mrf.mxu1  ;;  %v1423_v53 = vpop.f32.mrf.mxu0 }
 0x105   : > { %v1445_v49 = vadd.f32 %v1423_v53, %v1325_v46  ;;  %v2255_v53 = vld [vmem:[%s3157_s8] ss:$0 sm:$0xff] }
 0x106   : > { %v1306_v26 = vpop.f32.mrf.mxu1  ;;  %v2426_v33 = vpop.f32.mrf.mxu0 }
 0x107   : > { %v1326_v7 = vadd.f32 %v1306_v26, %v1226_v10  ;;  %v1228_v26 = vadd.f32 %v3103_v47, %v1117_v16 }
 0x108   : > { %v2409_v21 = vpop.f32.mrf.mxu1  ;;  %v1426_v54 = vpop.f32.mrf.mxu0 }
 0x109   : > { %v1446_v32 = vadd.f32 %v1426_v54, %v1326_v7 }
 0x10a   : > { %v1311_v55 = vpop.f32.mrf.mxu1  ;;  %v2427_v57 = vpop.f32.mrf.mxu0 }
 0x10b   : > { %v1327_v38 = vadd.f32 %v1311_v55, %v3099_v17 }
 0x10c   : > { %v2412_v58 = vpop.f32.mrf.mxu1  ;;  %v1431_v51 = vpop.f32.mrf.mxu0 }
 0x10e   : > { %v1314_v59 = vpop.f32.mrf.mxu1  ;;  %v2430_v60 = vpop.f32.mrf.mxu0 }
 0x10f   : > { %v1447_v60 = vadd.f32 %v1431_v51, %v1327_v38  ;;  %v1328_v25 = vadd.f32 %v1314_v59, %v1228_v26 }
 0x110   : > { %v2413_v61 = vpop.f32.mrf.mxu1  ;;  %v3109_v63 = vpop.f32.mrf.mxu0 }
 0x112   : > { %v3111_v0 = vpop.f32.mrf.mxu1  ;;  %v2431_v2 = vpop.f32.mrf.mxu0 }
 0x113   : > { %v1122_v2 = vadd.f32 %v3105_v48, %v3087_v12 }
 0x114   : > { %v2416_v62 = vpop.f32.mrf.mxu1  ;;  %v3113_v3 = vpop.f32.mrf.mxu0 }
 0x116   : > { %v1322_v56 = vpop.f32.mrf.mxu1  ;;  %v2434_v4 = vpop.f32.mrf.mxu0 }
 0x117   : > { %v1229_v4 = vadd.f32 %v3107_v11, %v1122_v2 }
 0x118   : > { %v2417_v6 = vpop.f32.mrf.mxu1  ;;  %v1442_v50 = vpop.f32.mrf.mxu0 }
 0x11a   : > { %v1526_v8 = vpop.f32.mrf.mxu1  ;;  %v2435_v9 = vpop.f32.mrf.mxu0 }
 0x11b   : > { %v1548_v37 = vadd.f32 %v1526_v8, %v1445_v49  ;;  %v1448_v8 = vadd.f32 %v3109_v63, %v1328_v25 }
 0x11c   : > { %v2444_v13 = vpop.f32.mrf.mxu1  ;;  %v1619_v14 = vpop.f32.mrf.mxu0 }
 0x11d   : > { %v1641_v33 = vadd.f32 %v1619_v14, %v1548_v37  ;;  %v1329_v13 = vadd.f32 %v3111_v0, %v1229_v4 }
 0x11e   : > { %v1529_v5 = vpop.f32.mrf.mxu1  ;;  %v2462_v22 = vpop.f32.mrf.mxu0 }
 0x11f   : > { %v1549_v39 = vadd.f32 %v1529_v5, %v1446_v32  ;;  %v1449_v11 = vadd.f32 %v3113_v3, %v1329_v13 }
 0x120   : > { %v2445_v23 = vpop.f32.mrf.mxu1  ;;  %v1622_v24 = vpop.f32.mrf.mxu0 }
 0x121   : > { %v1642_v54 = vadd.f32 %v1622_v24, %v1549_v39 }
 0x122   : > { %v1534_v27 = vpop.f32.mrf.mxu1  ;;  %v2463_v1 = vpop.f32.mrf.mxu0 }
 0x123   : > { %v1550_v17 = vadd.f32 %v1534_v27, %v1447_v60 }
 0x124   : > { %v2448_v29 = vpop.f32.mrf.mxu1  ;;  %v1627_v30 = vpop.f32.mrf.mxu0 }
 0x125   : > { %v1643_v47 = vadd.f32 %v1627_v30, %v1550_v17 }
 0x126   : > { %v1537_v34 = vpop.f32.mrf.mxu1  ;;  %v2466_v36 = vpop.f32.mrf.mxu0 }
 0x127   : > { %v1551_v14 = vadd.f32 %v1537_v34, %v1448_v8 }
 0x128   : > { %v2449_v40 = vpop.f32.mrf.mxu1  ;;  %v1630_v41 = vpop.f32.mrf.mxu0 }
 0x129   : > { %v1644_v24 = vadd.f32 %v1630_v41, %v1551_v14 }
 0x12a   : > { %v1542_v43 = vpop.f32.mrf.mxu1  ;;  %v2467_v44 = vpop.f32.mrf.mxu0 }
 0x12b   : > { %v1552_v30 = vadd.f32 %v1542_v43, %v1449_v11 }
 0x12c   : > { %v2452_v19 = vpop.f32.mrf.mxu1  ;;  %v1635_v35 = vpop.f32.mrf.mxu0 }
 0x12d   : > { %v1645_v45 = vadd.f32 %v1635_v35, %v1552_v30 }
 0x12e   : > { %v1545_v52 = vpop.f32.mrf.mxu1  ;;  %v2470_v18 = vpop.f32.mrf.mxu0 }
 0x130   : > { %v2453_v20 = vpop.f32.mrf.mxu1  ;;  %v1638_v15 = vpop.f32.mrf.mxu0 }
 0x132   : > { %v1726_v21 = vpop.f32.mrf.mxu1  ;;  %v2471_v57 = vpop.f32.mrf.mxu0 }
 0x133   : > { %v1748_v31 = vadd.f32 %v1726_v21, %v1641_v33 }
 0x134   : > { %v2480_v58 = vpop.f32.mrf.mxu1  ;;  %v1820_v42 = vpop.f32.mrf.mxu0 }
 0x135   : > { %v1842_v61 = vadd.f32 %v1820_v42, %v1748_v31 }
 0x136   : > { %v1729_v62 = vpop.f32.mrf.mxu1  ;;  %v2498_v28 = vpop.f32.mrf.mxu0 }
 0x137   : > { %v1749_v55 = vadd.f32 %v1729_v62, %v1642_v54  ;;  %v3128_v56 = vadd.f32 %v2255_v53, %v1842_v61 }
 0x138   : > { %v2481_v6 = vpop.f32.mrf.mxu1  ;;  %v1823_v50 = vpop.f32.mrf.mxu0 }
 0x139   : > { %v2256_v51 = vmul.f32 -1.442695, %v3128_v56  ;;  %v1843_v9 = vadd.f32 %v1823_v50, %v1749_v55 }
 0x13a   : > { %v1734_v12 = vpop.f32.mrf.mxu1  ;;  %v2499_v48 = vpop.f32.mrf.mxu0 }
 0x13b   : > { %2583 = vpow2.f32 %v2256_v51  ;;  %v1750_v59 = vadd.f32 %v1734_v12, %v1643_v47  ;;  %v1855_v5 = vadd.f32 %v2255_v53, %v1843_v9 }
 0x13c   : > { %v2484_v22 = vpop.f32.mrf.mxu1  ;;  %v1828_v23 = vpop.f32.mrf.mxu0 }
 0x13d   : > { %v2257_v27 = vmul.f32 -1.442695, %v1855_v5  ;;  %v1844_v1 = vadd.f32 %v1828_v23, %v1750_v59 }
 0x13e   : > { %v1737_v63 = vpop.f32.mrf.mxu1  ;;  %v2502_v29 = vpop.f32.mrf.mxu0 }
 0x13f   : > { %2585 = vpow2.f32 %v2257_v27  ;;  %v1751_v36 = vadd.f32 %v1737_v63, %v1644_v24  ;;  %v1856_v40 = vadd.f32 %v2255_v53, %v1844_v1 }
 0x140   : > { %v2485_v0 = vpop.f32.mrf.mxu1  ;;  %v1831_v44 = vpop.f32.mrf.mxu0 }
 0x141   : > { %v2258_v34 = vmul.f32 -1.442695, %v1856_v40  ;;  %v1845_v46 = vadd.f32 %v1831_v44, %v1751_v36 }
 0x142   : > { %v1742_v19 = vpop.f32.mrf.mxu1  ;;  %v2503_v10 = vpop.f32.mrf.mxu0 }
 0x143   : > { %2587 = vpow2.f32 %v2258_v34  ;;  %v1752_v49 = vadd.f32 %v1742_v19, %v1645_v45  ;;  %v1857_v52 = vadd.f32 %v2255_v53, %v1845_v46 }
 0x144   : > { %v2488_v3 = vpop.f32.mrf.mxu1  ;;  %v1836_v41 = vpop.f32.mrf.mxu0 }
 0x145   : > { %v2259_v18 = vmul.f32 -1.442695, %v1857_v52  ;;  %v1846_v7 = vadd.f32 %v1836_v41, %v1752_v49 }
 0x146   : > { %v1745_v37 = vpop.f32.mrf.mxu1  ;;  %v2506_v20 = vpop.f32.mrf.mxu0 }
 0x147   : > { %2589 = vpow2.f32 %v2259_v18  ;;  %v1858_v43 = vadd.f32 %v2255_v53, %v1846_v7 }
 0x148   : > { %v2584_v15 = vpop.eup %2583  ;;  %v2489_v32 = vpop.f32.mrf.mxu1 }
 0x149   : > { %v1839_v33 = vpop.f32.mrf.mxu0  ;;  %v1874_v21 = vadd.f32 1.0, %v2584_v15  ;;  %v2260_v35 = vmul.f32 -1.442695, %v1858_v43 }
 0x14b   : > { %v2507_v57 = vpop.f32.mrf.mxu0  ;;  %2591 = vpow2.f32 %v2260_v35 }
 0x14c   : > { %v2586_v16 = vpop.eup %2585  ;;  %2593 = vrcp.f32 %v1874_v21 }
 0x14d   : > { %v1875_v38 = vadd.f32 1.0, %v2586_v16 }
 0x14f   : > { %2595 = vrcp.f32 %v1875_v38 }
 0x150   : > { %v2588_v39 = vpop.eup %2587 }
 0x151   : > { %v1876_v31 = vadd.f32 1.0, %v2588_v39 }
 0x153   : > { %2597 = vrcp.f32 %v1876_v31 }
 0x154   : > { %v2590_v58 = vpop.eup %2589 }
 0x155   : > { %v1877_v42 = vadd.f32 1.0, %v2590_v58 }
 0x157   : > { %2599 = vrcp.f32 %v1877_v42 }
 0x158   : > { %v2592_v26 = vpop.eup %2591 }
 0x159   : > { %v2594_v53 = vpop.eup %2593  ;;  %v1878_v60 = vadd.f32 1.0, %v2592_v26 }
 0x15a   : > { %v1889_v61 = vmul.f32 %v2594_v53, %v3128_v56 }
 0x15b   : > { %2601 = vrcp.f32 %v1878_v60 }
 0x15c   : > { %v2596_v54 = vpop.eup %2595 }
 0x15d   : > { %v1890_v2 = vmul.f32 %v2596_v54, %v1855_v5 }
 0x15f   : > { %v2284_v62 = vpack.c.bf16 %v1890_v2, %v1889_v61 }
 0x160   : > { %v2598_v28 = vpop.eup %2597 }
 0x161   : > { %2285 = vst [vmem:[%s859_s16] sm:$0xff] %v2284_v62   ;;  %v1891_v17 = vmul.f32 %v2598_v28, %v1856_v40 }
 0x164   : > { %v2600_v25 = vpop.eup %2599 }
 0x165   : > { %v1892_v55 = vmul.f32 %v2600_v25, %v1857_v52 }
 0x167   : > { %v2289_v4 = vpack.c.bf16 %v1892_v55, %v1891_v17 }
 0x168   : > { %v2602_v6 = vpop.eup %2601 }
 0x169   : > { %2291 = vst [vmem:[%s859_s16 + $0x8] sm:$0xff] %v2289_v4   ;;  %v1893_v50 = vmul.f32 %v2602_v6, %v1858_v43 }
 0x16b   : > { %v2280_v8 = vpack.c.bf16 %v1893_v50, %v1893_v50 }
 0x16d   : > { %1919 = vst [vmem:[%s859_s16 + $0x10] sm:$0xf] %v2280_v8 }
 0x16e PF: > { %s19_s11 = sadd.s32 1, %s2625_s11   ;;  %s3159_s30 = smov %s2621_s10 }
 0x16f   : > { %p16_p5 = scmp.ge.s32.totalorder %s19_s11, 4   ;;  %s3160_s10 = smov %s3162_s12 }
 0x171   :  { %18 = sbr.rel (!%p16_p5) target bundleno = 2 (0x2), region = 112 }

</bundles_post_ra>
